<compile_context>
chip_gen: v7x
topology: tpu7x:2x2x1
jax: 0.10.0
libtpu: 0.0.40
codegen_flags: <defaults>
</compile_context>

<pallas_src>
import jax
import jax.numpy as jnp
from jax.experimental import pallas as pl
from jax.experimental.pallas import tpu as pltpu

# ---- hyperparameters chosen so the module's hard-coded dims line up ---------
VOCAB = 50
EMBED = 200                  # word embedding size
HIDDEN = 256                 # hidden_size  (fc3 expects 256 => hidden_size==256)
HALF = HIDDEN // 2           # 128 per-direction LSTM hidden / fc1 out
N_CLASSES = 5
LSTM_IN = 357                # hard-coded in the module for hidden_size != 512
LSTM_IN_PAD = 384            # 3*128 lane-aligned K for the input projection
F_DIM = LSTM_IN - HALF - EMBED          # 29
IMG_H, IMG_W = 60, 12        # per-word char "image": conv(7,s2)->(27,3), pool(3,s2)->(13,1)
CONV_H, CONV_W = 27, 3
POOL_H = 13
STRIP_K = 7 * IMG_W          # 84 features per conv-row strip (padded to 128)

BF16 = jnp.bfloat16


def _round_up(x, m):
    return ((x + m - 1) // m) * m


# ======================= generic M-tiled matmul + bias ========================
def _mm_bias_kernel(x_ref, w_ref, b_ref, o_ref):
    o_ref[...] = (jnp.dot(x_ref[...], w_ref[...],
                          preferred_element_type=jnp.float32)
                  + b_ref[...]).astype(o_ref.dtype)


def matmul_bias(x, w, b, *, block_m=256):
    """x:(M,K) bf16 @ w:(K,N) bf16 + b:(N,) f32 -> (M,N) f32.  Tiled over M."""
    m, k = x.shape
    n = w.shape[1]
    bm = min(block_m, _round_up(m, 8))
    mp = _round_up(m, bm)
    if mp != m:
        x = jnp.pad(x, ((0, mp - m), (0, 0)))
    out = pl.pallas_call(
        _mm_bias_kernel,
        out_shape=jax.ShapeDtypeStruct((mp, n), jnp.float32),
        grid_spec=pltpu.PrefetchScalarGridSpec(
            num_scalar_prefetch=0,
            grid=(mp // bm,),
            in_specs=[pl.BlockSpec((bm, k), lambda i: (i, 0)),
                      pl.BlockSpec((k, n), lambda i: (0, 0)),
                      pl.BlockSpec((1, n), lambda i: (0, 0))],
            out_specs=pl.BlockSpec((bm, n), lambda i: (i, 0)),
        ),
        compiler_params=pltpu.CompilerParams(
            dimension_semantics=("parallel",),
            vmem_limit_bytes=48 * 1024 * 1024),
    )(x, w, b.reshape(1, n))
    return out[:m] if mp != m else out


# ============== fused char CNN: conv matmul + maxpool + fc1 ===================
def _char_cnn_kernel(strips_ref, wconv_ref, bcnn_ref, wfc1_ref, bfc1_ref, out_ref):
    # strips_ref: (32, R, 128) bf16  (27 real conv rows + pad, per-row strip of 84+pad)
    # wconv_ref : (128, 384) bf16    (3 width groups x 128-lane channel pad)
    # wfc1_ref  : (13, 128, 128) bf16 (fc1 weight re-laid-out as [h, c, j])
    r = strips_ref.shape[1]
    x = strips_ref[...].reshape(32 * r, 128)                    # tile-aligned merge
    conv = jnp.dot(x, wconv_ref[...], preferred_element_type=jnp.float32)  # (32r,384)
    # pool over conv width (3 output columns) == max of 3 lane groups
    xw = jnp.maximum(jnp.maximum(conv[:, 0:128], conv[:, 128:256]),
                     conv[:, 256:384])                          # (32r, 128) f32
    bias = bcnn_ref[...]                                        # (1, 128)
    acc = jnp.zeros((r, HALF), jnp.float32)
    # pool over conv height (3, stride 2 -> 13) and fc1, accumulated per pooled row
    for h in range(POOL_H):
        a = xw[(2 * h) * r:(2 * h + 1) * r, :]
        b = xw[(2 * h + 1) * r:(2 * h + 2) * r, :]
        c = xw[(2 * h + 2) * r:(2 * h + 3) * r, :]
        ph = (jnp.maximum(jnp.maximum(a, b), c) + bias).astype(BF16)   # (r, 128)
        acc = acc + jnp.dot(ph, wfc1_ref[h], preferred_element_type=jnp.float32)
    out_ref[...] = acc + bfc1_ref[...]


def char_cnn(strips, wconv, bcnn, wfc1, bfc1, r_block):
    _, btp, _ = strips.shape
    return pl.pallas_call(
        _char_cnn_kernel,
        out_shape=jax.ShapeDtypeStruct((btp, HALF), jnp.float32),
        grid_spec=pltpu.PrefetchScalarGridSpec(
            num_scalar_prefetch=0,
            grid=(btp // r_block,),
            in_specs=[pl.BlockSpec((32, r_block, 128), lambda i: (0, i, 0)),
                      pl.BlockSpec((128, 384), lambda i: (0, 0)),
                      pl.BlockSpec((1, 128), lambda i: (0, 0)),
                      pl.BlockSpec((POOL_H, 128, HALF), lambda i: (0, 0, 0)),
                      pl.BlockSpec((1, HALF), lambda i: (0, 0))],
            out_specs=pl.BlockSpec((r_block, HALF), lambda i: (i, 0)),
        ),
        compiler_params=pltpu.CompilerParams(
            dimension_semantics=("parallel",),
            vmem_limit_bytes=48 * 1024 * 1024),
    )(strips, wconv, bcnn, wfc1, bfc1)


def _fold_conv_weight(w_cnn):
    """(64,1,7,7) OIHW -> (128, 384): K = strip features (84 + pad), N = 3*(64 ch + pad)."""
    w_t = jnp.transpose(w_cnn.reshape(64, 7, 7), (1, 2, 0))      # (kh, kw, co)
    groups = []
    for ow in range(CONV_W):
        g = jnp.zeros((7, IMG_W, 64), jnp.float32)
        g = g.at[:, 2 * ow:2 * ow + 7, :].set(w_t)
        g = jnp.pad(g.reshape(STRIP_K, 64), ((0, 0), (0, 64)))   # (84, 128)
        groups.append(g)
    wf = jnp.concatenate(groups, axis=1)                         # (84, 384)
    return jnp.pad(wf, ((0, 128 - STRIP_K), (0, 0))).astype(BF16)


def _fold_fc1_weight(w_fc1):
    """(128, 832) with flat index c*13+h (NCHW .view) -> (13, 128, 128) [h, c, j]."""
    w = jnp.transpose(w_fc1.reshape(HALF, 64, POOL_H), (2, 1, 0))   # (h, c, j)
    return jnp.pad(w, ((0, 0), (0, 64), (0, 0))).astype(BF16)


# ================= fused bidirectional, time-chunked LSTM =====================
def _sigmoid(z):
    # 0.5*tanh(z/2)+0.5 == logistic(z); keeps the op on the EUP (no VALU divide).
    return 0.5 * jnp.tanh(0.5 * z) + 0.5


def _pick_chunk(t_len, cap=16):
    for c in range(min(cap, t_len), 0, -1):
        if t_len % c == 0:
            return c
    return 1


def bilstm_recurrence(proj_tbg, whh_f, whh_b):
    """proj_tbg: (T, B, 1024) f32 = x@W_ih_cat + b (fwd gates | bwd gates)."""
    t_len, b, g2 = proj_tbg.shape
    g = g2 // 2
    tc = _pick_chunk(t_len)
    nc = t_len // tc

    def kernel(pf_ref, pb_ref, wf_ref, wb_ref, hf_out, hb_out,
               hf_sc, cf_sc, hb_sc, cb_sc):
        c = pl.program_id(0)

        @pl.when(c == 0)
        def _():
            hf_sc[...] = jnp.zeros_like(hf_sc)
            cf_sc[...] = jnp.zeros_like(cf_sc)
            hb_sc[...] = jnp.zeros_like(hb_sc)
            cb_sc[...] = jnp.zeros_like(cb_sc)

        def cell(gates, c_prev):
            i = _sigmoid(gates[:, 0 * HALF:1 * HALF])
            f = _sigmoid(gates[:, 1 * HALF:2 * HALF])
            gg = jnp.tanh(gates[:, 2 * HALF:3 * HALF])
            o = _sigmoid(gates[:, 3 * HALF:4 * HALF])
            c_new = f * c_prev + i * gg
            return o * jnp.tanh(c_new), c_new

        for tt in range(tc):
            # forward direction: local step tt of chunk c
            xf = pf_ref[tt]                                       # (B, 1024)
            gf = xf[:, 0:g] + jnp.dot(hf_sc[...].astype(BF16), wf_ref[...],
                                      preferred_element_type=jnp.float32)
            hf, cf = cell(gf, cf_sc[...])
            hf_sc[...] = hf
            cf_sc[...] = cf
            hf_out[tt] = hf

            # backward direction: local step tc-1-tt of chunk nc-1-c
            tb = tc - 1 - tt
            xb = pb_ref[tb]
            gb = xb[:, g:2 * g] + jnp.dot(hb_sc[...].astype(BF16), wb_ref[...],
                                          preferred_element_type=jnp.float32)
            hb, cb = cell(gb, cb_sc[...])
            hb_sc[...] = hb
            cb_sc[...] = cb
            hb_out[tb] = hb

    h_f, h_b = pl.pallas_call(
        kernel,
        out_shape=(jax.ShapeDtypeStruct((t_len, b, HALF), jnp.float32),
                   jax.ShapeDtypeStruct((t_len, b, HALF), jnp.float32)),
        grid_spec=pltpu.PrefetchScalarGridSpec(
            num_scalar_prefetch=0,
            grid=(nc,),
            in_specs=[pl.BlockSpec((tc, b, g2), lambda c: (c, 0, 0)),
                      pl.BlockSpec((tc, b, g2), lambda c: (nc - 1 - c, 0, 0)),
                      pl.BlockSpec((HALF, g), lambda c: (0, 0)),
                      pl.BlockSpec((HALF, g), lambda c: (0, 0))],
            out_specs=[pl.BlockSpec((tc, b, HALF), lambda c: (c, 0, 0)),
                       pl.BlockSpec((tc, b, HALF), lambda c: (nc - 1 - c, 0, 0))],
            scratch_shapes=[pltpu.VMEM((b, HALF), jnp.float32)] * 4,
        ),
        compiler_params=pltpu.CompilerParams(dimension_semantics=("arbitrary",)),
    )(proj_tbg, proj_tbg,
      whh_f.T.astype(BF16), whh_b.T.astype(BF16))
    return h_f, h_b


# ================================ forward =====================================
def bilstm_char_forward(params, x_idx, cs, f):
    # x_idx: (B,T) int32 ids ; cs: (B,T,1,IMG_H,IMG_W) f32 ; f: (B,T,F_DIM) f32
    B, T = x_idx.shape
    BT = B * T
    xe = params["emb"][x_idx]                                    # embedding gather (glue)

    # ---- fused char CNN (conv + maxpool + fc1), grid over words -----------------
    imgs = cs.reshape(BT, IMG_H, IMG_W)
    r_block = min(64, _round_up(BT, 16))
    btp = _round_up(BT, r_block)
    rows = [imgs[:, 2 * oh:2 * oh + 7, :].reshape(BT, STRIP_K) for oh in range(CONV_H)]
    strips = jnp.stack(rows, axis=0)                             # (27, BT, 84)
    strips = jnp.pad(strips, ((0, 32 - CONV_H), (0, btp - BT),
                              (0, 128 - STRIP_K))).astype(BF16)  # (32, btp, 128)

    wconv = _fold_conv_weight(params["w_cnn"])                   # (128, 384) bf16
    bcnn = jnp.pad(params["b_cnn"], (0, 64)).reshape(1, 128)
    wfc1 = _fold_fc1_weight(params["w_fc1"])                     # (13, 128, 128) bf16
    bfc1 = params["b_fc1"].reshape(1, HALF)

    c1 = char_cnn(strips, wconv, bcnn, wfc1, bfc1, r_block)[:BT]  # (BT, 128) f32
    c1 = c1.reshape(B, T, HALF)

    # ---- features + merged (fwd|bwd) LSTM input projection ----------------------
    feat = jnp.concatenate([c1, xe, f], axis=-1)                 # (B, T, 357)
    feat = jnp.pad(feat, ((0, 0), (0, 0), (0, LSTM_IN_PAD - LSTM_IN)))
    xs = feat.transpose(1, 0, 2).reshape(T * B, LSTM_IN_PAD).astype(BF16)

    wih = jnp.concatenate([params["w_ih_f"].T, params["w_ih_b"].T], axis=1)  # (357,1024)
    wih = jnp.pad(wih, ((0, LSTM_IN_PAD - LSTM_IN), (0, 0))).astype(BF16)
    bih = jnp.concatenate([params["b_ih_f"] + params["b_hh_f"],
                           params["b_ih_b"] + params["b_hh_b"]])             # (1024,)
    proj = matmul_bias(xs, wih, bih).reshape(T, B, 8 * HALF)     # f32 gates (fwd|bwd)

    # ---- fused bidirectional recurrence ------------------------------------------
    h_f, h_b = bilstm_recurrence(proj, params["w_hh_f"], params["w_hh_b"])

    # ---- fc3 (output padded 5 -> 128 lanes, sliced after) ------------------------
    h = jnp.concatenate([h_f, h_b], axis=-1).reshape(T * B, HIDDEN).astype(BF16)
    w3 = jnp.pad(params["w_fc3"].T, ((0, 0), (0, 128 - N_CLASSES))).astype(BF16)
    b3 = jnp.pad(params["b_fc3"], (0, 128 - N_CLASSES))
    logits = matmul_bias(h, w3, b3)[:, :N_CLASSES]               # (T*B, 5)
    return logits.reshape(T, B, N_CLASSES).transpose(1, 0, 2)


# ------------------------- deterministic parameter init ------------------------
def init_params(key):
    ks = jax.random.split(key, 15)

    def nrm(k, shape, scale):
        return (scale * jax.random.normal(k, shape)).astype(jnp.float32)

    # fc2 / char_embedding exist in __init__ but are unused in forward -> omitted.
    return {
        "emb":    nrm(ks[0], (VOCAB, EMBED), 0.1),
        "w_cnn":  nrm(ks[1], (64, 1, 7, 7), 0.2),
        "b_cnn":  nrm(ks[2], (64,), 0.1),
        "w_fc1":  nrm(ks[3], (HALF, 832), 0.05),
        "b_fc1":  nrm(ks[4], (HALF,), 0.1),
        "w_ih_f": nrm(ks[5], (4 * HALF, LSTM_IN), 0.05),
        "w_hh_f": nrm(ks[6], (4 * HALF, HALF), 0.05),
        "b_ih_f": nrm(ks[7], (4 * HALF,), 0.1),
        "b_hh_f": nrm(ks[8], (4 * HALF,), 0.1),
        "w_ih_b": nrm(ks[9], (4 * HALF, LSTM_IN), 0.05),
        "w_hh_b": nrm(ks[10], (4 * HALF, HALF), 0.05),
        "b_ih_b": nrm(ks[11], (4 * HALF,), 0.1),
        "b_hh_b": nrm(ks[12], (4 * HALF,), 0.1),
        "w_fc3":  nrm(ks[13], (N_CLASSES, HIDDEN), 0.1),
        "b_fc3":  nrm(ks[14], (N_CLASSES,), 0.1),
    }


# -------- pure-JAX reference with matched (bf16-operand) matmul precision ------
def reference_forward(params, x_idx, cs, f):
    bf = BF16
    B, T = x_idx.shape
    xe = params["emb"][x_idx]
    imgs = cs.reshape(B * T, 1, IMG_H, IMG_W).astype(bf)
    conv = jax.lax.conv_general_dilated(
        imgs, params["w_cnn"].astype(bf), (2, 2), "VALID",
        dimension_numbers=("NCHW", "OIHW", "NCHW"),
        preferred_element_type=jnp.float32)
    conv = conv + params["b_cnn"][None, :, None, None]
    pooled = jax.lax.reduce_window(conv, -jnp.inf, jax.lax.max,
                                   (1, 1, 3, 3), (1, 1, 2, 2), "VALID")
    flat = pooled.reshape(B * T, -1).astype(bf)
    c1 = jnp.dot(flat, params["w_fc1"].T.astype(bf),
                 preferred_element_type=jnp.float32) + params["b_fc1"]
    feat = jnp.concatenate([c1.reshape(B, T, HALF), xe, f], axis=-1)
    xs = feat.transpose(1, 0, 2)

    def run_dir(seq, wih, whh, bih, bhh):
        proj = jnp.dot(seq.reshape(T * B, LSTM_IN).astype(bf), wih.T.astype(bf),
                       preferred_element_type=jnp.float32) + (bih + bhh)
        proj = proj.reshape(T, B, 4 * HALF)
        whh_t = whh.T.astype(bf)

        def step(carry, gx):
            h, c = carry
            g = gx + jnp.dot(h.astype(bf), whh_t, preferred_element_type=jnp.float32)
            i, fo, gg, o = jnp.split(g, 4, axis=-1)
            i, fo, o = jax.nn.sigmoid(i), jax.nn.sigmoid(fo), jax.nn.sigmoid(o)
            gg = jnp.tanh(gg)
            c = fo * c + i * gg
            h = o * jnp.tanh(c)
            return (h, c), h

        init = (jnp.zeros((B, HALF), jnp.float32), jnp.zeros((B, HALF), jnp.float32))
        return jax.lax.scan(step, init, proj)[1]

    h_f = run_dir(xs, params["w_ih_f"], params["w_hh_f"], params["b_ih_f"], params["b_hh_f"])
    h_b = run_dir(xs[::-1], params["w_ih_b"], params["w_hh_b"],
                  params["b_ih_b"], params["b_hh_b"])[::-1]
    h = jnp.concatenate([h_f, h_b], axis=-1).transpose(1, 0, 2)
    h = h.reshape(B * T, HIDDEN).astype(bf)
    logits = jnp.dot(h, params["w_fc3"].T.astype(bf),
                     preferred_element_type=jnp.float32) + params["b_fc3"]
    return logits.reshape(B, T, N_CLASSES)


if __name__ == "__main__":
    key = jax.random.PRNGKey(0)
    kp, kx, kc, kf = jax.random.split(key, 4)
    params = init_params(kp)

    B, T = 2, 8
    x_idx = jax.random.randint(kx, (B, T), 0, VOCAB, dtype=jnp.int32)
    cs = jax.random.normal(kc, (B, T, 1, IMG_H, IMG_W), jnp.float32)
    f = jax.random.normal(kf, (B, T, F_DIM), jnp.float32)

    out = jax.jit(bilstm_char_forward)(params, x_idx, cs, f)
    out = jax.block_until_ready(out)
    assert out.shape == (B, T, N_CLASSES)

    ref = reference_forward(params, x_idx, cs, f)
    err = float(jnp.max(jnp.abs(out - ref)))
    assert jnp.allclose(out, ref, atol=1e-2, rtol=1e-2), err
    print("KERNEL_OK")
</pallas_src>

<mosaic_0001>
module attributes {stable_mosaic.version = 11 : i64} {
  func.func @_char_cnn_kernel(%arg0: i32, %arg1: memref<32x16x128xbf16, #tpu.memory_space<vmem>>, %arg2: memref<128x384xbf16, #tpu.memory_space<vmem>>, %arg3: memref<1x128xf32, #tpu.memory_space<vmem>>, %arg4: memref<13x128x128xbf16, #tpu.memory_space<vmem>>, %arg5: memref<1x128xf32, #tpu.memory_space<vmem>>, %arg6: memref<16x128xf32, #tpu.memory_space<vmem>>) attributes {dimension_semantics = [#tpu.dimension_semantics<parallel>], iteration_bounds = array<i64: 1>, scalar_prefetch = 0 : i64, scratch_operands = 0 : i64, tpu.core_type = #tpu.core_type<tc>, window_params = [{transform_indices = @transform_0, window_bounds = array<i64: 32, 16, 128>}, {pipeline_mode = #tpu.pipeline_mode<synchronous>, transform_indices = @transform_1, window_bounds = array<i64: 128, 384>}, {pipeline_mode = #tpu.pipeline_mode<synchronous>, transform_indices = @transform_2, window_bounds = array<i64: 1, 128>}, {pipeline_mode = #tpu.pipeline_mode<synchronous>, transform_indices = @transform_3, window_bounds = array<i64: 13, 128, 128>}, {pipeline_mode = #tpu.pipeline_mode<synchronous>, transform_indices = @transform_4, window_bounds = array<i64: 1, 128>}, {transform_indices = @transform_5, window_bounds = array<i64: 16, 128>}]} {
    %c0 = arith.constant 0 : index
    %c0_0 = arith.constant 0 : index
    %c0_1 = arith.constant 0 : index
    %0 = vector.load %arg1[%c0, %c0_0, %c0_1] : memref<32x16x128xbf16, #tpu.memory_space<vmem>>, vector<32x16x128xbf16>
    %1 = vector.shape_cast %0 : vector<32x16x128xbf16> to vector<512x128xbf16>
    %c0_2 = arith.constant 0 : index
    %c0_3 = arith.constant 0 : index
    %2 = vector.load %arg2[%c0_2, %c0_3] : memref<128x384xbf16, #tpu.memory_space<vmem>>, vector<128x384xbf16>
    %cst = arith.constant dense<0.000000e+00> : vector<512x384xf32>
    %3 = tpu.matmul %1, %2, %cst {dimension_numbers = #tpu.dot_dimension_numbers<[1], [0], [0], [1], [0, 0, 1, 1], [], []>} : vector<512x128xbf16>, vector<128x384xbf16>, vector<512x384xf32> -> vector<512x384xf32>
    %4 = vector.extract_strided_slice %3 {offsets = [0, 0], sizes = [512, 128], strides = [1, 1]} : vector<512x384xf32> to vector<512x128xf32>
    %5 = vector.extract_strided_slice %3 {offsets = [0, 128], sizes = [512, 128], strides = [1, 1]} : vector<512x384xf32> to vector<512x128xf32>
    %6 = arith.maximumf %4, %5 : vector<512x128xf32>
    %7 = vector.extract_strided_slice %3 {offsets = [0, 256], sizes = [512, 128], strides = [1, 1]} : vector<512x384xf32> to vector<512x128xf32>
    %8 = arith.maximumf %6, %7 : vector<512x128xf32>
    %c0_4 = arith.constant 0 : index
    %c0_5 = arith.constant 0 : index
    %9 = vector.load %arg3[%c0_4, %c0_5] : memref<1x128xf32, #tpu.memory_space<vmem>>, vector<1x128xf32>
    %cst_6 = arith.constant 0.000000e+00 : f32
    %10 = vector.broadcast %cst_6 : f32 to vector<16x128xf32>
    %11 = vector.extract_strided_slice %8 {offsets = [0, 0], sizes = [16, 128], strides = [1, 1]} : vector<512x128xf32> to vector<16x128xf32>
    %12 = vector.extract_strided_slice %8 {offsets = [16, 0], sizes = [16, 128], strides = [1, 1]} : vector<512x128xf32> to vector<16x128xf32>
    %13 = vector.extract_strided_slice %8 {offsets = [32, 0], sizes = [16, 128], strides = [1, 1]} : vector<512x128xf32> to vector<16x128xf32>
    %14 = arith.maximumf %11, %12 : vector<16x128xf32>
    %15 = arith.maximumf %14, %13 : vector<16x128xf32>
    %16 = vector.broadcast %9 : vector<1x128xf32> to vector<16x128xf32>
    %17 = arith.addf %15, %16 : vector<16x128xf32>
    %18 = arith.truncf %17 : vector<16x128xf32> to vector<16x128xbf16>
    %c0_7 = arith.constant 0 : index
    %c0_8 = arith.constant 0 : index
    %c0_9 = arith.constant 0 : index
    %19 = vector.load %arg4[%c0_7, %c0_8, %c0_9] : memref<13x128x128xbf16, #tpu.memory_space<vmem>>, vector<1x128x128xbf16>
    %20 = vector.shape_cast %19 : vector<1x128x128xbf16> to vector<128x128xbf16>
    %cst_10 = arith.constant dense<0.000000e+00> : vector<16x128xf32>
    %21 = tpu.matmul %18, %20, %cst_10 {dimension_numbers = #tpu.dot_dimension_numbers<[1], [0], [0], [1], [0, 0, 1, 1], [], []>} : vector<16x128xbf16>, vector<128x128xbf16>, vector<16x128xf32> -> vector<16x128xf32>
    %22 = arith.addf %10, %21 : vector<16x128xf32>
    %23 = vector.extract_strided_slice %8 {offsets = [32, 0], sizes = [16, 128], strides = [1, 1]} : vector<512x128xf32> to vector<16x128xf32>
    %24 = vector.extract_strided_slice %8 {offsets = [48, 0], sizes = [16, 128], strides = [1, 1]} : vector<512x128xf32> to vector<16x128xf32>
    %25 = vector.extract_strided_slice %8 {offsets = [64, 0], sizes = [16, 128], strides = [1, 1]} : vector<512x128xf32> to vector<16x128xf32>
    %26 = arith.maximumf %23, %24 : vector<16x128xf32>
    %27 = arith.maximumf %26, %25 : vector<16x128xf32>
    %28 = vector.broadcast %9 : vector<1x128xf32> to vector<16x128xf32>
    %29 = arith.addf %27, %28 : vector<16x128xf32>
    %30 = arith.truncf %29 : vector<16x128xf32> to vector<16x128xbf16>
    %c1 = arith.constant 1 : index
    %c0_11 = arith.constant 0 : index
    %c0_12 = arith.constant 0 : index
    %31 = vector.load %arg4[%c1, %c0_11, %c0_12] : memref<13x128x128xbf16, #tpu.memory_space<vmem>>, vector<1x128x128xbf16>
    %32 = vector.shape_cast %31 : vector<1x128x128xbf16> to vector<128x128xbf16>
    %cst_13 = arith.constant dense<0.000000e+00> : vector<16x128xf32>
    %33 = tpu.matmul %30, %32, %cst_13 {dimension_numbers = #tpu.dot_dimension_numbers<[1], [0], [0], [1], [0, 0, 1, 1], [], []>} : vector<16x128xbf16>, vector<128x128xbf16>, vector<16x128xf32> -> vector<16x128xf32>
    %34 = arith.addf %22, %33 : vector<16x128xf32>
    %35 = vector.extract_strided_slice %8 {offsets = [64, 0], sizes = [16, 128], strides = [1, 1]} : vector<512x128xf32> to vector<16x128xf32>
    %36 = vector.extract_strided_slice %8 {offsets = [80, 0], sizes = [16, 128], strides = [1, 1]} : vector<512x128xf32> to vector<16x128xf32>
    %37 = vector.extract_strided_slice %8 {offsets = [96, 0], sizes = [16, 128], strides = [1, 1]} : vector<512x128xf32> to vector<16x128xf32>
    %38 = arith.maximumf %35, %36 : vector<16x128xf32>
    %39 = arith.maximumf %38, %37 : vector<16x128xf32>
    %40 = vector.broadcast %9 : vector<1x128xf32> to vector<16x128xf32>
    %41 = arith.addf %39, %40 : vector<16x128xf32>
    %42 = arith.truncf %41 : vector<16x128xf32> to vector<16x128xbf16>
    %c2 = arith.constant 2 : index
    %c0_14 = arith.constant 0 : index
    %c0_15 = arith.constant 0 : index
    %43 = vector.load %arg4[%c2, %c0_14, %c0_15] : memref<13x128x128xbf16, #tpu.memory_space<vmem>>, vector<1x128x128xbf16>
    %44 = vector.shape_cast %43 : vector<1x128x128xbf16> to vector<128x128xbf16>
    %cst_16 = arith.constant dense<0.000000e+00> : vector<16x128xf32>
    %45 = tpu.matmul %42, %44, %cst_16 {dimension_numbers = #tpu.dot_dimension_numbers<[1], [0], [0], [1], [0, 0, 1, 1], [], []>} : vector<16x128xbf16>, vector<128x128xbf16>, vector<16x128xf32> -> vector<16x128xf32>
    %46 = arith.addf %34, %45 : vector<16x128xf32>
    %47 = vector.extract_strided_slice %8 {offsets = [96, 0], sizes = [16, 128], strides = [1, 1]} : vector<512x128xf32> to vector<16x128xf32>
    %48 = vector.extract_strided_slice %8 {offsets = [112, 0], sizes = [16, 128], strides = [1, 1]} : vector<512x128xf32> to vector<16x128xf32>
    %49 = vector.extract_strided_slice %8 {offsets = [128, 0], sizes = [16, 128], strides = [1, 1]} : vector<512x128xf32> to vector<16x128xf32>
    %50 = arith.maximumf %47, %48 : vector<16x128xf32>
    %51 = arith.maximumf %50, %49 : vector<16x128xf32>
    %52 = vector.broadcast %9 : vector<1x128xf32> to vector<16x128xf32>
    %53 = arith.addf %51, %52 : vector<16x128xf32>
    %54 = arith.truncf %53 : vector<16x128xf32> to vector<16x128xbf16>
    %c3 = arith.constant 3 : index
    %c0_17 = arith.constant 0 : index
    %c0_18 = arith.constant 0 : index
    %55 = vector.load %arg4[%c3, %c0_17, %c0_18] : memref<13x128x128xbf16, #tpu.memory_space<vmem>>, vector<1x128x128xbf16>
    %56 = vector.shape_cast %55 : vector<1x128x128xbf16> to vector<128x128xbf16>
    %cst_19 = arith.constant dense<0.000000e+00> : vector<16x128xf32>
    %57 = tpu.matmul %54, %56, %cst_19 {dimension_numbers = #tpu.dot_dimension_numbers<[1], [0], [0], [1], [0, 0, 1, 1], [], []>} : vector<16x128xbf16>, vector<128x128xbf16>, vector<16x128xf32> -> vector<16x128xf32>
    %58 = arith.addf %46, %57 : vector<16x128xf32>
    %59 = vector.extract_strided_slice %8 {offsets = [128, 0], sizes = [16, 128], strides = [1, 1]} : vector<512x128xf32> to vector<16x128xf32>
    %60 = vector.extract_strided_slice %8 {offsets = [144, 0], sizes = [16, 128], strides = [1, 1]} : vector<512x128xf32> to vector<16x128xf32>
    %61 = vector.extract_strided_slice %8 {offsets = [160, 0], sizes = [16, 128], strides = [1, 1]} : vector<512x128xf32> to vector<16x128xf32>
    %62 = arith.maximumf %59, %60 : vector<16x128xf32>
    %63 = arith.maximumf %62, %61 : vector<16x128xf32>
    %64 = vector.broadcast %9 : vector<1x128xf32> to vector<16x128xf32>
    %65 = arith.addf %63, %64 : vector<16x128xf32>
    %66 = arith.truncf %65 : vector<16x128xf32> to vector<16x128xbf16>
    %c4 = arith.constant 4 : index
    %c0_20 = arith.constant 0 : index
    %c0_21 = arith.constant 0 : index
    %67 = vector.load %arg4[%c4, %c0_20, %c0_21] : memref<13x128x128xbf16, #tpu.memory_space<vmem>>, vector<1x128x128xbf16>
    %68 = vector.shape_cast %67 : vector<1x128x128xbf16> to vector<128x128xbf16>
    %cst_22 = arith.constant dense<0.000000e+00> : vector<16x128xf32>
    %69 = tpu.matmul %66, %68, %cst_22 {dimension_numbers = #tpu.dot_dimension_numbers<[1], [0], [0], [1], [0, 0, 1, 1], [], []>} : vector<16x128xbf16>, vector<128x128xbf16>, vector<16x128xf32> -> vector<16x128xf32>
    %70 = arith.addf %58, %69 : vector<16x128xf32>
    %71 = vector.extract_strided_slice %8 {offsets = [160, 0], sizes = [16, 128], strides = [1, 1]} : vector<512x128xf32> to vector<16x128xf32>
    %72 = vector.extract_strided_slice %8 {offsets = [176, 0], sizes = [16, 128], strides = [1, 1]} : vector<512x128xf32> to vector<16x128xf32>
    %73 = vector.extract_strided_slice %8 {offsets = [192, 0], sizes = [16, 128], strides = [1, 1]} : vector<512x128xf32> to vector<16x128xf32>
    %74 = arith.maximumf %71, %72 : vector<16x128xf32>
    %75 = arith.maximumf %74, %73 : vector<16x128xf32>
    %76 = vector.broadcast %9 : vector<1x128xf32> to vector<16x128xf32>
    %77 = arith.addf %75, %76 : vector<16x128xf32>
    %78 = arith.truncf %77 : vector<16x128xf32> to vector<16x128xbf16>
    %c5 = arith.constant 5 : index
    %c0_23 = arith.constant 0 : index
    %c0_24 = arith.constant 0 : index
    %79 = vector.load %arg4[%c5, %c0_23, %c0_24] : memref<13x128x128xbf16, #tpu.memory_space<vmem>>, vector<1x128x128xbf16>
    %80 = vector.shape_cast %79 : vector<1x128x128xbf16> to vector<128x128xbf16>
    %cst_25 = arith.constant dense<0.000000e+00> : vector<16x128xf32>
    %81 = tpu.matmul %78, %80, %cst_25 {dimension_numbers = #tpu.dot_dimension_numbers<[1], [0], [0], [1], [0, 0, 1, 1], [], []>} : vector<16x128xbf16>, vector<128x128xbf16>, vector<16x128xf32> -> vector<16x128xf32>
    %82 = arith.addf %70, %81 : vector<16x128xf32>
    %83 = vector.extract_strided_slice %8 {offsets = [192, 0], sizes = [16, 128], strides = [1, 1]} : vector<512x128xf32> to vector<16x128xf32>
    %84 = vector.extract_strided_slice %8 {offsets = [208, 0], sizes = [16, 128], strides = [1, 1]} : vector<512x128xf32> to vector<16x128xf32>
    %85 = vector.extract_strided_slice %8 {offsets = [224, 0], sizes = [16, 128], strides = [1, 1]} : vector<512x128xf32> to vector<16x128xf32>
    %86 = arith.maximumf %83, %84 : vector<16x128xf32>
    %87 = arith.maximumf %86, %85 : vector<16x128xf32>
    %88 = vector.broadcast %9 : vector<1x128xf32> to vector<16x128xf32>
    %89 = arith.addf %87, %88 : vector<16x128xf32>
    %90 = arith.truncf %89 : vector<16x128xf32> to vector<16x128xbf16>
    %c6 = arith.constant 6 : index
    %c0_26 = arith.constant 0 : index
    %c0_27 = arith.constant 0 : index
    %91 = vector.load %arg4[%c6, %c0_26, %c0_27] : memref<13x128x128xbf16, #tpu.memory_space<vmem>>, vector<1x128x128xbf16>
    %92 = vector.shape_cast %91 : vector<1x128x128xbf16> to vector<128x128xbf16>
    %cst_28 = arith.constant dense<0.000000e+00> : vector<16x128xf32>
    %93 = tpu.matmul %90, %92, %cst_28 {dimension_numbers = #tpu.dot_dimension_numbers<[1], [0], [0], [1], [0, 0, 1, 1], [], []>} : vector<16x128xbf16>, vector<128x128xbf16>, vector<16x128xf32> -> vector<16x128xf32>
    %94 = arith.addf %82, %93 : vector<16x128xf32>
    %95 = vector.extract_strided_slice %8 {offsets = [224, 0], sizes = [16, 128], strides = [1, 1]} : vector<512x128xf32> to vector<16x128xf32>
    %96 = vector.extract_strided_slice %8 {offsets = [240, 0], sizes = [16, 128], strides = [1, 1]} : vector<512x128xf32> to vector<16x128xf32>
    %97 = vector.extract_strided_slice %8 {offsets = [256, 0], sizes = [16, 128], strides = [1, 1]} : vector<512x128xf32> to vector<16x128xf32>
    %98 = arith.maximumf %95, %96 : vector<16x128xf32>
    %99 = arith.maximumf %98, %97 : vector<16x128xf32>
    %100 = vector.broadcast %9 : vector<1x128xf32> to vector<16x128xf32>
    %101 = arith.addf %99, %100 : vector<16x128xf32>
    %102 = arith.truncf %101 : vector<16x128xf32> to vector<16x128xbf16>
    %c7 = arith.constant 7 : index
    %c0_29 = arith.constant 0 : index
    %c0_30 = arith.constant 0 : index
    %103 = vector.load %arg4[%c7, %c0_29, %c0_30] : memref<13x128x128xbf16, #tpu.memory_space<vmem>>, vector<1x128x128xbf16>
    %104 = vector.shape_cast %103 : vector<1x128x128xbf16> to vector<128x128xbf16>
    %cst_31 = arith.constant dense<0.000000e+00> : vector<16x128xf32>
    %105 = tpu.matmul %102, %104, %cst_31 {dimension_numbers = #tpu.dot_dimension_numbers<[1], [0], [0], [1], [0, 0, 1, 1], [], []>} : vector<16x128xbf16>, vector<128x128xbf16>, vector<16x128xf32> -> vector<16x128xf32>
    %106 = arith.addf %94, %105 : vector<16x128xf32>
    %107 = vector.extract_strided_slice %8 {offsets = [256, 0], sizes = [16, 128], strides = [1, 1]} : vector<512x128xf32> to vector<16x128xf32>
    %108 = vector.extract_strided_slice %8 {offsets = [272, 0], sizes = [16, 128], strides = [1, 1]} : vector<512x128xf32> to vector<16x128xf32>
    %109 = vector.extract_strided_slice %8 {offsets = [288, 0], sizes = [16, 128], strides = [1, 1]} : vector<512x128xf32> to vector<16x128xf32>
    %110 = arith.maximumf %107, %108 : vector<16x128xf32>
    %111 = arith.maximumf %110, %109 : vector<16x128xf32>
    %112 = vector.broadcast %9 : vector<1x128xf32> to vector<16x128xf32>
    %113 = arith.addf %111, %112 : vector<16x128xf32>
    %114 = arith.truncf %113 : vector<16x128xf32> to vector<16x128xbf16>
    %c8 = arith.constant 8 : index
    %c0_32 = arith.constant 0 : index
    %c0_33 = arith.constant 0 : index
    %115 = vector.load %arg4[%c8, %c0_32, %c0_33] : memref<13x128x128xbf16, #tpu.memory_space<vmem>>, vector<1x128x128xbf16>
    %116 = vector.shape_cast %115 : vector<1x128x128xbf16> to vector<128x128xbf16>
    %cst_34 = arith.constant dense<0.000000e+00> : vector<16x128xf32>
    %117 = tpu.matmul %114, %116, %cst_34 {dimension_numbers = #tpu.dot_dimension_numbers<[1], [0], [0], [1], [0, 0, 1, 1], [], []>} : vector<16x128xbf16>, vector<128x128xbf16>, vector<16x128xf32> -> vector<16x128xf32>
    %118 = arith.addf %106, %117 : vector<16x128xf32>
    %119 = vector.extract_strided_slice %8 {offsets = [288, 0], sizes = [16, 128], strides = [1, 1]} : vector<512x128xf32> to vector<16x128xf32>
    %120 = vector.extract_strided_slice %8 {offsets = [304, 0], sizes = [16, 128], strides = [1, 1]} : vector<512x128xf32> to vector<16x128xf32>
    %121 = vector.extract_strided_slice %8 {offsets = [320, 0], sizes = [16, 128], strides = [1, 1]} : vector<512x128xf32> to vector<16x128xf32>
    %122 = arith.maximumf %119, %120 : vector<16x128xf32>
    %123 = arith.maximumf %122, %121 : vector<16x128xf32>
    %124 = vector.broadcast %9 : vector<1x128xf32> to vector<16x128xf32>
    %125 = arith.addf %123, %124 : vector<16x128xf32>
    %126 = arith.truncf %125 : vector<16x128xf32> to vector<16x128xbf16>
    %c9 = arith.constant 9 : index
    %c0_35 = arith.constant 0 : index
    %c0_36 = arith.constant 0 : index
    %127 = vector.load %arg4[%c9, %c0_35, %c0_36] : memref<13x128x128xbf16, #tpu.memory_space<vmem>>, vector<1x128x128xbf16>
    %128 = vector.shape_cast %127 : vector<1x128x128xbf16> to vector<128x128xbf16>
    %cst_37 = arith.constant dense<0.000000e+00> : vector<16x128xf32>
    %129 = tpu.matmul %126, %128, %cst_37 {dimension_numbers = #tpu.dot_dimension_numbers<[1], [0], [0], [1], [0, 0, 1, 1], [], []>} : vector<16x128xbf16>, vector<128x128xbf16>, vector<16x128xf32> -> vector<16x128xf32>
    %130 = arith.addf %118, %129 : vector<16x128xf32>
    %131 = vector.extract_strided_slice %8 {offsets = [320, 0], sizes = [16, 128], strides = [1, 1]} : vector<512x128xf32> to vector<16x128xf32>
    %132 = vector.extract_strided_slice %8 {offsets = [336, 0], sizes = [16, 128], strides = [1, 1]} : vector<512x128xf32> to vector<16x128xf32>
    %133 = vector.extract_strided_slice %8 {offsets = [352, 0], sizes = [16, 128], strides = [1, 1]} : vector<512x128xf32> to vector<16x128xf32>
    %134 = arith.maximumf %131, %132 : vector<16x128xf32>
    %135 = arith.maximumf %134, %133 : vector<16x128xf32>
    %136 = vector.broadcast %9 : vector<1x128xf32> to vector<16x128xf32>
    %137 = arith.addf %135, %136 : vector<16x128xf32>
    %138 = arith.truncf %137 : vector<16x128xf32> to vector<16x128xbf16>
    %c10 = arith.constant 10 : index
    %c0_38 = arith.constant 0 : index
    %c0_39 = arith.constant 0 : index
    %139 = vector.load %arg4[%c10, %c0_38, %c0_39] : memref<13x128x128xbf16, #tpu.memory_space<vmem>>, vector<1x128x128xbf16>
    %140 = vector.shape_cast %139 : vector<1x128x128xbf16> to vector<128x128xbf16>
    %cst_40 = arith.constant dense<0.000000e+00> : vector<16x128xf32>
    %141 = tpu.matmul %138, %140, %cst_40 {dimension_numbers = #tpu.dot_dimension_numbers<[1], [0], [0], [1], [0, 0, 1, 1], [], []>} : vector<16x128xbf16>, vector<128x128xbf16>, vector<16x128xf32> -> vector<16x128xf32>
    %142 = arith.addf %130, %141 : vector<16x128xf32>
    %143 = vector.extract_strided_slice %8 {offsets = [352, 0], sizes = [16, 128], strides = [1, 1]} : vector<512x128xf32> to vector<16x128xf32>
    %144 = vector.extract_strided_slice %8 {offsets = [368, 0], sizes = [16, 128], strides = [1, 1]} : vector<512x128xf32> to vector<16x128xf32>
    %145 = vector.extract_strided_slice %8 {offsets = [384, 0], sizes = [16, 128], strides = [1, 1]} : vector<512x128xf32> to vector<16x128xf32>
    %146 = arith.maximumf %143, %144 : vector<16x128xf32>
    %147 = arith.maximumf %146, %145 : vector<16x128xf32>
    %148 = vector.broadcast %9 : vector<1x128xf32> to vector<16x128xf32>
    %149 = arith.addf %147, %148 : vector<16x128xf32>
    %150 = arith.truncf %149 : vector<16x128xf32> to vector<16x128xbf16>
    %c11 = arith.constant 11 : index
    %c0_41 = arith.constant 0 : index
    %c0_42 = arith.constant 0 : index
    %151 = vector.load %arg4[%c11, %c0_41, %c0_42] : memref<13x128x128xbf16, #tpu.memory_space<vmem>>, vector<1x128x128xbf16>
    %152 = vector.shape_cast %151 : vector<1x128x128xbf16> to vector<128x128xbf16>
    %cst_43 = arith.constant dense<0.000000e+00> : vector<16x128xf32>
    %153 = tpu.matmul %150, %152, %cst_43 {dimension_numbers = #tpu.dot_dimension_numbers<[1], [0], [0], [1], [0, 0, 1, 1], [], []>} : vector<16x128xbf16>, vector<128x128xbf16>, vector<16x128xf32> -> vector<16x128xf32>
    %154 = arith.addf %142, %153 : vector<16x128xf32>
    %155 = vector.extract_strided_slice %8 {offsets = [384, 0], sizes = [16, 128], strides = [1, 1]} : vector<512x128xf32> to vector<16x128xf32>
    %156 = vector.extract_strided_slice %8 {offsets = [400, 0], sizes = [16, 128], strides = [1, 1]} : vector<512x128xf32> to vector<16x128xf32>
    %157 = vector.extract_strided_slice %8 {offsets = [416, 0], sizes = [16, 128], strides = [1, 1]} : vector<512x128xf32> to vector<16x128xf32>
    %158 = arith.maximumf %155, %156 : vector<16x128xf32>
    %159 = arith.maximumf %158, %157 : vector<16x128xf32>
    %160 = vector.broadcast %9 : vector<1x128xf32> to vector<16x128xf32>
    %161 = arith.addf %159, %160 : vector<16x128xf32>
    %162 = arith.truncf %161 : vector<16x128xf32> to vector<16x128xbf16>
    %c12 = arith.constant 12 : index
    %c0_44 = arith.constant 0 : index
    %c0_45 = arith.constant 0 : index
    %163 = vector.load %arg4[%c12, %c0_44, %c0_45] : memref<13x128x128xbf16, #tpu.memory_space<vmem>>, vector<1x128x128xbf16>
    %164 = vector.shape_cast %163 : vector<1x128x128xbf16> to vector<128x128xbf16>
    %cst_46 = arith.constant dense<0.000000e+00> : vector<16x128xf32>
    %165 = tpu.matmul %162, %164, %cst_46 {dimension_numbers = #tpu.dot_dimension_numbers<[1], [0], [0], [1], [0, 0, 1, 1], [], []>} : vector<16x128xbf16>, vector<128x128xbf16>, vector<16x128xf32> -> vector<16x128xf32>
    %166 = arith.addf %154, %165 : vector<16x128xf32>
    %c0_47 = arith.constant 0 : index
    %c0_48 = arith.constant 0 : index
    %167 = vector.load %arg5[%c0_47, %c0_48] : memref<1x128xf32, #tpu.memory_space<vmem>>, vector<1x128xf32>
    %168 = vector.broadcast %167 : vector<1x128xf32> to vector<16x128xf32>
    %169 = arith.addf %166, %168 : vector<16x128xf32>
    %c0_49 = arith.constant 0 : index
    %c0_50 = arith.constant 0 : index
    %170 = vector.load %arg6[%c0_49, %c0_50] : memref<16x128xf32, #tpu.memory_space<vmem>>, vector<16x128xf32>
    tpu.vector_store %arg6[%c0_49, %c0_50], %169 {strides = array<i32>} : memref<16x128xf32, #tpu.memory_space<vmem>>, vector<16x128xf32>,
    return
  }
  func.func @transform_0(%arg0: i32) -> (i32, i32, i32) {
    %c0_i32 = arith.constant 0 : i32
    %c0_i32_0 = arith.constant 0 : i32
    %c0_i32_1 = arith.constant 0 : i32
    return %c0_i32, %arg0, %c0_i32_0 : i32, i32, i32
  }
  func.func @transform_1(%arg0: i32) -> (i32, i32) {
    %c0_i32 = arith.constant 0 : i32
    %c0_i32_0 = arith.constant 0 : i32
    %c0_i32_1 = arith.constant 0 : i32
    return %c0_i32, %c0_i32_0 : i32, i32
  }
  func.func @transform_2(%arg0: i32) -> (i32, i32) {
    %c0_i32 = arith.constant 0 : i32
    %c0_i32_0 = arith.constant 0 : i32
    %c0_i32_1 = arith.constant 0 : i32
    return %c0_i32, %c0_i32_0 : i32, i32
  }
  func.func @transform_3(%arg0: i32) -> (i32, i32, i32) {
    %c0_i32 = arith.constant 0 : i32
    %c0_i32_0 = arith.constant 0 : i32
    %c0_i32_1 = arith.constant 0 : i32
    %c0_i32_2 = arith.constant 0 : i32
    return %c0_i32, %c0_i32_0, %c0_i32_1 : i32, i32, i32
  }
  func.func @transform_4(%arg0: i32) -> (i32, i32) {
    %c0_i32 = arith.constant 0 : i32
    %c0_i32_0 = arith.constant 0 : i32
    %c0_i32_1 = arith.constant 0 : i32
    return %c0_i32, %c0_i32_0 : i32, i32
  }
  func.func @transform_5(%arg0: i32) -> (i32, i32) {
    %c0_i32 = arith.constant 0 : i32
    %c0_i32_0 = arith.constant 0 : i32
    return %arg0, %c0_i32 : i32, i32
  }
}

module attributes {stable_mosaic.version = 11 : i64} {
  func.func @_mm_bias_kernel(%arg0: i32, %arg1: memref<16x384xbf16, #tpu.memory_space<vmem>>, %arg2: memref<384x1024xbf16, #tpu.memory_space<vmem>>, %arg3: memref<1x1024xf32, #tpu.memory_space<vmem>>, %arg4: memref<16x1024xf32, #tpu.memory_space<vmem>>) attributes {dimension_semantics = [#tpu.dimension_semantics<parallel>], iteration_bounds = array<i64: 1>, scalar_prefetch = 0 : i64, scratch_operands = 0 : i64, tpu.core_type = #tpu.core_type<tc>, window_params = [{transform_indices = @transform_0, window_bounds = array<i64: 16, 384>}, {pipeline_mode = #tpu.pipeline_mode<synchronous>, transform_indices = @transform_1, window_bounds = array<i64: 384, 1024>}, {pipeline_mode = #tpu.pipeline_mode<synchronous>, transform_indices = @transform_2, window_bounds = array<i64: 1, 1024>}, {transform_indices = @transform_3, window_bounds = array<i64: 16, 1024>}]} {
    %c0 = arith.constant 0 : index
    %c0_0 = arith.constant 0 : index
    %0 = vector.load %arg1[%c0, %c0_0] : memref<16x384xbf16, #tpu.memory_space<vmem>>, vector<16x384xbf16>
    %c0_1 = arith.constant 0 : index
    %c0_2 = arith.constant 0 : index
    %1 = vector.load %arg2[%c0_1, %c0_2] : memref<384x1024xbf16, #tpu.memory_space<vmem>>, vector<384x1024xbf16>
    %cst = arith.constant dense<0.000000e+00> : vector<16x1024xf32>
    %2 = tpu.matmul %0, %1, %cst {dimension_numbers = #tpu.dot_dimension_numbers<[1], [0], [0], [1], [0, 0, 1, 1], [], []>} : vector<16x384xbf16>, vector<384x1024xbf16>, vector<16x1024xf32> -> vector<16x1024xf32>
    %c0_3 = arith.constant 0 : index
    %c0_4 = arith.constant 0 : index
    %3 = vector.load %arg3[%c0_3, %c0_4] : memref<1x1024xf32, #tpu.memory_space<vmem>>, vector<1x1024xf32>
    %4 = vector.broadcast %3 : vector<1x1024xf32> to vector<16x1024xf32>
    %5 = arith.addf %2, %4 : vector<16x1024xf32>
    %c0_5 = arith.constant 0 : index
    %c0_6 = arith.constant 0 : index
    %6 = vector.load %arg4[%c0_5, %c0_6] : memref<16x1024xf32, #tpu.memory_space<vmem>>, vector<16x1024xf32>
    tpu.vector_store %arg4[%c0_5, %c0_6], %5 {strides = array<i32>} : memref<16x1024xf32, #tpu.memory_space<vmem>>, vector<16x1024xf32>,
    return
  }
  func.func @transform_0(%arg0: i32) -> (i32, i32) {
    %c0_i32 = arith.constant 0 : i32
    %c0_i32_0 = arith.constant 0 : i32
    return %arg0, %c0_i32 : i32, i32
  }
  func.func @transform_1(%arg0: i32) -> (i32, i32) {
    %c0_i32 = arith.constant 0 : i32
    %c0_i32_0 = arith.constant 0 : i32
    %c0_i32_1 = arith.constant 0 : i32
    return %c0_i32, %c0_i32_0 : i32, i32
  }
  func.func @transform_2(%arg0: i32) -> (i32, i32) {
    %c0_i32 = arith.constant 0 : i32
    %c0_i32_0 = arith.constant 0 : i32
    %c0_i32_1 = arith.constant 0 : i32
    return %c0_i32, %c0_i32_0 : i32, i32
  }
  func.func @transform_3(%arg0: i32) -> (i32, i32) {
    %c0_i32 = arith.constant 0 : i32
    %c0_i32_0 = arith.constant 0 : i32
    return %arg0, %c0_i32 : i32, i32
  }
}

module attributes {stable_mosaic.version = 11 : i64} {
  func.func @kernel(%arg0: i32, %arg1: memref<8x2x1024xf32, #tpu.memory_space<vmem>>, %arg2: memref<8x2x1024xf32, #tpu.memory_space<vmem>>, %arg3: memref<128x512xbf16, #tpu.memory_space<vmem>>, %arg4: memref<128x512xbf16, #tpu.memory_space<vmem>>, %arg5: memref<8x2x128xf32, #tpu.memory_space<vmem>>, %arg6: memref<8x2x128xf32, #tpu.memory_space<vmem>>, %arg7: memref<2x128xf32, #tpu.memory_space<vmem>>, %arg8: memref<2x128xf32, #tpu.memory_space<vmem>>, %arg9: memref<2x128xf32, #tpu.memory_space<vmem>>, %arg10: memref<2x128xf32, #tpu.memory_space<vmem>>) attributes {dimension_semantics = [#tpu.dimension_semantics<arbitrary>], iteration_bounds = array<i64: 1>, scalar_prefetch = 0 : i64, scratch_operands = 4 : i64, tpu.core_type = #tpu.core_type<tc>, window_params = [{transform_indices = @transform_0, window_bounds = array<i64: 8, 2, 1024>}, {transform_indices = @transform_1, window_bounds = array<i64: 8, 2, 1024>}, {pipeline_mode = #tpu.pipeline_mode<synchronous>, transform_indices = @transform_2, window_bounds = array<i64: 128, 512>}, {pipeline_mode = #tpu.pipeline_mode<synchronous>, transform_indices = @transform_3, window_bounds = array<i64: 128, 512>}, {transform_indices = @transform_4, window_bounds = array<i64: 8, 2, 128>}, {transform_indices = @transform_5, window_bounds = array<i64: 8, 2, 128>}]} {
    %c0_i32 = arith.constant 0 : i32
    %0 = arith.cmpi eq, %arg0, %c0_i32 : i32
    %1 = arith.extui %0 : i1 to i32
    %c0_i32_0 = arith.constant 0 : i32
    %2 = arith.cmpi ne, %1, %c0_i32_0 : i32
    scf.if %2 {
      %cst_408 = arith.constant 0.000000e+00 : f32
      %723 = vector.broadcast %cst_408 : f32 to vector<2x128xf32>
      %c0_409 = arith.constant 0 : index
      %c0_410 = arith.constant 0 : index
      %724 = vector.load %arg7[%c0_409, %c0_410] : memref<2x128xf32, #tpu.memory_space<vmem>>, vector<2x128xf32>
      tpu.vector_store %arg7[%c0_409, %c0_410], %723 {strides = array<i32>} : memref<2x128xf32, #tpu.memory_space<vmem>>, vector<2x128xf32>,
      %cst_411 = arith.constant 0.000000e+00 : f32
      %725 = vector.broadcast %cst_411 : f32 to vector<2x128xf32>
      %c0_412 = arith.constant 0 : index
      %c0_413 = arith.constant 0 : index
      %726 = vector.load %arg8[%c0_412, %c0_413] : memref<2x128xf32, #tpu.memory_space<vmem>>, vector<2x128xf32>
      tpu.vector_store %arg8[%c0_412, %c0_413], %725 {strides = array<i32>} : memref<2x128xf32, #tpu.memory_space<vmem>>, vector<2x128xf32>,
      %cst_414 = arith.constant 0.000000e+00 : f32
      %727 = vector.broadcast %cst_414 : f32 to vector<2x128xf32>
      %c0_415 = arith.constant 0 : index
      %c0_416 = arith.constant 0 : index
      %728 = vector.load %arg9[%c0_415, %c0_416] : memref<2x128xf32, #tpu.memory_space<vmem>>, vector<2x128xf32>
      tpu.vector_store %arg9[%c0_415, %c0_416], %727 {strides = array<i32>} : memref<2x128xf32, #tpu.memory_space<vmem>>, vector<2x128xf32>,
      %cst_417 = arith.constant 0.000000e+00 : f32
      %729 = vector.broadcast %cst_417 : f32 to vector<2x128xf32>
      %c0_418 = arith.constant 0 : index
      %c0_419 = arith.constant 0 : index
      %730 = vector.load %arg10[%c0_418, %c0_419] : memref<2x128xf32, #tpu.memory_space<vmem>>, vector<2x128xf32>
      tpu.vector_store %arg10[%c0_418, %c0_419], %729 {strides = array<i32>} : memref<2x128xf32, #tpu.memory_space<vmem>>, vector<2x128xf32>,
    } else {
    }
    %c0 = arith.constant 0 : index
    %c0_1 = arith.constant 0 : index
    %c0_2 = arith.constant 0 : index
    %3 = vector.load %arg1[%c0, %c0_1, %c0_2] : memref<8x2x1024xf32, #tpu.memory_space<vmem>>, vector<1x2x1024xf32>
    %4 = vector.shape_cast %3 : vector<1x2x1024xf32> to vector<2x1024xf32>
    %5 = vector.extract_strided_slice %4 {offsets = [0, 0], sizes = [2, 512], strides = [1, 1]} : vector<2x1024xf32> to vector<2x512xf32>
    %c0_3 = arith.constant 0 : index
    %c0_4 = arith.constant 0 : index
    %6 = vector.load %arg7[%c0_3, %c0_4] : memref<2x128xf32, #tpu.memory_space<vmem>>, vector<2x128xf32>
    %7 = arith.truncf %6 : vector<2x128xf32> to vector<2x128xbf16>
    %c0_5 = arith.constant 0 : index
    %c0_6 = arith.constant 0 : index
    %8 = vector.load %arg3[%c0_5, %c0_6] : memref<128x512xbf16, #tpu.memory_space<vmem>>, vector<128x512xbf16>
    %cst = arith.constant dense<0.000000e+00> : vector<2x512xf32>
    %9 = tpu.matmul %7, %8, %cst {dimension_numbers = #tpu.dot_dimension_numbers<[1], [0], [0], [1], [0, 0, 1, 1], [], []>} : vector<2x128xbf16>, vector<128x512xbf16>, vector<2x512xf32> -> vector<2x512xf32>
    %10 = arith.addf %5, %9 : vector<2x512xf32>
    %c0_7 = arith.constant 0 : index
    %c0_8 = arith.constant 0 : index
    %11 = vector.load %arg8[%c0_7, %c0_8] : memref<2x128xf32, #tpu.memory_space<vmem>>, vector<2x128xf32>
    %12 = vector.extract_strided_slice %10 {offsets = [0, 0], sizes = [2, 128], strides = [1, 1]} : vector<2x512xf32> to vector<2x128xf32>
    %cst_9 = arith.constant 5.000000e-01 : f32
    %13 = vector.broadcast %cst_9 : f32 to vector<2x128xf32>
    %14 = arith.mulf %13, %12 : vector<2x128xf32>
    %15 = math.tanh %14 : vector<2x128xf32>
    %cst_10 = arith.constant 5.000000e-01 : f32
    %16 = vector.broadcast %cst_10 : f32 to vector<2x128xf32>
    %17 = arith.mulf %16, %15 : vector<2x128xf32>
    %cst_11 = arith.constant 5.000000e-01 : f32
    %18 = vector.broadcast %cst_11 : f32 to vector<2x128xf32>
    %19 = arith.addf %17, %18 : vector<2x128xf32>
    %20 = vector.extract_strided_slice %10 {offsets = [0, 128], sizes = [2, 128], strides = [1, 1]} : vector<2x512xf32> to vector<2x128xf32>
    %cst_12 = arith.constant 5.000000e-01 : f32
    %21 = vector.broadcast %cst_12 : f32 to vector<2x128xf32>
    %22 = arith.mulf %21, %20 : vector<2x128xf32>
    %23 = math.tanh %22 : vector<2x128xf32>
    %cst_13 = arith.constant 5.000000e-01 : f32
    %24 = vector.broadcast %cst_13 : f32 to vector<2x128xf32>
    %25 = arith.mulf %24, %23 : vector<2x128xf32>
    %cst_14 = arith.constant 5.000000e-01 : f32
    %26 = vector.broadcast %cst_14 : f32 to vector<2x128xf32>
    %27 = arith.addf %25, %26 : vector<2x128xf32>
    %28 = vector.extract_strided_slice %10 {offsets = [0, 256], sizes = [2, 128], strides = [1, 1]} : vector<2x512xf32> to vector<2x128xf32>
    %29 = math.tanh %28 : vector<2x128xf32>
    %30 = vector.extract_strided_slice %10 {offsets = [0, 384], sizes = [2, 128], strides = [1, 1]} : vector<2x512xf32> to vector<2x128xf32>
    %cst_15 = arith.constant 5.000000e-01 : f32
    %31 = vector.broadcast %cst_15 : f32 to vector<2x128xf32>
    %32 = arith.mulf %31, %30 : vector<2x128xf32>
    %33 = math.tanh %32 : vector<2x128xf32>
    %cst_16 = arith.constant 5.000000e-01 : f32
    %34 = vector.broadcast %cst_16 : f32 to vector<2x128xf32>
    %35 = arith.mulf %34, %33 : vector<2x128xf32>
    %cst_17 = arith.constant 5.000000e-01 : f32
    %36 = vector.broadcast %cst_17 : f32 to vector<2x128xf32>
    %37 = arith.addf %35, %36 : vector<2x128xf32>
    %38 = arith.mulf %27, %11 : vector<2x128xf32>
    %39 = arith.mulf %19, %29 : vector<2x128xf32>
    %40 = arith.addf %38, %39 : vector<2x128xf32>
    %41 = math.tanh %40 : vector<2x128xf32>
    %42 = arith.mulf %37, %41 : vector<2x128xf32>
    %c0_18 = arith.constant 0 : index
    %c0_19 = arith.constant 0 : index
    %43 = vector.load %arg7[%c0_18, %c0_19] : memref<2x128xf32, #tpu.memory_space<vmem>>, vector<2x128xf32>
    tpu.vector_store %arg7[%c0_18, %c0_19], %42 {strides = array<i32>} : memref<2x128xf32, #tpu.memory_space<vmem>>, vector<2x128xf32>,
    %c0_20 = arith.constant 0 : index
    %c0_21 = arith.constant 0 : index
    %44 = vector.load %arg8[%c0_20, %c0_21] : memref<2x128xf32, #tpu.memory_space<vmem>>, vector<2x128xf32>
    tpu.vector_store %arg8[%c0_20, %c0_21], %40 {strides = array<i32>} : memref<2x128xf32, #tpu.memory_space<vmem>>, vector<2x128xf32>,
    %c0_22 = arith.constant 0 : index
    %c0_23 = arith.constant 0 : index
    %c0_24 = arith.constant 0 : index
    %45 = vector.load %arg5[%c0_22, %c0_23, %c0_24] : memref<8x2x128xf32, #tpu.memory_space<vmem>>, vector<1x2x128xf32>
    %46 = vector.shape_cast %45 : vector<1x2x128xf32> to vector<2x128xf32>
    %47 = vector.shape_cast %42 : vector<2x128xf32> to vector<1x2x128xf32>
    tpu.vector_store %arg5[%c0_22, %c0_23, %c0_24], %47 {strides = array<i32>} : memref<8x2x128xf32, #tpu.memory_space<vmem>>, vector<1x2x128xf32>,
    %c7 = arith.constant 7 : index
    %c0_25 = arith.constant 0 : index
    %c0_26 = arith.constant 0 : index
    %48 = vector.load %arg2[%c7, %c0_25, %c0_26] : memref<8x2x1024xf32, #tpu.memory_space<vmem>>, vector<1x2x1024xf32>
    %49 = vector.shape_cast %48 : vector<1x2x1024xf32> to vector<2x1024xf32>
    %50 = vector.extract_strided_slice %49 {offsets = [0, 512], sizes = [2, 512], strides = [1, 1]} : vector<2x1024xf32> to vector<2x512xf32>
    %c0_27 = arith.constant 0 : index
    %c0_28 = arith.constant 0 : index
    %51 = vector.load %arg9[%c0_27, %c0_28] : memref<2x128xf32, #tpu.memory_space<vmem>>, vector<2x128xf32>
    %52 = arith.truncf %51 : vector<2x128xf32> to vector<2x128xbf16>
    %c0_29 = arith.constant 0 : index
    %c0_30 = arith.constant 0 : index
    %53 = vector.load %arg4[%c0_29, %c0_30] : memref<128x512xbf16, #tpu.memory_space<vmem>>, vector<128x512xbf16>
    %cst_31 = arith.constant dense<0.000000e+00> : vector<2x512xf32>
    %54 = tpu.matmul %52, %53, %cst_31 {dimension_numbers = #tpu.dot_dimension_numbers<[1], [0], [0], [1], [0, 0, 1, 1], [], []>} : vector<2x128xbf16>, vector<128x512xbf16>, vector<2x512xf32> -> vector<2x512xf32>
    %55 = arith.addf %50, %54 : vector<2x512xf32>
    %c0_32 = arith.constant 0 : index
    %c0_33 = arith.constant 0 : index
    %56 = vector.load %arg10[%c0_32, %c0_33] : memref<2x128xf32, #tpu.memory_space<vmem>>, vector<2x128xf32>
    %57 = vector.extract_strided_slice %55 {offsets = [0, 0], sizes = [2, 128], strides = [1, 1]} : vector<2x512xf32> to vector<2x128xf32>
    %cst_34 = arith.constant 5.000000e-01 : f32
    %58 = vector.broadcast %cst_34 : f32 to vector<2x128xf32>
    %59 = arith.mulf %58, %57 : vector<2x128xf32>
    %60 = math.tanh %59 : vector<2x128xf32>
    %cst_35 = arith.constant 5.000000e-01 : f32
    %61 = vector.broadcast %cst_35 : f32 to vector<2x128xf32>
    %62 = arith.mulf %61, %60 : vector<2x128xf32>
    %cst_36 = arith.constant 5.000000e-01 : f32
    %63 = vector.broadcast %cst_36 : f32 to vector<2x128xf32>
    %64 = arith.addf %62, %63 : vector<2x128xf32>
    %65 = vector.extract_strided_slice %55 {offsets = [0, 128], sizes = [2, 128], strides = [1, 1]} : vector<2x512xf32> to vector<2x128xf32>
    %cst_37 = arith.constant 5.000000e-01 : f32
    %66 = vector.broadcast %cst_37 : f32 to vector<2x128xf32>
    %67 = arith.mulf %66, %65 : vector<2x128xf32>
    %68 = math.tanh %67 : vector<2x128xf32>
    %cst_38 = arith.constant 5.000000e-01 : f32
    %69 = vector.broadcast %cst_38 : f32 to vector<2x128xf32>
    %70 = arith.mulf %69, %68 : vector<2x128xf32>
    %cst_39 = arith.constant 5.000000e-01 : f32
    %71 = vector.broadcast %cst_39 : f32 to vector<2x128xf32>
    %72 = arith.addf %70, %71 : vector<2x128xf32>
    %73 = vector.extract_strided_slice %55 {offsets = [0, 256], sizes = [2, 128], strides = [1, 1]} : vector<2x512xf32> to vector<2x128xf32>
    %74 = math.tanh %73 : vector<2x128xf32>
    %75 = vector.extract_strided_slice %55 {offsets = [0, 384], sizes = [2, 128], strides = [1, 1]} : vector<2x512xf32> to vector<2x128xf32>
    %cst_40 = arith.constant 5.000000e-01 : f32
    %76 = vector.broadcast %cst_40 : f32 to vector<2x128xf32>
    %77 = arith.mulf %76, %75 : vector<2x128xf32>
    %78 = math.tanh %77 : vector<2x128xf32>
    %cst_41 = arith.constant 5.000000e-01 : f32
    %79 = vector.broadcast %cst_41 : f32 to vector<2x128xf32>
    %80 = arith.mulf %79, %78 : vector<2x128xf32>
    %cst_42 = arith.constant 5.000000e-01 : f32
    %81 = vector.broadcast %cst_42 : f32 to vector<2x128xf32>
    %82 = arith.addf %80, %81 : vector<2x128xf32>
    %83 = arith.mulf %72, %56 : vector<2x128xf32>
    %84 = arith.mulf %64, %74 : vector<2x128xf32>
    %85 = arith.addf %83, %84 : vector<2x128xf32>
    %86 = math.tanh %85 : vector<2x128xf32>
    %87 = arith.mulf %82, %86 : vector<2x128xf32>
    %c0_43 = arith.constant 0 : index
    %c0_44 = arith.constant 0 : index
    %88 = vector.load %arg9[%c0_43, %c0_44] : memref<2x128xf32, #tpu.memory_space<vmem>>, vector<2x128xf32>
    tpu.vector_store %arg9[%c0_43, %c0_44], %87 {strides = array<i32>} : memref<2x128xf32, #tpu.memory_space<vmem>>, vector<2x128xf32>,
    %c0_45 = arith.constant 0 : index
    %c0_46 = arith.constant 0 : index
    %89 = vector.load %arg10[%c0_45, %c0_46] : memref<2x128xf32, #tpu.memory_space<vmem>>, vector<2x128xf32>
    tpu.vector_store %arg10[%c0_45, %c0_46], %85 {strides = array<i32>} : memref<2x128xf32, #tpu.memory_space<vmem>>, vector<2x128xf32>,
    %c7_47 = arith.constant 7 : index
    %c0_48 = arith.constant 0 : index
    %c0_49 = arith.constant 0 : index
    %90 = vector.load %arg6[%c7_47, %c0_48, %c0_49] : memref<8x2x128xf32, #tpu.memory_space<vmem>>, vector<1x2x128xf32>
    %91 = vector.shape_cast %90 : vector<1x2x128xf32> to vector<2x128xf32>
    %92 = vector.shape_cast %87 : vector<2x128xf32> to vector<1x2x128xf32>
    tpu.vector_store %arg6[%c7_47, %c0_48, %c0_49], %92 {strides = array<i32>} : memref<8x2x128xf32, #tpu.memory_space<vmem>>, vector<1x2x128xf32>,
    %c1 = arith.constant 1 : index
    %c0_50 = arith.constant 0 : index
    %c0_51 = arith.constant 0 : index
    %93 = vector.load %arg1[%c1, %c0_50, %c0_51] : memref<8x2x1024xf32, #tpu.memory_space<vmem>>, vector<1x2x1024xf32>
    %94 = vector.shape_cast %93 : vector<1x2x1024xf32> to vector<2x1024xf32>
    %95 = vector.extract_strided_slice %94 {offsets = [0, 0], sizes = [2, 512], strides = [1, 1]} : vector<2x1024xf32> to vector<2x512xf32>
    %c0_52 = arith.constant 0 : index
    %c0_53 = arith.constant 0 : index
    %96 = vector.load %arg7[%c0_52, %c0_53] : memref<2x128xf32, #tpu.memory_space<vmem>>, vector<2x128xf32>
    %97 = arith.truncf %96 : vector<2x128xf32> to vector<2x128xbf16>
    %c0_54 = arith.constant 0 : index
    %c0_55 = arith.constant 0 : index
    %98 = vector.load %arg3[%c0_54, %c0_55] : memref<128x512xbf16, #tpu.memory_space<vmem>>, vector<128x512xbf16>
    %cst_56 = arith.constant dense<0.000000e+00> : vector<2x512xf32>
    %99 = tpu.matmul %97, %98, %cst_56 {dimension_numbers = #tpu.dot_dimension_numbers<[1], [0], [0], [1], [0, 0, 1, 1], [], []>} : vector<2x128xbf16>, vector<128x512xbf16>, vector<2x512xf32> -> vector<2x512xf32>
    %100 = arith.addf %95, %99 : vector<2x512xf32>
    %c0_57 = arith.constant 0 : index
    %c0_58 = arith.constant 0 : index
    %101 = vector.load %arg8[%c0_57, %c0_58] : memref<2x128xf32, #tpu.memory_space<vmem>>, vector<2x128xf32>
    %102 = vector.extract_strided_slice %100 {offsets = [0, 0], sizes = [2, 128], strides = [1, 1]} : vector<2x512xf32> to vector<2x128xf32>
    %cst_59 = arith.constant 5.000000e-01 : f32
    %103 = vector.broadcast %cst_59 : f32 to vector<2x128xf32>
    %104 = arith.mulf %103, %102 : vector<2x128xf32>
    %105 = math.tanh %104 : vector<2x128xf32>
    %cst_60 = arith.constant 5.000000e-01 : f32
    %106 = vector.broadcast %cst_60 : f32 to vector<2x128xf32>
    %107 = arith.mulf %106, %105 : vector<2x128xf32>
    %cst_61 = arith.constant 5.000000e-01 : f32
    %108 = vector.broadcast %cst_61 : f32 to vector<2x128xf32>
    %109 = arith.addf %107, %108 : vector<2x128xf32>
    %110 = vector.extract_strided_slice %100 {offsets = [0, 128], sizes = [2, 128], strides = [1, 1]} : vector<2x512xf32> to vector<2x128xf32>
    %cst_62 = arith.constant 5.000000e-01 : f32
    %111 = vector.broadcast %cst_62 : f32 to vector<2x128xf32>
    %112 = arith.mulf %111, %110 : vector<2x128xf32>
    %113 = math.tanh %112 : vector<2x128xf32>
    %cst_63 = arith.constant 5.000000e-01 : f32
    %114 = vector.broadcast %cst_63 : f32 to vector<2x128xf32>
    %115 = arith.mulf %114, %113 : vector<2x128xf32>
    %cst_64 = arith.constant 5.000000e-01 : f32
    %116 = vector.broadcast %cst_64 : f32 to vector<2x128xf32>
    %117 = arith.addf %115, %116 : vector<2x128xf32>
    %118 = vector.extract_strided_slice %100 {offsets = [0, 256], sizes = [2, 128], strides = [1, 1]} : vector<2x512xf32> to vector<2x128xf32>
    %119 = math.tanh %118 : vector<2x128xf32>
    %120 = vector.extract_strided_slice %100 {offsets = [0, 384], sizes = [2, 128], strides = [1, 1]} : vector<2x512xf32> to vector<2x128xf32>
    %cst_65 = arith.constant 5.000000e-01 : f32
    %121 = vector.broadcast %cst_65 : f32 to vector<2x128xf32>
    %122 = arith.mulf %121, %120 : vector<2x128xf32>
    %123 = math.tanh %122 : vector<2x128xf32>
    %cst_66 = arith.constant 5.000000e-01 : f32
    %124 = vector.broadcast %cst_66 : f32 to vector<2x128xf32>
    %125 = arith.mulf %124, %123 : vector<2x128xf32>
    %cst_67 = arith.constant 5.000000e-01 : f32
    %126 = vector.broadcast %cst_67 : f32 to vector<2x128xf32>
    %127 = arith.addf %125, %126 : vector<2x128xf32>
    %128 = arith.mulf %117, %101 : vector<2x128xf32>
    %129 = arith.mulf %109, %119 : vector<2x128xf32>
    %130 = arith.addf %128, %129 : vector<2x128xf32>
    %131 = math.tanh %130 : vector<2x128xf32>
    %132 = arith.mulf %127, %131 : vector<2x128xf32>
    %c0_68 = arith.constant 0 : index
    %c0_69 = arith.constant 0 : index
    %133 = vector.load %arg7[%c0_68, %c0_69] : memref<2x128xf32, #tpu.memory_space<vmem>>, vector<2x128xf32>
    tpu.vector_store %arg7[%c0_68, %c0_69], %132 {strides = array<i32>} : memref<2x128xf32, #tpu.memory_space<vmem>>, vector<2x128xf32>,
    %c0_70 = arith.constant 0 : index
    %c0_71 = arith.constant 0 : index
    %134 = vector.load %arg8[%c0_70, %c0_71] : memref<2x128xf32, #tpu.memory_space<vmem>>, vector<2x128xf32>
    tpu.vector_store %arg8[%c0_70, %c0_71], %130 {strides = array<i32>} : memref<2x128xf32, #tpu.memory_space<vmem>>, vector<2x128xf32>,
    %c1_72 = arith.constant 1 : index
    %c0_73 = arith.constant 0 : index
    %c0_74 = arith.constant 0 : index
    %135 = vector.load %arg5[%c1_72, %c0_73, %c0_74] : memref<8x2x128xf32, #tpu.memory_space<vmem>>, vector<1x2x128xf32>
    %136 = vector.shape_cast %135 : vector<1x2x128xf32> to vector<2x128xf32>
    %137 = vector.shape_cast %132 : vector<2x128xf32> to vector<1x2x128xf32>
    tpu.vector_store %arg5[%c1_72, %c0_73, %c0_74], %137 {strides = array<i32>} : memref<8x2x128xf32, #tpu.memory_space<vmem>>, vector<1x2x128xf32>,
    %c6 = arith.constant 6 : index
    %c0_75 = arith.constant 0 : index
    %c0_76 = arith.constant 0 : index
    %138 = vector.load %arg2[%c6, %c0_75, %c0_76] : memref<8x2x1024xf32, #tpu.memory_space<vmem>>, vector<1x2x1024xf32>
    %139 = vector.shape_cast %138 : vector<1x2x1024xf32> to vector<2x1024xf32>
    %140 = vector.extract_strided_slice %139 {offsets = [0, 512], sizes = [2, 512], strides = [1, 1]} : vector<2x1024xf32> to vector<2x512xf32>
    %c0_77 = arith.constant 0 : index
    %c0_78 = arith.constant 0 : index
    %141 = vector.load %arg9[%c0_77, %c0_78] : memref<2x128xf32, #tpu.memory_space<vmem>>, vector<2x128xf32>
    %142 = arith.truncf %141 : vector<2x128xf32> to vector<2x128xbf16>
    %c0_79 = arith.constant 0 : index
    %c0_80 = arith.constant 0 : index
    %143 = vector.load %arg4[%c0_79, %c0_80] : memref<128x512xbf16, #tpu.memory_space<vmem>>, vector<128x512xbf16>
    %cst_81 = arith.constant dense<0.000000e+00> : vector<2x512xf32>
    %144 = tpu.matmul %142, %143, %cst_81 {dimension_numbers = #tpu.dot_dimension_numbers<[1], [0], [0], [1], [0, 0, 1, 1], [], []>} : vector<2x128xbf16>, vector<128x512xbf16>, vector<2x512xf32> -> vector<2x512xf32>
    %145 = arith.addf %140, %144 : vector<2x512xf32>
    %c0_82 = arith.constant 0 : index
    %c0_83 = arith.constant 0 : index
    %146 = vector.load %arg10[%c0_82, %c0_83] : memref<2x128xf32, #tpu.memory_space<vmem>>, vector<2x128xf32>
    %147 = vector.extract_strided_slice %145 {offsets = [0, 0], sizes = [2, 128], strides = [1, 1]} : vector<2x512xf32> to vector<2x128xf32>
    %cst_84 = arith.constant 5.000000e-01 : f32
    %148 = vector.broadcast %cst_84 : f32 to vector<2x128xf32>
    %149 = arith.mulf %148, %147 : vector<2x128xf32>
    %150 = math.tanh %149 : vector<2x128xf32>
    %cst_85 = arith.constant 5.000000e-01 : f32
    %151 = vector.broadcast %cst_85 : f32 to vector<2x128xf32>
    %152 = arith.mulf %151, %150 : vector<2x128xf32>
    %cst_86 = arith.constant 5.000000e-01 : f32
    %153 = vector.broadcast %cst_86 : f32 to vector<2x128xf32>
    %154 = arith.addf %152, %153 : vector<2x128xf32>
    %155 = vector.extract_strided_slice %145 {offsets = [0, 128], sizes = [2, 128], strides = [1, 1]} : vector<2x512xf32> to vector<2x128xf32>
    %cst_87 = arith.constant 5.000000e-01 : f32
    %156 = vector.broadcast %cst_87 : f32 to vector<2x128xf32>
    %157 = arith.mulf %156, %155 : vector<2x128xf32>
    %158 = math.tanh %157 : vector<2x128xf32>
    %cst_88 = arith.constant 5.000000e-01 : f32
    %159 = vector.broadcast %cst_88 : f32 to vector<2x128xf32>
    %160 = arith.mulf %159, %158 : vector<2x128xf32>
    %cst_89 = arith.constant 5.000000e-01 : f32
    %161 = vector.broadcast %cst_89 : f32 to vector<2x128xf32>
    %162 = arith.addf %160, %161 : vector<2x128xf32>
    %163 = vector.extract_strided_slice %145 {offsets = [0, 256], sizes = [2, 128], strides = [1, 1]} : vector<2x512xf32> to vector<2x128xf32>
    %164 = math.tanh %163 : vector<2x128xf32>
    %165 = vector.extract_strided_slice %145 {offsets = [0, 384], sizes = [2, 128], strides = [1, 1]} : vector<2x512xf32> to vector<2x128xf32>
    %cst_90 = arith.constant 5.000000e-01 : f32
    %166 = vector.broadcast %cst_90 : f32 to vector<2x128xf32>
    %167 = arith.mulf %166, %165 : vector<2x128xf32>
    %168 = math.tanh %167 : vector<2x128xf32>
    %cst_91 = arith.constant 5.000000e-01 : f32
    %169 = vector.broadcast %cst_91 : f32 to vector<2x128xf32>
    %170 = arith.mulf %169, %168 : vector<2x128xf32>
    %cst_92 = arith.constant 5.000000e-01 : f32
    %171 = vector.broadcast %cst_92 : f32 to vector<2x128xf32>
    %172 = arith.addf %170, %171 : vector<2x128xf32>
    %173 = arith.mulf %162, %146 : vector<2x128xf32>
    %174 = arith.mulf %154, %164 : vector<2x128xf32>
    %175 = arith.addf %173, %174 : vector<2x128xf32>
    %176 = math.tanh %175 : vector<2x128xf32>
    %177 = arith.mulf %172, %176 : vector<2x128xf32>
    %c0_93 = arith.constant 0 : index
    %c0_94 = arith.constant 0 : index
    %178 = vector.load %arg9[%c0_93, %c0_94] : memref<2x128xf32, #tpu.memory_space<vmem>>, vector<2x128xf32>
    tpu.vector_store %arg9[%c0_93, %c0_94], %177 {strides = array<i32>} : memref<2x128xf32, #tpu.memory_space<vmem>>, vector<2x128xf32>,
    %c0_95 = arith.constant 0 : index
    %c0_96 = arith.constant 0 : index
    %179 = vector.load %arg10[%c0_95, %c0_96] : memref<2x128xf32, #tpu.memory_space<vmem>>, vector<2x128xf32>
    tpu.vector_store %arg10[%c0_95, %c0_96], %175 {strides = array<i32>} : memref<2x128xf32, #tpu.memory_space<vmem>>, vector<2x128xf32>,
    %c6_97 = arith.constant 6 : index
    %c0_98 = arith.constant 0 : index
    %c0_99 = arith.constant 0 : index
    %180 = vector.load %arg6[%c6_97, %c0_98, %c0_99] : memref<8x2x128xf32, #tpu.memory_space<vmem>>, vector<1x2x128xf32>
    %181 = vector.shape_cast %180 : vector<1x2x128xf32> to vector<2x128xf32>
    %182 = vector.shape_cast %177 : vector<2x128xf32> to vector<1x2x128xf32>
    tpu.vector_store %arg6[%c6_97, %c0_98, %c0_99], %182 {strides = array<i32>} : memref<8x2x128xf32, #tpu.memory_space<vmem>>, vector<1x2x128xf32>,
    %c2 = arith.constant 2 : index
    %c0_100 = arith.constant 0 : index
    %c0_101 = arith.constant 0 : index
    %183 = vector.load %arg1[%c2, %c0_100, %c0_101] : memref<8x2x1024xf32, #tpu.memory_space<vmem>>, vector<1x2x1024xf32>
    %184 = vector.shape_cast %183 : vector<1x2x1024xf32> to vector<2x1024xf32>
    %185 = vector.extract_strided_slice %184 {offsets = [0, 0], sizes = [2, 512], strides = [1, 1]} : vector<2x1024xf32> to vector<2x512xf32>
    %c0_102 = arith.constant 0 : index
    %c0_103 = arith.constant 0 : index
    %186 = vector.load %arg7[%c0_102, %c0_103] : memref<2x128xf32, #tpu.memory_space<vmem>>, vector<2x128xf32>
    %187 = arith.truncf %186 : vector<2x128xf32> to vector<2x128xbf16>
    %c0_104 = arith.constant 0 : index
    %c0_105 = arith.constant 0 : index
    %188 = vector.load %arg3[%c0_104, %c0_105] : memref<128x512xbf16, #tpu.memory_space<vmem>>, vector<128x512xbf16>
    %cst_106 = arith.constant dense<0.000000e+00> : vector<2x512xf32>
    %189 = tpu.matmul %187, %188, %cst_106 {dimension_numbers = #tpu.dot_dimension_numbers<[1], [0], [0], [1], [0, 0, 1, 1], [], []>} : vector<2x128xbf16>, vector<128x512xbf16>, vector<2x512xf32> -> vector<2x512xf32>
    %190 = arith.addf %185, %189 : vector<2x512xf32>
    %c0_107 = arith.constant 0 : index
    %c0_108 = arith.constant 0 : index
    %191 = vector.load %arg8[%c0_107, %c0_108] : memref<2x128xf32, #tpu.memory_space<vmem>>, vector<2x128xf32>
    %192 = vector.extract_strided_slice %190 {offsets = [0, 0], sizes = [2, 128], strides = [1, 1]} : vector<2x512xf32> to vector<2x128xf32>
    %cst_109 = arith.constant 5.000000e-01 : f32
    %193 = vector.broadcast %cst_109 : f32 to vector<2x128xf32>
    %194 = arith.mulf %193, %192 : vector<2x128xf32>
    %195 = math.tanh %194 : vector<2x128xf32>
    %cst_110 = arith.constant 5.000000e-01 : f32
    %196 = vector.broadcast %cst_110 : f32 to vector<2x128xf32>
    %197 = arith.mulf %196, %195 : vector<2x128xf32>
    %cst_111 = arith.constant 5.000000e-01 : f32
    %198 = vector.broadcast %cst_111 : f32 to vector<2x128xf32>
    %199 = arith.addf %197, %198 : vector<2x128xf32>
    %200 = vector.extract_strided_slice %190 {offsets = [0, 128], sizes = [2, 128], strides = [1, 1]} : vector<2x512xf32> to vector<2x128xf32>
    %cst_112 = arith.constant 5.000000e-01 : f32
    %201 = vector.broadcast %cst_112 : f32 to vector<2x128xf32>
    %202 = arith.mulf %201, %200 : vector<2x128xf32>
    %203 = math.tanh %202 : vector<2x128xf32>
    %cst_113 = arith.constant 5.000000e-01 : f32
    %204 = vector.broadcast %cst_113 : f32 to vector<2x128xf32>
    %205 = arith.mulf %204, %203 : vector<2x128xf32>
    %cst_114 = arith.constant 5.000000e-01 : f32
    %206 = vector.broadcast %cst_114 : f32 to vector<2x128xf32>
    %207 = arith.addf %205, %206 : vector<2x128xf32>
    %208 = vector.extract_strided_slice %190 {offsets = [0, 256], sizes = [2, 128], strides = [1, 1]} : vector<2x512xf32> to vector<2x128xf32>
    %209 = math.tanh %208 : vector<2x128xf32>
    %210 = vector.extract_strided_slice %190 {offsets = [0, 384], sizes = [2, 128], strides = [1, 1]} : vector<2x512xf32> to vector<2x128xf32>
    %cst_115 = arith.constant 5.000000e-01 : f32
    %211 = vector.broadcast %cst_115 : f32 to vector<2x128xf32>
    %212 = arith.mulf %211, %210 : vector<2x128xf32>
    %213 = math.tanh %212 : vector<2x128xf32>
    %cst_116 = arith.constant 5.000000e-01 : f32
    %214 = vector.broadcast %cst_116 : f32 to vector<2x128xf32>
    %215 = arith.mulf %214, %213 : vector<2x128xf32>
    %cst_117 = arith.constant 5.000000e-01 : f32
    %216 = vector.broadcast %cst_117 : f32 to vector<2x128xf32>
    %217 = arith.addf %215, %216 : vector<2x128xf32>
    %218 = arith.mulf %207, %191 : vector<2x128xf32>
    %219 = arith.mulf %199, %209 : vector<2x128xf32>
    %220 = arith.addf %218, %219 : vector<2x128xf32>
    %221 = math.tanh %220 : vector<2x128xf32>
    %222 = arith.mulf %217, %221 : vector<2x128xf32>
    %c0_118 = arith.constant 0 : index
    %c0_119 = arith.constant 0 : index
    %223 = vector.load %arg7[%c0_118, %c0_119] : memref<2x128xf32, #tpu.memory_space<vmem>>, vector<2x128xf32>
    tpu.vector_store %arg7[%c0_118, %c0_119], %222 {strides = array<i32>} : memref<2x128xf32, #tpu.memory_space<vmem>>, vector<2x128xf32>,
    %c0_120 = arith.constant 0 : index
    %c0_121 = arith.constant 0 : index
    %224 = vector.load %arg8[%c0_120, %c0_121] : memref<2x128xf32, #tpu.memory_space<vmem>>, vector<2x128xf32>
    tpu.vector_store %arg8[%c0_120, %c0_121], %220 {strides = array<i32>} : memref<2x128xf32, #tpu.memory_space<vmem>>, vector<2x128xf32>,
    %c2_122 = arith.constant 2 : index
    %c0_123 = arith.constant 0 : index
    %c0_124 = arith.constant 0 : index
    %225 = vector.load %arg5[%c2_122, %c0_123, %c0_124] : memref<8x2x128xf32, #tpu.memory_space<vmem>>, vector<1x2x128xf32>
    %226 = vector.shape_cast %225 : vector<1x2x128xf32> to vector<2x128xf32>
    %227 = vector.shape_cast %222 : vector<2x128xf32> to vector<1x2x128xf32>
    tpu.vector_store %arg5[%c2_122, %c0_123, %c0_124], %227 {strides = array<i32>} : memref<8x2x128xf32, #tpu.memory_space<vmem>>, vector<1x2x128xf32>,
    %c5 = arith.constant 5 : index
    %c0_125 = arith.constant 0 : index
    %c0_126 = arith.constant 0 : index
    %228 = vector.load %arg2[%c5, %c0_125, %c0_126] : memref<8x2x1024xf32, #tpu.memory_space<vmem>>, vector<1x2x1024xf32>
    %229 = vector.shape_cast %228 : vector<1x2x1024xf32> to vector<2x1024xf32>
    %230 = vector.extract_strided_slice %229 {offsets = [0, 512], sizes = [2, 512], strides = [1, 1]} : vector<2x1024xf32> to vector<2x512xf32>
    %c0_127 = arith.constant 0 : index
    %c0_128 = arith.constant 0 : index
    %231 = vector.load %arg9[%c0_127, %c0_128] : memref<2x128xf32, #tpu.memory_space<vmem>>, vector<2x128xf32>
    %232 = arith.truncf %231 : vector<2x128xf32> to vector<2x128xbf16>
    %c0_129 = arith.constant 0 : index
    %c0_130 = arith.constant 0 : index
    %233 = vector.load %arg4[%c0_129, %c0_130] : memref<128x512xbf16, #tpu.memory_space<vmem>>, vector<128x512xbf16>
    %cst_131 = arith.constant dense<0.000000e+00> : vector<2x512xf32>
    %234 = tpu.matmul %232, %233, %cst_131 {dimension_numbers = #tpu.dot_dimension_numbers<[1], [0], [0], [1], [0, 0, 1, 1], [], []>} : vector<2x128xbf16>, vector<128x512xbf16>, vector<2x512xf32> -> vector<2x512xf32>
    %235 = arith.addf %230, %234 : vector<2x512xf32>
    %c0_132 = arith.constant 0 : index
    %c0_133 = arith.constant 0 : index
    %236 = vector.load %arg10[%c0_132, %c0_133] : memref<2x128xf32, #tpu.memory_space<vmem>>, vector<2x128xf32>
    %237 = vector.extract_strided_slice %235 {offsets = [0, 0], sizes = [2, 128], strides = [1, 1]} : vector<2x512xf32> to vector<2x128xf32>
    %cst_134 = arith.constant 5.000000e-01 : f32
    %238 = vector.broadcast %cst_134 : f32 to vector<2x128xf32>
    %239 = arith.mulf %238, %237 : vector<2x128xf32>
    %240 = math.tanh %239 : vector<2x128xf32>
    %cst_135 = arith.constant 5.000000e-01 : f32
    %241 = vector.broadcast %cst_135 : f32 to vector<2x128xf32>
    %242 = arith.mulf %241, %240 : vector<2x128xf32>
    %cst_136 = arith.constant 5.000000e-01 : f32
    %243 = vector.broadcast %cst_136 : f32 to vector<2x128xf32>
    %244 = arith.addf %242, %243 : vector<2x128xf32>
    %245 = vector.extract_strided_slice %235 {offsets = [0, 128], sizes = [2, 128], strides = [1, 1]} : vector<2x512xf32> to vector<2x128xf32>
    %cst_137 = arith.constant 5.000000e-01 : f32
    %246 = vector.broadcast %cst_137 : f32 to vector<2x128xf32>
    %247 = arith.mulf %246, %245 : vector<2x128xf32>
    %248 = math.tanh %247 : vector<2x128xf32>
    %cst_138 = arith.constant 5.000000e-01 : f32
    %249 = vector.broadcast %cst_138 : f32 to vector<2x128xf32>
    %250 = arith.mulf %249, %248 : vector<2x128xf32>
    %cst_139 = arith.constant 5.000000e-01 : f32
    %251 = vector.broadcast %cst_139 : f32 to vector<2x128xf32>
    %252 = arith.addf %250, %251 : vector<2x128xf32>
    %253 = vector.extract_strided_slice %235 {offsets = [0, 256], sizes = [2, 128], strides = [1, 1]} : vector<2x512xf32> to vector<2x128xf32>
    %254 = math.tanh %253 : vector<2x128xf32>
    %255 = vector.extract_strided_slice %235 {offsets = [0, 384], sizes = [2, 128], strides = [1, 1]} : vector<2x512xf32> to vector<2x128xf32>
    %cst_140 = arith.constant 5.000000e-01 : f32
    %256 = vector.broadcast %cst_140 : f32 to vector<2x128xf32>
    %257 = arith.mulf %256, %255 : vector<2x128xf32>
    %258 = math.tanh %257 : vector<2x128xf32>
    %cst_141 = arith.constant 5.000000e-01 : f32
    %259 = vector.broadcast %cst_141 : f32 to vector<2x128xf32>
    %260 = arith.mulf %259, %258 : vector<2x128xf32>
    %cst_142 = arith.constant 5.000000e-01 : f32
    %261 = vector.broadcast %cst_142 : f32 to vector<2x128xf32>
    %262 = arith.addf %260, %261 : vector<2x128xf32>
    %263 = arith.mulf %252, %236 : vector<2x128xf32>
    %264 = arith.mulf %244, %254 : vector<2x128xf32>
    %265 = arith.addf %263, %264 : vector<2x128xf32>
    %266 = math.tanh %265 : vector<2x128xf32>
    %267 = arith.mulf %262, %266 : vector<2x128xf32>
    %c0_143 = arith.constant 0 : index
    %c0_144 = arith.constant 0 : index
    %268 = vector.load %arg9[%c0_143, %c0_144] : memref<2x128xf32, #tpu.memory_space<vmem>>, vector<2x128xf32>
    tpu.vector_store %arg9[%c0_143, %c0_144], %267 {strides = array<i32>} : memref<2x128xf32, #tpu.memory_space<vmem>>, vector<2x128xf32>,
    %c0_145 = arith.constant 0 : index
    %c0_146 = arith.constant 0 : index
    %269 = vector.load %arg10[%c0_145, %c0_146] : memref<2x128xf32, #tpu.memory_space<vmem>>, vector<2x128xf32>
    tpu.vector_store %arg10[%c0_145, %c0_146], %265 {strides = array<i32>} : memref<2x128xf32, #tpu.memory_space<vmem>>, vector<2x128xf32>,
    %c5_147 = arith.constant 5 : index
    %c0_148 = arith.constant 0 : index
    %c0_149 = arith.constant 0 : index
    %270 = vector.load %arg6[%c5_147, %c0_148, %c0_149] : memref<8x2x128xf32, #tpu.memory_space<vmem>>, vector<1x2x128xf32>
    %271 = vector.shape_cast %270 : vector<1x2x128xf32> to vector<2x128xf32>
    %272 = vector.shape_cast %267 : vector<2x128xf32> to vector<1x2x128xf32>
    tpu.vector_store %arg6[%c5_147, %c0_148, %c0_149], %272 {strides = array<i32>} : memref<8x2x128xf32, #tpu.memory_space<vmem>>, vector<1x2x128xf32>,
    %c3 = arith.constant 3 : index
    %c0_150 = arith.constant 0 : index
    %c0_151 = arith.constant 0 : index
    %273 = vector.load %arg1[%c3, %c0_150, %c0_151] : memref<8x2x1024xf32, #tpu.memory_space<vmem>>, vector<1x2x1024xf32>
    %274 = vector.shape_cast %273 : vector<1x2x1024xf32> to vector<2x1024xf32>
    %275 = vector.extract_strided_slice %274 {offsets = [0, 0], sizes = [2, 512], strides = [1, 1]} : vector<2x1024xf32> to vector<2x512xf32>
    %c0_152 = arith.constant 0 : index
    %c0_153 = arith.constant 0 : index
    %276 = vector.load %arg7[%c0_152, %c0_153] : memref<2x128xf32, #tpu.memory_space<vmem>>, vector<2x128xf32>
    %277 = arith.truncf %276 : vector<2x128xf32> to vector<2x128xbf16>
    %c0_154 = arith.constant 0 : index
    %c0_155 = arith.constant 0 : index
    %278 = vector.load %arg3[%c0_154, %c0_155] : memref<128x512xbf16, #tpu.memory_space<vmem>>, vector<128x512xbf16>
    %cst_156 = arith.constant dense<0.000000e+00> : vector<2x512xf32>
    %279 = tpu.matmul %277, %278, %cst_156 {dimension_numbers = #tpu.dot_dimension_numbers<[1], [0], [0], [1], [0, 0, 1, 1], [], []>} : vector<2x128xbf16>, vector<128x512xbf16>, vector<2x512xf32> -> vector<2x512xf32>
    %280 = arith.addf %275, %279 : vector<2x512xf32>
    %c0_157 = arith.constant 0 : index
    %c0_158 = arith.constant 0 : index
    %281 = vector.load %arg8[%c0_157, %c0_158] : memref<2x128xf32, #tpu.memory_space<vmem>>, vector<2x128xf32>
    %282 = vector.extract_strided_slice %280 {offsets = [0, 0], sizes = [2, 128], strides = [1, 1]} : vector<2x512xf32> to vector<2x128xf32>
    %cst_159 = arith.constant 5.000000e-01 : f32
    %283 = vector.broadcast %cst_159 : f32 to vector<2x128xf32>
    %284 = arith.mulf %283, %282 : vector<2x128xf32>
    %285 = math.tanh %284 : vector<2x128xf32>
    %cst_160 = arith.constant 5.000000e-01 : f32
    %286 = vector.broadcast %cst_160 : f32 to vector<2x128xf32>
    %287 = arith.mulf %286, %285 : vector<2x128xf32>
    %cst_161 = arith.constant 5.000000e-01 : f32
    %288 = vector.broadcast %cst_161 : f32 to vector<2x128xf32>
    %289 = arith.addf %287, %288 : vector<2x128xf32>
    %290 = vector.extract_strided_slice %280 {offsets = [0, 128], sizes = [2, 128], strides = [1, 1]} : vector<2x512xf32> to vector<2x128xf32>
    %cst_162 = arith.constant 5.000000e-01 : f32
    %291 = vector.broadcast %cst_162 : f32 to vector<2x128xf32>
    %292 = arith.mulf %291, %290 : vector<2x128xf32>
    %293 = math.tanh %292 : vector<2x128xf32>
    %cst_163 = arith.constant 5.000000e-01 : f32
    %294 = vector.broadcast %cst_163 : f32 to vector<2x128xf32>
    %295 = arith.mulf %294, %293 : vector<2x128xf32>
    %cst_164 = arith.constant 5.000000e-01 : f32
    %296 = vector.broadcast %cst_164 : f32 to vector<2x128xf32>
    %297 = arith.addf %295, %296 : vector<2x128xf32>
    %298 = vector.extract_strided_slice %280 {offsets = [0, 256], sizes = [2, 128], strides = [1, 1]} : vector<2x512xf32> to vector<2x128xf32>
    %299 = math.tanh %298 : vector<2x128xf32>
    %300 = vector.extract_strided_slice %280 {offsets = [0, 384], sizes = [2, 128], strides = [1, 1]} : vector<2x512xf32> to vector<2x128xf32>
    %cst_165 = arith.constant 5.000000e-01 : f32
    %301 = vector.broadcast %cst_165 : f32 to vector<2x128xf32>
    %302 = arith.mulf %301, %300 : vector<2x128xf32>
    %303 = math.tanh %302 : vector<2x128xf32>
    %cst_166 = arith.constant 5.000000e-01 : f32
    %304 = vector.broadcast %cst_166 : f32 to vector<2x128xf32>
    %305 = arith.mulf %304, %303 : vector<2x128xf32>
    %cst_167 = arith.constant 5.000000e-01 : f32
    %306 = vector.broadcast %cst_167 : f32 to vector<2x128xf32>
    %307 = arith.addf %305, %306 : vector<2x128xf32>
    %308 = arith.mulf %297, %281 : vector<2x128xf32>
    %309 = arith.mulf %289, %299 : vector<2x128xf32>
    %310 = arith.addf %308, %309 : vector<2x128xf32>
    %311 = math.tanh %310 : vector<2x128xf32>
    %312 = arith.mulf %307, %311 : vector<2x128xf32>
    %c0_168 = arith.constant 0 : index
    %c0_169 = arith.constant 0 : index
    %313 = vector.load %arg7[%c0_168, %c0_169] : memref<2x128xf32, #tpu.memory_space<vmem>>, vector<2x128xf32>
    tpu.vector_store %arg7[%c0_168, %c0_169], %312 {strides = array<i32>} : memref<2x128xf32, #tpu.memory_space<vmem>>, vector<2x128xf32>,
    %c0_170 = arith.constant 0 : index
    %c0_171 = arith.constant 0 : index
    %314 = vector.load %arg8[%c0_170, %c0_171] : memref<2x128xf32, #tpu.memory_space<vmem>>, vector<2x128xf32>
    tpu.vector_store %arg8[%c0_170, %c0_171], %310 {strides = array<i32>} : memref<2x128xf32, #tpu.memory_space<vmem>>, vector<2x128xf32>,
    %c3_172 = arith.constant 3 : index
    %c0_173 = arith.constant 0 : index
    %c0_174 = arith.constant 0 : index
    %315 = vector.load %arg5[%c3_172, %c0_173, %c0_174] : memref<8x2x128xf32, #tpu.memory_space<vmem>>, vector<1x2x128xf32>
    %316 = vector.shape_cast %315 : vector<1x2x128xf32> to vector<2x128xf32>
    %317 = vector.shape_cast %312 : vector<2x128xf32> to vector<1x2x128xf32>
    tpu.vector_store %arg5[%c3_172, %c0_173, %c0_174], %317 {strides = array<i32>} : memref<8x2x128xf32, #tpu.memory_space<vmem>>, vector<1x2x128xf32>,
    %c4 = arith.constant 4 : index
    %c0_175 = arith.constant 0 : index
    %c0_176 = arith.constant 0 : index
    %318 = vector.load %arg2[%c4, %c0_175, %c0_176] : memref<8x2x1024xf32, #tpu.memory_space<vmem>>, vector<1x2x1024xf32>
    %319 = vector.shape_cast %318 : vector<1x2x1024xf32> to vector<2x1024xf32>
    %320 = vector.extract_strided_slice %319 {offsets = [0, 512], sizes = [2, 512], strides = [1, 1]} : vector<2x1024xf32> to vector<2x512xf32>
    %c0_177 = arith.constant 0 : index
    %c0_178 = arith.constant 0 : index
    %321 = vector.load %arg9[%c0_177, %c0_178] : memref<2x128xf32, #tpu.memory_space<vmem>>, vector<2x128xf32>
    %322 = arith.truncf %321 : vector<2x128xf32> to vector<2x128xbf16>
    %c0_179 = arith.constant 0 : index
    %c0_180 = arith.constant 0 : index
    %323 = vector.load %arg4[%c0_179, %c0_180] : memref<128x512xbf16, #tpu.memory_space<vmem>>, vector<128x512xbf16>
    %cst_181 = arith.constant dense<0.000000e+00> : vector<2x512xf32>
    %324 = tpu.matmul %322, %323, %cst_181 {dimension_numbers = #tpu.dot_dimension_numbers<[1], [0], [0], [1], [0, 0, 1, 1], [], []>} : vector<2x128xbf16>, vector<128x512xbf16>, vector<2x512xf32> -> vector<2x512xf32>
    %325 = arith.addf %320, %324 : vector<2x512xf32>
    %c0_182 = arith.constant 0 : index
    %c0_183 = arith.constant 0 : index
    %326 = vector.load %arg10[%c0_182, %c0_183] : memref<2x128xf32, #tpu.memory_space<vmem>>, vector<2x128xf32>
    %327 = vector.extract_strided_slice %325 {offsets = [0, 0], sizes = [2, 128], strides = [1, 1]} : vector<2x512xf32> to vector<2x128xf32>
    %cst_184 = arith.constant 5.000000e-01 : f32
    %328 = vector.broadcast %cst_184 : f32 to vector<2x128xf32>
    %329 = arith.mulf %328, %327 : vector<2x128xf32>
    %330 = math.tanh %329 : vector<2x128xf32>
    %cst_185 = arith.constant 5.000000e-01 : f32
    %331 = vector.broadcast %cst_185 : f32 to vector<2x128xf32>
    %332 = arith.mulf %331, %330 : vector<2x128xf32>
    %cst_186 = arith.constant 5.000000e-01 : f32
    %333 = vector.broadcast %cst_186 : f32 to vector<2x128xf32>
    %334 = arith.addf %332, %333 : vector<2x128xf32>
    %335 = vector.extract_strided_slice %325 {offsets = [0, 128], sizes = [2, 128], strides = [1, 1]} : vector<2x512xf32> to vector<2x128xf32>
    %cst_187 = arith.constant 5.000000e-01 : f32
    %336 = vector.broadcast %cst_187 : f32 to vector<2x128xf32>
    %337 = arith.mulf %336, %335 : vector<2x128xf32>
    %338 = math.tanh %337 : vector<2x128xf32>
    %cst_188 = arith.constant 5.000000e-01 : f32
    %339 = vector.broadcast %cst_188 : f32 to vector<2x128xf32>
    %340 = arith.mulf %339, %338 : vector<2x128xf32>
    %cst_189 = arith.constant 5.000000e-01 : f32
    %341 = vector.broadcast %cst_189 : f32 to vector<2x128xf32>
    %342 = arith.addf %340, %341 : vector<2x128xf32>
    %343 = vector.extract_strided_slice %325 {offsets = [0, 256], sizes = [2, 128], strides = [1, 1]} : vector<2x512xf32> to vector<2x128xf32>
    %344 = math.tanh %343 : vector<2x128xf32>
    %345 = vector.extract_strided_slice %325 {offsets = [0, 384], sizes = [2, 128], strides = [1, 1]} : vector<2x512xf32> to vector<2x128xf32>
    %cst_190 = arith.constant 5.000000e-01 : f32
    %346 = vector.broadcast %cst_190 : f32 to vector<2x128xf32>
    %347 = arith.mulf %346, %345 : vector<2x128xf32>
    %348 = math.tanh %347 : vector<2x128xf32>
    %cst_191 = arith.constant 5.000000e-01 : f32
    %349 = vector.broadcast %cst_191 : f32 to vector<2x128xf32>
    %350 = arith.mulf %349, %348 : vector<2x128xf32>
    %cst_192 = arith.constant 5.000000e-01 : f32
    %351 = vector.broadcast %cst_192 : f32 to vector<2x128xf32>
    %352 = arith.addf %350, %351 : vector<2x128xf32>
    %353 = arith.mulf %342, %326 : vector<2x128xf32>
    %354 = arith.mulf %334, %344 : vector<2x128xf32>
    %355 = arith.addf %353, %354 : vector<2x128xf32>
    %356 = math.tanh %355 : vector<2x128xf32>
    %357 = arith.mulf %352, %356 : vector<2x128xf32>
    %c0_193 = arith.constant 0 : index
    %c0_194 = arith.constant 0 : index
    %358 = vector.load %arg9[%c0_193, %c0_194] : memref<2x128xf32, #tpu.memory_space<vmem>>, vector<2x128xf32>
    tpu.vector_store %arg9[%c0_193, %c0_194], %357 {strides = array<i32>} : memref<2x128xf32, #tpu.memory_space<vmem>>, vector<2x128xf32>,
    %c0_195 = arith.constant 0 : index
    %c0_196 = arith.constant 0 : index
    %359 = vector.load %arg10[%c0_195, %c0_196] : memref<2x128xf32, #tpu.memory_space<vmem>>, vector<2x128xf32>
    tpu.vector_store %arg10[%c0_195, %c0_196], %355 {strides = array<i32>} : memref<2x128xf32, #tpu.memory_space<vmem>>, vector<2x128xf32>,
    %c4_197 = arith.constant 4 : index
    %c0_198 = arith.constant 0 : index
    %c0_199 = arith.constant 0 : index
    %360 = vector.load %arg6[%c4_197, %c0_198, %c0_199] : memref<8x2x128xf32, #tpu.memory_space<vmem>>, vector<1x2x128xf32>
    %361 = vector.shape_cast %360 : vector<1x2x128xf32> to vector<2x128xf32>
    %362 = vector.shape_cast %357 : vector<2x128xf32> to vector<1x2x128xf32>
    tpu.vector_store %arg6[%c4_197, %c0_198, %c0_199], %362 {strides = array<i32>} : memref<8x2x128xf32, #tpu.memory_space<vmem>>, vector<1x2x128xf32>,
    %c4_200 = arith.constant 4 : index
    %c0_201 = arith.constant 0 : index
    %c0_202 = arith.constant 0 : index
    %363 = vector.load %arg1[%c4_200, %c0_201, %c0_202] : memref<8x2x1024xf32, #tpu.memory_space<vmem>>, vector<1x2x1024xf32>
    %364 = vector.shape_cast %363 : vector<1x2x1024xf32> to vector<2x1024xf32>
    %365 = vector.extract_strided_slice %364 {offsets = [0, 0], sizes = [2, 512], strides = [1, 1]} : vector<2x1024xf32> to vector<2x512xf32>
    %c0_203 = arith.constant 0 : index
    %c0_204 = arith.constant 0 : index
    %366 = vector.load %arg7[%c0_203, %c0_204] : memref<2x128xf32, #tpu.memory_space<vmem>>, vector<2x128xf32>
    %367 = arith.truncf %366 : vector<2x128xf32> to vector<2x128xbf16>
    %c0_205 = arith.constant 0 : index
    %c0_206 = arith.constant 0 : index
    %368 = vector.load %arg3[%c0_205, %c0_206] : memref<128x512xbf16, #tpu.memory_space<vmem>>, vector<128x512xbf16>
    %cst_207 = arith.constant dense<0.000000e+00> : vector<2x512xf32>
    %369 = tpu.matmul %367, %368, %cst_207 {dimension_numbers = #tpu.dot_dimension_numbers<[1], [0], [0], [1], [0, 0, 1, 1], [], []>} : vector<2x128xbf16>, vector<128x512xbf16>, vector<2x512xf32> -> vector<2x512xf32>
    %370 = arith.addf %365, %369 : vector<2x512xf32>
    %c0_208 = arith.constant 0 : index
    %c0_209 = arith.constant 0 : index
    %371 = vector.load %arg8[%c0_208, %c0_209] : memref<2x128xf32, #tpu.memory_space<vmem>>, vector<2x128xf32>
    %372 = vector.extract_strided_slice %370 {offsets = [0, 0], sizes = [2, 128], strides = [1, 1]} : vector<2x512xf32> to vector<2x128xf32>
    %cst_210 = arith.constant 5.000000e-01 : f32
    %373 = vector.broadcast %cst_210 : f32 to vector<2x128xf32>
    %374 = arith.mulf %373, %372 : vector<2x128xf32>
    %375 = math.tanh %374 : vector<2x128xf32>
    %cst_211 = arith.constant 5.000000e-01 : f32
    %376 = vector.broadcast %cst_211 : f32 to vector<2x128xf32>
    %377 = arith.mulf %376, %375 : vector<2x128xf32>
    %cst_212 = arith.constant 5.000000e-01 : f32
    %378 = vector.broadcast %cst_212 : f32 to vector<2x128xf32>
    %379 = arith.addf %377, %378 : vector<2x128xf32>
    %380 = vector.extract_strided_slice %370 {offsets = [0, 128], sizes = [2, 128], strides = [1, 1]} : vector<2x512xf32> to vector<2x128xf32>
    %cst_213 = arith.constant 5.000000e-01 : f32
    %381 = vector.broadcast %cst_213 : f32 to vector<2x128xf32>
    %382 = arith.mulf %381, %380 : vector<2x128xf32>
    %383 = math.tanh %382 : vector<2x128xf32>
    %cst_214 = arith.constant 5.000000e-01 : f32
    %384 = vector.broadcast %cst_214 : f32 to vector<2x128xf32>
    %385 = arith.mulf %384, %383 : vector<2x128xf32>
    %cst_215 = arith.constant 5.000000e-01 : f32
    %386 = vector.broadcast %cst_215 : f32 to vector<2x128xf32>
    %387 = arith.addf %385, %386 : vector<2x128xf32>
    %388 = vector.extract_strided_slice %370 {offsets = [0, 256], sizes = [2, 128], strides = [1, 1]} : vector<2x512xf32> to vector<2x128xf32>
    %389 = math.tanh %388 : vector<2x128xf32>
    %390 = vector.extract_strided_slice %370 {offsets = [0, 384], sizes = [2, 128], strides = [1, 1]} : vector<2x512xf32> to vector<2x128xf32>
    %cst_216 = arith.constant 5.000000e-01 : f32
    %391 = vector.broadcast %cst_216 : f32 to vector<2x128xf32>
    %392 = arith.mulf %391, %390 : vector<2x128xf32>
    %393 = math.tanh %392 : vector<2x128xf32>
    %cst_217 = arith.constant 5.000000e-01 : f32
    %394 = vector.broadcast %cst_217 : f32 to vector<2x128xf32>
    %395 = arith.mulf %394, %393 : vector<2x128xf32>
    %cst_218 = arith.constant 5.000000e-01 : f32
    %396 = vector.broadcast %cst_218 : f32 to vector<2x128xf32>
    %397 = arith.addf %395, %396 : vector<2x128xf32>
    %398 = arith.mulf %387, %371 : vector<2x128xf32>
    %399 = arith.mulf %379, %389 : vector<2x128xf32>
    %400 = arith.addf %398, %399 : vector<2x128xf32>
    %401 = math.tanh %400 : vector<2x128xf32>
    %402 = arith.mulf %397, %401 : vector<2x128xf32>
    %c0_219 = arith.constant 0 : index
    %c0_220 = arith.constant 0 : index
    %403 = vector.load %arg7[%c0_219, %c0_220] : memref<2x128xf32, #tpu.memory_space<vmem>>, vector<2x128xf32>
    tpu.vector_store %arg7[%c0_219, %c0_220], %402 {strides = array<i32>} : memref<2x128xf32, #tpu.memory_space<vmem>>, vector<2x128xf32>,
    %c0_221 = arith.constant 0 : index
    %c0_222 = arith.constant 0 : index
    %404 = vector.load %arg8[%c0_221, %c0_222] : memref<2x128xf32, #tpu.memory_space<vmem>>, vector<2x128xf32>
    tpu.vector_store %arg8[%c0_221, %c0_222], %400 {strides = array<i32>} : memref<2x128xf32, #tpu.memory_space<vmem>>, vector<2x128xf32>,
    %c4_223 = arith.constant 4 : index
    %c0_224 = arith.constant 0 : index
    %c0_225 = arith.constant 0 : index
    %405 = vector.load %arg5[%c4_223, %c0_224, %c0_225] : memref<8x2x128xf32, #tpu.memory_space<vmem>>, vector<1x2x128xf32>
    %406 = vector.shape_cast %405 : vector<1x2x128xf32> to vector<2x128xf32>
    %407 = vector.shape_cast %402 : vector<2x128xf32> to vector<1x2x128xf32>
    tpu.vector_store %arg5[%c4_223, %c0_224, %c0_225], %407 {strides = array<i32>} : memref<8x2x128xf32, #tpu.memory_space<vmem>>, vector<1x2x128xf32>,
    %c3_226 = arith.constant 3 : index
    %c0_227 = arith.constant 0 : index
    %c0_228 = arith.constant 0 : index
    %408 = vector.load %arg2[%c3_226, %c0_227, %c0_228] : memref<8x2x1024xf32, #tpu.memory_space<vmem>>, vector<1x2x1024xf32>
    %409 = vector.shape_cast %408 : vector<1x2x1024xf32> to vector<2x1024xf32>
    %410 = vector.extract_strided_slice %409 {offsets = [0, 512], sizes = [2, 512], strides = [1, 1]} : vector<2x1024xf32> to vector<2x512xf32>
    %c0_229 = arith.constant 0 : index
    %c0_230 = arith.constant 0 : index
    %411 = vector.load %arg9[%c0_229, %c0_230] : memref<2x128xf32, #tpu.memory_space<vmem>>, vector<2x128xf32>
    %412 = arith.truncf %411 : vector<2x128xf32> to vector<2x128xbf16>
    %c0_231 = arith.constant 0 : index
    %c0_232 = arith.constant 0 : index
    %413 = vector.load %arg4[%c0_231, %c0_232] : memref<128x512xbf16, #tpu.memory_space<vmem>>, vector<128x512xbf16>
    %cst_233 = arith.constant dense<0.000000e+00> : vector<2x512xf32>
    %414 = tpu.matmul %412, %413, %cst_233 {dimension_numbers = #tpu.dot_dimension_numbers<[1], [0], [0], [1], [0, 0, 1, 1], [], []>} : vector<2x128xbf16>, vector<128x512xbf16>, vector<2x512xf32> -> vector<2x512xf32>
    %415 = arith.addf %410, %414 : vector<2x512xf32>
    %c0_234 = arith.constant 0 : index
    %c0_235 = arith.constant 0 : index
    %416 = vector.load %arg10[%c0_234, %c0_235] : memref<2x128xf32, #tpu.memory_space<vmem>>, vector<2x128xf32>
    %417 = vector.extract_strided_slice %415 {offsets = [0, 0], sizes = [2, 128], strides = [1, 1]} : vector<2x512xf32> to vector<2x128xf32>
    %cst_236 = arith.constant 5.000000e-01 : f32
    %418 = vector.broadcast %cst_236 : f32 to vector<2x128xf32>
    %419 = arith.mulf %418, %417 : vector<2x128xf32>
    %420 = math.tanh %419 : vector<2x128xf32>
    %cst_237 = arith.constant 5.000000e-01 : f32
    %421 = vector.broadcast %cst_237 : f32 to vector<2x128xf32>
    %422 = arith.mulf %421, %420 : vector<2x128xf32>
    %cst_238 = arith.constant 5.000000e-01 : f32
    %423 = vector.broadcast %cst_238 : f32 to vector<2x128xf32>
    %424 = arith.addf %422, %423 : vector<2x128xf32>
    %425 = vector.extract_strided_slice %415 {offsets = [0, 128], sizes = [2, 128], strides = [1, 1]} : vector<2x512xf32> to vector<2x128xf32>
    %cst_239 = arith.constant 5.000000e-01 : f32
    %426 = vector.broadcast %cst_239 : f32 to vector<2x128xf32>
    %427 = arith.mulf %426, %425 : vector<2x128xf32>
    %428 = math.tanh %427 : vector<2x128xf32>
    %cst_240 = arith.constant 5.000000e-01 : f32
    %429 = vector.broadcast %cst_240 : f32 to vector<2x128xf32>
    %430 = arith.mulf %429, %428 : vector<2x128xf32>
    %cst_241 = arith.constant 5.000000e-01 : f32
    %431 = vector.broadcast %cst_241 : f32 to vector<2x128xf32>
    %432 = arith.addf %430, %431 : vector<2x128xf32>
    %433 = vector.extract_strided_slice %415 {offsets = [0, 256], sizes = [2, 128], strides = [1, 1]} : vector<2x512xf32> to vector<2x128xf32>
    %434 = math.tanh %433 : vector<2x128xf32>
    %435 = vector.extract_strided_slice %415 {offsets = [0, 384], sizes = [2, 128], strides = [1, 1]} : vector<2x512xf32> to vector<2x128xf32>
    %cst_242 = arith.constant 5.000000e-01 : f32
    %436 = vector.broadcast %cst_242 : f32 to vector<2x128xf32>
    %437 = arith.mulf %436, %435 : vector<2x128xf32>
    %438 = math.tanh %437 : vector<2x128xf32>
    %cst_243 = arith.constant 5.000000e-01 : f32
    %439 = vector.broadcast %cst_243 : f32 to vector<2x128xf32>
    %440 = arith.mulf %439, %438 : vector<2x128xf32>
    %cst_244 = arith.constant 5.000000e-01 : f32
    %441 = vector.broadcast %cst_244 : f32 to vector<2x128xf32>
    %442 = arith.addf %440, %441 : vector<2x128xf32>
    %443 = arith.mulf %432, %416 : vector<2x128xf32>
    %444 = arith.mulf %424, %434 : vector<2x128xf32>
    %445 = arith.addf %443, %444 : vector<2x128xf32>
    %446 = math.tanh %445 : vector<2x128xf32>
    %447 = arith.mulf %442, %446 : vector<2x128xf32>
    %c0_245 = arith.constant 0 : index
    %c0_246 = arith.constant 0 : index
    %448 = vector.load %arg9[%c0_245, %c0_246] : memref<2x128xf32, #tpu.memory_space<vmem>>, vector<2x128xf32>
    tpu.vector_store %arg9[%c0_245, %c0_246], %447 {strides = array<i32>} : memref<2x128xf32, #tpu.memory_space<vmem>>, vector<2x128xf32>,
    %c0_247 = arith.constant 0 : index
    %c0_248 = arith.constant 0 : index
    %449 = vector.load %arg10[%c0_247, %c0_248] : memref<2x128xf32, #tpu.memory_space<vmem>>, vector<2x128xf32>
    tpu.vector_store %arg10[%c0_247, %c0_248], %445 {strides = array<i32>} : memref<2x128xf32, #tpu.memory_space<vmem>>, vector<2x128xf32>,
    %c3_249 = arith.constant 3 : index
    %c0_250 = arith.constant 0 : index
    %c0_251 = arith.constant 0 : index
    %450 = vector.load %arg6[%c3_249, %c0_250, %c0_251] : memref<8x2x128xf32, #tpu.memory_space<vmem>>, vector<1x2x128xf32>
    %451 = vector.shape_cast %450 : vector<1x2x128xf32> to vector<2x128xf32>
    %452 = vector.shape_cast %447 : vector<2x128xf32> to vector<1x2x128xf32>
    tpu.vector_store %arg6[%c3_249, %c0_250, %c0_251], %452 {strides = array<i32>} : memref<8x2x128xf32, #tpu.memory_space<vmem>>, vector<1x2x128xf32>,
    %c5_252 = arith.constant 5 : index
    %c0_253 = arith.constant 0 : index
    %c0_254 = arith.constant 0 : index
    %453 = vector.load %arg1[%c5_252, %c0_253, %c0_254] : memref<8x2x1024xf32, #tpu.memory_space<vmem>>, vector<1x2x1024xf32>
    %454 = vector.shape_cast %453 : vector<1x2x1024xf32> to vector<2x1024xf32>
    %455 = vector.extract_strided_slice %454 {offsets = [0, 0], sizes = [2, 512], strides = [1, 1]} : vector<2x1024xf32> to vector<2x512xf32>
    %c0_255 = arith.constant 0 : index
    %c0_256 = arith.constant 0 : index
    %456 = vector.load %arg7[%c0_255, %c0_256] : memref<2x128xf32, #tpu.memory_space<vmem>>, vector<2x128xf32>
    %457 = arith.truncf %456 : vector<2x128xf32> to vector<2x128xbf16>
    %c0_257 = arith.constant 0 : index
    %c0_258 = arith.constant 0 : index
    %458 = vector.load %arg3[%c0_257, %c0_258] : memref<128x512xbf16, #tpu.memory_space<vmem>>, vector<128x512xbf16>
    %cst_259 = arith.constant dense<0.000000e+00> : vector<2x512xf32>
    %459 = tpu.matmul %457, %458, %cst_259 {dimension_numbers = #tpu.dot_dimension_numbers<[1], [0], [0], [1], [0, 0, 1, 1], [], []>} : vector<2x128xbf16>, vector<128x512xbf16>, vector<2x512xf32> -> vector<2x512xf32>
    %460 = arith.addf %455, %459 : vector<2x512xf32>
    %c0_260 = arith.constant 0 : index
    %c0_261 = arith.constant 0 : index
    %461 = vector.load %arg8[%c0_260, %c0_261] : memref<2x128xf32, #tpu.memory_space<vmem>>, vector<2x128xf32>
    %462 = vector.extract_strided_slice %460 {offsets = [0, 0], sizes = [2, 128], strides = [1, 1]} : vector<2x512xf32> to vector<2x128xf32>
    %cst_262 = arith.constant 5.000000e-01 : f32
    %463 = vector.broadcast %cst_262 : f32 to vector<2x128xf32>
    %464 = arith.mulf %463, %462 : vector<2x128xf32>
    %465 = math.tanh %464 : vector<2x128xf32>
    %cst_263 = arith.constant 5.000000e-01 : f32
    %466 = vector.broadcast %cst_263 : f32 to vector<2x128xf32>
    %467 = arith.mulf %466, %465 : vector<2x128xf32>
    %cst_264 = arith.constant 5.000000e-01 : f32
    %468 = vector.broadcast %cst_264 : f32 to vector<2x128xf32>
    %469 = arith.addf %467, %468 : vector<2x128xf32>
    %470 = vector.extract_strided_slice %460 {offsets = [0, 128], sizes = [2, 128], strides = [1, 1]} : vector<2x512xf32> to vector<2x128xf32>
    %cst_265 = arith.constant 5.000000e-01 : f32
    %471 = vector.broadcast %cst_265 : f32 to vector<2x128xf32>
    %472 = arith.mulf %471, %470 : vector<2x128xf32>
    %473 = math.tanh %472 : vector<2x128xf32>
    %cst_266 = arith.constant 5.000000e-01 : f32
    %474 = vector.broadcast %cst_266 : f32 to vector<2x128xf32>
    %475 = arith.mulf %474, %473 : vector<2x128xf32>
    %cst_267 = arith.constant 5.000000e-01 : f32
    %476 = vector.broadcast %cst_267 : f32 to vector<2x128xf32>
    %477 = arith.addf %475, %476 : vector<2x128xf32>
    %478 = vector.extract_strided_slice %460 {offsets = [0, 256], sizes = [2, 128], strides = [1, 1]} : vector<2x512xf32> to vector<2x128xf32>
    %479 = math.tanh %478 : vector<2x128xf32>
    %480 = vector.extract_strided_slice %460 {offsets = [0, 384], sizes = [2, 128], strides = [1, 1]} : vector<2x512xf32> to vector<2x128xf32>
    %cst_268 = arith.constant 5.000000e-01 : f32
    %481 = vector.broadcast %cst_268 : f32 to vector<2x128xf32>
    %482 = arith.mulf %481, %480 : vector<2x128xf32>
    %483 = math.tanh %482 : vector<2x128xf32>
    %cst_269 = arith.constant 5.000000e-01 : f32
    %484 = vector.broadcast %cst_269 : f32 to vector<2x128xf32>
    %485 = arith.mulf %484, %483 : vector<2x128xf32>
    %cst_270 = arith.constant 5.000000e-01 : f32
    %486 = vector.broadcast %cst_270 : f32 to vector<2x128xf32>
    %487 = arith.addf %485, %486 : vector<2x128xf32>
    %488 = arith.mulf %477, %461 : vector<2x128xf32>
    %489 = arith.mulf %469, %479 : vector<2x128xf32>
    %490 = arith.addf %488, %489 : vector<2x128xf32>
    %491 = math.tanh %490 : vector<2x128xf32>
    %492 = arith.mulf %487, %491 : vector<2x128xf32>
    %c0_271 = arith.constant 0 : index
    %c0_272 = arith.constant 0 : index
    %493 = vector.load %arg7[%c0_271, %c0_272] : memref<2x128xf32, #tpu.memory_space<vmem>>, vector<2x128xf32>
    tpu.vector_store %arg7[%c0_271, %c0_272], %492 {strides = array<i32>} : memref<2x128xf32, #tpu.memory_space<vmem>>, vector<2x128xf32>,
    %c0_273 = arith.constant 0 : index
    %c0_274 = arith.constant 0 : index
    %494 = vector.load %arg8[%c0_273, %c0_274] : memref<2x128xf32, #tpu.memory_space<vmem>>, vector<2x128xf32>
    tpu.vector_store %arg8[%c0_273, %c0_274], %490 {strides = array<i32>} : memref<2x128xf32, #tpu.memory_space<vmem>>, vector<2x128xf32>,
    %c5_275 = arith.constant 5 : index
    %c0_276 = arith.constant 0 : index
    %c0_277 = arith.constant 0 : index
    %495 = vector.load %arg5[%c5_275, %c0_276, %c0_277] : memref<8x2x128xf32, #tpu.memory_space<vmem>>, vector<1x2x128xf32>
    %496 = vector.shape_cast %495 : vector<1x2x128xf32> to vector<2x128xf32>
    %497 = vector.shape_cast %492 : vector<2x128xf32> to vector<1x2x128xf32>
    tpu.vector_store %arg5[%c5_275, %c0_276, %c0_277], %497 {strides = array<i32>} : memref<8x2x128xf32, #tpu.memory_space<vmem>>, vector<1x2x128xf32>,
    %c2_278 = arith.constant 2 : index
    %c0_279 = arith.constant 0 : index
    %c0_280 = arith.constant 0 : index
    %498 = vector.load %arg2[%c2_278, %c0_279, %c0_280] : memref<8x2x1024xf32, #tpu.memory_space<vmem>>, vector<1x2x1024xf32>
    %499 = vector.shape_cast %498 : vector<1x2x1024xf32> to vector<2x1024xf32>
    %500 = vector.extract_strided_slice %499 {offsets = [0, 512], sizes = [2, 512], strides = [1, 1]} : vector<2x1024xf32> to vector<2x512xf32>
    %c0_281 = arith.constant 0 : index
    %c0_282 = arith.constant 0 : index
    %501 = vector.load %arg9[%c0_281, %c0_282] : memref<2x128xf32, #tpu.memory_space<vmem>>, vector<2x128xf32>
    %502 = arith.truncf %501 : vector<2x128xf32> to vector<2x128xbf16>
    %c0_283 = arith.constant 0 : index
    %c0_284 = arith.constant 0 : index
    %503 = vector.load %arg4[%c0_283, %c0_284] : memref<128x512xbf16, #tpu.memory_space<vmem>>, vector<128x512xbf16>
    %cst_285 = arith.constant dense<0.000000e+00> : vector<2x512xf32>
    %504 = tpu.matmul %502, %503, %cst_285 {dimension_numbers = #tpu.dot_dimension_numbers<[1], [0], [0], [1], [0, 0, 1, 1], [], []>} : vector<2x128xbf16>, vector<128x512xbf16>, vector<2x512xf32> -> vector<2x512xf32>
    %505 = arith.addf %500, %504 : vector<2x512xf32>
    %c0_286 = arith.constant 0 : index
    %c0_287 = arith.constant 0 : index
    %506 = vector.load %arg10[%c0_286, %c0_287] : memref<2x128xf32, #tpu.memory_space<vmem>>, vector<2x128xf32>
    %507 = vector.extract_strided_slice %505 {offsets = [0, 0], sizes = [2, 128], strides = [1, 1]} : vector<2x512xf32> to vector<2x128xf32>
    %cst_288 = arith.constant 5.000000e-01 : f32
    %508 = vector.broadcast %cst_288 : f32 to vector<2x128xf32>
    %509 = arith.mulf %508, %507 : vector<2x128xf32>
    %510 = math.tanh %509 : vector<2x128xf32>
    %cst_289 = arith.constant 5.000000e-01 : f32
    %511 = vector.broadcast %cst_289 : f32 to vector<2x128xf32>
    %512 = arith.mulf %511, %510 : vector<2x128xf32>
    %cst_290 = arith.constant 5.000000e-01 : f32
    %513 = vector.broadcast %cst_290 : f32 to vector<2x128xf32>
    %514 = arith.addf %512, %513 : vector<2x128xf32>
    %515 = vector.extract_strided_slice %505 {offsets = [0, 128], sizes = [2, 128], strides = [1, 1]} : vector<2x512xf32> to vector<2x128xf32>
    %cst_291 = arith.constant 5.000000e-01 : f32
    %516 = vector.broadcast %cst_291 : f32 to vector<2x128xf32>
    %517 = arith.mulf %516, %515 : vector<2x128xf32>
    %518 = math.tanh %517 : vector<2x128xf32>
    %cst_292 = arith.constant 5.000000e-01 : f32
    %519 = vector.broadcast %cst_292 : f32 to vector<2x128xf32>
    %520 = arith.mulf %519, %518 : vector<2x128xf32>
    %cst_293 = arith.constant 5.000000e-01 : f32
    %521 = vector.broadcast %cst_293 : f32 to vector<2x128xf32>
    %522 = arith.addf %520, %521 : vector<2x128xf32>
    %523 = vector.extract_strided_slice %505 {offsets = [0, 256], sizes = [2, 128], strides = [1, 1]} : vector<2x512xf32> to vector<2x128xf32>
    %524 = math.tanh %523 : vector<2x128xf32>
    %525 = vector.extract_strided_slice %505 {offsets = [0, 384], sizes = [2, 128], strides = [1, 1]} : vector<2x512xf32> to vector<2x128xf32>
    %cst_294 = arith.constant 5.000000e-01 : f32
    %526 = vector.broadcast %cst_294 : f32 to vector<2x128xf32>
    %527 = arith.mulf %526, %525 : vector<2x128xf32>
    %528 = math.tanh %527 : vector<2x128xf32>
    %cst_295 = arith.constant 5.000000e-01 : f32
    %529 = vector.broadcast %cst_295 : f32 to vector<2x128xf32>
    %530 = arith.mulf %529, %528 : vector<2x128xf32>
    %cst_296 = arith.constant 5.000000e-01 : f32
    %531 = vector.broadcast %cst_296 : f32 to vector<2x128xf32>
    %532 = arith.addf %530, %531 : vector<2x128xf32>
    %533 = arith.mulf %522, %506 : vector<2x128xf32>
    %534 = arith.mulf %514, %524 : vector<2x128xf32>
    %535 = arith.addf %533, %534 : vector<2x128xf32>
    %536 = math.tanh %535 : vector<2x128xf32>
    %537 = arith.mulf %532, %536 : vector<2x128xf32>
    %c0_297 = arith.constant 0 : index
    %c0_298 = arith.constant 0 : index
    %538 = vector.load %arg9[%c0_297, %c0_298] : memref<2x128xf32, #tpu.memory_space<vmem>>, vector<2x128xf32>
    tpu.vector_store %arg9[%c0_297, %c0_298], %537 {strides = array<i32>} : memref<2x128xf32, #tpu.memory_space<vmem>>, vector<2x128xf32>,
    %c0_299 = arith.constant 0 : index
    %c0_300 = arith.constant 0 : index
    %539 = vector.load %arg10[%c0_299, %c0_300] : memref<2x128xf32, #tpu.memory_space<vmem>>, vector<2x128xf32>
    tpu.vector_store %arg10[%c0_299, %c0_300], %535 {strides = array<i32>} : memref<2x128xf32, #tpu.memory_space<vmem>>, vector<2x128xf32>,
    %c2_301 = arith.constant 2 : index
    %c0_302 = arith.constant 0 : index
    %c0_303 = arith.constant 0 : index
    %540 = vector.load %arg6[%c2_301, %c0_302, %c0_303] : memref<8x2x128xf32, #tpu.memory_space<vmem>>, vector<1x2x128xf32>
    %541 = vector.shape_cast %540 : vector<1x2x128xf32> to vector<2x128xf32>
    %542 = vector.shape_cast %537 : vector<2x128xf32> to vector<1x2x128xf32>
    tpu.vector_store %arg6[%c2_301, %c0_302, %c0_303], %542 {strides = array<i32>} : memref<8x2x128xf32, #tpu.memory_space<vmem>>, vector<1x2x128xf32>,
    %c6_304 = arith.constant 6 : index
    %c0_305 = arith.constant 0 : index
    %c0_306 = arith.constant 0 : index
    %543 = vector.load %arg1[%c6_304, %c0_305, %c0_306] : memref<8x2x1024xf32, #tpu.memory_space<vmem>>, vector<1x2x1024xf32>
    %544 = vector.shape_cast %543 : vector<1x2x1024xf32> to vector<2x1024xf32>
    %545 = vector.extract_strided_slice %544 {offsets = [0, 0], sizes = [2, 512], strides = [1, 1]} : vector<2x1024xf32> to vector<2x512xf32>
    %c0_307 = arith.constant 0 : index
    %c0_308 = arith.constant 0 : index
    %546 = vector.load %arg7[%c0_307, %c0_308] : memref<2x128xf32, #tpu.memory_space<vmem>>, vector<2x128xf32>
    %547 = arith.truncf %546 : vector<2x128xf32> to vector<2x128xbf16>
    %c0_309 = arith.constant 0 : index
    %c0_310 = arith.constant 0 : index
    %548 = vector.load %arg3[%c0_309, %c0_310] : memref<128x512xbf16, #tpu.memory_space<vmem>>, vector<128x512xbf16>
    %cst_311 = arith.constant dense<0.000000e+00> : vector<2x512xf32>
    %549 = tpu.matmul %547, %548, %cst_311 {dimension_numbers = #tpu.dot_dimension_numbers<[1], [0], [0], [1], [0, 0, 1, 1], [], []>} : vector<2x128xbf16>, vector<128x512xbf16>, vector<2x512xf32> -> vector<2x512xf32>
    %550 = arith.addf %545, %549 : vector<2x512xf32>
    %c0_312 = arith.constant 0 : index
    %c0_313 = arith.constant 0 : index
    %551 = vector.load %arg8[%c0_312, %c0_313] : memref<2x128xf32, #tpu.memory_space<vmem>>, vector<2x128xf32>
    %552 = vector.extract_strided_slice %550 {offsets = [0, 0], sizes = [2, 128], strides = [1, 1]} : vector<2x512xf32> to vector<2x128xf32>
    %cst_314 = arith.constant 5.000000e-01 : f32
    %553 = vector.broadcast %cst_314 : f32 to vector<2x128xf32>
    %554 = arith.mulf %553, %552 : vector<2x128xf32>
    %555 = math.tanh %554 : vector<2x128xf32>
    %cst_315 = arith.constant 5.000000e-01 : f32
    %556 = vector.broadcast %cst_315 : f32 to vector<2x128xf32>
    %557 = arith.mulf %556, %555 : vector<2x128xf32>
    %cst_316 = arith.constant 5.000000e-01 : f32
    %558 = vector.broadcast %cst_316 : f32 to vector<2x128xf32>
    %559 = arith.addf %557, %558 : vector<2x128xf32>
    %560 = vector.extract_strided_slice %550 {offsets = [0, 128], sizes = [2, 128], strides = [1, 1]} : vector<2x512xf32> to vector<2x128xf32>
    %cst_317 = arith.constant 5.000000e-01 : f32
    %561 = vector.broadcast %cst_317 : f32 to vector<2x128xf32>
    %562 = arith.mulf %561, %560 : vector<2x128xf32>
    %563 = math.tanh %562 : vector<2x128xf32>
    %cst_318 = arith.constant 5.000000e-01 : f32
    %564 = vector.broadcast %cst_318 : f32 to vector<2x128xf32>
    %565 = arith.mulf %564, %563 : vector<2x128xf32>
    %cst_319 = arith.constant 5.000000e-01 : f32
    %566 = vector.broadcast %cst_319 : f32 to vector<2x128xf32>
    %567 = arith.addf %565, %566 : vector<2x128xf32>
    %568 = vector.extract_strided_slice %550 {offsets = [0, 256], sizes = [2, 128], strides = [1, 1]} : vector<2x512xf32> to vector<2x128xf32>
    %569 = math.tanh %568 : vector<2x128xf32>
    %570 = vector.extract_strided_slice %550 {offsets = [0, 384], sizes = [2, 128], strides = [1, 1]} : vector<2x512xf32> to vector<2x128xf32>
    %cst_320 = arith.constant 5.000000e-01 : f32
    %571 = vector.broadcast %cst_320 : f32 to vector<2x128xf32>
    %572 = arith.mulf %571, %570 : vector<2x128xf32>
    %573 = math.tanh %572 : vector<2x128xf32>
    %cst_321 = arith.constant 5.000000e-01 : f32
    %574 = vector.broadcast %cst_321 : f32 to vector<2x128xf32>
    %575 = arith.mulf %574, %573 : vector<2x128xf32>
    %cst_322 = arith.constant 5.000000e-01 : f32
    %576 = vector.broadcast %cst_322 : f32 to vector<2x128xf32>
    %577 = arith.addf %575, %576 : vector<2x128xf32>
    %578 = arith.mulf %567, %551 : vector<2x128xf32>
    %579 = arith.mulf %559, %569 : vector<2x128xf32>
    %580 = arith.addf %578, %579 : vector<2x128xf32>
    %581 = math.tanh %580 : vector<2x128xf32>
    %582 = arith.mulf %577, %581 : vector<2x128xf32>
    %c0_323 = arith.constant 0 : index
    %c0_324 = arith.constant 0 : index
    %583 = vector.load %arg7[%c0_323, %c0_324] : memref<2x128xf32, #tpu.memory_space<vmem>>, vector<2x128xf32>
    tpu.vector_store %arg7[%c0_323, %c0_324], %582 {strides = array<i32>} : memref<2x128xf32, #tpu.memory_space<vmem>>, vector<2x128xf32>,
    %c0_325 = arith.constant 0 : index
    %c0_326 = arith.constant 0 : index
    %584 = vector.load %arg8[%c0_325, %c0_326] : memref<2x128xf32, #tpu.memory_space<vmem>>, vector<2x128xf32>
    tpu.vector_store %arg8[%c0_325, %c0_326], %580 {strides = array<i32>} : memref<2x128xf32, #tpu.memory_space<vmem>>, vector<2x128xf32>,
    %c6_327 = arith.constant 6 : index
    %c0_328 = arith.constant 0 : index
    %c0_329 = arith.constant 0 : index
    %585 = vector.load %arg5[%c6_327, %c0_328, %c0_329] : memref<8x2x128xf32, #tpu.memory_space<vmem>>, vector<1x2x128xf32>
    %586 = vector.shape_cast %585 : vector<1x2x128xf32> to vector<2x128xf32>
    %587 = vector.shape_cast %582 : vector<2x128xf32> to vector<1x2x128xf32>
    tpu.vector_store %arg5[%c6_327, %c0_328, %c0_329], %587 {strides = array<i32>} : memref<8x2x128xf32, #tpu.memory_space<vmem>>, vector<1x2x128xf32>,
    %c1_330 = arith.constant 1 : index
    %c0_331 = arith.constant 0 : index
    %c0_332 = arith.constant 0 : index
    %588 = vector.load %arg2[%c1_330, %c0_331, %c0_332] : memref<8x2x1024xf32, #tpu.memory_space<vmem>>, vector<1x2x1024xf32>
    %589 = vector.shape_cast %588 : vector<1x2x1024xf32> to vector<2x1024xf32>
    %590 = vector.extract_strided_slice %589 {offsets = [0, 512], sizes = [2, 512], strides = [1, 1]} : vector<2x1024xf32> to vector<2x512xf32>
    %c0_333 = arith.constant 0 : index
    %c0_334 = arith.constant 0 : index
    %591 = vector.load %arg9[%c0_333, %c0_334] : memref<2x128xf32, #tpu.memory_space<vmem>>, vector<2x128xf32>
    %592 = arith.truncf %591 : vector<2x128xf32> to vector<2x128xbf16>
    %c0_335 = arith.constant 0 : index
    %c0_336 = arith.constant 0 : index
    %593 = vector.load %arg4[%c0_335, %c0_336] : memref<128x512xbf16, #tpu.memory_space<vmem>>, vector<128x512xbf16>
    %cst_337 = arith.constant dense<0.000000e+00> : vector<2x512xf32>
    %594 = tpu.matmul %592, %593, %cst_337 {dimension_numbers = #tpu.dot_dimension_numbers<[1], [0], [0], [1], [0, 0, 1, 1], [], []>} : vector<2x128xbf16>, vector<128x512xbf16>, vector<2x512xf32> -> vector<2x512xf32>
    %595 = arith.addf %590, %594 : vector<2x512xf32>
    %c0_338 = arith.constant 0 : index
    %c0_339 = arith.constant 0 : index
    %596 = vector.load %arg10[%c0_338, %c0_339] : memref<2x128xf32, #tpu.memory_space<vmem>>, vector<2x128xf32>
    %597 = vector.extract_strided_slice %595 {offsets = [0, 0], sizes = [2, 128], strides = [1, 1]} : vector<2x512xf32> to vector<2x128xf32>
    %cst_340 = arith.constant 5.000000e-01 : f32
    %598 = vector.broadcast %cst_340 : f32 to vector<2x128xf32>
    %599 = arith.mulf %598, %597 : vector<2x128xf32>
    %600 = math.tanh %599 : vector<2x128xf32>
    %cst_341 = arith.constant 5.000000e-01 : f32
    %601 = vector.broadcast %cst_341 : f32 to vector<2x128xf32>
    %602 = arith.mulf %601, %600 : vector<2x128xf32>
    %cst_342 = arith.constant 5.000000e-01 : f32
    %603 = vector.broadcast %cst_342 : f32 to vector<2x128xf32>
    %604 = arith.addf %602, %603 : vector<2x128xf32>
    %605 = vector.extract_strided_slice %595 {offsets = [0, 128], sizes = [2, 128], strides = [1, 1]} : vector<2x512xf32> to vector<2x128xf32>
    %cst_343 = arith.constant 5.000000e-01 : f32
    %606 = vector.broadcast %cst_343 : f32 to vector<2x128xf32>
    %607 = arith.mulf %606, %605 : vector<2x128xf32>
    %608 = math.tanh %607 : vector<2x128xf32>
    %cst_344 = arith.constant 5.000000e-01 : f32
    %609 = vector.broadcast %cst_344 : f32 to vector<2x128xf32>
    %610 = arith.mulf %609, %608 : vector<2x128xf32>
    %cst_345 = arith.constant 5.000000e-01 : f32
    %611 = vector.broadcast %cst_345 : f32 to vector<2x128xf32>
    %612 = arith.addf %610, %611 : vector<2x128xf32>
    %613 = vector.extract_strided_slice %595 {offsets = [0, 256], sizes = [2, 128], strides = [1, 1]} : vector<2x512xf32> to vector<2x128xf32>
    %614 = math.tanh %613 : vector<2x128xf32>
    %615 = vector.extract_strided_slice %595 {offsets = [0, 384], sizes = [2, 128], strides = [1, 1]} : vector<2x512xf32> to vector<2x128xf32>
    %cst_346 = arith.constant 5.000000e-01 : f32
    %616 = vector.broadcast %cst_346 : f32 to vector<2x128xf32>
    %617 = arith.mulf %616, %615 : vector<2x128xf32>
    %618 = math.tanh %617 : vector<2x128xf32>
    %cst_347 = arith.constant 5.000000e-01 : f32
    %619 = vector.broadcast %cst_347 : f32 to vector<2x128xf32>
    %620 = arith.mulf %619, %618 : vector<2x128xf32>
    %cst_348 = arith.constant 5.000000e-01 : f32
    %621 = vector.broadcast %cst_348 : f32 to vector<2x128xf32>
    %622 = arith.addf %620, %621 : vector<2x128xf32>
    %623 = arith.mulf %612, %596 : vector<2x128xf32>
    %624 = arith.mulf %604, %614 : vector<2x128xf32>
    %625 = arith.addf %623, %624 : vector<2x128xf32>
    %626 = math.tanh %625 : vector<2x128xf32>
    %627 = arith.mulf %622, %626 : vector<2x128xf32>
    %c0_349 = arith.constant 0 : index
    %c0_350 = arith.constant 0 : index
    %628 = vector.load %arg9[%c0_349, %c0_350] : memref<2x128xf32, #tpu.memory_space<vmem>>, vector<2x128xf32>
    tpu.vector_store %arg9[%c0_349, %c0_350], %627 {strides = array<i32>} : memref<2x128xf32, #tpu.memory_space<vmem>>, vector<2x128xf32>,
    %c0_351 = arith.constant 0 : index
    %c0_352 = arith.constant 0 : index
    %629 = vector.load %arg10[%c0_351, %c0_352] : memref<2x128xf32, #tpu.memory_space<vmem>>, vector<2x128xf32>
    tpu.vector_store %arg10[%c0_351, %c0_352], %625 {strides = array<i32>} : memref<2x128xf32, #tpu.memory_space<vmem>>, vector<2x128xf32>,
    %c1_353 = arith.constant 1 : index
    %c0_354 = arith.constant 0 : index
    %c0_355 = arith.constant 0 : index
    %630 = vector.load %arg6[%c1_353, %c0_354, %c0_355] : memref<8x2x128xf32, #tpu.memory_space<vmem>>, vector<1x2x128xf32>
    %631 = vector.shape_cast %630 : vector<1x2x128xf32> to vector<2x128xf32>
    %632 = vector.shape_cast %627 : vector<2x128xf32> to vector<1x2x128xf32>
    tpu.vector_store %arg6[%c1_353, %c0_354, %c0_355], %632 {strides = array<i32>} : memref<8x2x128xf32, #tpu.memory_space<vmem>>, vector<1x2x128xf32>,
    %c7_356 = arith.constant 7 : index
    %c0_357 = arith.constant 0 : index
    %c0_358 = arith.constant 0 : index
    %633 = vector.load %arg1[%c7_356, %c0_357, %c0_358] : memref<8x2x1024xf32, #tpu.memory_space<vmem>>, vector<1x2x1024xf32>
    %634 = vector.shape_cast %633 : vector<1x2x1024xf32> to vector<2x1024xf32>
    %635 = vector.extract_strided_slice %634 {offsets = [0, 0], sizes = [2, 512], strides = [1, 1]} : vector<2x1024xf32> to vector<2x512xf32>
    %c0_359 = arith.constant 0 : index
    %c0_360 = arith.constant 0 : index
    %636 = vector.load %arg7[%c0_359, %c0_360] : memref<2x128xf32, #tpu.memory_space<vmem>>, vector<2x128xf32>
    %637 = arith.truncf %636 : vector<2x128xf32> to vector<2x128xbf16>
    %c0_361 = arith.constant 0 : index
    %c0_362 = arith.constant 0 : index
    %638 = vector.load %arg3[%c0_361, %c0_362] : memref<128x512xbf16, #tpu.memory_space<vmem>>, vector<128x512xbf16>
    %cst_363 = arith.constant dense<0.000000e+00> : vector<2x512xf32>
    %639 = tpu.matmul %637, %638, %cst_363 {dimension_numbers = #tpu.dot_dimension_numbers<[1], [0], [0], [1], [0, 0, 1, 1], [], []>} : vector<2x128xbf16>, vector<128x512xbf16>, vector<2x512xf32> -> vector<2x512xf32>
    %640 = arith.addf %635, %639 : vector<2x512xf32>
    %c0_364 = arith.constant 0 : index
    %c0_365 = arith.constant 0 : index
    %641 = vector.load %arg8[%c0_364, %c0_365] : memref<2x128xf32, #tpu.memory_space<vmem>>, vector<2x128xf32>
    %642 = vector.extract_strided_slice %640 {offsets = [0, 0], sizes = [2, 128], strides = [1, 1]} : vector<2x512xf32> to vector<2x128xf32>
    %cst_366 = arith.constant 5.000000e-01 : f32
    %643 = vector.broadcast %cst_366 : f32 to vector<2x128xf32>
    %644 = arith.mulf %643, %642 : vector<2x128xf32>
    %645 = math.tanh %644 : vector<2x128xf32>
    %cst_367 = arith.constant 5.000000e-01 : f32
    %646 = vector.broadcast %cst_367 : f32 to vector<2x128xf32>
    %647 = arith.mulf %646, %645 : vector<2x128xf32>
    %cst_368 = arith.constant 5.000000e-01 : f32
    %648 = vector.broadcast %cst_368 : f32 to vector<2x128xf32>
    %649 = arith.addf %647, %648 : vector<2x128xf32>
    %650 = vector.extract_strided_slice %640 {offsets = [0, 128], sizes = [2, 128], strides = [1, 1]} : vector<2x512xf32> to vector<2x128xf32>
    %cst_369 = arith.constant 5.000000e-01 : f32
    %651 = vector.broadcast %cst_369 : f32 to vector<2x128xf32>
    %652 = arith.mulf %651, %650 : vector<2x128xf32>
    %653 = math.tanh %652 : vector<2x128xf32>
    %cst_370 = arith.constant 5.000000e-01 : f32
    %654 = vector.broadcast %cst_370 : f32 to vector<2x128xf32>
    %655 = arith.mulf %654, %653 : vector<2x128xf32>
    %cst_371 = arith.constant 5.000000e-01 : f32
    %656 = vector.broadcast %cst_371 : f32 to vector<2x128xf32>
    %657 = arith.addf %655, %656 : vector<2x128xf32>
    %658 = vector.extract_strided_slice %640 {offsets = [0, 256], sizes = [2, 128], strides = [1, 1]} : vector<2x512xf32> to vector<2x128xf32>
    %659 = math.tanh %658 : vector<2x128xf32>
    %660 = vector.extract_strided_slice %640 {offsets = [0, 384], sizes = [2, 128], strides = [1, 1]} : vector<2x512xf32> to vector<2x128xf32>
    %cst_372 = arith.constant 5.000000e-01 : f32
    %661 = vector.broadcast %cst_372 : f32 to vector<2x128xf32>
    %662 = arith.mulf %661, %660 : vector<2x128xf32>
    %663 = math.tanh %662 : vector<2x128xf32>
    %cst_373 = arith.constant 5.000000e-01 : f32
    %664 = vector.broadcast %cst_373 : f32 to vector<2x128xf32>
    %665 = arith.mulf %664, %663 : vector<2x128xf32>
    %cst_374 = arith.constant 5.000000e-01 : f32
    %666 = vector.broadcast %cst_374 : f32 to vector<2x128xf32>
    %667 = arith.addf %665, %666 : vector<2x128xf32>
    %668 = arith.mulf %657, %641 : vector<2x128xf32>
    %669 = arith.mulf %649, %659 : vector<2x128xf32>
    %670 = arith.addf %668, %669 : vector<2x128xf32>
    %671 = math.tanh %670 : vector<2x128xf32>
    %672 = arith.mulf %667, %671 : vector<2x128xf32>
    %c0_375 = arith.constant 0 : index
    %c0_376 = arith.constant 0 : index
    %673 = vector.load %arg7[%c0_375, %c0_376] : memref<2x128xf32, #tpu.memory_space<vmem>>, vector<2x128xf32>
    tpu.vector_store %arg7[%c0_375, %c0_376], %672 {strides = array<i32>} : memref<2x128xf32, #tpu.memory_space<vmem>>, vector<2x128xf32>,
    %c0_377 = arith.constant 0 : index
    %c0_378 = arith.constant 0 : index
    %674 = vector.load %arg8[%c0_377, %c0_378] : memref<2x128xf32, #tpu.memory_space<vmem>>, vector<2x128xf32>
    tpu.vector_store %arg8[%c0_377, %c0_378], %670 {strides = array<i32>} : memref<2x128xf32, #tpu.memory_space<vmem>>, vector<2x128xf32>,
    %c7_379 = arith.constant 7 : index
    %c0_380 = arith.constant 0 : index
    %c0_381 = arith.constant 0 : index
    %675 = vector.load %arg5[%c7_379, %c0_380, %c0_381] : memref<8x2x128xf32, #tpu.memory_space<vmem>>, vector<1x2x128xf32>
    %676 = vector.shape_cast %675 : vector<1x2x128xf32> to vector<2x128xf32>
    %677 = vector.shape_cast %672 : vector<2x128xf32> to vector<1x2x128xf32>
    tpu.vector_store %arg5[%c7_379, %c0_380, %c0_381], %677 {strides = array<i32>} : memref<8x2x128xf32, #tpu.memory_space<vmem>>, vector<1x2x128xf32>,
    %c0_382 = arith.constant 0 : index
    %c0_383 = arith.constant 0 : index
    %c0_384 = arith.constant 0 : index
    %678 = vector.load %arg2[%c0_382, %c0_383, %c0_384] : memref<8x2x1024xf32, #tpu.memory_space<vmem>>, vector<1x2x1024xf32>
    %679 = vector.shape_cast %678 : vector<1x2x1024xf32> to vector<2x1024xf32>
    %680 = vector.extract_strided_slice %679 {offsets = [0, 512], sizes = [2, 512], strides = [1, 1]} : vector<2x1024xf32> to vector<2x512xf32>
    %c0_385 = arith.constant 0 : index
    %c0_386 = arith.constant 0 : index
    %681 = vector.load %arg9[%c0_385, %c0_386] : memref<2x128xf32, #tpu.memory_space<vmem>>, vector<2x128xf32>
    %682 = arith.truncf %681 : vector<2x128xf32> to vector<2x128xbf16>
    %c0_387 = arith.constant 0 : index
    %c0_388 = arith.constant 0 : index
    %683 = vector.load %arg4[%c0_387, %c0_388] : memref<128x512xbf16, #tpu.memory_space<vmem>>, vector<128x512xbf16>
    %cst_389 = arith.constant dense<0.000000e+00> : vector<2x512xf32>
    %684 = tpu.matmul %682, %683, %cst_389 {dimension_numbers = #tpu.dot_dimension_numbers<[1], [0], [0], [1], [0, 0, 1, 1], [], []>} : vector<2x128xbf16>, vector<128x512xbf16>, vector<2x512xf32> -> vector<2x512xf32>
    %685 = arith.addf %680, %684 : vector<2x512xf32>
    %c0_390 = arith.constant 0 : index
    %c0_391 = arith.constant 0 : index
    %686 = vector.load %arg10[%c0_390, %c0_391] : memref<2x128xf32, #tpu.memory_space<vmem>>, vector<2x128xf32>
    %687 = vector.extract_strided_slice %685 {offsets = [0, 0], sizes = [2, 128], strides = [1, 1]} : vector<2x512xf32> to vector<2x128xf32>
    %cst_392 = arith.constant 5.000000e-01 : f32
    %688 = vector.broadcast %cst_392 : f32 to vector<2x128xf32>
    %689 = arith.mulf %688, %687 : vector<2x128xf32>
    %690 = math.tanh %689 : vector<2x128xf32>
    %cst_393 = arith.constant 5.000000e-01 : f32
    %691 = vector.broadcast %cst_393 : f32 to vector<2x128xf32>
    %692 = arith.mulf %691, %690 : vector<2x128xf32>
    %cst_394 = arith.constant 5.000000e-01 : f32
    %693 = vector.broadcast %cst_394 : f32 to vector<2x128xf32>
    %694 = arith.addf %692, %693 : vector<2x128xf32>
    %695 = vector.extract_strided_slice %685 {offsets = [0, 128], sizes = [2, 128], strides = [1, 1]} : vector<2x512xf32> to vector<2x128xf32>
    %cst_395 = arith.constant 5.000000e-01 : f32
    %696 = vector.broadcast %cst_395 : f32 to vector<2x128xf32>
    %697 = arith.mulf %696, %695 : vector<2x128xf32>
    %698 = math.tanh %697 : vector<2x128xf32>
    %cst_396 = arith.constant 5.000000e-01 : f32
    %699 = vector.broadcast %cst_396 : f32 to vector<2x128xf32>
    %700 = arith.mulf %699, %698 : vector<2x128xf32>
    %cst_397 = arith.constant 5.000000e-01 : f32
    %701 = vector.broadcast %cst_397 : f32 to vector<2x128xf32>
    %702 = arith.addf %700, %701 : vector<2x128xf32>
    %703 = vector.extract_strided_slice %685 {offsets = [0, 256], sizes = [2, 128], strides = [1, 1]} : vector<2x512xf32> to vector<2x128xf32>
    %704 = math.tanh %703 : vector<2x128xf32>
    %705 = vector.extract_strided_slice %685 {offsets = [0, 384], sizes = [2, 128], strides = [1, 1]} : vector<2x512xf32> to vector<2x128xf32>
    %cst_398 = arith.constant 5.000000e-01 : f32
    %706 = vector.broadcast %cst_398 : f32 to vector<2x128xf32>
    %707 = arith.mulf %706, %705 : vector<2x128xf32>
    %708 = math.tanh %707 : vector<2x128xf32>
    %cst_399 = arith.constant 5.000000e-01 : f32
    %709 = vector.broadcast %cst_399 : f32 to vector<2x128xf32>
    %710 = arith.mulf %709, %708 : vector<2x128xf32>
    %cst_400 = arith.constant 5.000000e-01 : f32
    %711 = vector.broadcast %cst_400 : f32 to vector<2x128xf32>
    %712 = arith.addf %710, %711 : vector<2x128xf32>
    %713 = arith.mulf %702, %686 : vector<2x128xf32>
    %714 = arith.mulf %694, %704 : vector<2x128xf32>
    %715 = arith.addf %713, %714 : vector<2x128xf32>
    %716 = math.tanh %715 : vector<2x128xf32>
    %717 = arith.mulf %712, %716 : vector<2x128xf32>
    %c0_401 = arith.constant 0 : index
    %c0_402 = arith.constant 0 : index
    %718 = vector.load %arg9[%c0_401, %c0_402] : memref<2x128xf32, #tpu.memory_space<vmem>>, vector<2x128xf32>
    tpu.vector_store %arg9[%c0_401, %c0_402], %717 {strides = array<i32>} : memref<2x128xf32, #tpu.memory_space<vmem>>, vector<2x128xf32>,
    %c0_403 = arith.constant 0 : index
    %c0_404 = arith.constant 0 : index
    %719 = vector.load %arg10[%c0_403, %c0_404] : memref<2x128xf32, #tpu.memory_space<vmem>>, vector<2x128xf32>
    tpu.vector_store %arg10[%c0_403, %c0_404], %715 {strides = array<i32>} : memref<2x128xf32, #tpu.memory_space<vmem>>, vector<2x128xf32>,
    %c0_405 = arith.constant 0 : index
    %c0_406 = arith.constant 0 : index
    %c0_407 = arith.constant 0 : index
    %720 = vector.load %arg6[%c0_405, %c0_406, %c0_407] : memref<8x2x128xf32, #tpu.memory_space<vmem>>, vector<1x2x128xf32>
    %721 = vector.shape_cast %720 : vector<1x2x128xf32> to vector<2x128xf32>
    %722 = vector.shape_cast %717 : vector<2x128xf32> to vector<1x2x128xf32>
    tpu.vector_store %arg6[%c0_405, %c0_406, %c0_407], %722 {strides = array<i32>} : memref<8x2x128xf32, #tpu.memory_space<vmem>>, vector<1x2x128xf32>,
    return
  }
  func.func @transform_0(%arg0: i32) -> (i32, i32, i32) {
    %c0_i32 = arith.constant 0 : i32
    %c0_i32_0 = arith.constant 0 : i32
    %c0_i32_1 = arith.constant 0 : i32
    return %arg0, %c0_i32, %c0_i32_0 : i32, i32, i32
  }
  func.func @transform_1(%arg0: i32) -> (i32, i32, i32) {
    %c0_i32 = arith.constant 0 : i32
    %0 = arith.subi %c0_i32, %arg0 : i32
    %c0_i32_0 = arith.constant 0 : i32
    %c0_i32_1 = arith.constant 0 : i32
    %c0_i32_2 = arith.constant 0 : i32
    return %0, %c0_i32_0, %c0_i32_1 : i32, i32, i32
  }
  func.func @transform_2(%arg0: i32) -> (i32, i32) {
    %c0_i32 = arith.constant 0 : i32
    %c0_i32_0 = arith.constant 0 : i32
    %c0_i32_1 = arith.constant 0 : i32
    return %c0_i32, %c0_i32_0 : i32, i32
  }
  func.func @transform_3(%arg0: i32) -> (i32, i32) {
    %c0_i32 = arith.constant 0 : i32
    %c0_i32_0 = arith.constant 0 : i32
    %c0_i32_1 = arith.constant 0 : i32
    return %c0_i32, %c0_i32_0 : i32, i32
  }
  func.func @transform_4(%arg0: i32) -> (i32, i32, i32) {
    %c0_i32 = arith.constant 0 : i32
    %c0_i32_0 = arith.constant 0 : i32
    %c0_i32_1 = arith.constant 0 : i32
    return %arg0, %c0_i32, %c0_i32_0 : i32, i32, i32
  }
  func.func @transform_5(%arg0: i32) -> (i32, i32, i32) {
    %c0_i32 = arith.constant 0 : i32
    %0 = arith.subi %c0_i32, %arg0 : i32
    %c0_i32_0 = arith.constant 0 : i32
    %c0_i32_1 = arith.constant 0 : i32
    %c0_i32_2 = arith.constant 0 : i32
    return %0, %c0_i32_0, %c0_i32_1 : i32, i32, i32
  }
}

module attributes {stable_mosaic.version = 11 : i64} {
  func.func @_mm_bias_kernel(%arg0: i32, %arg1: memref<16x256xbf16, #tpu.memory_space<vmem>>, %arg2: memref<256x128xbf16, #tpu.memory_space<vmem>>, %arg3: memref<1x128xf32, #tpu.memory_space<vmem>>, %arg4: memref<16x128xf32, #tpu.memory_space<vmem>>) attributes {dimension_semantics = [#tpu.dimension_semantics<parallel>], iteration_bounds = array<i64: 1>, scalar_prefetch = 0 : i64, scratch_operands = 0 : i64, tpu.core_type = #tpu.core_type<tc>, window_params = [{transform_indices = @transform_0, window_bounds = array<i64: 16, 256>}, {pipeline_mode = #tpu.pipeline_mode<synchronous>, transform_indices = @transform_1, window_bounds = array<i64: 256, 128>}, {pipeline_mode = #tpu.pipeline_mode<synchronous>, transform_indices = @transform_2, window_bounds = array<i64: 1, 128>}, {transform_indices = @transform_3, window_bounds = array<i64: 16, 128>}]} {
    %c0 = arith.constant 0 : index
    %c0_0 = arith.constant 0 : index
    %0 = vector.load %arg1[%c0, %c0_0] : memref<16x256xbf16, #tpu.memory_space<vmem>>, vector<16x256xbf16>
    %c0_1 = arith.constant 0 : index
    %c0_2 = arith.constant 0 : index
    %1 = vector.load %arg2[%c0_1, %c0_2] : memref<256x128xbf16, #tpu.memory_space<vmem>>, vector<256x128xbf16>
    %cst = arith.constant dense<0.000000e+00> : vector<16x128xf32>
    %2 = tpu.matmul %0, %1, %cst {dimension_numbers = #tpu.dot_dimension_numbers<[1], [0], [0], [1], [0, 0, 1, 1], [], []>} : vector<16x256xbf16>, vector<256x128xbf16>, vector<16x128xf32> -> vector<16x128xf32>
    %c0_3 = arith.constant 0 : index
    %c0_4 = arith.constant 0 : index
    %3 = vector.load %arg3[%c0_3, %c0_4] : memref<1x128xf32, #tpu.memory_space<vmem>>, vector<1x128xf32>
    %4 = vector.broadcast %3 : vector<1x128xf32> to vector<16x128xf32>
    %5 = arith.addf %2, %4 : vector<16x128xf32>
    %c0_5 = arith.constant 0 : index
    %c0_6 = arith.constant 0 : index
    %6 = vector.load %arg4[%c0_5, %c0_6] : memref<16x128xf32, #tpu.memory_space<vmem>>, vector<16x128xf32>
    tpu.vector_store %arg4[%c0_5, %c0_6], %5 {strides = array<i32>} : memref<16x128xf32, #tpu.memory_space<vmem>>, vector<16x128xf32>,
    return
  }
  func.func @transform_0(%arg0: i32) -> (i32, i32) {
    %c0_i32 = arith.constant 0 : i32
    %c0_i32_0 = arith.constant 0 : i32
    return %arg0, %c0_i32 : i32, i32
  }
  func.func @transform_1(%arg0: i32) -> (i32, i32) {
    %c0_i32 = arith.constant 0 : i32
    %c0_i32_0 = arith.constant 0 : i32
    %c0_i32_1 = arith.constant 0 : i32
    return %c0_i32, %c0_i32_0 : i32, i32
  }
  func.func @transform_2(%arg0: i32) -> (i32, i32) {
    %c0_i32 = arith.constant 0 : i32
    %c0_i32_0 = arith.constant 0 : i32
    %c0_i32_1 = arith.constant 0 : i32
    return %c0_i32, %c0_i32_0 : i32, i32
  }
  func.func @transform_3(%arg0: i32) -> (i32, i32) {
    %c0_i32 = arith.constant 0 : i32
    %c0_i32_0 = arith.constant 0 : i32
    return %arg0, %c0_i32 : i32, i32
  }
}

</mosaic_0001>

<bundles_post_ra>
// kernel: bilstm_char_forward.4
= control target key start
LH: loop header
LB: loop body
LE: loop exit
PB: predicated region body
PF: predicated region fallthrough
CT: control target
= control target key end

     0   :  { %v3692_v1 = vmov 0   ;;  %v3693_v28 = vmov 0.0   ;;  %vm3694_vm0 = vmmov 0   ;;  %s4629_s1 = inlined_call_operand.vmem [shape: bf16[128,384], index: 1, kind: input, shape index: {}]   ;;  %s4630_s0 = inlined_call_operand.vmem [shape: bf16[32,16,128], index: 0, kind: input, shape index: {}]   ;;  %s4631_s3 = inlined_call_operand.vmem [shape: bf16[13,128,128], index: 3, kind: input, shape index: {}]   ;;  %s4632_s2 = inlined_call_operand.vmem [shape: f32[1,128], index: 2, kind: input, shape index: {}]   ;;  %s4633_s4 = inlined_call_operand.vmem [shape: f32[1,128], index: 4, kind: input, shape index: {}]   ;;  %s4634_s5 = inlined_call_operand.vmem [shape: f32[16,128], index: 5, kind: output, shape index: {}]  }
   0x1   :  { %v3523_v0 = vld [vmem:[%s4629_s1 + $0x4] ss:$12 sps:$4 sm:$0xff]   ;;  %469 = vmatprep.mubr.bf16.mxu0 %v3692_v1  ;;  %v3525_v2 = vld [vmem:[%s4629_s1] ss:$12 sps:$4 sm:$0xff]   ;;  %v3526_v3 = vld [vmem:[%s4629_s1 + $0x8] ss:$12 sps:$4 sm:$0xff]  }
   0x2   :  { %437 = vmatprep.subr.bf16.mxu0 %v3523_v0  ;;  %v3527_v4 = vld [vmem:[%s4629_s1 + $0x1c] ss:$12 sps:$4 sm:$0xff]   ;;  %v3529_v5 = vld [vmem:[%s4629_s1 + $0x18] ss:$12 sps:$4 sm:$0xff]   ;;  %3180 = vmatprep.subr.bf16.mxu1 %v3526_v3  ;;  %v3530_v6 = vld [vmem:[%s4629_s1 + $0x20] ss:$12 sps:$4 sm:$0xff]  }
   0x3   :  { %438 = vmatpush1.bf16.msra.mxu0 %v3525_v2  ;;  %3181 = vmatpush3.bf16.msra.mxu1 %v3526_v3  ;;  %v3531_v7 = vld [vmem:[%s4629_s1 + $0x34] ss:$12 sps:$4 sm:$0xff]   ;;  %v3534_v8 = vld [vmem:[%s4629_s1 + $0x38] ss:$12 sps:$4 sm:$0xff]   ;;  %v3533_v9 = vld [vmem:[%s4629_s1 + $0x30] ss:$12 sps:$4 sm:$0xff]  }
   0x4   :  { %439 = vmatprep.subr.bf16.mxu0 %v3527_v4  ;;  %3182 = vmatprep.subr.bf16.mxu1 %v3530_v6  ;;  %v3535_v10 = vld [vmem:[%s4629_s1 + $0x4c] ss:$12 sps:$4 sm:$0xff]   ;;  %v3538_v11 = vld [vmem:[%s4629_s1 + $0x50] ss:$12 sps:$4 sm:$0xff]   ;;  %v3537_v12 = vld [vmem:[%s4629_s1 + $0x48] ss:$12 sps:$4 sm:$0xff]  }
   0x5   :  { %v3539_v13 = vld [vmem:[%s4629_s1 + $0x64] ss:$12 sps:$4 sm:$0xff]   ;;  %v3542_v14 = vld [vmem:[%s4629_s1 + $0x68] ss:$12 sps:$4 sm:$0xff]   ;;  %v3541_v15 = vld [vmem:[%s4629_s1 + $0x60] ss:$12 sps:$4 sm:$0xff]  }
   0x6   :  { %v3543_v16 = vld [vmem:[%s4629_s1 + $0x7c] ss:$12 sps:$4 sm:$0xff]   ;;  %v3545_v17 = vld [vmem:[%s4629_s1 + $0x78] ss:$12 sps:$4 sm:$0xff]   ;;  %v3546_v18 = vld [vmem:[%s4629_s1 + $0x80] ss:$12 sps:$4 sm:$0xff]  }
   0x7   :  { %440 = vmatpush1.bf16.msra.mxu0 %v3529_v5  ;;  %3183 = vmatpush3.bf16.msra.mxu1 %v3530_v6  ;;  %v3555_v19 = vld [vmem:[%s4630_s0] sm:$0xff]   ;;  %v3549_v22 = vld [vmem:[%s4629_s1 + $0x90] ss:$12 sps:$4 sm:$0xff]   ;;  %v3551_v23 = vld [vmem:[%s4629_s1 + $0xac] ss:$12 sps:$4 sm:$0xff]  }
   0x8   :  { %441 = vmatprep.subr.bf16.mxu0 %v3531_v7  ;;  %3184 = vmatprep.subr.bf16.mxu1 %v3534_v8  ;;  %v3547_v20 = vld [vmem:[%s4629_s1 + $0x94] ss:$12 sps:$4 sm:$0xff]   ;;  %v3550_v21 = vld [vmem:[%s4629_s1 + $0x98] ss:$12 sps:$4 sm:$0xff]   ;;  %v3554_v24 = vld [vmem:[%s4629_s1 + $0xb0] ss:$12 sps:$4 sm:$0xff]  }
   0x9   :  { %3196 = vmatprep.mubr.bf16.mxu1 %v3555_v19  ;;  %v3553_v25 = vld [vmem:[%s4629_s1 + $0xa8] ss:$12 sps:$4 sm:$0xff]   ;;  %v3567_v26 = vld [vmem:[%s4631_s3 + $0x100] sm:$0xff]   ;;  %v3558_v32 = vld [vmem:[%s4630_s0 + $0x18] sm:$0xff]  }
   0xa   :  { %v3556_v27 = vld [vmem:[%s4630_s0 + $0x8] sm:$0xff]   ;;  %v3557_v29 = vld [vmem:[%s4630_s0 + $0x10] sm:$0xff]   ;;  %v3572_v30 = vld [vmem:[%s4631_s3 + $0x40] sm:$0xff]  }
   0xb   :  { %442 = vmatpush1.bf16.msra.mxu0 %v3533_v9  ;;  %3185 = vmatpush3.bf16.msra.mxu1 %v3534_v8  ;;  %v3573_v31 = vld [vmem:[%s4631_s3 + $0x108] sm:$0xff]   ;;  %v3559_v34 = vld [vmem:[%s4630_s0 + $0x20] sm:$0xff]   ;;  %v3561_v36 = vld [vmem:[%s4630_s0 + $0x30] sm:$0xff]  }
   0xc   :  { %443 = vmatprep.subr.bf16.mxu0 %v3535_v10  ;;  %3186 = vmatprep.subr.bf16.mxu1 %v3538_v11  ;;  %v3575_v33 = vld [vmem:[%s4631_s3 + $0x48] sm:$0xff]   ;;  %v3579_v37 = vld [vmem:[%s4631_s3 + $0x50] sm:$0xff]   ;;  %v3562_v38 = vld [vmem:[%s4630_s0 + $0x38] sm:$0xff]  }
   0xd   :  { %v3560_v35 = vld [vmem:[%s4630_s0 + $0x28] sm:$0xff]   ;;  %v3580_v39 = vld [vmem:[%s4631_s3 + $0x110] sm:$0xff]   ;;  %v3563_v40 = vld [vmem:[%s4630_s0 + $0x40] sm:$0xff]  }
   0xe   :  { %v3564_v41 = vld [vmem:[%s4630_s0 + $0x48] sm:$0xff]   ;;  %v3582_v42 = vld [vmem:[%s4631_s3 + $0x58] sm:$0xff]   ;;  %v3565_v43 = vld [vmem:[%s4630_s0 + $0x50] sm:$0xff]  }
   0xf   :  { %444 = vmatpush1.bf16.msra.mxu0 %v3537_v12  ;;  %3187 = vmatpush3.bf16.msra.mxu1 %v3538_v11  ;;  %v3566_v44 = vld [vmem:[%s4630_s0 + $0x58] sm:$0xff]   ;;  %v3568_v45 = vld [vmem:[%s4630_s0 + $0x60] sm:$0xff]   ;;  %v3569_v46 = vld [vmem:[%s4630_s0 + $0x68] sm:$0xff]  }
  0x10   :  { %445 = vmatprep.subr.bf16.mxu0 %v3539_v13  ;;  %3188 = vmatprep.subr.bf16.mxu1 %v3542_v14  ;;  %v3570_v47 = vld [vmem:[%s4630_s0 + $0x70] sm:$0xff]   ;;  %v3586_v48 = vld [vmem:[%s4631_s3 + $0x60] sm:$0xff]   ;;  %v3886_v49 = vld [vmem:[%s4630_s0 + $0x78] sm:$0xff]  }
  0x11   :  { %v3587_v50 = vld [vmem:[%s4631_s3 + $0x118] sm:$0xff]   ;;  %v3574_v51 = vld [vmem:[%s4630_s0 + $0x80] sm:$0xff]   ;;  %v3901_v52 = vld [vmem:[%s4630_s0 + $0x88] sm:$0xff]  }
  0x12   :  { %v3906_v53 = vld [vmem:[%s4630_s0 + $0x90] sm:$0xff]   ;;  %v3589_v54 = vld [vmem:[%s4631_s3 + $0x68] sm:$0xff]   ;;  %v3578_v55 = vld [vmem:[%s4630_s0 + $0x98] sm:$0xff]  }
  0x13   :  { %446 = vmatpush1.bf16.msra.mxu0 %v3541_v15  ;;  %3189 = vmatpush3.bf16.msra.mxu1 %v3542_v14  ;;  %v3581_v56 = vld [vmem:[%s4630_s0 + $0xa0] sm:$0xff]   ;;  %v3583_v57 = vld [vmem:[%s4630_s0 + $0xa8] sm:$0xff]   ;;  %v3584_v58 = vld [vmem:[%s4630_s0 + $0xb0] sm:$0xff]  }
  0x14   :  { %447 = vmatprep.subr.bf16.mxu0 %v3543_v16  ;;  %3190 = vmatprep.subr.bf16.mxu1 %v3546_v18  ;;  %v3585_v59 = vld [vmem:[%s4630_s0 + $0xb8] sm:$0xff]   ;;  %v3588_v60 = vld [vmem:[%s4630_s0 + $0xc0] sm:$0xff]   ;;  %v3591_v61 = vld [vmem:[%s4630_s0 + $0xd0] sm:$0xff]  }
  0x15   :  { %v3590_v62 = vld [vmem:[%s4630_s0 + $0xc8] sm:$0xff]   ;;  %v3593_v63 = vld [vmem:[%s4631_s3 + $0x70] sm:$0xff]   ;;  %v3594_v0 = vld [vmem:[%s4631_s3 + $0x120] sm:$0xff]  }
  0x16   :  { %v3953_v2 = vld [vmem:[%s4630_s0 + $0xd8] sm:$0xff]   ;;  %v3961_v3 = vld [vmem:[%s4630_s0 + $0xe0] sm:$0xff]   ;;  %v3967_v4 = vld [vmem:[%s4630_s0 + $0xe8] sm:$0xff]  }
  0x17   :  { %448 = vmatpush1.bf16.msra.mxu0 %v3545_v17  ;;  %3191 = vmatpush3.bf16.msra.mxu1 %v3546_v18  ;;  %v3597_v5 = vld [vmem:[%s4631_s3 + $0x78] sm:$0xff]   ;;  %v3977_v6 = vld [vmem:[%s4630_s0 + $0xf0] sm:$0xff]   ;;  %v3601_v8 = vld [vmem:[%s4631_s3 + $0x128] sm:$0xff]  }
  0x18   :  { %449 = vmatprep.subr.bf16.mxu0 %v3547_v20  ;;  %3192 = vmatprep.subr.bf16.mxu1 %v3550_v21  ;;  %v3983_v7 = vld [vmem:[%s4630_s0 + $0xf8] sm:$0xff]   ;;  %v3610_v9 = vld [vmem:[%s4631_s3 + $0x130] sm:$0xff]  }
  0x19   :  { %v3617_v10 = vld [vmem:[%s4631_s3 + $0x138] sm:$0xff]  }
  0x1b   :  { %450 = vmatpush1.bf16.msra.mxu0 %v3549_v22  ;;  %3193 = vmatpush3.bf16.msra.mxu1 %v3550_v21 }
  0x1c   :  { %451 = vmatprep.subr.bf16.mxu0 %v3551_v23  ;;  %3194 = vmatprep.subr.bf16.mxu1 %v3554_v24 }
  0x1f   :  { %452 = vmatpush1.bf16.msra.mxu0 %v3553_v25  ;;  %3195 = vmatpush3.bf16.msra.mxu1 %v3554_v24 }
  0x20   :  { %3340 = vmatprep.subr.bf16.mxu0 %v3693_v28  ;;  %3260 = vmatprep.subr.bf16.mxu1 %v3693_v28 }
  0x22   :  { %470 = vmatmul.mubr.bf16.vlgmr.msra.gmra.mrb[0].mxu0 %v3555_v19  ;;  %3197 = vmatmul.mubr.bf16.vlgmr.msra.gmra.mrb[0].mxu1 %v3556_v27 }
  0x23   :  { %479 = vmatprep.mubr.bf16.mxu0 %v3692_v1  ;;  %3341 = vmatpush3.bf16.msra.mxu0 %v3567_v26 }
  0x24   :  { %3342 = vmatprep.subr.bf16.mxu0 %v3693_v28  ;;  %3200 = vmatprep.mubr.bf16.mxu1 %v3557_v29 }
  0x25   :  { %3261 = vmatpush3.bf16.msra.mxu1 %v3572_v30 }
  0x26   :  { %3262 = vmatprep.subr.bf16.mxu1 %v3693_v28 }
  0x27   :  { %3343 = vmatpush3.bf16.msra.mxu0 %v3573_v31 }
  0x28   :  { %3344 = vmatprep.subr.bf16.mxu0 %v3693_v28 }
  0x29   :  { %3263 = vmatpush3.bf16.msra.mxu1 %v3575_v33 }
  0x2a   :  { %480 = vmatmul.mubr.bf16.gmra.mrb[4].mxu0 %v3556_v27  ;;  %3264 = vmatprep.subr.bf16.mxu1 %v3693_v28 }
  0x2b   :  { %489 = vmatprep.mubr.bf16.mxu0 %v3692_v1  ;;  %3201 = vmatmul.mubr.bf16.gmra.mrb[4].mxu1 %v3558_v32 }
  0x2c   :  { %3204 = vmatprep.mubr.bf16.mxu1 %v3559_v34  ;;  %3345 = vmatpush3.bf16.msra.mxu0 %v3580_v39 }
  0x2d   :  { %3265 = vmatpush3.bf16.msra.mxu1 %v3579_v37  ;;  %3346 = vmatprep.subr.bf16.mxu0 %v3693_v28 }
  0x2e   :  { %3266 = vmatprep.subr.bf16.mxu1 %v3693_v28 }
  0x30   :  { %3347 = vmatpush3.bf16.msra.mxu0 %v3587_v50 }
  0x31   :  { %3267 = vmatpush3.bf16.msra.mxu1 %v3582_v42  ;;  %3348 = vmatprep.subr.bf16.mxu0 %v3693_v28 }
  0x32   :  { %490 = vmatmul.mubr.bf16.gmra.mrb[8].mxu0 %v3557_v29  ;;  %3268 = vmatprep.subr.bf16.mxu1 %v3693_v28 }
  0x33   :  { %499 = vmatprep.mubr.bf16.mxu0 %v3692_v1  ;;  %3205 = vmatmul.mubr.bf16.gmra.mrb[8].mxu1 %v3560_v35 }
  0x34   :  { %3208 = vmatprep.mubr.bf16.mxu1 %v3561_v36  ;;  %3349 = vmatpush3.bf16.msra.mxu0 %v3594_v0 }
  0x35   :  { %3269 = vmatpush3.bf16.msra.mxu1 %v3586_v48  ;;  %3350 = vmatprep.subr.bf16.mxu0 %v3693_v28 }
  0x36   :  { %3270 = vmatprep.subr.bf16.mxu1 %v3693_v28 }
  0x38   :  { %3351 = vmatpush3.bf16.msra.mxu0 %v3601_v8 }
  0x39   :  { %3271 = vmatpush3.bf16.msra.mxu1 %v3589_v54  ;;  %3352 = vmatprep.subr.bf16.mxu0 %v3693_v28 }
  0x3a   :  { %500 = vmatmul.mubr.bf16.gmra.mrb[12].mxu0 %v3558_v32  ;;  %3272 = vmatprep.subr.bf16.mxu1 %v3693_v28 }
  0x3b   :  { %509 = vmatprep.mubr.bf16.mxu0 %v3692_v1  ;;  %3209 = vmatmul.mubr.bf16.gmra.mrb[12].mxu1 %v3562_v38 }
  0x3c   :  { %3212 = vmatprep.mubr.bf16.mxu1 %v3563_v40  ;;  %3353 = vmatpush3.bf16.msra.mxu0 %v3610_v9 }
  0x3d   :  { %3273 = vmatpush3.bf16.msra.mxu1 %v3593_v63  ;;  %3354 = vmatprep.subr.bf16.mxu0 %v3693_v28 }
  0x3e   :  { %3274 = vmatprep.subr.bf16.mxu1 %v3693_v28 }
  0x40   :  { %3355 = vmatpush3.bf16.msra.mxu0 %v3617_v10 }
  0x41   :  { %3275 = vmatpush3.bf16.msra.mxu1 %v3597_v5  ;;  %3380 = vmatprep.subr.bf16.mxu0 %v3693_v28 }
  0x42   :  { %510 = vmatmul.mubr.bf16.gmra.mrb[16].mxu0 %v3559_v34  ;;  %3280 = vmatprep.subr.bf16.mxu1 %v3693_v28 }
  0x43   :  { %519 = vmatprep.mubr.bf16.mxu0 %v3692_v1  ;;  %3213 = vmatmul.mubr.bf16.gmra.mrb[16].mxu1 %v3564_v41 }
  0x44   :  { %3216 = vmatprep.mubr.bf16.mxu1 %v3565_v43 }
  0x4a   :  { %520 = vmatmul.mubr.bf16.gmra.mrb[20].mxu0 %v3560_v35 }
  0x4b   :  { %529 = vmatprep.mubr.bf16.mxu0 %v3692_v1  ;;  %3217 = vmatmul.mubr.bf16.gmra.mrb[20].mxu1 %v3566_v44 }
  0x4c   :  { %3220 = vmatprep.mubr.bf16.mxu1 %v3568_v45 }
  0x52   :  { %530 = vmatmul.mubr.bf16.gmra.mrb[24].mxu0 %v3561_v36 }
  0x53   :  { %539 = vmatprep.mubr.bf16.mxu0 %v3692_v1  ;;  %3221 = vmatmul.mubr.bf16.gmra.mrb[24].mxu1 %v3569_v46 }
  0x54   :  { %3224 = vmatprep.mubr.bf16.mxu1 %v3570_v47 }
  0x5a   :  { %540 = vmatmul.mubr.bf16.gmra.mrb[28].mxu0 %v3562_v38 }
  0x5b   :  { %549 = vmatprep.mubr.bf16.mxu0 %v3692_v1  ;;  %3225 = vmatmul.mubr.bf16.gmra.mrb[28].mxu1 %v3886_v49 }
  0x5c   :  { %3228 = vmatprep.mubr.bf16.mxu1 %v3574_v51 }
  0x62   :  { %550 = vmatmul.mubr.bf16.gmra.mrb[32].mxu0 %v3563_v40 }
  0x63   :  { %559 = vmatprep.mubr.bf16.mxu0 %v3692_v1  ;;  %3229 = vmatmul.mubr.bf16.gmra.mrb[32].mxu1 %v3901_v52 }
  0x64   :  { %3232 = vmatprep.mubr.bf16.mxu1 %v3906_v53 }
  0x6a   :  { %560 = vmatmul.mubr.bf16.gmra.mrb[36].mxu0 %v3564_v41 }
  0x6b   :  { %569 = vmatprep.mubr.bf16.mxu0 %v3692_v1  ;;  %3233 = vmatmul.mubr.bf16.gmra.mrb[36].mxu1 %v3578_v55 }
  0x6c   :  { %3236 = vmatprep.mubr.bf16.mxu1 %v3581_v56 }
  0x72   :  { %570 = vmatmul.mubr.bf16.gmra.mrb[40].mxu0 %v3565_v43 }
  0x73   :  { %579 = vmatprep.mubr.bf16.mxu0 %v3692_v1  ;;  %3237 = vmatmul.mubr.bf16.gmra.mrb[40].mxu1 %v3583_v57 }
  0x74   :  { %3240 = vmatprep.mubr.bf16.mxu1 %v3584_v58 }
  0x7a   :  { %580 = vmatmul.mubr.bf16.gmra.mrb[44].mxu0 %v3566_v44 }
  0x7b   :  { %589 = vmatprep.mubr.bf16.mxu0 %v3692_v1  ;;  %3241 = vmatmul.mubr.bf16.gmra.mrb[44].mxu1 %v3585_v59 }
  0x7c   :  { %3244 = vmatprep.mubr.bf16.mxu1 %v3588_v60 }
  0x82   :  { %590 = vmatmul.mubr.bf16.gmra.mrb[48].mxu0 %v3568_v45 }
  0x83   :  { %599 = vmatprep.mubr.bf16.mxu0 %v3692_v1  ;;  %3245 = vmatmul.mubr.bf16.gmra.mrb[48].mxu1 %v3590_v62 }
  0x84   :  { %3248 = vmatprep.mubr.bf16.mxu1 %v3591_v61 }
  0x8a   :  { %600 = vmatmul.mubr.bf16.gmra.mrb[52].mxu0 %v3569_v46 }
  0x8b   :  { %609 = vmatprep.mubr.bf16.mxu0 %v3692_v1  ;;  %3249 = vmatmul.mubr.bf16.gmra.mrb[52].mxu1 %v3953_v2 }
  0x8c   :  { %3252 = vmatprep.mubr.bf16.mxu1 %v3961_v3 }
  0x92   :  { %610 = vmatmul.mubr.bf16.gmra.mrb[56].mxu0 %v3570_v47 }
  0x93   :  { %619 = vmatprep.mubr.bf16.mxu0 %v3692_v1  ;;  %3253 = vmatmul.mubr.bf16.gmra.mrb[56].mxu1 %v3967_v4 }
  0x94   :  { %3256 = vmatprep.mubr.bf16.mxu1 %v3977_v6 }
  0x9a   :  { %620 = vmatmul.mubr.bf16.gmra.mrb[60].mxu0 %v3886_v49 }
  0x9b   :  { %629 = vmatprep.mubr.bf16.mxu0 %v3692_v1  ;;  %3257 = vmatmul.mubr.bf16.gmra.mrb[60].mxu1 %v3983_v7 }
  0x9c   :  { %3276 = vmatprep.mubr.msk.bf16.mxu1 %vm3694_vm0, %v3693_v28 }
  0xa2   :  { %630 = vmatmul.mubr.bf16.gmra.mrb[64].mxu0 %v3574_v51  ;;  %v4025_v51 = vld [vmem:[%s4632_s2] ss:$0 sm:$0xff] }
  0xa3   :  { %639 = vmatprep.mubr.bf16.mxu0 %v3692_v1 }
  0xaa   :  { %640 = vmatmul.mubr.bf16.gmra.mrb[68].mxu0 %v3901_v52 }
  0xab   :  { %649 = vmatprep.mubr.bf16.mxu0 %v3692_v1 }
  0xb2   :  { %650 = vmatmul.mubr.bf16.gmra.mrb[72].mxu0 %v3906_v53 }
  0xb3   :  { %659 = vmatprep.mubr.bf16.mxu0 %v3692_v1 }
  0xba   :  { %660 = vmatmul.mubr.bf16.gmra.mrb[76].mxu0 %v3578_v55 }
  0xbb   :  { %669 = vmatprep.mubr.bf16.mxu0 %v3692_v1 }
  0xc2   :  { %670 = vmatmul.mubr.bf16.gmra.mrb[80].mxu0 %v3581_v56 }
  0xc3   :  { %679 = vmatprep.mubr.bf16.mxu0 %v3692_v1 }
  0xca   :  { %680 = vmatmul.mubr.bf16.gmra.mrb[84].mxu0 %v3583_v57 }
  0xcb   :  { %689 = vmatprep.mubr.bf16.mxu0 %v3692_v1 }
  0xd2   :  { %690 = vmatmul.mubr.bf16.gmra.mrb[88].mxu0 %v3584_v58 }
  0xd3   :  { %699 = vmatprep.mubr.bf16.mxu0 %v3692_v1 }
  0xda   :  { %700 = vmatmul.mubr.bf16.gmra.mrb[92].mxu0 %v3585_v59 }
  0xdb   :  { %709 = vmatprep.mubr.bf16.mxu0 %v3692_v1 }
  0xe2   :  { %710 = vmatmul.mubr.bf16.gmra.mrb[96].mxu0 %v3588_v60 }
  0xe3   :  { %719 = vmatprep.mubr.bf16.mxu0 %v3692_v1 }
  0xea   :  { %720 = vmatmul.mubr.bf16.gmra.mrb[100].mxu0 %v3590_v62 }
  0xeb   :  { %729 = vmatprep.mubr.bf16.mxu0 %v3692_v1 }
  0xf2   :  { %730 = vmatmul.mubr.bf16.gmra.mrb[104].mxu0 %v3591_v61 }
  0xf3   :  { %739 = vmatprep.mubr.bf16.mxu0 %v3692_v1 }
  0xf5   :  { %v471_v11 = vpop.f32.mrb[0].mxu0  ;;  %v3198_v15 = vpop.f32.mrb[0].mxu1 }
  0xf6   :  { %v473_v12 = vpop.f32.mrb[1].mxu0  ;;  %v804_v17 = vpop.f32.mrb[1].mxu1 }
  0xf7   :  { %v1049_v13 = vmax.f32 %v471_v11, %v473_v12  ;;  %v475_v14 = vpop.f32.mrb[2].mxu0  ;;  %v3199_v20 = vpop.f32.mrb[2].mxu1 }
  0xf8   :  { %v477_v16 = vpop.f32.mrb[3].mxu0  ;;  %v807_v21 = vpop.f32.mrb[3].mxu1 }
  0xf9   :  { %v1050_v18 = vmax.f32 %v475_v14, %v477_v16  ;;  %v1103_v19 = vmax.f32 %v1049_v13, %v804_v17 }
  0xfa   :  { %740 = vmatmul.mubr.bf16.gmra.mrb[108].mxu0 %v3953_v2 }
  0xfb   :  { %v1104_v22 = vmax.f32 %v1050_v18, %v807_v21  ;;  %745 = vmatprep.mubr.bf16.mxu0 %v3692_v1 }
  0xfd   :  { %v481_v23 = vpop.f32.mrb[4].mxu0 }
  0xfe   :  { %v483_v24 = vpop.f32.mrb[5].mxu0  ;;  %v3202_v27 = vpop.f32.mrb[4].mxu1 }
  0xff   :  { %v1051_v25 = vmax.f32 %v481_v23, %v483_v24  ;;  %v485_v26 = vpop.f32.mrb[6].mxu0  ;;  %v820_v30 = vpop.f32.mrb[5].mxu1 }
 0x100   :  { %v487_v29 = vpop.f32.mrb[7].mxu0  ;;  %v3203_v33 = vpop.f32.mrb[6].mxu1 }
 0x101   :  { %v1105_v31 = vmax.f32 %v1051_v25, %v3198_v15  ;;  %v1052_v32 = vmax.f32 %v485_v26, %v487_v29  ;;  %v823_v34 = vpop.f32.mrb[7].mxu1 }
 0x102   :  { %746 = vmatmul.mubr.bf16.gmra.mrb[112].mxu0 %v3961_v3 }
 0x103   :  { %v1106_v35 = vmax.f32 %v1052_v32, %v3199_v20  ;;  %v1158_v36 = vmax.f32 %v1103_v19, %v1105_v31  ;;  %751 = vmatprep.mubr.bf16.mxu0 %v3692_v1 }
 0x105   :  { %v491_v37 = vpop.f32.mrb[8].mxu0  ;;  %v1159_v38 = vmax.f32 %v1104_v22, %v1106_v35 }
 0x106   :  { %v493_v39 = vpop.f32.mrb[9].mxu0  ;;  %v3206_v42 = vpop.f32.mrb[8].mxu1 }
 0x107   :  { %v1053_v40 = vmax.f32 %v491_v37, %v493_v39  ;;  %v495_v41 = vpop.f32.mrb[10].mxu0  ;;  %v836_v44 = vpop.f32.mrb[9].mxu1 }
 0x108   :  { %v497_v43 = vpop.f32.mrb[11].mxu0  ;;  %v3207_v47 = vpop.f32.mrb[10].mxu1 }
 0x109   :  { %v1054_v45 = vmax.f32 %v495_v41, %v497_v43  ;;  %v1107_v46 = vmax.f32 %v1053_v40, %v820_v30  ;;  %v839_v48 = vpop.f32.mrb[11].mxu1 }
 0x10a   :  { %752 = vmatmul.mubr.bf16.gmra.mrb[116].mxu0 %v3967_v4 }
 0x10b   :  { %v1160_v49 = vmax.f32 %v1158_v36, %v1107_v46  ;;  %v1108_v50 = vmax.f32 %v1054_v45, %v823_v34  ;;  %757 = vmatprep.mubr.bf16.mxu0 %v3692_v1 }
 0x10d   :  { %v1161_v52 = vmax.f32 %v1159_v38, %v1108_v50  ;;  %v501_v53 = vpop.f32.mrb[12].mxu0  ;;  %v4028_v55 = vadd.f32 %v4025_v51, %v1160_v49  ;;  %v3602_v38 = vld [vmem:[%s4631_s3 + $0x8] sm:$0xff]  }
 0x10e   :  { %v503_v54 = vpop.f32.mrb[13].mxu0  ;;  %v4033_v59 = vpop.f32.mrb[12].mxu1 }
 0x10f   :  { %v4031_v56 = vadd.f32 %v4025_v51, %v1161_v52  ;;  %v1055_v57 = vmax.f32 %v501_v53, %v503_v54  ;;  %v505_v58 = vpop.f32.mrb[14].mxu0  ;;  %v852_v61 = vpop.f32.mrb[13].mxu1 }
 0x110   :  { %v507_v60 = vpop.f32.mrb[15].mxu0  ;;  %v4037_v2 = vpop.f32.mrb[14].mxu1 }
 0x111   :  { %v1170_v62 = vpack.c.bf16 %v4031_v56, %v4028_v55  ;;  %v1109_v63 = vmax.f32 %v1055_v57, %v3202_v27  ;;  %v1056_v0 = vmax.f32 %v505_v58, %v507_v60  ;;  %v855_v3 = vpop.f32.mrb[15].mxu1  ;;  %v3604_v57 = vld [vmem:[%s4631_s3 + $0x18] sm:$0xff]   ;;  %v3612_v56 = vld [vmem:[%s4631_s3 + $0x90] sm:$0xff]  }
 0x112   :  { %758 = vmatmul.mubr.bf16.gmra.mrb[120].mxu0 %v3977_v6 }
 0x113   :  { %v1187_v4 = vmax.f32 %v1107_v46, %v1109_v63  ;;  %v1110_v5 = vmax.f32 %v1056_v0, %v3203_v33  ;;  %763 = vmatprep.mubr.bf16.mxu0 %v3692_v1  ;;  %v3603_v46 = vld [vmem:[%s4631_s3 + $0x10] sm:$0xff]  }
 0x115   :  { %v1188_v8 = vmax.f32 %v1108_v50, %v1110_v5  ;;  %v511_v9 = vpop.f32.mrb[16].mxu0 }
 0x116   :  { %v513_v10 = vpop.f32.mrb[17].mxu0  ;;  %v4041_v13 = vpop.f32.mrb[16].mxu1 }
 0x117   :  { %v1057_v11 = vmax.f32 %v511_v9, %v513_v10  ;;  %v515_v12 = vpop.f32.mrb[18].mxu0  ;;  %v4043_v15 = vpop.f32.mrb[17].mxu1 }
 0x118   :  { %v517_v14 = vpop.f32.mrb[19].mxu0  ;;  %v4045_v18 = vpop.f32.mrb[18].mxu1 }
 0x119   :  { %v1111_v16 = vmax.f32 %v1057_v11, %v836_v44  ;;  %v1058_v17 = vmax.f32 %v515_v12, %v517_v14  ;;  %v4047_v19 = vpop.f32.mrb[19].mxu1 }
 0x11a   :  { %764 = vmatmul.mubr.bf16.gmra.mrb[124].mxu0 %v3983_v7  ;;  %v3600_v7 = vld [vmem:[%s4631_s3] sm:$0xff]  }
 0x11b   :  { %v1189_v6 = vmax.f32 %v1187_v4, %v1111_v16  ;;  %v1112_v1 = vmax.f32 %v1058_v17, %v839_v48  ;;  %3356 = vmatprep.mubr.msk.bf16.mxu0 %vm3694_vm0, %v3693_v28 }
 0x11d   :  { %v1190_v20 = vmax.f32 %v1188_v8, %v1112_v1  ;;  %v521_v21 = vpop.f32.mrb[20].mxu0  ;;  %v1191_v23 = vadd.f32 %v4025_v51, %v1189_v6 }
 0x11e   :  { %v523_v22 = vpop.f32.mrb[21].mxu0  ;;  %v4054_v27 = vpop.f32.mrb[20].mxu1 }
 0x11f   :  { %v1192_v24 = vadd.f32 %v4025_v51, %v1190_v20  ;;  %v1059_v25 = vmax.f32 %v521_v21, %v523_v22  ;;  %v525_v26 = vpop.f32.mrb[22].mxu0  ;;  %v4059_v30 = vpop.f32.mrb[21].mxu1  ;;  %v3606_v20 = vld [vmem:[%s4631_s3 + $0x28] sm:$0xff]  }
 0x120   :  { %v527_v29 = vpop.f32.mrb[23].mxu0  ;;  %v4061_v34 = vpop.f32.mrb[22].mxu1 }
 0x121   :  { %v1193_v31 = vpack.c.bf16 %v1192_v24, %v1191_v23  ;;  %v1113_v32 = vmax.f32 %v1059_v25, %v3206_v42  ;;  %v1060_v33 = vmax.f32 %v525_v26, %v527_v29  ;;  %v4063_v35 = vpop.f32.mrb[23].mxu1 }
 0x123   :  { %v1114_v36 = vmax.f32 %v1060_v33, %v3207_v47  ;;  %3277 = vmatmul.mubr.bf16.vlgmr.msra.gmra.mrb[64].mxu1 %v1193_v31  ;;  %v1389_v37 = vmax.f32 %v1111_v16, %v1113_v32 }
 0x124   :  { %3281 = vmatpush3.bf16.msra.mxu1 %v3600_v7  ;;  %3296 = vmatprep.mubr.msk.bf16.mxu1 %vm3694_vm0, %v3693_v28 }
 0x125   :  { %v531_v39 = vpop.f32.mrb[24].mxu0  ;;  %3282 = vmatprep.subr.bf16.mxu1 %v3693_v28  ;;  %v1390_v40 = vmax.f32 %v1112_v1, %v1114_v36 }
 0x126   :  { %v533_v41 = vpop.f32.mrb[25].mxu0  ;;  %v4071_v44 = vpop.f32.mrb[24].mxu1 }
 0x127   :  { %v1061_v42 = vmax.f32 %v531_v39, %v533_v41  ;;  %v535_v43 = vpop.f32.mrb[26].mxu0  ;;  %v4076_v47 = vpop.f32.mrb[25].mxu1 }
 0x128   :  { %3283 = vmatpush3.bf16.msra.mxu1 %v3602_v38  ;;  %v537_v45 = vpop.f32.mrb[27].mxu0  ;;  %v4079_v50 = vpop.f32.mrb[26].mxu1  ;;  %v3608_v38 = vld [vmem:[%s4631_s3 + $0x38] sm:$0xff]  }
 0x129   :  { %v1062_v48 = vmax.f32 %v535_v43, %v537_v45  ;;  %v1115_v49 = vmax.f32 %v1061_v42, %v852_v61  ;;  %3284 = vmatprep.subr.bf16.mxu1 %v3693_v28  ;;  %v4081_v52 = vpop.f32.mrb[27].mxu1 }
 0x12b   :  { %v1391_v53 = vmax.f32 %v1389_v37, %v1115_v49  ;;  %v1116_v54 = vmax.f32 %v1062_v48, %v855_v3  ;;  %v3605_v3 = vld [vmem:[%s4631_s3 + $0x20] sm:$0xff]  }
 0x12c   :  { %3285 = vmatpush3.bf16.msra.mxu1 %v3603_v46 }
 0x12d   :  { %v1392_v58 = vmax.f32 %v1390_v40, %v1116_v54  ;;  %3286 = vmatprep.subr.bf16.mxu1 %v3693_v28  ;;  %v541_v60 = vpop.f32.mrb[28].mxu0  ;;  %v4088_v61 = vadd.f32 %v4025_v51, %v1391_v53 }
 0x12e   :  { %v543_v63 = vpop.f32.mrb[29].mxu0  ;;  %v4093_v8 = vpop.f32.mrb[28].mxu1 }
 0x12f   :  { %v4091_v0 = vadd.f32 %v4025_v51, %v1392_v58  ;;  %v1063_v4 = vmax.f32 %v541_v60, %v543_v63  ;;  %v545_v5 = vpop.f32.mrb[30].mxu0  ;;  %v4098_v10 = vpop.f32.mrb[29].mxu1 }
 0x130   :  { %3287 = vmatpush3.bf16.msra.mxu1 %v3604_v57  ;;  %v547_v9 = vpop.f32.mrb[31].mxu0  ;;  %v4104_v16 = vpop.f32.mrb[30].mxu1 }
 0x131   :  { %v1395_v11 = vpack.c.bf16 %v4091_v0, %v4088_v61  ;;  %3288 = vmatprep.subr.bf16.mxu1 %v3693_v28  ;;  %v1117_v12 = vmax.f32 %v1063_v4, %v4033_v59  ;;  %v1064_v14 = vmax.f32 %v545_v5, %v547_v9  ;;  %v4106_v17 = vpop.f32.mrb[31].mxu1 }
 0x133   :  { %v1118_v6 = vmax.f32 %v1064_v14, %v4037_v2  ;;  %v1504_v1 = vmax.f32 %v1115_v49, %v1117_v12  ;;  %v3607_v2 = vld [vmem:[%s4631_s3 + $0x30] sm:$0xff]  }
 0x134   :  { %3289 = vmatpush3.bf16.msra.mxu1 %v3605_v3 }
 0x135   :  { %3290 = vmatprep.subr.bf16.mxu1 %v3693_v28  ;;  %v551_v21 = vpop.f32.mrb[32].mxu0  ;;  %v1505_v22 = vmax.f32 %v1116_v54, %v1118_v6 }
 0x136   :  { %v553_v23 = vpop.f32.mrb[33].mxu0  ;;  %v4113_v25 = vpop.f32.mrb[32].mxu1 }
 0x137   :  { %v1065_v24 = vmax.f32 %v551_v21, %v553_v23  ;;  %v555_v59 = vpop.f32.mrb[34].mxu0  ;;  %v4118_v29 = vpop.f32.mrb[33].mxu1 }
 0x138   :  { %3291 = vmatpush3.bf16.msra.mxu1 %v3606_v20  ;;  %v557_v26 = vpop.f32.mrb[35].mxu0  ;;  %v4122_v32 = vpop.f32.mrb[34].mxu1 }
 0x139   :  { %3292 = vmatprep.subr.bf16.mxu1 %v3693_v28  ;;  %v1066_v7 = vmax.f32 %v555_v59, %v557_v26  ;;  %v1119_v31 = vmax.f32 %v1065_v24, %v4043_v15  ;;  %v4124_v33 = vpop.f32.mrb[35].mxu1  ;;  %v3613_v24 = vld [vmem:[%s4631_s3 + $0x98] sm:$0xff]  }
 0x13b   :  { %v1506_v36 = vmax.f32 %v1504_v1, %v1119_v31  ;;  %v1120_v37 = vmax.f32 %v1066_v7, %v4047_v19  ;;  %v3609_v19 = vld [vmem:[%s4631_s3 + $0x80] sm:$0xff]  }
 0x13c   :  { %3293 = vmatpush3.bf16.msra.mxu1 %v3607_v2 }
 0x13d   :  { %3294 = vmatprep.subr.bf16.mxu1 %v3693_v28  ;;  %v561_v39 = vpop.f32.mrb[36].mxu0  ;;  %v4132_v40 = vadd.f32 %v4025_v51, %v1506_v36  ;;  %v1507_v41 = vmax.f32 %v1505_v22, %v1120_v37 }
 0x13e   :  { %v563_v15 = vpop.f32.mrb[37].mxu0  ;;  %v4137_v46 = vpop.f32.mrb[36].mxu1 }
 0x13f   :  { %v1067_v42 = vmax.f32 %v561_v39, %v563_v15  ;;  %v565_v43 = vpop.f32.mrb[38].mxu0  ;;  %v4135_v45 = vadd.f32 %v4025_v51, %v1507_v41  ;;  %v4142_v49 = vpop.f32.mrb[37].mxu1 }
 0x140   :  { %3295 = vmatpush3.bf16.msra.mxu1 %v3608_v38  ;;  %v567_v48 = vpop.f32.mrb[39].mxu0  ;;  %v4148_v58 = vpop.f32.mrb[38].mxu1  ;;  %v3619_v38 = vld [vmem:[%s4631_s3 + $0x180] sm:$0xff]  }
 0x141   :  { %3300 = vmatprep.subr.bf16.mxu1 %v3693_v28  ;;  %v1121_v53 = vmax.f32 %v1067_v42, %v4041_v13  ;;  %v1068_v54 = vmax.f32 %v565_v43, %v567_v48  ;;  %v1510_v57 = vpack.c.bf16 %v4135_v45, %v4132_v40  ;;  %v4150_v60 = vpop.f32.mrb[39].mxu1  ;;  %v3611_v13 = vld [vmem:[%s4631_s3 + $0x88] sm:$0xff]  }
 0x143   :  { %3297 = vmatmul.mubr.bf16.vlgmr.msra.gmra.mrb[68].mxu1 %v1170_v62  ;;  %v1619_v63 = vmax.f32 %v1119_v31, %v1121_v53  ;;  %v1122_v4 = vmax.f32 %v1068_v54, %v4045_v18 }
 0x144   :  { %3301 = vmatpush3.bf16.msra.mxu1 %v3609_v19  ;;  %3316 = vmatprep.mubr.msk.bf16.mxu1 %vm3694_vm0, %v3693_v28 }
 0x145   :  { %3302 = vmatprep.subr.bf16.mxu1 %v3693_v28  ;;  %v571_v5 = vpop.f32.mrb[40].mxu0  ;;  %v1620_v3 = vmax.f32 %v1120_v37, %v1122_v4  ;;  %v3621_v4 = vld [vmem:[%s4631_s3 + $0x188] sm:$0xff]  }
 0x146   :  { %v573_v9 = vpop.f32.mrb[41].mxu0  ;;  %v4162_v55 = vpop.f32.mrb[40].mxu1 }
 0x147   :  { %v1069_v12 = vmax.f32 %v571_v5, %v573_v9  ;;  %v575_v14 = vpop.f32.mrb[42].mxu0  ;;  %v4167_v18 = vpop.f32.mrb[41].mxu1 }
 0x148   :  { %3303 = vmatpush3.bf16.msra.mxu1 %v3611_v13  ;;  %v577_v62 = vpop.f32.mrb[43].mxu0  ;;  %v4171_v20 = vpop.f32.mrb[42].mxu1 }
 0x149   :  { %3304 = vmatprep.subr.bf16.mxu1 %v3693_v28  ;;  %v1070_v6 = vmax.f32 %v575_v14, %v577_v62  ;;  %v1123_v1 = vmax.f32 %v1069_v12, %v4059_v30  ;;  %v4173_v21 = vpop.f32.mrb[43].mxu1  ;;  %v3616_v12 = vld [vmem:[%s4631_s3 + $0xb0] sm:$0xff]  }
 0x14a   :  { %v3623_v14 = vld [vmem:[%s4631_s3 + $0x190] sm:$0xff]  }
 0x14b   :  { %v1621_v22 = vmax.f32 %v1619_v63, %v1123_v1  ;;  %v1124_v23 = vmax.f32 %v1070_v6, %v4063_v35  ;;  %v3614_v35 = vld [vmem:[%s4631_s3 + $0xa0] sm:$0xff]   ;;  %v3615_v63 = vld [vmem:[%s4631_s3 + $0xa8] sm:$0xff]  }
 0x14c   :  { %3305 = vmatpush3.bf16.msra.mxu1 %v3612_v56 }
 0x14d   :  { %3306 = vmatprep.subr.bf16.mxu1 %v3693_v28  ;;  %v1623_v59 = vadd.f32 %v4025_v51, %v1621_v22  ;;  %v1622_v2 = vmax.f32 %v1620_v3, %v1124_v23  ;;  %v581_v26 = vpop.f32.mrb[44].mxu0 }
 0x14e   :  { %v583_v7 = vpop.f32.mrb[45].mxu0  ;;  %v4182_v37 = vpop.f32.mrb[44].mxu1 }
 0x14f   :  { %v1624_v30 = vadd.f32 %v4025_v51, %v1622_v2  ;;  %v1071_v31 = vmax.f32 %v581_v26, %v583_v7  ;;  %v585_v36 = vpop.f32.mrb[46].mxu0  ;;  %v4190_v41 = vpop.f32.mrb[45].mxu1  ;;  %v3618_v2 = vld [vmem:[%s4631_s3 + $0xb8] sm:$0xff]  }
 0x150   :  { %3307 = vmatpush3.bf16.msra.mxu1 %v3613_v24  ;;  %v587_v39 = vpop.f32.mrb[47].mxu0  ;;  %v4194_v19 = vpop.f32.mrb[46].mxu1  ;;  %v3625_v26 = vld [vmem:[%s4631_s3 + $0x198] sm:$0xff]  }
 0x151   :  { %3308 = vmatprep.subr.bf16.mxu1 %v3693_v28  ;;  %v1625_v15 = vpack.c.bf16 %v1624_v30, %v1623_v59  ;;  %v1125_v42 = vmax.f32 %v1071_v31, %v4054_v27  ;;  %v1072_v43 = vmax.f32 %v585_v36, %v587_v39  ;;  %v4196_v48 = vpop.f32.mrb[47].mxu1  ;;  %v3620_v39 = vld [vmem:[%s4631_s3 + $0xc0] sm:$0xff]  }
 0x153   :  { %3357 = vmatmul.mubr.bf16.vlgmr.msra.gmra.mrb[128].mxu0 %v1625_v15  ;;  %v1126_v53 = vmax.f32 %v1072_v43, %v4061_v34  ;;  %v1734_v54 = vmax.f32 %v1123_v1, %v1125_v42  ;;  %v3627_v15 = vld [vmem:[%s4631_s3 + $0x1a0] sm:$0xff]  }
 0x154   :  { %3309 = vmatpush3.bf16.msra.mxu1 %v3614_v35  ;;  %3381 = vmatpush3.bf16.msra.mxu0 %v3619_v38 }
 0x155   :  { %3310 = vmatprep.subr.bf16.mxu1 %v3693_v28  ;;  %3382 = vmatprep.subr.bf16.mxu0 %v3693_v28  ;;  %v591_v27 = vpop.f32.mrb[48].mxu0  ;;  %v1735_v13 = vmax.f32 %v1124_v23, %v1126_v53 }
 0x156   :  { %v593_v5 = vpop.f32.mrb[49].mxu0  ;;  %3396 = vmatprep.mubr.msk.bf16.mxu0 %vm3694_vm0, %v3693_v28  ;;  %v4209_v9 = vpop.f32.mrb[48].mxu1 }
 0x157   :  { %v1073_v34 = vmax.f32 %v591_v27, %v593_v5  ;;  %v595_v3 = vpop.f32.mrb[50].mxu0  ;;  %v4217_v62 = vpop.f32.mrb[49].mxu1 }
 0x158   :  { %3311 = vmatpush3.bf16.msra.mxu1 %v3615_v63  ;;  %3383 = vmatpush3.bf16.msra.mxu0 %v3621_v4  ;;  %v597_v56 = vpop.f32.mrb[51].mxu0  ;;  %v4222_v22 = vpop.f32.mrb[50].mxu1 }
 0x159   :  { %3312 = vmatprep.subr.bf16.mxu1 %v3693_v28  ;;  %3384 = vmatprep.subr.bf16.mxu0 %v3693_v28  ;;  %v1074_v6 = vmax.f32 %v595_v3, %v597_v56  ;;  %v1127_v1 = vmax.f32 %v1073_v34, %v4076_v47  ;;  %v4224_v23 = vpop.f32.mrb[51].mxu1  ;;  %v3622_v34 = vld [vmem:[%s4631_s3 + $0xc8] sm:$0xff]  }
 0x15b   :  { %v1736_v24 = vmax.f32 %v1734_v54, %v1127_v1  ;;  %v4227_v59 = vmax.f32 %v1074_v6, %v4081_v52  ;;  %v3631_v6 = vld [vmem:[%s4631_s3 + $0x1b0] sm:$0xff]  }
 0x15c   :  { %3313 = vmatpush3.bf16.msra.mxu1 %v3616_v12  ;;  %3385 = vmatpush3.bf16.msra.mxu0 %v3623_v14  ;;  %v3624_v14 = vld [vmem:[%s4631_s3 + $0xd0] sm:$0xff]  }
 0x15d   :  { %3314 = vmatprep.subr.bf16.mxu1 %v3693_v28  ;;  %3386 = vmatprep.subr.bf16.mxu0 %v3693_v28  ;;  %v601_v47 = vpop.f32.mrb[52].mxu0  ;;  %v4238_v7 = vadd.f32 %v4025_v51, %v1736_v24  ;;  %v1737_v52 = vmax.f32 %v1735_v13, %v4227_v59 }
 0x15e   :  { %v603_v30 = vpop.f32.mrb[53].mxu0  ;;  %v3250_v38 = vpop.f32.mrb[52].mxu1 }
 0x15f   :  { %v1075_v31 = vmax.f32 %v601_v47, %v603_v30  ;;  %v605_v36 = vpop.f32.mrb[54].mxu0  ;;  %v4242_v35 = vadd.f32 %v4025_v51, %v1737_v52  ;;  %v4250_v43 = vpop.f32.mrb[53].mxu1  ;;  %v3626_v30 = vld [vmem:[%s4631_s3 + $0xd8] sm:$0xff]  }
 0x160   :  { %3315 = vmatpush3.bf16.msra.mxu1 %v3618_v2  ;;  %3387 = vmatpush3.bf16.msra.mxu0 %v3625_v26  ;;  %v607_v42 = vpop.f32.mrb[55].mxu0  ;;  %v3251_v4 = vpop.f32.mrb[54].mxu1 }
 0x161   :  { %3320 = vmatprep.subr.bf16.mxu1 %v3693_v28  ;;  %3388 = vmatprep.subr.bf16.mxu0 %v3693_v28  ;;  %v1129_v53 = vmax.f32 %v1075_v31, %v4071_v44  ;;  %v1076_v54 = vmax.f32 %v605_v36, %v607_v42  ;;  %v1740_v63 = vpack.c.bf16 %v4242_v35, %v4238_v7  ;;  %v4257_v27 = vpop.f32.mrb[55].mxu1  ;;  %v3629_v44 = vld [vmem:[%s4631_s3 + $0x1a8] sm:$0xff]   ;;  %v3633_v31 = vld [vmem:[%s4631_s3 + $0x1b8] sm:$0xff]   ;;  %v3635_v4 = vld [vmem:[%s4631_s3 + $0x200] sm:$0xff]  }
 0x163   :  { %3317 = vmatmul.mubr.bf16.vlgmr.msra.gmra.mrb[72].mxu1 %v1395_v11  ;;  %v1849_v13 = vmax.f32 %v1127_v1, %v1129_v53  ;;  %v1130_v5 = vmax.f32 %v1076_v54, %v4079_v50  ;;  %v3628_v54 = vld [vmem:[%s4631_s3 + $0xe0] sm:$0xff]  }
 0x164   :  { %3321 = vmatpush3.bf16.msra.mxu1 %v3620_v39  ;;  %3389 = vmatpush3.bf16.msra.mxu0 %v3627_v15 }
 0x165   :  { %3322 = vmatprep.subr.bf16.mxu1 %v3693_v28  ;;  %v611_v3 = vpop.f32.mrb[56].mxu0  ;;  %v1850_v12 = vmax.f32 %v4227_v59, %v1130_v5  ;;  %3390 = vmatprep.subr.bf16.mxu0 %v3693_v28 }
 0x166   :  { %v613_v61 = vpop.f32.mrb[57].mxu0  ;;  %3336 = vmatprep.mubr.msk.bf16.mxu1 %vm3694_vm0, %v3693_v28  ;;  %v3254_v11 = vpop.f32.mrb[56].mxu1 }
 0x167   :  { %v1077_v50 = vmax.f32 %v611_v3, %v613_v61  ;;  %v615_v0 = vpop.f32.mrb[58].mxu0  ;;  %v1026_v1 = vpop.f32.mrb[57].mxu1  ;;  %v3630_v11 = vld [vmem:[%s4631_s3 + $0xe8] sm:$0xff]  }
 0x168   :  { %3323 = vmatpush3.bf16.msra.mxu1 %v3622_v34  ;;  %3391 = vmatpush3.bf16.msra.mxu0 %v3629_v44  ;;  %v617_v56 = vpop.f32.mrb[59].mxu0  ;;  %v3255_v2 = vpop.f32.mrb[58].mxu1 }
 0x169   :  { %3324 = vmatprep.subr.bf16.mxu1 %v3693_v28  ;;  %v1078_v24 = vmax.f32 %v615_v0, %v617_v56  ;;  %v1131_v59 = vmax.f32 %v1077_v50, %v4098_v10  ;;  %3392 = vmatprep.subr.bf16.mxu0 %v3693_v28  ;;  %v1028_v26 = vpop.f32.mrb[59].mxu1 }
 0x16b   :  { %v1851_v47 = vmax.f32 %v1849_v13, %v1131_v59  ;;  %v4284_v52 = vmax.f32 %v1078_v24, %v4106_v17  ;;  %v3632_v24 = vld [vmem:[%s4631_s3 + $0xf0] sm:$0xff]  }
 0x16c   :  { %3325 = vmatpush3.bf16.msra.mxu1 %v3624_v14  ;;  %3393 = vmatpush3.bf16.msra.mxu0 %v3631_v6  ;;  %v3637_v14 = vld [vmem:[%s4631_s3 + $0x208] sm:$0xff]  }
 0x16d   :  { %3326 = vmatprep.subr.bf16.mxu1 %v3693_v28  ;;  %v1853_v10 = vadd.f32 %v4025_v51, %v1851_v47  ;;  %v1852_v36 = vmax.f32 %v1850_v12, %v4284_v52  ;;  %3394 = vmatprep.subr.bf16.mxu0 %v3693_v28  ;;  %v621_v17 = vpop.f32.mrb[60].mxu0 }
 0x16e   :  { %v623_v38 = vpop.f32.mrb[61].mxu0  ;;  %v3258_v53 = vpop.f32.mrb[60].mxu1 }
 0x16f   :  { %v1854_v39 = vadd.f32 %v4025_v51, %v1852_v36  ;;  %v1079_v15 = vmax.f32 %v621_v17, %v623_v38  ;;  %v625_v42 = vpop.f32.mrb[62].mxu0  ;;  %v1038_v5 = vpop.f32.mrb[61].mxu1  ;;  %v3643_v53 = vld [vmem:[%s4631_s3 + $0x220] sm:$0xff]  }
 0x170   :  { %3327 = vmatpush3.bf16.msra.mxu1 %v3626_v30  ;;  %3395 = vmatpush3.bf16.msra.mxu0 %v3633_v31  ;;  %v627_v13 = vpop.f32.mrb[63].mxu0  ;;  %v3259_v12 = vpop.f32.mrb[62].mxu1  ;;  %v3634_v31 = vld [vmem:[%s4631_s3 + $0xf8] sm:$0xff]  }
 0x171   :  { %3328 = vmatprep.subr.bf16.mxu1 %v3693_v28  ;;  %v1855_v34 = vpack.c.bf16 %v1854_v39, %v1853_v10  ;;  %3420 = vmatprep.subr.bf16.mxu0 %v3693_v28  ;;  %v1133_v44 = vmax.f32 %v1079_v15, %v4093_v8  ;;  %v1080_v3 = vmax.f32 %v625_v42, %v627_v13  ;;  %v1040_v61 = vpop.f32.mrb[63].mxu1  ;;  %v3641_v10 = vld [vmem:[%s4631_s3 + $0x218] sm:$0xff]   ;;  %v3636_v42 = vld [vmem:[%s4631_s3 + $0x140] sm:$0xff]  }
 0x173   :  { %3397 = vmatmul.mubr.bf16.vlgmr.msra.gmra.mrb[132].mxu0 %v1855_v34  ;;  %v1134_v50 = vmax.f32 %v1080_v3, %v4104_v16  ;;  %v1964_v0 = vmax.f32 %v1131_v59, %v1133_v44  ;;  %v3639_v59 = vld [vmem:[%s4631_s3 + $0x210] sm:$0xff]   ;;  %v3638_v3 = vld [vmem:[%s4631_s3 + $0x148] sm:$0xff]  }
 0x174   :  { %3329 = vmatpush3.bf16.msra.mxu1 %v3628_v54  ;;  %3421 = vmatpush3.bf16.msra.mxu0 %v3635_v4 }
 0x175   :  { %3330 = vmatprep.subr.bf16.mxu1 %v3693_v28  ;;  %3422 = vmatprep.subr.bf16.mxu0 %v3693_v28  ;;  %v631_v8 = vpop.f32.mrb[64].mxu0  ;;  %v1965_v56 = vmax.f32 %v4284_v52, %v1134_v50 }
 0x176   :  { %v633_v6 = vpop.f32.mrb[65].mxu0  ;;  %3436 = vmatprep.mubr.msk.bf16.mxu0 %vm3694_vm0, %v3693_v28 }
 0x177   :  { %v1081_v16 = vmax.f32 %v631_v8, %v633_v6  ;;  %v635_v1 = vpop.f32.mrb[66].mxu0  ;;  %v3642_v6 = vld [vmem:[%s4631_s3 + $0x158] sm:$0xff]  }
 0x178   :  { %3331 = vmatpush3.bf16.msra.mxu1 %v3630_v11  ;;  %3423 = vmatpush3.bf16.msra.mxu0 %v3637_v14  ;;  %v637_v2 = vpop.f32.mrb[67].mxu0 }
 0x179   :  { %3332 = vmatprep.subr.bf16.mxu1 %v3693_v28  ;;  %3424 = vmatprep.subr.bf16.mxu0 %v3693_v28  ;;  %v1082_v26 = vmax.f32 %v635_v1, %v637_v2  ;;  %v1135_v47 = vmax.f32 %v1081_v16, %v4118_v29  ;;  %v3649_v16 = vld [vmem:[%s4631_s3 + $0x238] sm:$0xff]  }
 0x17b   :  { %v1966_v52 = vmax.f32 %v1964_v0, %v1135_v47  ;;  %v1136_v30 = vmax.f32 %v1082_v26, %v4124_v33  ;;  %v3647_v0 = vld [vmem:[%s4631_s3 + $0x230] sm:$0xff]  }
 0x17c   :  { %3333 = vmatpush3.bf16.msra.mxu1 %v3632_v24  ;;  %3425 = vmatpush3.bf16.msra.mxu0 %v3639_v59 }
 0x17d   :  { %3334 = vmatprep.subr.bf16.mxu1 %v3693_v28  ;;  %3426 = vmatprep.subr.bf16.mxu0 %v3693_v28  ;;  %v641_v36 = vpop.f32.mrb[68].mxu0  ;;  %v4337_v29 = vadd.f32 %v4025_v51, %v1966_v52  ;;  %v1967_v17 = vmax.f32 %v1965_v56, %v1136_v30  ;;  %v3651_v52 = vld [vmem:[%s4631_s3 + $0x280] sm:$0xff]  }
 0x17e   :  { %v643_v33 = vpop.f32.mrb[69].mxu0 }
 0x17f   :  { %v1083_v38 = vmax.f32 %v641_v36, %v643_v33  ;;  %v645_v39 = vpop.f32.mrb[70].mxu0  ;;  %v4340_v15 = vadd.f32 %v4025_v51, %v1967_v17 }
 0x180   :  { %3335 = vmatpush3.bf16.msra.mxu1 %v3634_v31  ;;  %3427 = vmatpush3.bf16.msra.mxu0 %v3641_v10  ;;  %v647_v54 = vpop.f32.mrb[71].mxu0 }
 0x181   :  { %3360 = vmatprep.subr.bf16.mxu1 %v3693_v28  ;;  %3428 = vmatprep.subr.bf16.mxu0 %v3693_v28  ;;  %v1137_v4 = vmax.f32 %v1083_v38, %v4113_v25  ;;  %v1084_v13 = vmax.f32 %v645_v39, %v647_v54  ;;  %v1970_v5 = vpack.c.bf16 %v4340_v15, %v4337_v29  ;;  %v3645_v25 = vld [vmem:[%s4631_s3 + $0x228] sm:$0xff]  }
 0x182   :  { %v3646_v38 = vld [vmem:[%s4631_s3 + $0x168] sm:$0xff]  }
 0x183   :  { %3337 = vmatmul.mubr.bf16.vlgmr.msra.gmra.mrb[76].mxu1 %v1510_v57  ;;  %v2079_v34 = vmax.f32 %v1135_v47, %v1137_v4  ;;  %v1138_v44 = vmax.f32 %v1084_v13, %v4122_v32  ;;  %v3640_v57 = vld [vmem:[%s4631_s3 + $0x150] sm:$0xff]   ;;  %v3644_v47 = vld [vmem:[%s4631_s3 + $0x160] sm:$0xff]   ;;  %v3653_v39 = vld [vmem:[%s4631_s3 + $0x288] sm:$0xff]  }
 0x184   :  { %3361 = vmatpush3.bf16.msra.mxu1 %v3636_v42  ;;  %3429 = vmatpush3.bf16.msra.mxu0 %v3643_v53  ;;  %v3648_v4 = vld [vmem:[%s4631_s3 + $0x170] sm:$0xff]  }
 0x185   :  { %3362 = vmatprep.subr.bf16.mxu1 %v3693_v28  ;;  %v651_v12 = vpop.f32.mrb[72].mxu0  ;;  %v2080_v61 = vmax.f32 %v1136_v30, %v1138_v44  ;;  %3430 = vmatprep.subr.bf16.mxu0 %v3693_v28  ;;  %v3655_v13 = vld [vmem:[%s4631_s3 + $0x290] sm:$0xff]  }
 0x186   :  { %v653_v40 = vpop.f32.mrb[73].mxu0  ;;  %3376 = vmatprep.mubr.msk.bf16.mxu1 %vm3694_vm0, %v3693_v28 }
 0x187   :  { %v1085_v32 = vmax.f32 %v651_v12, %v653_v40  ;;  %v655_v45 = vpop.f32.mrb[74].mxu0  ;;  %v3657_v40 = vld [vmem:[%s4631_s3 + $0x298] sm:$0xff]  }
 0x188   :  { %3363 = vmatpush3.bf16.msra.mxu1 %v3638_v3  ;;  %3431 = vmatpush3.bf16.msra.mxu0 %v3645_v25  ;;  %v657_v50 = vpop.f32.mrb[75].mxu0 }
 0x189   :  { %3364 = vmatprep.subr.bf16.mxu1 %v3693_v28  ;;  %v1086_v11 = vmax.f32 %v655_v45, %v657_v50  ;;  %v1139_v14 = vmax.f32 %v1085_v32, %v4142_v49  ;;  %3432 = vmatprep.subr.bf16.mxu0 %v3693_v28 }
 0x18b   :  { %v2081_v8 = vmax.f32 %v2079_v34, %v1139_v14  ;;  %v1140_v56 = vmax.f32 %v1086_v11, %v4150_v60  ;;  %v3652_v11 = vld [vmem:[%s4631_s3 + $0x1c0] sm:$0xff]  }
 0x18c   :  { %3365 = vmatpush3.bf16.msra.mxu1 %v3640_v57  ;;  %3433 = vmatpush3.bf16.msra.mxu0 %v3647_v0 }
 0x18d   :  { %3366 = vmatprep.subr.bf16.mxu1 %v3693_v28  ;;  %v2083_v1 = vadd.f32 %v4025_v51, %v2081_v8  ;;  %v2082_v49 = vmax.f32 %v2080_v61, %v1140_v56  ;;  %3434 = vmatprep.subr.bf16.mxu0 %v3693_v28  ;;  %v661_v24 = vpop.f32.mrb[76].mxu0  ;;  %v3650_v61 = vld [vmem:[%s4631_s3 + $0x178] sm:$0xff]  }
 0x18e   :  { %v663_v59 = vpop.f32.mrb[77].mxu0 }
 0x18f   :  { %v2084_v60 = vadd.f32 %v4025_v51, %v2082_v49  ;;  %v1087_v2 = vmax.f32 %v661_v24, %v663_v59  ;;  %v665_v26 = vpop.f32.mrb[78].mxu0  ;;  %v3654_v24 = vld [vmem:[%s4631_s3 + $0x1c8] sm:$0xff]  }
 0x190   :  { %3367 = vmatpush3.bf16.msra.mxu1 %v3642_v6  ;;  %3435 = vmatpush3.bf16.msra.mxu0 %v3649_v16  ;;  %v667_v30 = vpop.f32.mrb[79].mxu0 }
 0x191   :  { %3368 = vmatprep.subr.bf16.mxu1 %v3693_v28  ;;  %v2085_v31 = vpack.c.bf16 %v2084_v60, %v2083_v1  ;;  %3460 = vmatprep.subr.bf16.mxu0 %v3693_v28  ;;  %v1141_v10 = vmax.f32 %v1087_v2, %v4137_v46  ;;  %v1088_v36 = vmax.f32 %v665_v26, %v667_v30  ;;  %v3663_v26 = vld [vmem:[%s4631_s3 + $0x2b0] sm:$0xff]  }
 0x193   :  { %3437 = vmatmul.mubr.bf16.vlgmr.msra.gmra.mrb[136].mxu0 %v2085_v31  ;;  %v1142_v17 = vmax.f32 %v1088_v36, %v4148_v58  ;;  %v2194_v33 = vmax.f32 %v1139_v14, %v1141_v10  ;;  %v3659_v14 = vld [vmem:[%s4631_s3 + $0x2a0] sm:$0xff]   ;;  %v3658_v10 = vld [vmem:[%s4631_s3 + $0x1d8] sm:$0xff]  }
 0x194   :  { %3369 = vmatpush3.bf16.msra.mxu1 %v3644_v47  ;;  %3461 = vmatpush3.bf16.msra.mxu0 %v3651_v52  ;;  %v3665_v36 = vld [vmem:[%s4631_s3 + $0x2b8] sm:$0xff]  }
 0x195   :  { %3370 = vmatprep.subr.bf16.mxu1 %v3693_v28  ;;  %3462 = vmatprep.subr.bf16.mxu0 %v3693_v28  ;;  %v671_v46 = vpop.f32.mrb[80].mxu0  ;;  %v2195_v42 = vmax.f32 %v1140_v56, %v1142_v17 }
 0x196   :  { %v673_v53 = vpop.f32.mrb[81].mxu0  ;;  %3476 = vmatprep.mubr.msk.bf16.mxu0 %vm3694_vm0, %v3693_v28 }
 0x197   :  { %v1089_v58 = vmax.f32 %v671_v46, %v673_v53  ;;  %v675_v54 = vpop.f32.mrb[82].mxu0  ;;  %v3667_v53 = vld [vmem:[%s4631_s3 + $0x300] sm:$0xff]  }
 0x198   :  { %3371 = vmatpush3.bf16.msra.mxu1 %v3646_v38  ;;  %3463 = vmatpush3.bf16.msra.mxu0 %v3653_v39  ;;  %v677_v34 = vpop.f32.mrb[83].mxu0 }
 0x199   :  { %3372 = vmatprep.subr.bf16.mxu1 %v3693_v28  ;;  %3464 = vmatprep.subr.bf16.mxu0 %v3693_v28  ;;  %v1090_v44 = vmax.f32 %v675_v54, %v677_v34  ;;  %v1143_v3 = vmax.f32 %v1089_v58, %v4167_v18 }
 0x19b   :  { %v2196_v25 = vmax.f32 %v2194_v33, %v1143_v3  ;;  %v1144_v12 = vmax.f32 %v1090_v44, %v4173_v21  ;;  %v3662_v44 = vld [vmem:[%s4631_s3 + $0x1e8] sm:$0xff]  }
 0x19c   :  { %3373 = vmatpush3.bf16.msra.mxu1 %v3648_v4  ;;  %3465 = vmatpush3.bf16.msra.mxu0 %v3655_v13 }
 0x19d   :  { %3374 = vmatprep.subr.bf16.mxu1 %v3693_v28  ;;  %3466 = vmatprep.subr.bf16.mxu0 %v3693_v28  ;;  %v681_v32 = vpop.f32.mrb[84].mxu0  ;;  %v4426_v18 = vadd.f32 %v4025_v51, %v2196_v25  ;;  %v2197_v45 = vmax.f32 %v2195_v42, %v1144_v12  ;;  %v3660_v42 = vld [vmem:[%s4631_s3 + $0x1e0] sm:$0xff]  }
 0x19e   :  { %v683_v21 = vpop.f32.mrb[85].mxu0 }
 0x19f   :  { %v1091_v57 = vmax.f32 %v681_v32, %v683_v21  ;;  %v685_v50 = vpop.f32.mrb[86].mxu0  ;;  %v4429_v0 = vadd.f32 %v4025_v51, %v2197_v45  ;;  %v3671_v32 = vld [vmem:[%s4631_s3 + $0x310] sm:$0xff]  }
 0x1a0   :  { %3375 = vmatpush3.bf16.msra.mxu1 %v3650_v61  ;;  %3467 = vmatpush3.bf16.msra.mxu0 %v3657_v40  ;;  %v687_v8 = vpop.f32.mrb[87].mxu0  ;;  %v3664_v40 = vld [vmem:[%s4631_s3 + $0x1f0] sm:$0xff]  }
 0x1a1   :  { %3400 = vmatprep.subr.bf16.mxu1 %v3693_v28  ;;  %3468 = vmatprep.subr.bf16.mxu0 %v3693_v28  ;;  %v1145_v56 = vmax.f32 %v1091_v57, %v4162_v55  ;;  %v1092_v6 = vmax.f32 %v685_v50, %v687_v8  ;;  %v2200_v16 = vpack.c.bf16 %v4429_v0, %v4426_v18  ;;  %v3661_v55 = vld [vmem:[%s4631_s3 + $0x2a8] sm:$0xff]   ;;  %v3673_v8 = vld [vmem:[%s4631_s3 + $0x318] sm:$0xff]  }
 0x1a2   :  { %v3686_v0 = vld [vmem:[%s4631_s3 + $0x2d8] sm:$0xff]  }
 0x1a3   :  { %3377 = vmatmul.mubr.bf16.vlgmr.msra.gmra.mrb[80].mxu1 %v1740_v63  ;;  %v2309_v1 = vmax.f32 %v1143_v3, %v1145_v56  ;;  %v1146_v49 = vmax.f32 %v1092_v6, %v4171_v20  ;;  %v3656_v63 = vld [vmem:[%s4631_s3 + $0x1d0] sm:$0xff]   ;;  %v3669_v3 = vld [vmem:[%s4631_s3 + $0x308] sm:$0xff]  }
 0x1a4   :  { %3401 = vmatpush3.bf16.msra.mxu1 %v3652_v11  ;;  %3469 = vmatpush3.bf16.msra.mxu0 %v3659_v14  ;;  %v3666_v14 = vld [vmem:[%s4631_s3 + $0x1f8] sm:$0xff]  }
 0x1a5   :  { %3402 = vmatprep.subr.bf16.mxu1 %v3693_v28  ;;  %v691_v59 = vpop.f32.mrb[88].mxu0  ;;  %v2310_v60 = vmax.f32 %v1144_v12, %v1146_v49  ;;  %3470 = vmatprep.subr.bf16.mxu0 %v3693_v28 }
 0x1a6   :  { %v693_v7 = vpop.f32.mrb[89].mxu0  ;;  %3416 = vmatprep.mubr.msk.bf16.mxu1 %vm3694_vm0, %v3693_v28 }
 0x1a7   :  { %v1093_v20 = vmax.f32 %v691_v59, %v693_v7  ;;  %v695_v35 = vpop.f32.mrb[90].mxu0  ;;  %v3668_v59 = vld [vmem:[%s4631_s3 + $0x240] sm:$0xff]  }
 0x1a8   :  { %3403 = vmatpush3.bf16.msra.mxu1 %v3654_v24  ;;  %3471 = vmatpush3.bf16.msra.mxu0 %v3661_v55  ;;  %v697_v2 = vpop.f32.mrb[91].mxu0  ;;  %v3675_v7 = vld [vmem:[%s4631_s3 + $0x320] sm:$0xff]  }
 0x1a9   :  { %3404 = vmatprep.subr.bf16.mxu1 %v3693_v28  ;;  %v1094_v47 = vmax.f32 %v695_v35, %v697_v2  ;;  %v1147_v52 = vmax.f32 %v1093_v20, %v4190_v41  ;;  %3472 = vmatprep.subr.bf16.mxu0 %v3693_v28 }
 0x1ab   :  { %v2311_v30 = vmax.f32 %v2309_v1, %v1147_v52  ;;  %v1148_v31 = vmax.f32 %v1094_v47, %v4196_v48  ;;  %v3670_v47 = vld [vmem:[%s4631_s3 + $0x248] sm:$0xff]  }
 0x1ac   :  { %3405 = vmatpush3.bf16.msra.mxu1 %v3656_v63  ;;  %3473 = vmatpush3.bf16.msra.mxu0 %v3663_v26 }
 0x1ad   :  { %3406 = vmatprep.subr.bf16.mxu1 %v3693_v28  ;;  %v2313_v17 = vadd.f32 %v4025_v51, %v2311_v30  ;;  %v2312_v41 = vmax.f32 %v2310_v60, %v1148_v31  ;;  %3474 = vmatprep.subr.bf16.mxu0 %v3693_v28  ;;  %v701_v33 = vpop.f32.mrb[92].mxu0 }
 0x1ae   :  { %v703_v38 = vpop.f32.mrb[93].mxu0 }
 0x1af   :  { %v2314_v48 = vadd.f32 %v4025_v51, %v2312_v41  ;;  %v1095_v39 = vmax.f32 %v701_v33, %v703_v38  ;;  %v705_v46 = vpop.f32.mrb[94].mxu0  ;;  %v3674_v38 = vld [vmem:[%s4631_s3 + $0x258] sm:$0xff]  }
 0x1b0   :  { %3407 = vmatpush3.bf16.msra.mxu1 %v3658_v10  ;;  %3475 = vmatpush3.bf16.msra.mxu0 %v3665_v36  ;;  %v707_v58 = vpop.f32.mrb[95].mxu0  ;;  %v3679_v10 = vld [vmem:[%s4631_s3 + $0x330] sm:$0xff]  }
 0x1b1   :  { %3408 = vmatprep.subr.bf16.mxu1 %v3693_v28  ;;  %v2315_v54 = vpack.c.bf16 %v2314_v48, %v2313_v17  ;;  %3500 = vmatprep.subr.bf16.mxu0 %v3693_v28  ;;  %v1149_v51 = vmax.f32 %v1095_v39, %v4182_v37  ;;  %v1096_v4 = vmax.f32 %v705_v46, %v707_v58  ;;  %v3681_v48 = vld [vmem:[%s4631_s3 + $0x338] sm:$0xff]   ;;  %v3676_v58 = vld [vmem:[%s4631_s3 + $0x260] sm:$0xff]  }
 0x1b3   :  { %3477 = vmatmul.mubr.bf16.vlgmr.msra.gmra.mrb[140].mxu0 %v2315_v54  ;;  %v1150_v13 = vmax.f32 %v1096_v4, %v4194_v19  ;;  %v2424_v34 = vmax.f32 %v1147_v52, %v1149_v51  ;;  %v3678_v4 = vld [vmem:[%s4631_s3 + $0x268] sm:$0xff]  }
 0x1b4   :  { %3409 = vmatpush3.bf16.msra.mxu1 %v3660_v42  ;;  %3501 = vmatpush3.bf16.msra.mxu0 %v3667_v53 }
 0x1b5   :  { %3410 = vmatprep.subr.bf16.mxu1 %v3693_v28  ;;  %3502 = vmatprep.subr.bf16.mxu0 %v3693_v28  ;;  %v711_v37 = vpop.f32.mrb[96].mxu0  ;;  %v2425_v25 = vmax.f32 %v1148_v31, %v1150_v13 }
 0x1b6   :  { %v713_v12 = vpop.f32.mrb[97].mxu0  ;;  %3516 = vmatprep.mubr.msk.bf16.mxu0 %vm3694_vm0, %v3693_v28 }
 0x1b7   :  { %v1097_v19 = vmax.f32 %v711_v37, %v713_v12  ;;  %v715_v61 = vpop.f32.mrb[98].mxu0 }
 0x1b8   :  { %3411 = vmatpush3.bf16.msra.mxu1 %v3662_v44  ;;  %3503 = vmatpush3.bf16.msra.mxu0 %v3669_v3  ;;  %v717_v45 = vpop.f32.mrb[99].mxu0  ;;  %v3680_v3 = vld [vmem:[%s4631_s3 + $0x270] sm:$0xff]  }
 0x1b9   :  { %3412 = vmatprep.subr.bf16.mxu1 %v3693_v28  ;;  %3504 = vmatprep.subr.bf16.mxu0 %v3693_v28  ;;  %v1098_v21 = vmax.f32 %v715_v61, %v717_v45  ;;  %v1151_v57 = vmax.f32 %v1097_v19, %v4217_v62  ;;  %v3691_v62 = vld [vmem:[%s4632_s2] ss:$0 sm:$0xff]  ;;  %v3684_v45 = vld [vmem:[%s4631_s3 + $0x2c8] sm:$0xff]  }
 0x1bb   :  { %v2426_v50 = vmax.f32 %v2424_v34, %v1151_v57  ;;  %v1152_v11 = vmax.f32 %v1098_v21, %v4224_v23 }
 0x1bc   :  { %3413 = vmatpush3.bf16.msra.mxu1 %v3664_v40  ;;  %3505 = vmatpush3.bf16.msra.mxu0 %v3671_v32  ;;  %v3683_v40 = vld [vmem:[%s4631_s3 + $0x2c0] sm:$0xff]  }
 0x1bd   :  { %3414 = vmatprep.subr.bf16.mxu1 %v3693_v28  ;;  %3506 = vmatprep.subr.bf16.mxu0 %v3693_v28  ;;  %v721_v56 = vpop.f32.mrb[100].mxu0  ;;  %v4517_v23 = vadd.f32 %v3691_v62, %v2426_v50  ;;  %v2427_v6 = vmax.f32 %v2425_v25, %v1152_v11  ;;  %v3682_v25 = vld [vmem:[%s4631_s3 + $0x278] sm:$0xff]  }
 0x1be   :  { %v723_v1 = vpop.f32.mrb[101].mxu0 }
 0x1bf   :  { %v1099_v49 = vmax.f32 %v721_v56, %v723_v1  ;;  %v725_v24 = vpop.f32.mrb[102].mxu0  ;;  %v4519_v55 = vadd.f32 %v3691_v62, %v2427_v6  ;;  %v3687_v56 = vld [vmem:[%s4631_s3 + $0x2e0] sm:$0xff]   ;;  %v3688_v6 = vld [vmem:[%s4631_s3 + $0x2e8] sm:$0xff]  }
 0x1c0   :  { %3415 = vmatpush3.bf16.msra.mxu1 %v3666_v14  ;;  %3507 = vmatpush3.bf16.msra.mxu0 %v3673_v8  ;;  %v727_v60 = vpop.f32.mrb[103].mxu0 }
 0x1c1   :  { %3440 = vmatprep.subr.bf16.mxu1 %v3693_v28  ;;  %v1153_v20 = vmax.f32 %v1099_v49, %v4209_v9  ;;  %3508 = vmatprep.subr.bf16.mxu0 %v3693_v28  ;;  %v1100_v35 = vmax.f32 %v725_v24, %v727_v60  ;;  %v2430_v63 = vpack.c.bf16 %v4519_v55, %v4517_v23  ;;  %v3677_v9 = vld [vmem:[%s4631_s3 + $0x328] sm:$0xff]  }
 0x1c3   :  { %3417 = vmatmul.mubr.bf16.vlgmr.msra.gmra.mrb[84].mxu1 %v1970_v5  ;;  %v2539_v2 = vmax.f32 %v1151_v57, %v1153_v20  ;;  %v1154_v26 = vmax.f32 %v1100_v35, %v4222_v22  ;;  %v3672_v5 = vld [vmem:[%s4631_s3 + $0x250] sm:$0xff]  }
 0x1c4   :  { %3441 = vmatpush3.bf16.msra.mxu1 %v3668_v59  ;;  %3509 = vmatpush3.bf16.msra.mxu0 %v3675_v7  ;;  %v3689_v59 = vld [vmem:[%s4631_s3 + $0x2f0] sm:$0xff]   ;;  %v3690_v7 = vld [vmem:[%s4631_s3 + $0x2f8] sm:$0xff]  }
 0x1c5   :  { %3442 = vmatprep.subr.bf16.mxu1 %v3693_v28  ;;  %v731_v52 = vpop.f32.mrb[104].mxu0  ;;  %v2540_v30 = vmax.f32 %v1152_v11, %v1154_v26  ;;  %3510 = vmatprep.subr.bf16.mxu0 %v3693_v28  ;;  %v3685_v11 = vld [vmem:[%s4631_s3 + $0x2d0] sm:$0xff]  }
 0x1c6   :  { %v733_v29 = vpop.f32.mrb[105].mxu0  ;;  %3456 = vmatprep.mubr.msk.bf16.mxu1 %vm3694_vm0, %v3693_v28 }
 0x1c7   :  { %v1101_v22 = vmax.f32 %v731_v52, %v733_v29  ;;  %v735_v15 = vpop.f32.mrb[106].mxu0 }
 0x1c8   :  { %3443 = vmatpush3.bf16.msra.mxu1 %v3670_v47  ;;  %v737_v31 = vpop.f32.mrb[107].mxu0  ;;  %3511 = vmatpush3.bf16.msra.mxu0 %v3677_v9 }
 0x1c9   :  { %3444 = vmatprep.subr.bf16.mxu1 %v3693_v28  ;;  %v1102_v36 = vmax.f32 %v735_v15, %v737_v31  ;;  %v1155_v17 = vmax.f32 %v1101_v22, %v4250_v43  ;;  %3512 = vmatprep.subr.bf16.mxu0 %v3693_v28 }
 0x1cb   :  { %v2541_v41 = vmax.f32 %v2539_v2, %v1155_v17  ;;  %v1156_v33 = vmax.f32 %v1102_v36, %v4257_v27 }
 0x1cc   :  { %3445 = vmatpush3.bf16.msra.mxu1 %v3672_v5  ;;  %3513 = vmatpush3.bf16.msra.mxu0 %v3679_v10 }
 0x1cd   :  { %3446 = vmatprep.subr.bf16.mxu1 %v3693_v28  ;;  %v2543_v39 = vadd.f32 %v3691_v62, %v2541_v41  ;;  %v2542_v46 = vmax.f32 %v2540_v30, %v1156_v33  ;;  %3514 = vmatprep.subr.bf16.mxu0 %v3693_v28  ;;  %v741_v43 = vpop.f32.mrb[108].mxu0 }
 0x1ce   :  { %v742_v42 = vpop.f32.mrb[109].mxu0 }
 0x1cf   :  { %v2544_v53 = vadd.f32 %v3691_v62, %v2542_v46  ;;  %v743_v27 = vpop.f32.mrb[110].mxu0 }
 0x1d0   :  { %3447 = vmatpush3.bf16.msra.mxu1 %v3674_v38  ;;  %3515 = vmatpush3.bf16.msra.mxu0 %v3681_v48  ;;  %v744_v54 = vpop.f32.mrb[111].mxu0 }
 0x1d1   :  { %3448 = vmatprep.subr.bf16.mxu1 %v3693_v28  ;;  %v2545_v51 = vpack.c.bf16 %v2544_v53, %v2543_v39 }
 0x1d3   :  { %3517 = vmatmul.mubr.bf16.vlgmr.msra.gmra.mrb[144].mxu0 %v2545_v51 }
 0x1d4   :  { %3449 = vmatpush3.bf16.msra.mxu1 %v3676_v58 }
 0x1d5   :  { %3450 = vmatprep.subr.bf16.mxu1 %v3693_v28  ;;  %v747_v13 = vpop.f32.mrb[112].mxu0 }
 0x1d6   :  { %v748_v34 = vpop.f32.mrb[113].mxu0 }
 0x1d7   :  { %v749_v44 = vpop.f32.mrb[114].mxu0 }
 0x1d8   :  { %3451 = vmatpush3.bf16.msra.mxu1 %v3678_v4  ;;  %v750_v37 = vpop.f32.mrb[115].mxu0 }
 0x1d9   :  { %3452 = vmatprep.subr.bf16.mxu1 %v3693_v28 }
 0x1dc   :  { %3453 = vmatpush3.bf16.msra.mxu1 %v3680_v3 }
 0x1dd   :  { %3454 = vmatprep.subr.bf16.mxu1 %v3693_v28  ;;  %v753_v12 = vpop.f32.mrb[116].mxu0 }
 0x1de   :  { %v754_v19 = vpop.f32.mrb[117].mxu0 }
 0x1df   :  { %v755_v61 = vpop.f32.mrb[118].mxu0 }
 0x1e0   :  { %3455 = vmatpush3.bf16.msra.mxu1 %v3682_v25  ;;  %v756_v32 = vpop.f32.mrb[119].mxu0 }
 0x1e1   :  { %3480 = vmatprep.subr.bf16.mxu1 %v3693_v28 }
 0x1e3   :  { %3457 = vmatmul.mubr.bf16.vlgmr.msra.gmra.mrb[88].mxu1 %v2200_v16 }
 0x1e4   :  { %3481 = vmatpush3.bf16.msra.mxu1 %v3683_v40  ;;  %3496 = vmatprep.mubr.msk.bf16.mxu1 %vm3694_vm0, %v3693_v28 }
 0x1e5   :  { %3482 = vmatprep.subr.bf16.mxu1 %v3693_v28  ;;  %v759_v21 = vpop.f32.mrb[120].mxu0 }
 0x1e6   :  { %v760_v57 = vpop.f32.mrb[121].mxu0 }
 0x1e7   :  { %v761_v50 = vpop.f32.mrb[122].mxu0 }
 0x1e8   :  { %3483 = vmatpush3.bf16.msra.mxu1 %v3684_v45  ;;  %v762_v18 = vpop.f32.mrb[123].mxu0 }
 0x1e9   :  { %3484 = vmatprep.subr.bf16.mxu1 %v3693_v28 }
 0x1ec   :  { %3485 = vmatpush3.bf16.msra.mxu1 %v3685_v11 }
 0x1ed   :  { %3486 = vmatprep.subr.bf16.mxu1 %v3693_v28  ;;  %v765_v16 = vpop.f32.mrb[124].mxu0 }
 0x1ee   :  { %v766_v14 = vpop.f32.mrb[125].mxu0 }
 0x1ef   :  { %v767_v8 = vpop.f32.mrb[126].mxu0 }
 0x1f0   :  { %3487 = vmatpush3.bf16.msra.mxu1 %v3686_v0  ;;  %v768_v62 = vpop.f32.mrb[127].mxu0 }
 0x1f1   :  { %3488 = vmatprep.subr.bf16.mxu1 %v3693_v28 }
 0x1f4   :  { %3489 = vmatpush3.bf16.msra.mxu1 %v3687_v56 }
 0x1f5   :  { %3490 = vmatprep.subr.bf16.mxu1 %v3693_v28 }
 0x1f6   :  { %v1293_v1 = vpop.f32.mrb[64].mxu1 }
 0x1f7   :  { %v3278_v49 = vpop.f32.mrb[65].mxu1 }
 0x1f8   :  { %3491 = vmatpush3.bf16.msra.mxu1 %v3688_v6  ;;  %v1296_v24 = vpop.f32.mrb[66].mxu1 }
 0x1f9   :  { %v3279_v60 = vpop.f32.mrb[67].mxu1  ;;  %3492 = vmatprep.subr.bf16.mxu1 %v3693_v28 }
 0x1fc   :  { %3493 = vmatpush3.bf16.msra.mxu1 %v3689_v59 }
 0x1fd   :  { %3494 = vmatprep.subr.bf16.mxu1 %v3693_v28 }
 0x200   :  { %3495 = vmatpush3.bf16.msra.mxu1 %v3690_v7 }
 0x203   :  { %3497 = vmatmul.mubr.bf16.vlgmr.msra.gmra.mrb[92].mxu1 %v2430_v63 }
 0x216   :  { %v1382_v20 = vpop.f32.mrb[68].mxu1 }
 0x217   :  { %v1383_v35 = vadd.f32 %v1382_v20, %v1293_v1  ;;  %v3298_v2 = vpop.f32.mrb[69].mxu1 }
 0x218   :  { %v1385_v26 = vpop.f32.mrb[70].mxu1 }
 0x219   :  { %v1386_v47 = vadd.f32 %v1385_v26, %v1296_v24  ;;  %v3299_v9 = vpop.f32.mrb[71].mxu1  ;;  %v3022_v26 = vld [vmem:[%s4633_s4] ss:$0 sm:$0xff] }
 0x226   :  { %v1725_v52 = vpop.f32.mrb[128].mxu0 }
 0x227   :  { %v3358_v30 = vpop.f32.mrb[129].mxu0 }
 0x228   :  { %v1728_v29 = vpop.f32.mrb[130].mxu0 }
 0x229   :  { %v3359_v22 = vpop.f32.mrb[131].mxu0 }
 0x236   :  { %v1495_v15 = vpop.f32.mrb[72].mxu1 }
 0x237   :  { %v1502_v5 = vadd.f32 %v1495_v15, %v1383_v35  ;;  %v3318_v31 = vpop.f32.mrb[73].mxu1 }
 0x238   :  { %v1498_v10 = vpop.f32.mrb[74].mxu1 }
 0x239   :  { %v1503_v28 = vadd.f32 %v1498_v10, %v1386_v47  ;;  %v3319_v36 = vpop.f32.mrb[75].mxu1 }
 0x246   :  { %v1955_v17 = vpop.f32.mrb[132].mxu0 }
 0x247   :  { %v3398_v41 = vpop.f32.mrb[133].mxu0 }
 0x248   :  { %v1958_v23 = vpop.f32.mrb[134].mxu0 }
 0x249   :  { %v3399_v55 = vpop.f32.mrb[135].mxu0 }
 0x256   :  { %v1610_v63 = vpop.f32.mrb[76].mxu1 }
 0x257   :  { %v1617_v33 = vadd.f32 %v1610_v63, %v1502_v5  ;;  %v3338_v38 = vpop.f32.mrb[77].mxu1 }
 0x258   :  { %v1613_v48 = vpop.f32.mrb[78].mxu1 }
 0x259   :  { %v1618_v39 = vadd.f32 %v1613_v48, %v1503_v28  ;;  %v3339_v46 = vpop.f32.mrb[79].mxu1  ;;  %v1732_v43 = vadd.f32 %v1725_v52, %v1617_v33 }
 0x25b   :  { %v1733_v42 = vadd.f32 %v1728_v29, %v1618_v39 }
 0x266   :  { %v2185_v53 = vpop.f32.mrb[136].mxu0 }
 0x267   :  { %v3438_v27 = vpop.f32.mrb[137].mxu0 }
 0x268   :  { %v2188_v58 = vpop.f32.mrb[138].mxu0 }
 0x269   :  { %v3439_v54 = vpop.f32.mrb[139].mxu0 }
 0x276   :  { %v1840_v51 = vpop.f32.mrb[80].mxu1 }
 0x277   :  { %v1847_v4 = vadd.f32 %v1840_v51, %v1732_v43  ;;  %v3378_v13 = vpop.f32.mrb[81].mxu1 }
 0x278   :  { %v1843_v34 = vpop.f32.mrb[82].mxu1 }
 0x279   :  { %v1848_v44 = vadd.f32 %v1843_v34, %v1733_v42  ;;  %v3379_v3 = vpop.f32.mrb[83].mxu1  ;;  %v1962_v37 = vadd.f32 %v1955_v17, %v1847_v4 }
 0x27b   :  { %v1963_v25 = vadd.f32 %v1958_v23, %v1848_v44 }
 0x286   :  { %v2415_v12 = vpop.f32.mrb[140].mxu0 }
 0x287   :  { %v3478_v19 = vpop.f32.mrb[141].mxu0 }
 0x288   :  { %v2418_v61 = vpop.f32.mrb[142].mxu0 }
 0x289   :  { %v3479_v40 = vpop.f32.mrb[143].mxu0 }
 0x296   :  { %v2070_v32 = vpop.f32.mrb[84].mxu1 }
 0x297   :  { %v2077_v45 = vadd.f32 %v2070_v32, %v1962_v37  ;;  %v3418_v21 = vpop.f32.mrb[85].mxu1 }
 0x298   :  { %v2073_v57 = vpop.f32.mrb[86].mxu1 }
 0x299   :  { %v2078_v50 = vadd.f32 %v2073_v57, %v1963_v25  ;;  %v3419_v11 = vpop.f32.mrb[87].mxu1  ;;  %v2192_v18 = vadd.f32 %v2185_v53, %v2077_v45 }
 0x29b   :  { %v2193_v0 = vadd.f32 %v2188_v58, %v2078_v50 }
 0x2a6   :  { %v2645_v16 = vpop.f32.mrb[144].mxu0 }
 0x2a7   :  { %v3518_v14 = vpop.f32.mrb[145].mxu0 }
 0x2a8   :  { %v2648_v8 = vpop.f32.mrb[146].mxu0 }
 0x2a9   :  { %v3519_v56 = vpop.f32.mrb[147].mxu0 }
 0x2b6   :  { %v2300_v62 = vpop.f32.mrb[88].mxu1 }
 0x2b7   :  { %v2307_v6 = vadd.f32 %v2300_v62, %v2192_v18  ;;  %v3458_v1 = vpop.f32.mrb[89].mxu1 }
 0x2b8   :  { %v2303_v49 = vpop.f32.mrb[90].mxu1 }
 0x2b9   :  { %v2308_v24 = vadd.f32 %v2303_v49, %v2193_v0  ;;  %v3459_v59 = vpop.f32.mrb[91].mxu1  ;;  %v2422_v60 = vadd.f32 %v2415_v12, %v2307_v6 }
 0x2bb   :  { %v2423_v7 = vadd.f32 %v2418_v61, %v2308_v24 }
 0x2d6   :  { %v2530_v20 = vpop.f32.mrb[92].mxu1 }
 0x2d7   :  { %v2537_v35 = vadd.f32 %v2530_v20, %v2422_v60  ;;  %v3498_v2 = vpop.f32.mrb[93].mxu1 }
 0x2d8   :  { %v2533_v47 = vpop.f32.mrb[94].mxu1 }
 0x2d9   :  { %v2652_v9 = vadd.f32 %v2645_v16, %v2537_v35  ;;  %v2538_v52 = vadd.f32 %v2533_v47, %v2423_v7  ;;  %v3499_v30 = vpop.f32.mrb[95].mxu1 }
 0x2db   :  { %v2661_v29 = vadd.f32 %v3022_v26, %v2652_v9  ;;  %v2653_v22 = vadd.f32 %v2648_v8, %v2538_v52 }
 0x2dd   :  { %2663 = vst [vmem:[%s4634_s5] sm:$0xff] %v2661_v29  ;;  %v2662_v15 = vadd.f32 %v3022_v26, %v2653_v22 }
 0x2df   :  { %2664 = vst [vmem:[%s4634_s5 + $0x8] sm:$0xff] %v2662_v15 }

// kernel: bilstm_char_forward.5
= control target key start
LH: loop header
LB: loop body
LE: loop exit
PB: predicated region body
PF: predicated region fallthrough
CT: control target
= control target key end

     0   :  { %s2504_s1 = inlined_call_operand.vmem [shape: bf16[384,1024], index: 1, kind: input, shape index: {}]   ;;  %s2505_s0 = inlined_call_operand.vmem [shape: bf16[16,384], index: 0, kind: input, shape index: {}]   ;;  %s2506_s2 = inlined_call_operand.vmem [shape: f32[1,1024], index: 2, kind: input, shape index: {}]   ;;  %s2507_s3 = inlined_call_operand.vmem [shape: f32[16,1024], index: 3, kind: output, shape index: {}]  }
   0x1   :  { %v19_v0 = vld [vmem:[%s2504_s1] sm:$0xff]  ;;  %v20_v2 = vld [vmem:[%s2504_s1 + $0x8] sm:$0xff] }
   0x2   :  { %v23_v1 = vld [vmem:[%s2504_s1 + $0x20] sm:$0xff]  ;;  %v24_v4 = vld [vmem:[%s2504_s1 + $0x28] sm:$0xff] }
   0x3   :  { %v1597_v3 = vcombine.high %v19_v0, %v23_v1  ;;  %v1596_v5 = vcombine.low %v19_v0, %v23_v1  ;;  %v27_v6 = vld [vmem:[%s2504_s1 + $0x40] sm:$0xff]  ;;  %v1599_v8 = vcombine.high %v20_v2, %v24_v4  ;;  %v1598_v9 = vcombine.low %v20_v2, %v24_v4  ;;  %v28_v11 = vld [vmem:[%s2504_s1 + $0x48] sm:$0xff] }
   0x4   :  { %v31_v7 = vld [vmem:[%s2504_s1 + $0x60] sm:$0xff]  ;;  %v32_v12 = vld [vmem:[%s2504_s1 + $0x68] sm:$0xff] }
   0x5   :  { %v1605_v10 = vcombine.high %v27_v6, %v31_v7  ;;  %v35_v13 = vld [vmem:[%s2504_s1 + $0x80] sm:$0xff]  ;;  %1229 = vmatprep.subr.bf16.mxu0 %v1597_v3  ;;  %v1607_v14 = vcombine.high %v28_v11, %v32_v12  ;;  %v36_v16 = vld [vmem:[%s2504_s1 + $0x88] sm:$0xff]  ;;  %1315 = vmatprep.subr.bf16.mxu1 %v1599_v8  ;;  %v1604_v18 = vcombine.low %v27_v6, %v31_v7 }
   0x6   :  { %v39_v15 = vld [vmem:[%s2504_s1 + $0xa0] sm:$0xff]  ;;  %v40_v17 = vld [vmem:[%s2504_s1 + $0xa8] sm:$0xff]  ;;  %1230 = vmatpush1.bf16.msra.mxu0 %v1596_v5  ;;  %1316 = vmatpush1.bf16.msra.mxu1 %v1598_v9  ;;  %v1606_v19 = vcombine.low %v28_v11, %v32_v12 }
   0x7   :  { %1231 = vmatprep.subr.bf16.mxu0 %v1605_v10  ;;  %v1613_v20 = vcombine.high %v35_v13, %v39_v15  ;;  %1317 = vmatprep.subr.bf16.mxu1 %v1607_v14  ;;  %v1615_v21 = vcombine.high %v36_v16, %v40_v17  ;;  %v43_v22 = vld [vmem:[%s2504_s1 + $0xc0] sm:$0xff]  ;;  %v44_v24 = vld [vmem:[%s2504_s1 + $0xc8] sm:$0xff]  ;;  %v1612_v26 = vcombine.low %v35_v13, %v39_v15 }
   0x8   :  { %v47_v23 = vld [vmem:[%s2504_s1 + $0xe0] sm:$0xff]  ;;  %v48_v25 = vld [vmem:[%s2504_s1 + $0xe8] sm:$0xff]  ;;  %v1614_v27 = vcombine.low %v36_v16, %v40_v17 }
   0x9   :  { %v1621_v28 = vcombine.high %v43_v22, %v47_v23  ;;  %v1623_v29 = vcombine.high %v44_v24, %v48_v25  ;;  %v51_v30 = vld [vmem:[%s2504_s1 + $0x100] sm:$0xff]  ;;  %v52_v32 = vld [vmem:[%s2504_s1 + $0x108] sm:$0xff]  ;;  %v1620_v34 = vcombine.low %v43_v22, %v47_v23  ;;  %v1622_v35 = vcombine.low %v44_v24, %v48_v25 }
   0xa   :  { %1232 = vmatpush1.bf16.msra.mxu0 %v1604_v18  ;;  %1318 = vmatpush1.bf16.msra.mxu1 %v1606_v19  ;;  %v55_v31 = vld [vmem:[%s2504_s1 + $0x120] sm:$0xff]  ;;  %v56_v33 = vld [vmem:[%s2504_s1 + $0x128] sm:$0xff] }
   0xb   :  { %1233 = vmatprep.subr.bf16.mxu0 %v1613_v20  ;;  %1319 = vmatprep.subr.bf16.mxu1 %v1615_v21  ;;  %v1629_v36 = vcombine.high %v51_v30, %v55_v31  ;;  %v1631_v37 = vcombine.high %v52_v32, %v56_v33  ;;  %v59_v38 = vld [vmem:[%s2504_s1 + $0x140] sm:$0xff]  ;;  %v60_v40 = vld [vmem:[%s2504_s1 + $0x148] sm:$0xff]  ;;  %v1628_v42 = vcombine.low %v51_v30, %v55_v31 }
   0xc   :  { %v63_v39 = vld [vmem:[%s2504_s1 + $0x160] sm:$0xff]  ;;  %v64_v41 = vld [vmem:[%s2504_s1 + $0x168] sm:$0xff]  ;;  %v1630_v43 = vcombine.low %v52_v32, %v56_v33 }
   0xd   :  { %v1637_v44 = vcombine.high %v59_v38, %v63_v39  ;;  %v1639_v45 = vcombine.high %v60_v40, %v64_v41  ;;  %v67_v46 = vld [vmem:[%s2504_s1 + $0x180] sm:$0xff]  ;;  %v68_v48 = vld [vmem:[%s2504_s1 + $0x188] sm:$0xff]  ;;  %v1636_v50 = vcombine.low %v59_v38, %v63_v39  ;;  %v1638_v51 = vcombine.low %v60_v40, %v64_v41 }
   0xe   :  { %1234 = vmatpush1.bf16.msra.mxu0 %v1612_v26  ;;  %1320 = vmatpush1.bf16.msra.mxu1 %v1614_v27  ;;  %v71_v47 = vld [vmem:[%s2504_s1 + $0x1a0] sm:$0xff]  ;;  %v72_v49 = vld [vmem:[%s2504_s1 + $0x1a8] sm:$0xff] }
   0xf   :  { %1235 = vmatprep.subr.bf16.mxu0 %v1621_v28  ;;  %1321 = vmatprep.subr.bf16.mxu1 %v1623_v29  ;;  %v1645_v52 = vcombine.high %v67_v46, %v71_v47  ;;  %v1647_v53 = vcombine.high %v68_v48, %v72_v49  ;;  %v75_v54 = vld [vmem:[%s2504_s1 + $0x1c0] sm:$0xff]  ;;  %v76_v57 = vld [vmem:[%s2504_s1 + $0x1c8] sm:$0xff]  ;;  %v1644_v59 = vcombine.low %v67_v46, %v71_v47 }
  0x10   :  { %v79_v55 = vld [vmem:[%s2504_s1 + $0x1e0] sm:$0xff]  ;;  %v80_v58 = vld [vmem:[%s2504_s1 + $0x1e8] sm:$0xff]  ;;  %v1646_v60 = vcombine.low %v68_v48, %v72_v49 }
  0x11   :  { %v1939_v56 = vld [vmem:[%s2505_s0 + $0x4] ss:$12 sps:$4 sm:$0xff]   ;;  %v1653_v61 = vcombine.high %v75_v54, %v79_v55  ;;  %v1655_v62 = vcombine.high %v76_v57, %v80_v58  ;;  %v84_v1 = vld [vmem:[%s2504_s1 + $0x208] sm:$0xff]  ;;  %v1652_v3 = vcombine.low %v75_v54, %v79_v55  ;;  %v1654_v4 = vcombine.low %v76_v57, %v80_v58 }
  0x12   :  { %1236 = vmatpush1.bf16.msra.mxu0 %v1620_v34  ;;  %1322 = vmatpush1.bf16.msra.mxu1 %v1622_v35  ;;  %v83_v63 = vld [vmem:[%s2504_s1 + $0x200] sm:$0xff]  ;;  %v88_v2 = vld [vmem:[%s2504_s1 + $0x228] sm:$0xff] }
  0x13   :  { %1237 = vmatprep.subr.bf16.mxu0 %v1629_v36  ;;  %1323 = vmatprep.subr.bf16.mxu1 %v1631_v37  ;;  %v87_v0 = vld [vmem:[%s2504_s1 + $0x220] sm:$0xff]  ;;  %v1663_v6 = vcombine.high %v84_v1, %v88_v2  ;;  %v92_v9 = vld [vmem:[%s2504_s1 + $0x248] sm:$0xff]  ;;  %v1662_v12 = vcombine.low %v84_v1, %v88_v2 }
  0x14   :  { %1261 = vmatprep.mubr.bf16.mxu0 %v1939_v56  ;;  %1347 = vmatprep.mubr.bf16.mxu1 %v1939_v56  ;;  %v1661_v5 = vcombine.high %v83_v63, %v87_v0  ;;  %v91_v7 = vld [vmem:[%s2504_s1 + $0x240] sm:$0xff]  ;;  %v96_v10 = vld [vmem:[%s2504_s1 + $0x268] sm:$0xff]  ;;  %v1660_v11 = vcombine.low %v83_v63, %v87_v0 }
  0x15   :  { %v95_v8 = vld [vmem:[%s2504_s1 + $0x260] sm:$0xff]  ;;  %v1671_v14 = vcombine.high %v92_v9, %v96_v10  ;;  %v100_v17 = vld [vmem:[%s2504_s1 + $0x288] sm:$0xff]  ;;  %v1670_v20 = vcombine.low %v92_v9, %v96_v10 }
  0x16   :  { %1238 = vmatpush1.bf16.msra.mxu0 %v1628_v42  ;;  %1324 = vmatpush1.bf16.msra.mxu1 %v1630_v43  ;;  %v1669_v13 = vcombine.high %v91_v7, %v95_v8  ;;  %v99_v15 = vld [vmem:[%s2504_s1 + $0x280] sm:$0xff]  ;;  %v104_v18 = vld [vmem:[%s2504_s1 + $0x2a8] sm:$0xff]  ;;  %v1668_v19 = vcombine.low %v91_v7, %v95_v8 }
  0x17   :  { %1239 = vmatprep.subr.bf16.mxu0 %v1637_v44  ;;  %1325 = vmatprep.subr.bf16.mxu1 %v1639_v45  ;;  %v103_v16 = vld [vmem:[%s2504_s1 + $0x2a0] sm:$0xff]  ;;  %v1679_v22 = vcombine.high %v100_v17, %v104_v18  ;;  %v108_v25 = vld [vmem:[%s2504_s1 + $0x2c8] sm:$0xff]  ;;  %v1678_v28 = vcombine.low %v100_v17, %v104_v18 }
  0x18   :  { %v1677_v21 = vcombine.high %v99_v15, %v103_v16  ;;  %v107_v23 = vld [vmem:[%s2504_s1 + $0x2c0] sm:$0xff]  ;;  %v112_v26 = vld [vmem:[%s2504_s1 + $0x2e8] sm:$0xff]  ;;  %v1676_v27 = vcombine.low %v99_v15, %v103_v16 }
  0x19   :  { %v111_v24 = vld [vmem:[%s2504_s1 + $0x2e0] sm:$0xff]  ;;  %v1687_v30 = vcombine.high %v108_v25, %v112_v26  ;;  %v116_v33 = vld [vmem:[%s2504_s1 + $0x308] sm:$0xff]  ;;  %v1686_v36 = vcombine.low %v108_v25, %v112_v26 }
  0x1a   :  { %1240 = vmatpush1.bf16.msra.mxu0 %v1636_v50  ;;  %1326 = vmatpush1.bf16.msra.mxu1 %v1638_v51  ;;  %v1685_v29 = vcombine.high %v107_v23, %v111_v24  ;;  %v115_v31 = vld [vmem:[%s2504_s1 + $0x300] sm:$0xff]  ;;  %v120_v34 = vld [vmem:[%s2504_s1 + $0x328] sm:$0xff]  ;;  %v1684_v35 = vcombine.low %v107_v23, %v111_v24 }
  0x1b   :  { %1241 = vmatprep.subr.bf16.mxu0 %v1645_v52  ;;  %1327 = vmatprep.subr.bf16.mxu1 %v1647_v53  ;;  %v119_v32 = vld [vmem:[%s2504_s1 + $0x320] sm:$0xff]  ;;  %v1695_v38 = vcombine.high %v116_v33, %v120_v34  ;;  %v124_v41 = vld [vmem:[%s2504_s1 + $0x348] sm:$0xff]  ;;  %v1694_v44 = vcombine.low %v116_v33, %v120_v34 }
  0x1c   :  { %v1693_v37 = vcombine.high %v115_v31, %v119_v32  ;;  %v123_v39 = vld [vmem:[%s2504_s1 + $0x340] sm:$0xff]  ;;  %v128_v42 = vld [vmem:[%s2504_s1 + $0x368] sm:$0xff]  ;;  %v1692_v43 = vcombine.low %v115_v31, %v119_v32 }
  0x1d   :  { %v127_v40 = vld [vmem:[%s2504_s1 + $0x360] sm:$0xff]  ;;  %v1703_v46 = vcombine.high %v124_v41, %v128_v42  ;;  %v132_v49 = vld [vmem:[%s2504_s1 + $0x388] sm:$0xff]  ;;  %v1702_v52 = vcombine.low %v124_v41, %v128_v42 }
  0x1e   :  { %1242 = vmatpush1.bf16.msra.mxu0 %v1644_v59  ;;  %1328 = vmatpush1.bf16.msra.mxu1 %v1646_v60  ;;  %v1701_v45 = vcombine.high %v123_v39, %v127_v40  ;;  %v131_v47 = vld [vmem:[%s2504_s1 + $0x380] sm:$0xff]  ;;  %v136_v50 = vld [vmem:[%s2504_s1 + $0x3a8] sm:$0xff]  ;;  %v1700_v51 = vcombine.low %v123_v39, %v127_v40 }
  0x1f   :  { %1243 = vmatprep.subr.bf16.mxu0 %v1653_v61  ;;  %1329 = vmatprep.subr.bf16.mxu1 %v1655_v62  ;;  %v135_v48 = vld [vmem:[%s2504_s1 + $0x3a0] sm:$0xff]  ;;  %v1711_v54 = vcombine.high %v132_v49, %v136_v50  ;;  %v140_v58 = vld [vmem:[%s2504_s1 + $0x3c8] sm:$0xff]  ;;  %v1710_v61 = vcombine.low %v132_v49, %v136_v50 }
  0x20   :  { %v1709_v53 = vcombine.high %v131_v47, %v135_v48  ;;  %v139_v55 = vld [vmem:[%s2504_s1 + $0x3c0] sm:$0xff]  ;;  %v144_v59 = vld [vmem:[%s2504_s1 + $0x3e8] sm:$0xff]  ;;  %v1708_v60 = vcombine.low %v131_v47, %v135_v48 }
  0x21   :  { %v143_v57 = vld [vmem:[%s2504_s1 + $0x3e0] sm:$0xff]  ;;  %v1719_v63 = vcombine.high %v140_v58, %v144_v59  ;;  %v148_v2 = vld [vmem:[%s2504_s1 + $0x408] sm:$0xff] }
  0x22   :  { %1244 = vmatpush1.bf16.msra.mxu0 %v1652_v3  ;;  %1330 = vmatpush1.bf16.msra.mxu1 %v1654_v4  ;;  %v1717_v62 = vcombine.high %v139_v55, %v143_v57  ;;  %v147_v0 = vld [vmem:[%s2504_s1 + $0x400] sm:$0xff]  ;;  %v152_v3 = vld [vmem:[%s2504_s1 + $0x428] sm:$0xff]  ;;  %v1716_v4 = vcombine.low %v139_v55, %v143_v57 }
  0x23   :  { %1245 = vmatprep.subr.bf16.mxu0 %v1661_v5  ;;  %1331 = vmatprep.subr.bf16.mxu1 %v1663_v6  ;;  %v151_v1 = vld [vmem:[%s2504_s1 + $0x420] sm:$0xff]  ;;  %v1718_v5 = vcombine.low %v140_v58, %v144_v59  ;;  %v1727_v7 = vcombine.high %v148_v2, %v152_v3 }
  0x24   :  { %v1725_v6 = vcombine.high %v147_v0, %v151_v1  ;;  %v155_v8 = vld [vmem:[%s2504_s1 + $0x440] sm:$0xff] }
  0x25   :  { %v159_v9 = vld [vmem:[%s2504_s1 + $0x460] sm:$0xff] }
  0x26   :  { %1246 = vmatpush1.bf16.msra.mxu0 %v1660_v11  ;;  %1332 = vmatpush1.bf16.msra.mxu1 %v1662_v12  ;;  %v2066_v10 = vld [vmem:[%s2505_s0] ss:$12 sps:$4 sm:$0xff]   ;;  %v1733_v15 = vcombine.high %v155_v8, %v159_v9 }
  0x27   :  { %1247 = vmatprep.subr.bf16.mxu0 %v1669_v13  ;;  %1333 = vmatprep.subr.bf16.mxu1 %v1671_v14  ;;  %v156_v11 = vld [vmem:[%s2504_s1 + $0x448] sm:$0xff]  ;;  %v1724_v13 = vcombine.low %v147_v0, %v151_v1  ;;  %v1726_v14 = vcombine.low %v148_v2, %v152_v3  ;;  %v163_v17 = vld [vmem:[%s2504_s1 + $0x480] sm:$0xff]  ;;  %v21_v3 = vld [vmem:[%s2504_s1 + $0x10] sm:$0xff] }
  0x28   :  { %v160_v12 = vld [vmem:[%s2504_s1 + $0x468] sm:$0xff]  ;;  %v167_v18 = vld [vmem:[%s2504_s1 + $0x4a0] sm:$0xff] }
  0x29   :  { %v1735_v16 = vcombine.high %v156_v11, %v160_v12  ;;  %v1741_v23 = vcombine.high %v163_v17, %v167_v18  ;;  %v171_v25 = vld [vmem:[%s2504_s1 + $0x4c0] sm:$0xff] }
  0x2a   :  { %1248 = vmatpush1.bf16.msra.mxu0 %v1668_v19  ;;  %1334 = vmatpush1.bf16.msra.mxu1 %v1670_v20  ;;  %v164_v19 = vld [vmem:[%s2504_s1 + $0x488] sm:$0xff]  ;;  %v175_v26 = vld [vmem:[%s2504_s1 + $0x4e0] sm:$0xff] }
  0x2b   :  { %1249 = vmatprep.subr.bf16.mxu0 %v1677_v21  ;;  %1335 = vmatprep.subr.bf16.mxu1 %v1679_v22  ;;  %v168_v20 = vld [vmem:[%s2504_s1 + $0x4a8] sm:$0xff]  ;;  %v1732_v21 = vcombine.low %v155_v8, %v159_v9  ;;  %v1734_v22 = vcombine.low %v156_v11, %v160_v12  ;;  %v1749_v32 = vcombine.high %v171_v25, %v175_v26  ;;  %v179_v34 = vld [vmem:[%s2504_s1 + $0x500] sm:$0xff]  ;;  %v29_v12 = vld [vmem:[%s2504_s1 + $0x50] sm:$0xff] }
  0x2c   :  { %v1743_v24 = vcombine.high %v164_v19, %v168_v20  ;;  %v1742_v31 = vcombine.low %v164_v19, %v168_v20  ;;  %v187_v42 = vld [vmem:[%s2504_s1 + $0x540] sm:$0xff] }
  0x2d   :  { %v195_v50 = vld [vmem:[%s2504_s1 + $0x580] sm:$0xff] }
  0x2e   :  { %1250 = vmatpush1.bf16.msra.mxu0 %v1676_v27  ;;  %1336 = vmatpush1.bf16.msra.mxu1 %v1678_v28  ;;  %v1825_v27 = vmov 0   ;;  %v172_v28 = vld [vmem:[%s2504_s1 + $0x4c8] sm:$0xff]  ;;  %v203_v59 = vld [vmem:[%s2504_s1 + $0x5c0] sm:$0xff] }
  0x2f   :  { %1251 = vmatprep.subr.bf16.mxu0 %v1685_v29  ;;  %1337 = vmatprep.subr.bf16.mxu1 %v1687_v30  ;;  %v176_v29 = vld [vmem:[%s2504_s1 + $0x4e8] sm:$0xff]  ;;  %v1740_v30 = vcombine.low %v163_v17, %v167_v18 }
  0x30   :  { %v1751_v33 = vcombine.high %v172_v28, %v176_v29  ;;  %v1750_v39 = vcombine.low %v172_v28, %v176_v29 }
  0x32   :  { %1252 = vmatpush1.bf16.msra.mxu0 %v1684_v35  ;;  %1338 = vmatpush1.bf16.msra.mxu1 %v1686_v36  ;;  %v183_v35 = vld [vmem:[%s2504_s1 + $0x520] sm:$0xff]  ;;  %v180_v36 = vld [vmem:[%s2504_s1 + $0x508] sm:$0xff] }
  0x33   :  { %1253 = vmatprep.subr.bf16.mxu0 %v1693_v37  ;;  %1339 = vmatprep.subr.bf16.mxu1 %v1695_v38  ;;  %v184_v37 = vld [vmem:[%s2504_s1 + $0x528] sm:$0xff]  ;;  %v1748_v38 = vcombine.low %v171_v25, %v175_v26  ;;  %v1757_v40 = vcombine.high %v179_v34, %v183_v35 }
  0x34   :  { %v1759_v41 = vcombine.high %v180_v36, %v184_v37  ;;  %v1758_v47 = vcombine.low %v180_v36, %v184_v37 }
  0x36   :  { %1254 = vmatpush1.bf16.msra.mxu0 %v1692_v43  ;;  %1340 = vmatpush1.bf16.msra.mxu1 %v1694_v44  ;;  %v191_v43 = vld [vmem:[%s2504_s1 + $0x560] sm:$0xff]  ;;  %v188_v44 = vld [vmem:[%s2504_s1 + $0x548] sm:$0xff] }
  0x37   :  { %1255 = vmatprep.subr.bf16.mxu0 %v1701_v45  ;;  %1341 = vmatprep.subr.bf16.mxu1 %v1703_v46  ;;  %v192_v45 = vld [vmem:[%s2504_s1 + $0x568] sm:$0xff]  ;;  %v1756_v46 = vcombine.low %v179_v34, %v183_v35  ;;  %v1765_v48 = vcombine.high %v187_v42, %v191_v43 }
  0x38   :  { %v1767_v49 = vcombine.high %v188_v44, %v192_v45  ;;  %v1766_v55 = vcombine.low %v188_v44, %v192_v45  ;;  %v61_v45 = vld [vmem:[%s2504_s1 + $0x150] sm:$0xff] }
  0x3a   :  { %1256 = vmatpush1.bf16.msra.mxu0 %v1700_v51  ;;  %1342 = vmatpush1.bf16.msra.mxu1 %v1702_v52  ;;  %v199_v51 = vld [vmem:[%s2504_s1 + $0x5a0] sm:$0xff]  ;;  %v196_v52 = vld [vmem:[%s2504_s1 + $0x588] sm:$0xff] }
  0x3b   :  { %1257 = vmatprep.subr.bf16.mxu0 %v1709_v53  ;;  %1343 = vmatprep.subr.bf16.mxu1 %v1711_v54  ;;  %v200_v53 = vld [vmem:[%s2504_s1 + $0x5a8] sm:$0xff]  ;;  %v1764_v54 = vcombine.low %v187_v42, %v191_v43  ;;  %v1773_v57 = vcombine.high %v195_v50, %v199_v51 }
  0x3c   :  { %v1775_v58 = vcombine.high %v196_v52, %v200_v53  ;;  %v1774_v0 = vcombine.low %v196_v52, %v200_v53  ;;  %v69_v53 = vld [vmem:[%s2504_s1 + $0x190] sm:$0xff] }
  0x3e   :  { %1258 = vmatpush1.bf16.msra.mxu0 %v1708_v60  ;;  %1344 = vmatpush1.bf16.msra.mxu1 %v1710_v61  ;;  %v207_v60 = vld [vmem:[%s2504_s1 + $0x5e0] sm:$0xff]  ;;  %v204_v61 = vld [vmem:[%s2504_s1 + $0x5c8] sm:$0xff] }
  0x3f   :  { %1259 = vmatprep.subr.bf16.mxu0 %v1717_v62  ;;  %1345 = vmatprep.subr.bf16.mxu1 %v1719_v63  ;;  %v208_v62 = vld [vmem:[%s2504_s1 + $0x5e8] sm:$0xff]  ;;  %v1772_v63 = vcombine.low %v195_v50, %v199_v51  ;;  %v1781_v1 = vcombine.high %v203_v59, %v207_v60 }
  0x40   :  { %v1783_v2 = vcombine.high %v204_v61, %v208_v62  ;;  %v1782_v8 = vcombine.low %v204_v61, %v208_v62  ;;  %v77_v62 = vld [vmem:[%s2504_s1 + $0x1d0] sm:$0xff] }
  0x42   :  { %1260 = vmatpush1.bf16.msra.mxu0 %v1716_v4  ;;  %1346 = vmatpush1.bf16.msra.mxu1 %v1718_v5  ;;  %v25_v4 = vld [vmem:[%s2504_s1 + $0x30] sm:$0xff]  ;;  %v22_v5 = vld [vmem:[%s2504_s1 + $0x18] sm:$0xff] }
  0x43   :  { %1272 = vmatprep.subr.bf16.mxu0 %v1725_v6  ;;  %1358 = vmatprep.subr.bf16.mxu1 %v1727_v7  ;;  %v26_v6 = vld [vmem:[%s2504_s1 + $0x38] sm:$0xff]  ;;  %v1780_v7 = vcombine.low %v203_v59, %v207_v60  ;;  %v1601_v9 = vcombine.high %v21_v3, %v25_v4  ;;  %v1600_v17 = vcombine.low %v21_v3, %v25_v4 }
  0x44   :  { %v1603_v11 = vcombine.high %v22_v5, %v26_v6  ;;  %v1602_v18 = vcombine.low %v22_v5, %v26_v6  ;;  %v85_v6 = vld [vmem:[%s2504_s1 + $0x210] sm:$0xff] }
  0x45   :  { %1262 = vmatmul.mubr.bf16.vlgmr.msra.gmra.mrb[0].mxu0 %v2066_v10  ;;  %1348 = vmatmul.mubr.bf16.vlgmr.msra.gmra.mrb[0].mxu1 %v2066_v10 }
  0x46   :  { %1273 = vmatpush1.bf16.msra.mxu0 %v1724_v13  ;;  %1359 = vmatpush1.bf16.msra.mxu1 %v1726_v14  ;;  %v33_v13 = vld [vmem:[%s2504_s1 + $0x70] sm:$0xff] }
  0x47   :  { %1274 = vmatprep.subr.bf16.mxu0 %v1733_v15  ;;  %1360 = vmatprep.subr.bf16.mxu1 %v1735_v16  ;;  %v2171_v14 = vld [vmem:[%s2505_s0 + $0x8] ss:$12 sps:$4 sm:$0xff]   ;;  %v30_v15 = vld [vmem:[%s2504_s1 + $0x58] sm:$0xff]  ;;  %v1609_v19 = vcombine.high %v29_v12, %v33_v13  ;;  %v1608_v25 = vcombine.low %v29_v12, %v33_v13 }
  0x48   :  { %1304 = vmatprep.mubr.bf16.mxu0 %v1825_v27  ;;  %1390 = vmatprep.mubr.bf16.mxu1 %v1825_v27  ;;  %v34_v16 = vld [vmem:[%s2504_s1 + $0x78] sm:$0xff] }
  0x49   :  { %v1611_v20 = vcombine.high %v30_v15, %v34_v16  ;;  %v1610_v26 = vcombine.low %v30_v15, %v34_v16  ;;  %v93_v16 = vld [vmem:[%s2504_s1 + $0x250] sm:$0xff] }
  0x4a   :  { %1275 = vmatpush1.bf16.msra.mxu0 %v1732_v21  ;;  %1361 = vmatpush1.bf16.msra.mxu1 %v1734_v22  ;;  %v37_v21 = vld [vmem:[%s2504_s1 + $0x90] sm:$0xff] }
  0x4b   :  { %1276 = vmatprep.subr.bf16.mxu0 %v1741_v23  ;;  %1362 = vmatprep.subr.bf16.mxu1 %v1743_v24  ;;  %v41_v22 = vld [vmem:[%s2504_s1 + $0xb0] sm:$0xff]  ;;  %v38_v23 = vld [vmem:[%s2504_s1 + $0x98] sm:$0xff] }
  0x4c   :  { %v42_v24 = vld [vmem:[%s2504_s1 + $0xb8] sm:$0xff]  ;;  %v1617_v28 = vcombine.high %v37_v21, %v41_v22  ;;  %v1616_v34 = vcombine.low %v37_v21, %v41_v22 }
  0x4d   :  { %v1619_v29 = vcombine.high %v38_v23, %v42_v24  ;;  %v1618_v35 = vcombine.low %v38_v23, %v42_v24  ;;  %v101_v24 = vld [vmem:[%s2504_s1 + $0x290] sm:$0xff] }
  0x4e   :  { %1277 = vmatpush1.bf16.msra.mxu0 %v1740_v30  ;;  %1363 = vmatpush1.bf16.msra.mxu1 %v1742_v31  ;;  %v45_v30 = vld [vmem:[%s2504_s1 + $0xd0] sm:$0xff] }
  0x4f   :  { %1278 = vmatprep.subr.bf16.mxu0 %v1749_v32  ;;  %1364 = vmatprep.subr.bf16.mxu1 %v1751_v33  ;;  %v49_v31 = vld [vmem:[%s2504_s1 + $0xf0] sm:$0xff]  ;;  %v46_v32 = vld [vmem:[%s2504_s1 + $0xd8] sm:$0xff] }
  0x50   :  { %v50_v33 = vld [vmem:[%s2504_s1 + $0xf8] sm:$0xff]  ;;  %v1625_v36 = vcombine.high %v45_v30, %v49_v31 }
  0x51   :  { %v1627_v37 = vcombine.high %v46_v32, %v50_v33  ;;  %v1626_v42 = vcombine.low %v46_v32, %v50_v33  ;;  %v109_v33 = vld [vmem:[%s2504_s1 + $0x2d0] sm:$0xff] }
  0x52   :  { %1279 = vmatpush1.bf16.msra.mxu0 %v1748_v38  ;;  %1365 = vmatpush1.bf16.msra.mxu1 %v1750_v39  ;;  %v53_v38 = vld [vmem:[%s2504_s1 + $0x110] sm:$0xff] }
  0x53   :  { %1280 = vmatprep.subr.bf16.mxu0 %v1757_v40  ;;  %1366 = vmatprep.subr.bf16.mxu1 %v1759_v41  ;;  %v57_v39 = vld [vmem:[%s2504_s1 + $0x130] sm:$0xff]  ;;  %v58_v40 = vld [vmem:[%s2504_s1 + $0x138] sm:$0xff]  ;;  %v1624_v41 = vcombine.low %v45_v30, %v49_v31 }
  0x54   :  { %v1633_v43 = vcombine.high %v53_v38, %v57_v39 }
  0x56   :  { %1281 = vmatpush1.bf16.msra.mxu0 %v1756_v46  ;;  %1367 = vmatpush1.bf16.msra.mxu1 %v1758_v47  ;;  %v65_v46 = vld [vmem:[%s2504_s1 + $0x170] sm:$0xff]  ;;  %v62_v47 = vld [vmem:[%s2504_s1 + $0x158] sm:$0xff] }
  0x57   :  { %1282 = vmatprep.subr.bf16.mxu0 %v1765_v48  ;;  %1368 = vmatprep.subr.bf16.mxu1 %v1767_v49  ;;  %v66_v48 = vld [vmem:[%s2504_s1 + $0x178] sm:$0xff]  ;;  %v1632_v49 = vcombine.low %v53_v38, %v57_v39  ;;  %v1641_v51 = vcombine.high %v61_v45, %v65_v46 }
  0x58   :  { %v1643_v52 = vcombine.high %v62_v47, %v66_v48  ;;  %v1642_v59 = vcombine.low %v62_v47, %v66_v48  ;;  %v125_v48 = vld [vmem:[%s2504_s1 + $0x350] sm:$0xff] }
  0x5a   :  { %1283 = vmatpush1.bf16.msra.mxu0 %v1764_v54  ;;  %1369 = vmatpush1.bf16.msra.mxu1 %v1766_v55  ;;  %v73_v54 = vld [vmem:[%s2504_s1 + $0x1b0] sm:$0xff]  ;;  %v70_v55 = vld [vmem:[%s2504_s1 + $0x198] sm:$0xff] }
  0x5b   :  { %1284 = vmatprep.subr.bf16.mxu0 %v1773_v57  ;;  %1370 = vmatprep.subr.bf16.mxu1 %v1775_v58  ;;  %v74_v57 = vld [vmem:[%s2504_s1 + $0x1b8] sm:$0xff]  ;;  %v1640_v58 = vcombine.low %v61_v45, %v65_v46  ;;  %v1649_v60 = vcombine.high %v69_v53, %v73_v54 }
  0x5c   :  { %v1651_v61 = vcombine.high %v70_v55, %v74_v57  ;;  %v1650_v3 = vcombine.low %v70_v55, %v74_v57  ;;  %v133_v57 = vld [vmem:[%s2504_s1 + $0x390] sm:$0xff] }
  0x5e   :  { %1285 = vmatpush1.bf16.msra.mxu0 %v1772_v63  ;;  %1371 = vmatpush1.bf16.msra.mxu1 %v1774_v0  ;;  %v81_v63 = vld [vmem:[%s2504_s1 + $0x1f0] sm:$0xff]  ;;  %v78_v0 = vld [vmem:[%s2504_s1 + $0x1d8] sm:$0xff] }
  0x5f   :  { %1286 = vmatprep.subr.bf16.mxu0 %v1781_v1  ;;  %1372 = vmatprep.subr.bf16.mxu1 %v1783_v2  ;;  %v82_v1 = vld [vmem:[%s2504_s1 + $0x1f8] sm:$0xff]  ;;  %v1648_v2 = vcombine.low %v69_v53, %v73_v54  ;;  %v1657_v4 = vcombine.high %v77_v62, %v81_v63 }
  0x60   :  { %v1659_v5 = vcombine.high %v78_v0, %v82_v1  ;;  %v1658_v12 = vcombine.low %v78_v0, %v82_v1  ;;  %v141_v1 = vld [vmem:[%s2504_s1 + $0x3d0] sm:$0xff] }
  0x62   :  { %1287 = vmatpush1.bf16.msra.mxu0 %v1780_v7  ;;  %1373 = vmatpush1.bf16.msra.mxu1 %v1782_v8  ;;  %v89_v7 = vld [vmem:[%s2504_s1 + $0x230] sm:$0xff]  ;;  %v86_v8 = vld [vmem:[%s2504_s1 + $0x218] sm:$0xff] }
  0x63   :  { %1401 = vmatprep.subr.bf16.mxu0 %v1601_v9  ;;  %1487 = vmatprep.subr.bf16.mxu1 %v1603_v11  ;;  %v90_v9 = vld [vmem:[%s2504_s1 + $0x238] sm:$0xff]  ;;  %v1656_v11 = vcombine.low %v77_v62, %v81_v63  ;;  %v1665_v13 = vcombine.high %v85_v6, %v89_v7 }
  0x64   :  { %v1667_v15 = vcombine.high %v86_v8, %v90_v9  ;;  %v1666_v21 = vcombine.low %v86_v8, %v90_v9  ;;  %v149_v9 = vld [vmem:[%s2504_s1 + $0x410] sm:$0xff] }
  0x65   :  { %1305 = vmatmul.mubr.bf16.vlgmr.msra.gmra.mrb[0].mxu0 %v2171_v14  ;;  %1391 = vmatmul.mubr.bf16.vlgmr.msra.gmra.mrb[0].mxu1 %v2171_v14 }
  0x66   :  { %1402 = vmatpush1.bf16.msra.mxu0 %v1600_v17  ;;  %1488 = vmatpush1.bf16.msra.mxu1 %v1602_v18  ;;  %v97_v17 = vld [vmem:[%s2504_s1 + $0x270] sm:$0xff]  ;;  %v94_v18 = vld [vmem:[%s2504_s1 + $0x258] sm:$0xff] }
  0x67   :  { %1403 = vmatprep.subr.bf16.mxu0 %v1609_v19  ;;  %1489 = vmatprep.subr.bf16.mxu1 %v1611_v20  ;;  %v98_v19 = vld [vmem:[%s2504_s1 + $0x278] sm:$0xff]  ;;  %v1664_v20 = vcombine.low %v85_v6, %v89_v7  ;;  %v1673_v22 = vcombine.high %v93_v16, %v97_v17 }
  0x68   :  { %1433 = vmatprep.mubr.bf16.mxu0 %v1939_v56  ;;  %1519 = vmatprep.mubr.bf16.mxu1 %v1939_v56  ;;  %v54_v56 = vld [vmem:[%s2504_s1 + $0x118] sm:$0xff]  ;;  %v1675_v23 = vcombine.high %v94_v18, %v98_v19  ;;  %v1674_v30 = vcombine.low %v94_v18, %v98_v19  ;;  %v157_v19 = vld [vmem:[%s2504_s1 + $0x450] sm:$0xff] }
  0x69   :  { %v1635_v44 = vcombine.high %v54_v56, %v58_v40  ;;  %v1634_v50 = vcombine.low %v54_v56, %v58_v40  ;;  %v117_v40 = vld [vmem:[%s2504_s1 + $0x310] sm:$0xff] }
  0x6a   :  { %1404 = vmatpush1.bf16.msra.mxu0 %v1608_v25  ;;  %1490 = vmatpush1.bf16.msra.mxu1 %v1610_v26  ;;  %v105_v25 = vld [vmem:[%s2504_s1 + $0x2b0] sm:$0xff]  ;;  %v102_v26 = vld [vmem:[%s2504_s1 + $0x298] sm:$0xff] }
  0x6b   :  { %1405 = vmatprep.subr.bf16.mxu0 %v1617_v28  ;;  %1491 = vmatprep.subr.bf16.mxu1 %v1619_v29  ;;  %v106_v28 = vld [vmem:[%s2504_s1 + $0x2b8] sm:$0xff]  ;;  %v1672_v29 = vcombine.low %v93_v16, %v97_v17  ;;  %v1681_v31 = vcombine.high %v101_v24, %v105_v25 }
  0x6c   :  { %v1683_v32 = vcombine.high %v102_v26, %v106_v28  ;;  %v1682_v38 = vcombine.low %v102_v26, %v106_v28  ;;  %v165_v28 = vld [vmem:[%s2504_s1 + $0x490] sm:$0xff] }
  0x6e   :  { %1406 = vmatpush1.bf16.msra.mxu0 %v1616_v34  ;;  %1492 = vmatpush1.bf16.msra.mxu1 %v1618_v35  ;;  %v113_v34 = vld [vmem:[%s2504_s1 + $0x2f0] sm:$0xff]  ;;  %v110_v35 = vld [vmem:[%s2504_s1 + $0x2d8] sm:$0xff] }
  0x6f   :  { %1407 = vmatprep.subr.bf16.mxu0 %v1625_v36  ;;  %1493 = vmatprep.subr.bf16.mxu1 %v1627_v37  ;;  %v114_v36 = vld [vmem:[%s2504_s1 + $0x2f8] sm:$0xff]  ;;  %v1680_v37 = vcombine.low %v101_v24, %v105_v25  ;;  %v1689_v39 = vcombine.high %v109_v33, %v113_v34 }
  0x70   :  { %v1691_v56 = vcombine.high %v110_v35, %v114_v36  ;;  %v1690_v45 = vcombine.low %v110_v35, %v114_v36  ;;  %v173_v36 = vld [vmem:[%s2504_s1 + $0x4d0] sm:$0xff] }
  0x72   :  { %1408 = vmatpush1.bf16.msra.mxu0 %v1624_v41  ;;  %1494 = vmatpush1.bf16.msra.mxu1 %v1626_v42  ;;  %v121_v41 = vld [vmem:[%s2504_s1 + $0x330] sm:$0xff]  ;;  %v118_v42 = vld [vmem:[%s2504_s1 + $0x318] sm:$0xff] }
  0x73   :  { %1409 = vmatprep.subr.bf16.mxu0 %v1633_v43  ;;  %1495 = vmatprep.subr.bf16.mxu1 %v1635_v44  ;;  %v122_v43 = vld [vmem:[%s2504_s1 + $0x338] sm:$0xff]  ;;  %v1688_v44 = vcombine.low %v109_v33, %v113_v34  ;;  %v1697_v46 = vcombine.high %v117_v40, %v121_v41 }
  0x74   :  { %v1699_v47 = vcombine.high %v118_v42, %v122_v43  ;;  %v1698_v53 = vcombine.low %v118_v42, %v122_v43  ;;  %v181_v42 = vld [vmem:[%s2504_s1 + $0x510] sm:$0xff] }
  0x75   :  { %v185_v43 = vld [vmem:[%s2504_s1 + $0x530] sm:$0xff] }
  0x76   :  { %1410 = vmatpush1.bf16.msra.mxu0 %v1632_v49  ;;  %1496 = vmatpush1.bf16.msra.mxu1 %v1634_v50  ;;  %v129_v49 = vld [vmem:[%s2504_s1 + $0x370] sm:$0xff]  ;;  %v126_v50 = vld [vmem:[%s2504_s1 + $0x358] sm:$0xff] }
  0x77   :  { %1411 = vmatprep.subr.bf16.mxu0 %v1641_v51  ;;  %1497 = vmatprep.subr.bf16.mxu1 %v1643_v52  ;;  %v130_v51 = vld [vmem:[%s2504_s1 + $0x378] sm:$0xff]  ;;  %v1696_v52 = vcombine.low %v117_v40, %v121_v41  ;;  %v1705_v54 = vcombine.high %v125_v48, %v129_v49 }
  0x78   :  { %v1707_v55 = vcombine.high %v126_v50, %v130_v51  ;;  %v1706_v62 = vcombine.low %v126_v50, %v130_v51  ;;  %v193_v50 = vld [vmem:[%s2504_s1 + $0x570] sm:$0xff]  ;;  %v190_v51 = vld [vmem:[%s2504_s1 + $0x558] sm:$0xff] }
  0x7a   :  { %1412 = vmatpush1.bf16.msra.mxu0 %v1640_v58  ;;  %1498 = vmatpush1.bf16.msra.mxu1 %v1642_v59  ;;  %v137_v58 = vld [vmem:[%s2504_s1 + $0x3b0] sm:$0xff]  ;;  %v134_v59 = vld [vmem:[%s2504_s1 + $0x398] sm:$0xff] }
  0x7b   :  { %1413 = vmatprep.subr.bf16.mxu0 %v1649_v60  ;;  %1499 = vmatprep.subr.bf16.mxu1 %v1651_v61  ;;  %v138_v60 = vld [vmem:[%s2504_s1 + $0x3b8] sm:$0xff]  ;;  %v1704_v61 = vcombine.low %v125_v48, %v129_v49  ;;  %v1713_v63 = vcombine.high %v133_v57, %v137_v58  ;;  %v189_v49 = vld [vmem:[%s2504_s1 + $0x550] sm:$0xff] }
  0x7c   :  { %v1715_v0 = vcombine.high %v134_v59, %v138_v60  ;;  %v1714_v6 = vcombine.low %v134_v59, %v138_v60  ;;  %v201_v59 = vld [vmem:[%s2504_s1 + $0x5b0] sm:$0xff]  ;;  %v198_v60 = vld [vmem:[%s2504_s1 + $0x598] sm:$0xff] }
  0x7e   :  { %1414 = vmatpush1.bf16.msra.mxu0 %v1648_v2  ;;  %1500 = vmatpush1.bf16.msra.mxu1 %v1650_v3  ;;  %v145_v2 = vld [vmem:[%s2504_s1 + $0x3f0] sm:$0xff]  ;;  %v142_v3 = vld [vmem:[%s2504_s1 + $0x3d8] sm:$0xff] }
  0x7f   :  { %1415 = vmatprep.subr.bf16.mxu0 %v1657_v4  ;;  %1501 = vmatprep.subr.bf16.mxu1 %v1659_v5  ;;  %v146_v4 = vld [vmem:[%s2504_s1 + $0x3f8] sm:$0xff]  ;;  %v1712_v5 = vcombine.low %v133_v57, %v137_v58  ;;  %v1721_v7 = vcombine.high %v141_v1, %v145_v2  ;;  %v197_v58 = vld [vmem:[%s2504_s1 + $0x590] sm:$0xff] }
  0x80   :  { %v1723_v8 = vcombine.high %v142_v3, %v146_v4  ;;  %v1722_v16 = vcombine.low %v142_v3, %v146_v4  ;;  %v209_v3 = vld [vmem:[%s2504_s1 + $0x5f0] sm:$0xff]  ;;  %v206_v4 = vld [vmem:[%s2504_s1 + $0x5d8] sm:$0xff] }
  0x82   :  { %1416 = vmatpush1.bf16.msra.mxu0 %v1656_v11  ;;  %1502 = vmatpush1.bf16.msra.mxu1 %v1658_v12  ;;  %v153_v11 = vld [vmem:[%s2504_s1 + $0x430] sm:$0xff]  ;;  %v150_v12 = vld [vmem:[%s2504_s1 + $0x418] sm:$0xff] }
  0x83   :  { %1417 = vmatprep.subr.bf16.mxu0 %v1665_v13  ;;  %1503 = vmatprep.subr.bf16.mxu1 %v1667_v15  ;;  %v154_v13 = vld [vmem:[%s2504_s1 + $0x438] sm:$0xff]  ;;  %v1720_v15 = vcombine.low %v141_v1, %v145_v2  ;;  %v1729_v17 = vcombine.high %v149_v9, %v153_v11  ;;  %v205_v2 = vld [vmem:[%s2504_s1 + $0x5d0] sm:$0xff] }
  0x84   :  { %v1731_v18 = vcombine.high %v150_v12, %v154_v13  ;;  %v1730_v24 = vcombine.low %v150_v12, %v154_v13  ;;  %v213_v13 = vlaneseq }
  0x86   :  { %1418 = vmatpush1.bf16.msra.mxu0 %v1664_v20  ;;  %1504 = vmatpush1.bf16.msra.mxu1 %v1666_v21  ;;  %v161_v20 = vld [vmem:[%s2504_s1 + $0x470] sm:$0xff]  ;;  %v158_v21 = vld [vmem:[%s2504_s1 + $0x458] sm:$0xff] }
  0x87   :  { %1419 = vmatprep.subr.bf16.mxu0 %v1673_v22  ;;  %1505 = vmatprep.subr.bf16.mxu1 %v1675_v23  ;;  %v162_v22 = vld [vmem:[%s2504_s1 + $0x478] sm:$0xff]  ;;  %v1728_v23 = vcombine.low %v149_v9, %v153_v11  ;;  %v1737_v25 = vcombine.high %v157_v19, %v161_v20  ;;  %v1784_v11 = vcombine.low %v205_v2, %v209_v3 }
  0x88   :  { %v1739_v26 = vcombine.high %v158_v21, %v162_v22  ;;  %v1738_v33 = vcombine.low %v158_v21, %v162_v22 }
  0x8a   :  { %1420 = vmatpush1.bf16.msra.mxu0 %v1672_v29  ;;  %1506 = vmatpush1.bf16.msra.mxu1 %v1674_v30  ;;  %v169_v29 = vld [vmem:[%s2504_s1 + $0x4b0] sm:$0xff]  ;;  %v166_v30 = vld [vmem:[%s2504_s1 + $0x498] sm:$0xff] }
  0x8b   :  { %1421 = vmatprep.subr.bf16.mxu0 %v1681_v31  ;;  %1507 = vmatprep.subr.bf16.mxu1 %v1683_v32  ;;  %v170_v31 = vld [vmem:[%s2504_s1 + $0x4b8] sm:$0xff]  ;;  %v1736_v32 = vcombine.low %v157_v19, %v161_v20  ;;  %v1745_v34 = vcombine.high %v165_v28, %v169_v29 }
  0x8c   :  { %v1747_v35 = vcombine.high %v166_v30, %v170_v31 }
  0x8e   :  { %1422 = vmatpush1.bf16.msra.mxu0 %v1680_v37  ;;  %1508 = vmatpush1.bf16.msra.mxu1 %v1682_v38  ;;  %v177_v37 = vld [vmem:[%s2504_s1 + $0x4f0] sm:$0xff]  ;;  %v178_v38 = vld [vmem:[%s2504_s1 + $0x4f8] sm:$0xff] }
  0x8f   :  { %1423 = vmatprep.subr.bf16.mxu0 %v1689_v39  ;;  %1509 = vmatprep.subr.bf16.mxu1 %v1691_v56  ;;  %v1744_v39 = vcombine.low %v165_v28, %v169_v29  ;;  %v1746_v56 = vcombine.low %v166_v30, %v170_v31  ;;  %v1753_v40 = vcombine.high %v173_v36, %v177_v37 }
  0x92   :  { %1424 = vmatpush1.bf16.msra.mxu0 %v1688_v44  ;;  %1510 = vmatpush1.bf16.msra.mxu1 %v1690_v45  ;;  %v186_v44 = vld [vmem:[%s2504_s1 + $0x538] sm:$0xff]  ;;  %v1752_v45 = vcombine.low %v173_v36, %v177_v37 }
  0x93   :  { %1425 = vmatprep.subr.bf16.mxu0 %v1697_v46  ;;  %1511 = vmatprep.subr.bf16.mxu1 %v1699_v47  ;;  %v1761_v47 = vcombine.high %v181_v42, %v185_v43 }
  0x96   :  { %1426 = vmatpush1.bf16.msra.mxu0 %v1696_v52  ;;  %1512 = vmatpush1.bf16.msra.mxu1 %v1698_v53  ;;  %v194_v52 = vld [vmem:[%s2504_s1 + $0x578] sm:$0xff]  ;;  %v1760_v53 = vcombine.low %v181_v42, %v185_v43 }
  0x97   :  { %1427 = vmatprep.subr.bf16.mxu0 %v1705_v54  ;;  %1513 = vmatprep.subr.bf16.mxu1 %v1707_v55  ;;  %v1769_v55 = vcombine.high %v189_v49, %v193_v50  ;;  %v1771_v57 = vcombine.high %v190_v51, %v194_v52 }
  0x9a   :  { %1428 = vmatpush1.bf16.msra.mxu0 %v1704_v61  ;;  %1514 = vmatpush1.bf16.msra.mxu1 %v1706_v62  ;;  %v202_v61 = vld [vmem:[%s2504_s1 + $0x5b8] sm:$0xff]  ;;  %v1768_v62 = vcombine.low %v189_v49, %v193_v50 }
  0x9b   :  { %1429 = vmatprep.subr.bf16.mxu0 %v1713_v63  ;;  %1515 = vmatprep.subr.bf16.mxu1 %v1715_v0  ;;  %v1770_v63 = vcombine.low %v190_v51, %v194_v52  ;;  %v1777_v0 = vcombine.high %v197_v58, %v201_v59  ;;  %v1779_v1 = vcombine.high %v198_v60, %v202_v61 }
  0x9e   :  { %1430 = vmatpush1.bf16.msra.mxu0 %v1712_v5  ;;  %1516 = vmatpush1.bf16.msra.mxu1 %v1714_v6  ;;  %v210_v5 = vld [vmem:[%s2504_s1 + $0x5f8] sm:$0xff]  ;;  %v1776_v6 = vcombine.low %v197_v58, %v201_v59 }
  0x9f   :  { %1431 = vmatprep.subr.bf16.mxu0 %v1721_v7  ;;  %1517 = vmatprep.subr.bf16.mxu1 %v1723_v8  ;;  %v1778_v7 = vcombine.low %v198_v60, %v202_v61  ;;  %v1785_v8 = vcombine.high %v205_v2, %v209_v3  ;;  %v1787_v9 = vcombine.high %v206_v4, %v210_v5 }
  0xa0   :  { %v1786_v12 = vcombine.low %v206_v4, %v210_v5 }
  0xa2   :  { %1432 = vmatpush1.bf16.msra.mxu0 %v1720_v15  ;;  %1518 = vmatpush1.bf16.msra.mxu1 %v1722_v16  ;;  %v214_v15 = vshrl.u32 %v213_v13, 7 }
  0xa3   :  { %1444 = vmatprep.subr.bf16.mxu0 %v1729_v17  ;;  %1530 = vmatprep.subr.bf16.mxu1 %v1731_v18  ;;  %v211_v17 = vld [vmem:[%s2506_s2] sm:$0xff] }
  0xa4   :  { %v215_v16 = vsub.s32 0, %v214_v15  ;;  %v223_v18 = vsub.s32 2, %v214_v15  ;;  %v219_v19 = vsub.s32 1, %v214_v15  ;;  %v227_v20 = vsub.s32 3, %v214_v15 }
  0xa5   :  { %1434 = vmatmul.mubr.bf16.vlgmr.msra.gmra.mrb[4].mxu0 %v2066_v10  ;;  %1520 = vmatmul.mubr.bf16.vlgmr.msra.gmra.mrb[4].mxu1 %v2066_v10  ;;  %v174_v10 = vld [vmem:[%s2504_s1 + $0x4d8] sm:$0xff]  ;;  %v243_v42 = vsub.s32 7, %v214_v15 }
  0xa6   :  { %1445 = vmatpush1.bf16.msra.mxu0 %v1728_v23  ;;  %1531 = vmatpush1.bf16.msra.mxu1 %v1730_v24  ;;  %v1755_v41 = vcombine.high %v174_v10, %v178_v38  ;;  %v1754_v46 = vcombine.low %v174_v10, %v178_v38  ;;  %v216_v21 = vrot.slane %v211_v17, %v215_v16 }
  0xa7   :  { %1446 = vmatprep.subr.bf16.mxu0 %v1737_v25  ;;  %1532 = vmatprep.subr.bf16.mxu1 %v1739_v26  ;;  %v224_v22 = vrot.slane %v211_v17, %v223_v18  ;;  %v220_v23 = vrot.slane %v211_v17, %v219_v19  ;;  %v228_v24 = vrot.slane %v211_v17, %v227_v20 }
  0xa8   :  { %1476 = vmatprep.mubr.bf16.mxu0 %v1825_v27  ;;  %1562 = vmatprep.mubr.bf16.mxu1 %v1825_v27  ;;  %v182_v27 = vld [vmem:[%s2504_s1 + $0x518] sm:$0xff] }
  0xa9   :  { %v1763_v48 = vcombine.high %v182_v27, %v186_v44  ;;  %v1762_v54 = vcombine.low %v182_v27, %v186_v44 }
  0xaa   :  { %1447 = vmatpush1.bf16.msra.mxu0 %v1736_v32  ;;  %1533 = vmatpush1.bf16.msra.mxu1 %v1738_v33 }
  0xab   :  { %1448 = vmatprep.subr.bf16.mxu0 %v1745_v34  ;;  %1534 = vmatprep.subr.bf16.mxu1 %v1747_v35 }
  0xae   :  { %1449 = vmatpush1.bf16.msra.mxu0 %v1744_v39  ;;  %1535 = vmatpush1.bf16.msra.mxu1 %v1746_v56  ;;  %v231_v56 = vsub.s32 4, %v214_v15 }
  0xaf   :  { %1450 = vmatprep.subr.bf16.mxu0 %v1753_v40  ;;  %1536 = vmatprep.subr.bf16.mxu1 %v1755_v41  ;;  %v239_v40 = vsub.s32 6, %v214_v15  ;;  %v235_v41 = vsub.s32 5, %v214_v15 }
  0xb0   :  { %v232_v43 = vrot.slane %v211_v17, %v231_v56 }
  0xb1   :  { %v240_v27 = vrot.slane %v211_v17, %v239_v40  ;;  %v236_v44 = vrot.slane %v211_v17, %v235_v41 }
  0xb2   :  { %1451 = vmatpush1.bf16.msra.mxu0 %v1752_v45  ;;  %1537 = vmatpush1.bf16.msra.mxu1 %v1754_v46  ;;  %v244_v45 = vrot.slane %v211_v17, %v243_v42 }
  0xb3   :  { %1452 = vmatprep.subr.bf16.mxu0 %v1761_v47  ;;  %1538 = vmatprep.subr.bf16.mxu1 %v1763_v48 }
  0xb6   :  { %1453 = vmatpush1.bf16.msra.mxu0 %v1760_v53  ;;  %1539 = vmatpush1.bf16.msra.mxu1 %v1762_v54 }
  0xb7   :  { %1454 = vmatprep.subr.bf16.mxu0 %v1769_v55  ;;  %1540 = vmatprep.subr.bf16.mxu1 %v1771_v57 }
  0xba   :  { %1455 = vmatpush1.bf16.msra.mxu0 %v1768_v62  ;;  %1541 = vmatpush1.bf16.msra.mxu1 %v1770_v63 }
  0xbb   :  { %1456 = vmatprep.subr.bf16.mxu0 %v1777_v0  ;;  %1542 = vmatprep.subr.bf16.mxu1 %v1779_v1 }
  0xbe   :  { %1457 = vmatpush1.bf16.msra.mxu0 %v1776_v6  ;;  %1543 = vmatpush1.bf16.msra.mxu1 %v1778_v7 }
  0xbf   :  { %1458 = vmatprep.subr.bf16.mxu0 %v1785_v8  ;;  %1544 = vmatprep.subr.bf16.mxu1 %v1787_v9 }
  0xc2   :  { %1459 = vmatpush1.bf16.msra.mxu0 %v1784_v11  ;;  %1545 = vmatpush1.bf16.msra.mxu1 %v1786_v12 }
  0xc5   :  { %1477 = vmatmul.mubr.bf16.vlgmr.msra.gmra.mrb[4].mxu0 %v2171_v14  ;;  %1563 = vmatmul.mubr.bf16.vlgmr.msra.gmra.mrb[4].mxu1 %v2171_v14 }
 0x138   :  { %v1306_v25 = vpop.f32.mrb[0].mxu0  ;;  %v1392_v28 = vpop.f32.mrb[0].mxu1 }
 0x139   :  { %v1788_v26 = vadd.f32 %v1306_v25, %v216_v21  ;;  %v1308_v29 = vpop.f32.mrb[1].mxu0  ;;  %v1792_v30 = vadd.f32 %v1392_v28, %v224_v22  ;;  %v1394_v31 = vpop.f32.mrb[1].mxu1 }
 0x13a   :  { %v1789_v14 = vadd.f32 %v1308_v29, %v220_v23  ;;  %v1310_v32 = vpop.f32.mrb[2].mxu0  ;;  %v1793_v33 = vadd.f32 %v1394_v31, %v228_v24  ;;  %v1396_v35 = vpop.f32.mrb[2].mxu1 }
 0x13b   :  { %1573 = vst [vmem:[%s2507_s3] sm:$0xff] %v1788_v26  ;;  %v1790_v34 = vadd.f32 %v1310_v32, %v216_v21  ;;  %v1312_v36 = vpop.f32.mrb[3].mxu0  ;;  %1575 = vst [vmem:[%s2507_s3 + $0x10] sm:$0xff] %v1792_v30  ;;  %v1794_v37 = vadd.f32 %v1396_v35, %v224_v22  ;;  %v1398_v38 = vpop.f32.mrb[3].mxu1 }
 0x13c   :  { %1574 = vst [vmem:[%s2507_s3 + $0x8] sm:$0xff] %v1789_v14  ;;  %v1791_v10 = vadd.f32 %v1312_v36, %v220_v23  ;;  %1576 = vst [vmem:[%s2507_s3 + $0x18] sm:$0xff] %v1793_v33  ;;  %v1795_v39 = vadd.f32 %v1398_v38, %v228_v24 }
 0x13d   :  { %1581 = vst [vmem:[%s2507_s3 + $0x40] sm:$0xff] %v1790_v34  ;;  %1583 = vst [vmem:[%s2507_s3 + $0x50] sm:$0xff] %v1794_v37 }
 0x13e   :  { %1582 = vst [vmem:[%s2507_s3 + $0x48] sm:$0xff] %v1791_v10  ;;  %1584 = vst [vmem:[%s2507_s3 + $0x58] sm:$0xff] %v1795_v39 }
 0x198   :  { %v1478_v46 = vpop.f32.mrb[4].mxu0  ;;  %v1564_v48 = vpop.f32.mrb[4].mxu1 }
 0x199   :  { %v1796_v47 = vadd.f32 %v1478_v46, %v232_v43  ;;  %v1480_v49 = vpop.f32.mrb[5].mxu0  ;;  %v1800_v50 = vadd.f32 %v1564_v48, %v240_v27  ;;  %v1566_v52 = vpop.f32.mrb[5].mxu1 }
 0x19a   :  { %v1797_v51 = vadd.f32 %v1480_v49, %v236_v44  ;;  %v1482_v53 = vpop.f32.mrb[6].mxu0  ;;  %v1801_v54 = vadd.f32 %v1566_v52, %v244_v45  ;;  %v1568_v57 = vpop.f32.mrb[6].mxu1 }
 0x19b   :  { %1577 = vst [vmem:[%s2507_s3 + $0x20] sm:$0xff] %v1796_v47  ;;  %v1798_v55 = vadd.f32 %v1482_v53, %v232_v43  ;;  %v1484_v58 = vpop.f32.mrb[7].mxu0  ;;  %1579 = vst [vmem:[%s2507_s3 + $0x30] sm:$0xff] %v1800_v50  ;;  %v1802_v59 = vadd.f32 %v1568_v57, %v240_v27  ;;  %v1570_v61 = vpop.f32.mrb[7].mxu1 }
 0x19c   :  { %1578 = vst [vmem:[%s2507_s3 + $0x28] sm:$0xff] %v1797_v51  ;;  %v1799_v60 = vadd.f32 %v1484_v58, %v236_v44  ;;  %1580 = vst [vmem:[%s2507_s3 + $0x38] sm:$0xff] %v1801_v54  ;;  %v1803_v62 = vadd.f32 %v1570_v61, %v244_v45 }
 0x19d   :  { %1585 = vst [vmem:[%s2507_s3 + $0x60] sm:$0xff] %v1798_v55  ;;  %1587 = vst [vmem:[%s2507_s3 + $0x70] sm:$0xff] %v1802_v59 }
 0x19e   :  { %1586 = vst [vmem:[%s2507_s3 + $0x68] sm:$0xff] %v1799_v60  ;;  %1588 = vst [vmem:[%s2507_s3 + $0x78] sm:$0xff] %v1803_v62 }

// kernel: bilstm_char_forward.7
= control target key start
LH: loop header
LB: loop body
LE: loop exit
PB: predicated region body
PF: predicated region fallthrough
CT: control target
= control target key end

     0   :  { %s352_s1 = inlined_call_operand.vmem [shape: bf16[256,128], index: 1, kind: input, shape index: {}]   ;;  %s353_s0 = inlined_call_operand.vmem [shape: bf16[16,256], index: 0, kind: input, shape index: {}]   ;;  %s354_s2 = inlined_call_operand.vmem [shape: f32[1,128], index: 2, kind: input, shape index: {}]   ;;  %s355_s3 = inlined_call_operand.vmem [shape: f32[16,128], index: 3, kind: output, shape index: {}]  }
   0x1   :  { %v250_v0 = vld [vmem:[%s352_s1 + $0x40] sm:$0xff]   ;;  %v252_v2 = vld [vmem:[%s352_s1 + $0x48] sm:$0xff]   ;;  %v254_v4 = vld [vmem:[%s352_s1 + $0x50] sm:$0xff]  }
   0x2   :  { %v251_v1 = vld [vmem:[%s352_s1] sm:$0xff]   ;;  %228 = vmatprep.subr.bf16.mxu0 %v250_v0  ;;  %v253_v3 = vld [vmem:[%s352_s1 + $0x8] sm:$0xff]   ;;  %v255_v5 = vld [vmem:[%s352_s1 + $0x10] sm:$0xff]  }
   0x3   :  { %229 = vmatpush3.bf16.msra.mxu0 %v251_v1  ;;  %v256_v6 = vld [vmem:[%s352_s1 + $0x58] sm:$0xff]   ;;  %v258_v8 = vld [vmem:[%s352_s1 + $0x60] sm:$0xff]   ;;  %v260_v10 = vld [vmem:[%s352_s1 + $0x68] sm:$0xff]  }
   0x4   :  { %230 = vmatprep.subr.bf16.mxu0 %v252_v2  ;;  %v257_v7 = vld [vmem:[%s352_s1 + $0x18] sm:$0xff]   ;;  %v259_v9 = vld [vmem:[%s352_s1 + $0x20] sm:$0xff]   ;;  %v261_v12 = vld [vmem:[%s352_s1 + $0x28] sm:$0xff]  }
   0x5   :  { %v268_v11 = vld [vmem:[%s353_s0 + $0x4] ss:$8 sps:$4 sm:$0xff]   ;;  %v262_v13 = vld [vmem:[%s352_s1 + $0x70] sm:$0xff]   ;;  %v264_v15 = vld [vmem:[%s352_s1 + $0x78] sm:$0xff]  }
   0x6   :  { %194 = vmatprep.mubr.bf16.mxu0 %v268_v11  ;;  %v263_v14 = vld [vmem:[%s352_s1 + $0x30] sm:$0xff]   ;;  %v265_v16 = vld [vmem:[%s352_s1 + $0x38] sm:$0xff]   ;;  %v266_v17 = vld [vmem:[%s353_s0] ss:$8 sps:$4 sm:$0xff]  }
   0x7   :  { %231 = vmatpush3.bf16.msra.mxu0 %v253_v3  ;;  %v209_v19 = vld [vmem:[%s354_s2] ss:$0 sm:$0xff] }
   0x8   :  { %232 = vmatprep.subr.bf16.mxu0 %v254_v4 }
   0xb   :  { %233 = vmatpush3.bf16.msra.mxu0 %v255_v5 }
   0xc   :  { %234 = vmatprep.subr.bf16.mxu0 %v256_v6 }
   0xf   :  { %235 = vmatpush3.bf16.msra.mxu0 %v257_v7 }
  0x10   :  { %236 = vmatprep.subr.bf16.mxu0 %v258_v8 }
  0x13   :  { %237 = vmatpush3.bf16.msra.mxu0 %v259_v9 }
  0x14   :  { %238 = vmatprep.subr.bf16.mxu0 %v260_v10 }
  0x17   :  { %239 = vmatpush3.bf16.msra.mxu0 %v261_v12 }
  0x18   :  { %240 = vmatprep.subr.bf16.mxu0 %v262_v13 }
  0x1b   :  { %241 = vmatpush3.bf16.msra.mxu0 %v263_v14 }
  0x1c   :  { %242 = vmatprep.subr.bf16.mxu0 %v264_v15 }
  0x1f   :  { %243 = vmatpush3.bf16.msra.mxu0 %v265_v16 }
  0x22   :  { %195 = vmatmul.mubr.bf16.vlgmr.msra.gmra.mrb[0].mxu0 %v266_v17 }
  0xf5   :  { %v244_v18 = vpop.f32.mrb[0].mxu0 }
  0xf6   :  { %v245_v20 = vpop.f32.mrb[1].mxu0 }
  0xf7   :  { %v246_v21 = vadd.f32 %v245_v20, %v244_v18  ;;  %v247_v22 = vpop.f32.mrb[2].mxu0 }
  0xf8   :  { %v248_v23 = vpop.f32.mrb[3].mxu0 }
  0xf9   :  { %v197_v24 = vadd.f32 %v246_v21, %v209_v19  ;;  %v249_v25 = vadd.f32 %v248_v23, %v247_v22 }
  0xfb   :  { %203 = vst [vmem:[%s355_s3] sm:$0xff] %v197_v24  ;;  %v200_v26 = vadd.f32 %v249_v25, %v209_v19 }
  0xfd   :  { %204 = vst [vmem:[%s355_s3 + $0x8] sm:$0xff] %v200_v26 }

// kernel: bilstm_char_forward.6
= control target key start
LH: loop header
LB: loop body
LE: loop exit
PB: predicated region body
PF: predicated region fallthrough
CT: control target
= control target key end

     0   :  { %v8475_v1 = vmov 0   ;;  %v6483_v2 = vmov 0.0   ;;  %s8469_s2 = inlined_call_operand.vmem [shape: bf16[128,512], index: 2, kind: input, shape index: {}]   ;;  %s8470_s3 = inlined_call_operand.vmem [shape: bf16[128,512], index: 3, kind: input, shape index: {}]   ;;  %s8471_s0 = inlined_call_operand.vmem [shape: f32[8,2,1024], index: 0, kind: input, shape index: {}, may-alias: {0,1}]   ;;  %s8472_s1 = inlined_call_operand.vmem [shape: f32[8,2,1024], index: 1, kind: input, shape index: {}, may-alias: {0,1}]   ;;  %s8473_s4 = inlined_call_operand.vmem [shape: f32[8,2,128], index: 4, kind: output, shape index: {0}]   ;;  %s8474_s5 = inlined_call_operand.vmem [shape: f32[8,2,128], index: 5, kind: output, shape index: {1}]  }
   0x1   :  { %v6518_v0 = vld [vmem:[%s8469_s2 + $0x4] ss:$16 sps:$4 sm:$0xff]   ;;  %294 = vmatprep.mubr.bf16.mxu0 %v8475_v1  ;;  %335 = vmatprep.mubr.bf16.mxu1 %v8475_v1  ;;  %63 = vst [vmem:[#allocation2] sm:$0x3] %v6483_v2  ;;  %64 = vst [vmem:[#allocation3] sm:$0x3] %v6483_v2 }
   0x2   :  { %65 = vst [vmem:[#allocation4] sm:$0x3] %v6483_v2  ;;  %66 = vst [vmem:[#allocation5] sm:$0x3] %v6483_v2  ;;  %v6525_v3 = vld [vmem:[%s8469_s2 + $0xc] ss:$16 sps:$4 sm:$0xff]   ;;  %262 = vmatprep.subr.bf16.mxu0 %v6518_v0 }
   0x3   :  { %v6531_v4 = vld [vmem:[%s8469_s2] ss:$16 sps:$4 sm:$0xff]   ;;  %v6536_v5 = vld [vmem:[%s8469_s2 + $0x8] ss:$16 sps:$4 sm:$0xff]   ;;  %303 = vmatprep.subr.bf16.mxu1 %v6525_v3  ;;  %v6542_v6 = vld [vmem:[%s8469_s2 + $0x24] ss:$16 sps:$4 sm:$0xff]  }
   0x4   :  { %263 = vmatpush1.bf16.msra.mxu0 %v6531_v4  ;;  %304 = vmatpush1.bf16.msra.mxu1 %v6536_v5  ;;  %v6549_v7 = vld [vmem:[%s8469_s2 + $0x2c] ss:$16 sps:$4 sm:$0xff]   ;;  %v6554_v8 = vld [vmem:[%s8469_s2 + $0x20] ss:$16 sps:$4 sm:$0xff]   ;;  %v6560_v9 = vld [vmem:[%s8469_s2 + $0x28] ss:$16 sps:$4 sm:$0xff]  }
   0x5   :  { %264 = vmatprep.subr.bf16.mxu0 %v6542_v6  ;;  %305 = vmatprep.subr.bf16.mxu1 %v6549_v7  ;;  %v6566_v10 = vld [vmem:[%s8469_s2 + $0x44] ss:$16 sps:$4 sm:$0xff]   ;;  %v6571_v11 = vld [vmem:[%s8469_s2 + $0x4c] ss:$16 sps:$4 sm:$0xff]   ;;  %v6576_v12 = vld [vmem:[%s8469_s2 + $0x40] ss:$16 sps:$4 sm:$0xff]  }
   0x6   :  { %v6581_v13 = vld [vmem:[%s8469_s2 + $0x48] ss:$16 sps:$4 sm:$0xff]   ;;  %v6588_v14 = vld [vmem:[%s8469_s2 + $0x64] ss:$16 sps:$4 sm:$0xff]   ;;  %v6595_v15 = vld [vmem:[%s8469_s2 + $0x6c] ss:$16 sps:$4 sm:$0xff]  }
   0x7   :  { %v6600_v16 = vld [vmem:[%s8469_s2 + $0x60] ss:$16 sps:$4 sm:$0xff]   ;;  %v6607_v17 = vld [vmem:[%s8469_s2 + $0x68] ss:$16 sps:$4 sm:$0xff]   ;;  %v6612_v18 = vld [vmem:[%s8469_s2 + $0x84] ss:$16 sps:$4 sm:$0xff]  }
   0x8   :  { %265 = vmatpush1.bf16.msra.mxu0 %v6554_v8  ;;  %306 = vmatpush1.bf16.msra.mxu1 %v6560_v9  ;;  %v6619_v19 = vld [vmem:[%s8469_s2 + $0x8c] ss:$16 sps:$4 sm:$0xff]   ;;  %v6624_v20 = vld [vmem:[%s8469_s2 + $0x80] ss:$16 sps:$4 sm:$0xff]   ;;  %v6629_v21 = vld [vmem:[%s8469_s2 + $0x88] ss:$16 sps:$4 sm:$0xff]  }
   0x9   :  { %266 = vmatprep.subr.bf16.mxu0 %v6566_v10  ;;  %307 = vmatprep.subr.bf16.mxu1 %v6571_v11  ;;  %v6636_v22 = vld [vmem:[%s8469_s2 + $0xa4] ss:$16 sps:$4 sm:$0xff]   ;;  %v6643_v23 = vld [vmem:[%s8469_s2 + $0xac] ss:$16 sps:$4 sm:$0xff]   ;;  %v6650_v24 = vld [vmem:[%s8469_s2 + $0xa0] ss:$16 sps:$4 sm:$0xff]  }
   0xa   :  { %v6655_v25 = vld [vmem:[%s8469_s2 + $0xa8] ss:$16 sps:$4 sm:$0xff]   ;;  %v6662_v26 = vld [vmem:[%s8469_s2 + $0xc4] ss:$16 sps:$4 sm:$0xff]   ;;  %v6667_v27 = vld [vmem:[%s8469_s2 + $0xcc] ss:$16 sps:$4 sm:$0xff]  }
   0xb   :  { %v6672_v28 = vld [vmem:[%s8469_s2 + $0xc0] ss:$16 sps:$4 sm:$0xff]   ;;  %v6679_v29 = vld [vmem:[%s8469_s2 + $0xc8] ss:$16 sps:$4 sm:$0xff]   ;;  %v6686_v30 = vld [vmem:[%s8469_s2 + $0xe4] ss:$16 sps:$4 sm:$0xff]  }
   0xc   :  { %267 = vmatpush1.bf16.msra.mxu0 %v6576_v12  ;;  %308 = vmatpush1.bf16.msra.mxu1 %v6581_v13  ;;  %v6691_v31 = vld [vmem:[%s8469_s2 + $0xec] ss:$16 sps:$4 sm:$0xff]   ;;  %v6696_v32 = vld [vmem:[%s8469_s2 + $0xe0] ss:$16 sps:$4 sm:$0xff]   ;;  %v6701_v33 = vld [vmem:[%s8469_s2 + $0xe8] ss:$16 sps:$4 sm:$0xff]  }
   0xd   :  { %268 = vmatprep.subr.bf16.mxu0 %v6588_v14  ;;  %309 = vmatprep.subr.bf16.mxu1 %v6595_v15  ;;  %v68_v34 = vld [vmem:[#allocation2] sm:$0x3]  ;;  %v6710_v35 = vld [vmem:[%s8470_s3 + $0x4] ss:$16 sps:$4 sm:$0xff]   ;;  %v6715_v36 = vld [vmem:[%s8470_s3 + $0xc] ss:$16 sps:$4 sm:$0xff]  }
   0xe   :  { %v69_v37 = vpack.c.bf16 %v68_v34, %v68_v34  ;;  %v6720_v38 = vld [vmem:[%s8470_s3] ss:$16 sps:$4 sm:$0xff]   ;;  %v6727_v39 = vld [vmem:[%s8470_s3 + $0x8] ss:$16 sps:$4 sm:$0xff]   ;;  %v6734_v40 = vld [vmem:[%s8470_s3 + $0x24] ss:$16 sps:$4 sm:$0xff]  }
   0xf   :  { %v6739_v41 = vld [vmem:[%s8470_s3 + $0x2c] ss:$16 sps:$4 sm:$0xff]   ;;  %v6744_v42 = vld [vmem:[%s8470_s3 + $0x20] ss:$16 sps:$4 sm:$0xff]   ;;  %v6751_v43 = vld [vmem:[%s8470_s3 + $0x28] ss:$16 sps:$4 sm:$0xff]  }
  0x10   :  { %269 = vmatpush1.bf16.msra.mxu0 %v6600_v16  ;;  %310 = vmatpush1.bf16.msra.mxu1 %v6607_v17  ;;  %v6758_v44 = vld [vmem:[%s8470_s3 + $0x44] ss:$16 sps:$4 sm:$0xff]   ;;  %v6763_v45 = vld [vmem:[%s8470_s3 + $0x4c] ss:$16 sps:$4 sm:$0xff]   ;;  %v6770_v46 = vld [vmem:[%s8470_s3 + $0x40] ss:$16 sps:$4 sm:$0xff]  }
  0x11   :  { %270 = vmatprep.subr.bf16.mxu0 %v6612_v18  ;;  %311 = vmatprep.subr.bf16.mxu1 %v6619_v19  ;;  %v6777_v47 = vld [vmem:[%s8470_s3 + $0x48] ss:$16 sps:$4 sm:$0xff]   ;;  %v6784_v48 = vld [vmem:[%s8470_s3 + $0x64] ss:$16 sps:$4 sm:$0xff]   ;;  %v6789_v49 = vld [vmem:[%s8470_s3 + $0x6c] ss:$16 sps:$4 sm:$0xff]  }
  0x12   :  { %v6794_v50 = vld [vmem:[%s8470_s3 + $0x60] ss:$16 sps:$4 sm:$0xff]   ;;  %v6799_v51 = vld [vmem:[%s8470_s3 + $0x68] ss:$16 sps:$4 sm:$0xff]   ;;  %v6804_v52 = vld [vmem:[%s8470_s3 + $0x84] ss:$16 sps:$4 sm:$0xff]  }
  0x13   :  { %v6809_v53 = vld [vmem:[%s8470_s3 + $0x8c] ss:$16 sps:$4 sm:$0xff]   ;;  %v6818_v54 = vld [vmem:[%s8470_s3 + $0x80] ss:$16 sps:$4 sm:$0xff]   ;;  %v6823_v55 = vld [vmem:[%s8470_s3 + $0x88] ss:$16 sps:$4 sm:$0xff]  }
  0x14   :  { %271 = vmatpush1.bf16.msra.mxu0 %v6624_v20  ;;  %312 = vmatpush1.bf16.msra.mxu1 %v6629_v21  ;;  %v6828_v56 = vld [vmem:[%s8470_s3 + $0xa4] ss:$16 sps:$4 sm:$0xff]   ;;  %v6833_v57 = vld [vmem:[%s8470_s3 + $0xac] ss:$16 sps:$4 sm:$0xff]   ;;  %v6842_v58 = vld [vmem:[%s8470_s3 + $0xa0] ss:$16 sps:$4 sm:$0xff]  }
  0x15   :  { %272 = vmatprep.subr.bf16.mxu0 %v6636_v22  ;;  %313 = vmatprep.subr.bf16.mxu1 %v6643_v23  ;;  %8492 = vst [vmem:[#allocation6_spill] sm:$0xff] %v6833_v57  ;;  %v6847_v59 = vld [vmem:[%s8470_s3 + $0xa8] ss:$16 sps:$4 sm:$0xff]   ;;  %v6852_v60 = vld [vmem:[%s8470_s3 + $0xc4] ss:$16 sps:$4 sm:$0xff]  }
  0x16   :  { %v6857_v61 = vld [vmem:[%s8470_s3 + $0xcc] ss:$16 sps:$4 sm:$0xff]   ;;  %v6866_v62 = vld [vmem:[%s8470_s3 + $0xc0] ss:$16 sps:$4 sm:$0xff]   ;;  %v6871_v63 = vld [vmem:[%s8470_s3 + $0xc8] ss:$16 sps:$4 sm:$0xff]  }
  0x17   :  { %8493 = vst [vmem:[#allocation7_spill] sm:$0xff] %v6857_v61  ;;  %v6876_v2 = vld [vmem:[%s8470_s3 + $0xe4] ss:$16 sps:$4 sm:$0xff]   ;;  %v6881_v34 = vld [vmem:[%s8470_s3 + $0xec] ss:$16 sps:$4 sm:$0xff]  }
  0x18   :  { %273 = vmatpush1.bf16.msra.mxu0 %v6650_v24  ;;  %314 = vmatpush1.bf16.msra.mxu1 %v6655_v25  ;;  %8494 = vst [vmem:[#allocation8_spill] sm:$0xff] %v6881_v34 }
  0x19   :  { %274 = vmatprep.subr.bf16.mxu0 %v6662_v26  ;;  %315 = vmatprep.subr.bf16.mxu1 %v6667_v27 }
  0x1c   :  { %275 = vmatpush1.bf16.msra.mxu0 %v6672_v28  ;;  %316 = vmatpush1.bf16.msra.mxu1 %v6679_v29 }
  0x1d   :  { %276 = vmatprep.subr.bf16.mxu0 %v6686_v30  ;;  %317 = vmatprep.subr.bf16.mxu1 %v6691_v31 }
  0x20   :  { %277 = vmatpush1.bf16.msra.mxu0 %v6696_v32  ;;  %318 = vmatpush1.bf16.msra.mxu1 %v6701_v33 }
  0x21   :  { %592 = vmatprep.subr.bf16.mxu0 %v6710_v35  ;;  %633 = vmatprep.subr.bf16.mxu1 %v6715_v36 }
  0x23   :  { %295 = vmatmul.mubr.bf16.vlgmr.msra.gmra.mrb[0].mxu0 %v69_v37  ;;  %336 = vmatmul.mubr.bf16.vlgmr.msra.gmra.mrb[0].mxu1 %v69_v37  ;;  %v6890_v37 = vld [vmem:[%s8470_s3 + $0xe0] ss:$16 sps:$4 sm:$0xff]  }
  0x24   :  { %593 = vmatpush1.bf16.msra.mxu0 %v6720_v38  ;;  %634 = vmatpush1.bf16.msra.mxu1 %v6727_v39 }
  0x25   :  { %594 = vmatprep.subr.bf16.mxu0 %v6734_v40  ;;  %635 = vmatprep.subr.bf16.mxu1 %v6739_v41 }
  0x26   :  { %624 = vmatprep.mubr.bf16.mxu0 %v8475_v1  ;;  %665 = vmatprep.mubr.bf16.mxu1 %v8475_v1  ;;  %v6895_v1 = vld [vmem:[%s8470_s3 + $0xe8] ss:$16 sps:$4 sm:$0xff]  }
  0x28   :  { %595 = vmatpush1.bf16.msra.mxu0 %v6744_v42  ;;  %636 = vmatpush1.bf16.msra.mxu1 %v6751_v43 }
  0x29   :  { %596 = vmatprep.subr.bf16.mxu0 %v6758_v44  ;;  %637 = vmatprep.subr.bf16.mxu1 %v6763_v45 }
  0x2c   :  { %597 = vmatpush1.bf16.msra.mxu0 %v6770_v46  ;;  %638 = vmatpush1.bf16.msra.mxu1 %v6777_v47 }
  0x2d   :  { %598 = vmatprep.subr.bf16.mxu0 %v6784_v48  ;;  %639 = vmatprep.subr.bf16.mxu1 %v6789_v49 }
  0x30   :  { %599 = vmatpush1.bf16.msra.mxu0 %v6794_v50  ;;  %640 = vmatpush1.bf16.msra.mxu1 %v6799_v51 }
  0x31   :  { %600 = vmatprep.subr.bf16.mxu0 %v6804_v52  ;;  %641 = vmatprep.subr.bf16.mxu1 %v6809_v53 }
  0x34   :  { %601 = vmatpush1.bf16.msra.mxu0 %v6818_v54  ;;  %642 = vmatpush1.bf16.msra.mxu1 %v6823_v55 }
  0x35   :  { %602 = vmatprep.subr.bf16.mxu0 %v6828_v56  ;;  %643 = vmatprep.subr.bf16.mxu1 %v6833_v57  ;;  %v398_v57 = vld [vmem:[#allocation4] sm:$0x3] }
  0x38   :  { %603 = vmatpush1.bf16.msra.mxu0 %v6842_v58  ;;  %644 = vmatpush1.bf16.msra.mxu1 %v6847_v59 }
  0x39   :  { %604 = vmatprep.subr.bf16.mxu0 %v6852_v60  ;;  %645 = vmatprep.subr.bf16.mxu1 %v6857_v61  ;;  %v399_v61 = vpack.c.bf16 %v398_v57, %v398_v57 }
  0x3c   :  { %605 = vmatpush1.bf16.msra.mxu0 %v6866_v62  ;;  %646 = vmatpush1.bf16.msra.mxu1 %v6871_v63 }
  0x3d   :  { %606 = vmatprep.subr.bf16.mxu0 %v6876_v2  ;;  %647 = vmatprep.subr.bf16.mxu1 %v6881_v34  ;;  %v8495_v34 = vmov 0  }
  0x40   :  { %607 = vmatpush1.bf16.msra.mxu0 %v6890_v37  ;;  %648 = vmatpush1.bf16.msra.mxu1 %v6895_v1 }
  0x41   :  { %923 = vmatprep.subr.bf16.mxu0 %v6518_v0  ;;  %964 = vmatprep.subr.bf16.mxu1 %v6525_v3  ;;  %v6484_v0 = vmov 1983009808  }
  0x42   :  { %v351_v3 = vunpack.c.l.s4 %v6484_v0 }
  0x43   :  { %625 = vmatmul.mubr.bf16.vlgmr.msra.gmra.mrb[4].mxu0 %v399_v61  ;;  %666 = vmatmul.mubr.bf16.vlgmr.msra.gmra.mrb[4].mxu1 %v399_v61 }
  0x44   :  { %924 = vmatpush1.bf16.msra.mxu0 %v6531_v4  ;;  %965 = vmatpush1.bf16.msra.mxu1 %v6536_v5  ;;  %v353_v4 = vlaneseq  ;;  %v352_v5 = vunpack.c.0.s8 %v351_v3 }
  0x45   :  { %925 = vmatprep.subr.bf16.mxu0 %v6542_v6  ;;  %966 = vmatprep.subr.bf16.mxu1 %v6549_v7 }
  0x46   :  { %955 = vmatprep.mubr.bf16.mxu0 %v8495_v34  ;;  %996 = vmatprep.mubr.bf16.mxu1 %v8495_v34  ;;  %v354_v6 = vshrl.u32 %v353_v4, 7 }
  0x48   :  { %926 = vmatpush1.bf16.msra.mxu0 %v6554_v8  ;;  %967 = vmatpush1.bf16.msra.mxu1 %v6560_v9  ;;  %v6939_v9 = vsub.s32 %v352_v5, %v354_v6 }
  0x49   :  { %927 = vmatprep.subr.bf16.mxu0 %v6566_v10  ;;  %968 = vmatprep.subr.bf16.mxu1 %v6571_v11 }
  0x4c   :  { %928 = vmatpush1.bf16.msra.mxu0 %v6576_v12  ;;  %969 = vmatpush1.bf16.msra.mxu1 %v6581_v13 }
  0x4d   :  { %929 = vmatprep.subr.bf16.mxu0 %v6588_v14  ;;  %970 = vmatprep.subr.bf16.mxu1 %v6595_v15 }
  0x50   :  { %930 = vmatpush1.bf16.msra.mxu0 %v6600_v16  ;;  %971 = vmatpush1.bf16.msra.mxu1 %v6607_v17 }
  0x51   :  { %931 = vmatprep.subr.bf16.mxu0 %v6612_v18  ;;  %972 = vmatprep.subr.bf16.mxu1 %v6619_v19 }
  0x54   :  { %932 = vmatpush1.bf16.msra.mxu0 %v6624_v20  ;;  %973 = vmatpush1.bf16.msra.mxu1 %v6629_v21  ;;  %v67_v20 = vld [vmem:[%s8471_s0] sm:$0xff] }
  0x55   :  { %933 = vmatprep.subr.bf16.mxu0 %v6636_v22  ;;  %974 = vmatprep.subr.bf16.mxu1 %v6643_v23 }
  0x58   :  { %934 = vmatpush1.bf16.msra.mxu0 %v6650_v24  ;;  %975 = vmatpush1.bf16.msra.mxu1 %v6655_v25 }
  0x59   :  { %935 = vmatprep.subr.bf16.mxu0 %v6662_v26  ;;  %976 = vmatprep.subr.bf16.mxu1 %v6667_v27 }
  0x5c   :  { %936 = vmatpush1.bf16.msra.mxu0 %v6672_v28  ;;  %977 = vmatpush1.bf16.msra.mxu1 %v6679_v29 }
  0x5d   :  { %937 = vmatprep.subr.bf16.mxu0 %v6686_v30  ;;  %978 = vmatprep.subr.bf16.mxu1 %v6691_v31 }
  0x60   :  { %938 = vmatpush1.bf16.msra.mxu0 %v6696_v32  ;;  %979 = vmatpush1.bf16.msra.mxu1 %v6701_v33 }
  0x61   :  { %1254 = vmatprep.subr.bf16.mxu0 %v6710_v35  ;;  %1295 = vmatprep.subr.bf16.mxu1 %v6715_v36  ;;  %v367_v35 = vld [vmem:[#allocation3] sm:$0x3] }
  0xf6   :  { %v296_v7 = vpop.f32.mrb[0].mxu0  ;;  %v337_v8 = vpop.f32.mrb[0].mxu1 }
  0xf7   :  { %v298_v10 = vpop.f32.mrb[1].mxu0  ;;  %v339_v11 = vpop.f32.mrb[1].mxu1 }
  0xf8   :  { %v348_v12 = vcombine.low %v296_v7, %v298_v10  ;;  %v349_v13 = vcombine.low %v337_v8, %v339_v11  ;;  %v300_v14 = vpop.f32.mrb[2].mxu0  ;;  %v341_v15 = vpop.f32.mrb[2].mxu1 }
  0xf9   :  { %v301_v16 = vpop.f32.mrb[3].mxu0  ;;  %v342_v17 = vpop.f32.mrb[3].mxu1 }
  0xfa   :  { %v356_v18 = vrot.slane %v348_v12, %v6939_v9  ;;  %v363_v19 = vrot.slane %v349_v13, %v6939_v9 }
  0xfc   :  { %v364_v21 = vcombine.low %v356_v18, %v363_v19  ;;  %v5427_v18 = vld [vmem:[%s8472_s1 + $0x78] sm:$0xff] }
  0xfe   :  { %v366_v22 = vadd.f32 %v364_v21, %v67_v20 }
 0x100   :  { %v368_v23 = vmul.f32 0.5, %v366_v22  ;;  %v373_v24 = vrot.slane %v366_v22, 2  ;;  %v379_v26 = vrot.slane %v366_v22, 4  ;;  %v382_v27 = vrot.slane %v366_v22, 6 }
 0x102   :  { %6322 = vtanh.f32 %v368_v23  ;;  %v375_v25 = vmul.f32 0.5, %v373_v24  ;;  %v384_v28 = vmul.f32 0.5, %v382_v27 }
 0x104   :  { %6324 = vtanh.f32 %v375_v25 }
 0x105   :  { %6326 = vtanh.f32 %v379_v26 }
 0x106   :  { %6328 = vtanh.f32 %v384_v28 }
 0x10c   :  { %v6323_v29 = vpop.eup %6322 }
 0x10d   :  { %v370_v30 = vmul.f32 0.5, %v6323_v29 }
 0x10e   :  { %v6325_v31 = vpop.eup %6324 }
 0x10f   :  { %v371_v32 = vadd.f32 0.5, %v370_v30  ;;  %v377_v33 = vmul.f32 0.5, %v6325_v31  ;;  %v6327_v57 = vpop.eup %6326 }
 0x110   :  { %v6329_v13 = vpop.eup %6328 }
 0x111   :  { %v378_v36 = vadd.f32 0.5, %v377_v33  ;;  %v389_v0 = vmul.f32 %v6327_v57, %v371_v32  ;;  %v386_v19 = vmul.f32 0.5, %v6329_v13  ;;  %v7119_v13 = vld [vmem:[%s8469_s2 + $0xac] ss:$16 sps:$4 sm:$0xff]  }
 0x113   :  { %v388_v61 = vmul.f32 %v378_v36, %v367_v35  ;;  %v387_v22 = vadd.f32 0.5, %v386_v19  ;;  %v7153_v19 = vld [vmem:[%s8469_s2 + $0xc8] ss:$16 sps:$4 sm:$0xff]  }
 0x115   :  { %v390_v3 = vadd.f32 %v389_v0, %v388_v61  ;;  %v697_v0 = vld [vmem:[#allocation5] sm:$0x3] }
 0x116   :  { %v626_v4 = vpop.f32.mrb[4].mxu0  ;;  %v667_v5 = vpop.f32.mrb[4].mxu1 }
 0x117   :  { %6330 = vtanh.f32 %v390_v3  ;;  %394 = vst [vmem:[#allocation3] sm:$0x3] %v390_v3  ;;  %v628_v6 = vpop.f32.mrb[5].mxu0  ;;  %v669_v7 = vpop.f32.mrb[5].mxu1 }
 0x118   :  { %v678_v8 = vcombine.low %v626_v4, %v628_v6  ;;  %v679_v10 = vcombine.low %v667_v5, %v669_v7  ;;  %v630_v11 = vpop.f32.mrb[6].mxu0  ;;  %v671_v12 = vpop.f32.mrb[6].mxu1  ;;  %v7090_v7 = vld [vmem:[%s8469_s2 + $0x84] ss:$16 sps:$4 sm:$0xff]  }
 0x119   :  { %v631_v14 = vpop.f32.mrb[7].mxu0  ;;  %v672_v15 = vpop.f32.mrb[7].mxu1  ;;  %v7105_v11 = vld [vmem:[%s8469_s2 + $0x88] ss:$16 sps:$4 sm:$0xff]   ;;  %v7114_v12 = vld [vmem:[%s8469_s2 + $0xa4] ss:$16 sps:$4 sm:$0xff]  }
 0x11a   :  { %v686_v16 = vrot.slane %v678_v8, %v6939_v9  ;;  %v693_v17 = vrot.slane %v679_v10, %v6939_v9  ;;  %v7095_v8 = vld [vmem:[%s8469_s2 + $0x8c] ss:$16 sps:$4 sm:$0xff]   ;;  %v7100_v10 = vld [vmem:[%s8469_s2 + $0x80] ss:$16 sps:$4 sm:$0xff]   ;;  %v7129_v15 = vld [vmem:[%s8469_s2 + $0xa8] ss:$16 sps:$4 sm:$0xff]  }
 0x11b   :  { %v7124_v14 = vld [vmem:[%s8469_s2 + $0xa0] ss:$16 sps:$4 sm:$0xff]  }
 0x11c   :  { %v694_v20 = vcombine.low %v686_v16, %v693_v17  ;;  %v7138_v16 = vld [vmem:[%s8469_s2 + $0xc4] ss:$16 sps:$4 sm:$0xff]   ;;  %v7143_v17 = vld [vmem:[%s8469_s2 + $0xcc] ss:$16 sps:$4 sm:$0xff]  }
 0x11e   :  { %v696_v21 = vadd.f32 %v5427_v18, %v694_v20  ;;  %v7148_v18 = vld [vmem:[%s8469_s2 + $0xc0] ss:$16 sps:$4 sm:$0xff]   ;;  %v7162_v20 = vld [vmem:[%s8469_s2 + $0xe4] ss:$16 sps:$4 sm:$0xff]  }
 0x120   :  { %v698_v23 = vmul.f32 0.5, %v696_v21  ;;  %v703_v24 = vrot.slane %v696_v21, 2  ;;  %v709_v28 = vrot.slane %v696_v21, 4  ;;  %v712_v29 = vrot.slane %v696_v21, 6  ;;  %v7167_v21 = vld [vmem:[%s8469_s2 + $0xec] ss:$16 sps:$4 sm:$0xff]  }
 0x121   :  { %v6331_v25 = vpop.eup %6330 }
 0x122   :  { %v392_v26 = vmul.f32 %v6331_v25, %v387_v22  ;;  %6332 = vtanh.f32 %v698_v23  ;;  %v705_v27 = vmul.f32 0.5, %v703_v24  ;;  %v714_v30 = vmul.f32 0.5, %v712_v29  ;;  %v7172_v22 = vld [vmem:[%s8469_s2 + $0xe0] ss:$16 sps:$4 sm:$0xff]   ;;  %v7177_v23 = vld [vmem:[%s8469_s2 + $0xe8] ss:$16 sps:$4 sm:$0xff]  }
 0x123   :  { %v7186_v24 = vld [vmem:[%s8470_s3 + $0x4] ss:$16 sps:$4 sm:$0xff]   ;;  %v7191_v25 = vld [vmem:[%s8470_s3 + $0xc] ss:$16 sps:$4 sm:$0xff]  }
 0x124   :  { %393 = vst [vmem:[#allocation2] sm:$0x3] %v392_v26  ;;  %395 = vst [vmem:[%s8473_s4] sm:$0x3] %v392_v26  ;;  %6334 = vtanh.f32 %v705_v27 }
 0x125   :  { %6336 = vtanh.f32 %v709_v28 }
 0x126   :  { %6338 = vtanh.f32 %v714_v30 }
 0x12b   :  { %v729_v31 = vld [vmem:[#allocation2] sm:$0x3] }
 0x12c   :  { %v6333_v32 = vpop.eup %6332  ;;  %v730_v33 = vpack.c.bf16 %v729_v31, %v729_v31 }
 0x12d   :  { %v700_v35 = vmul.f32 0.5, %v6333_v32 }
 0x12e   :  { %v6335_v36 = vpop.eup %6334  ;;  %956 = vmatmul.mubr.bf16.vlgmr.msra.gmra.mrb[8].mxu0 %v730_v33  ;;  %997 = vmatmul.mubr.bf16.vlgmr.msra.gmra.mrb[8].mxu1 %v730_v33 }
 0x12f   :  { %v701_v57 = vadd.f32 0.5, %v700_v35  ;;  %v707_v61 = vmul.f32 0.5, %v6335_v36  ;;  %1255 = vmatpush1.bf16.msra.mxu0 %v6720_v38  ;;  %1296 = vmatpush1.bf16.msra.mxu1 %v6727_v39  ;;  %v6337_v4 = vpop.eup %6336 }
 0x130   :  { %1256 = vmatprep.subr.bf16.mxu0 %v6734_v40  ;;  %1297 = vmatprep.subr.bf16.mxu1 %v6739_v41  ;;  %v6339_v39 = vpop.eup %6338 }
 0x131   :  { %v708_v3 = vadd.f32 0.5, %v707_v61  ;;  %1286 = vmatprep.mubr.bf16.mxu0 %v8495_v34  ;;  %1327 = vmatprep.mubr.bf16.mxu1 %v8495_v34  ;;  %v719_v6 = vmul.f32 %v6337_v4, %v701_v57  ;;  %v716_v40 = vmul.f32 0.5, %v6339_v39 }
 0x133   :  { %v718_v5 = vmul.f32 %v708_v3, %v697_v0  ;;  %1257 = vmatpush1.bf16.msra.mxu0 %v6744_v42  ;;  %1298 = vmatpush1.bf16.msra.mxu1 %v6751_v43  ;;  %v717_v41 = vadd.f32 0.5, %v716_v40  ;;  %v8496_v42 = vld [vmem:[#allocation6_spill] sm:$0xff]  ;;  %v5461_v0 = vld [vmem:[%s8471_s0 + $0x10] sm:$0xff] }
 0x134   :  { %1258 = vmatprep.subr.bf16.mxu0 %v6758_v44  ;;  %1299 = vmatprep.subr.bf16.mxu1 %v6763_v45  ;;  %v8497_v45 = vld [vmem:[#allocation7_spill] sm:$0xff] }
 0x135   :  { %v720_v38 = vadd.f32 %v719_v6, %v718_v5 }
 0x137   :  { %6340 = vtanh.f32 %v720_v38  ;;  %724 = vst [vmem:[#allocation5] sm:$0x3] %v720_v38  ;;  %1259 = vmatpush1.bf16.msra.mxu0 %v6770_v46  ;;  %1300 = vmatpush1.bf16.msra.mxu1 %v6777_v47  ;;  %v8498_v46 = vld [vmem:[#allocation8_spill] sm:$0xff] }
 0x138   :  { %1260 = vmatprep.subr.bf16.mxu0 %v6784_v48  ;;  %1301 = vmatprep.subr.bf16.mxu1 %v6789_v49  ;;  %v6994_v49 = vld [vmem:[%s8469_s2 + $0x4] ss:$16 sps:$4 sm:$0xff]  }
 0x13b   :  { %1261 = vmatpush1.bf16.msra.mxu0 %v6794_v50  ;;  %1302 = vmatpush1.bf16.msra.mxu1 %v6799_v51  ;;  %v6999_v50 = vld [vmem:[%s8469_s2 + $0xc] ss:$16 sps:$4 sm:$0xff]   ;;  %v7009_v51 = vld [vmem:[%s8469_s2 + $0x8] ss:$16 sps:$4 sm:$0xff]  }
 0x13c   :  { %1262 = vmatprep.subr.bf16.mxu0 %v6804_v52  ;;  %1303 = vmatprep.subr.bf16.mxu1 %v6809_v53  ;;  %v7018_v52 = vld [vmem:[%s8469_s2 + $0x24] ss:$16 sps:$4 sm:$0xff]   ;;  %v7023_v53 = vld [vmem:[%s8469_s2 + $0x2c] ss:$16 sps:$4 sm:$0xff]  }
 0x13f   :  { %1263 = vmatpush1.bf16.msra.mxu0 %v6818_v54  ;;  %1304 = vmatpush1.bf16.msra.mxu1 %v6823_v55  ;;  %v7028_v54 = vld [vmem:[%s8469_s2 + $0x20] ss:$16 sps:$4 sm:$0xff]   ;;  %v7033_v55 = vld [vmem:[%s8469_s2 + $0x28] ss:$16 sps:$4 sm:$0xff]  }
 0x140   :  { %1264 = vmatprep.subr.bf16.mxu0 %v6828_v56  ;;  %1305 = vmatprep.subr.bf16.mxu1 %v8496_v42  ;;  %v7042_v56 = vld [vmem:[%s8469_s2 + $0x44] ss:$16 sps:$4 sm:$0xff]  }
 0x141   :  { %v6341_v43 = vpop.eup %6340 }
 0x142   :  { %v722_v44 = vmul.f32 %v6341_v43, %v717_v41 }
 0x143   :  { %1265 = vmatpush1.bf16.msra.mxu0 %v6842_v58  ;;  %1306 = vmatpush1.bf16.msra.mxu1 %v6847_v59  ;;  %v7047_v58 = vld [vmem:[%s8469_s2 + $0x4c] ss:$16 sps:$4 sm:$0xff]   ;;  %v7052_v59 = vld [vmem:[%s8469_s2 + $0x40] ss:$16 sps:$4 sm:$0xff]  }
 0x144   :  { %723 = vst [vmem:[#allocation4] sm:$0x3] %v722_v44  ;;  %5460 = vst [vmem:[%s8474_s5 + $0xe] sm:$0x3] %v722_v44  ;;  %1266 = vmatprep.subr.bf16.mxu0 %v6852_v60  ;;  %1307 = vmatprep.subr.bf16.mxu1 %v8497_v45  ;;  %v7057_v60 = vld [vmem:[%s8469_s2 + $0x48] ss:$16 sps:$4 sm:$0xff]  }
 0x147   :  { %1267 = vmatpush1.bf16.msra.mxu0 %v6866_v62  ;;  %1308 = vmatpush1.bf16.msra.mxu1 %v6871_v63  ;;  %v7066_v62 = vld [vmem:[%s8469_s2 + $0x64] ss:$16 sps:$4 sm:$0xff]   ;;  %v7071_v63 = vld [vmem:[%s8469_s2 + $0x6c] ss:$16 sps:$4 sm:$0xff]  }
 0x148   :  { %1268 = vmatprep.subr.bf16.mxu0 %v6876_v2  ;;  %1309 = vmatprep.subr.bf16.mxu1 %v8498_v46  ;;  %v7076_v2 = vld [vmem:[%s8469_s2 + $0x60] ss:$16 sps:$4 sm:$0xff]  }
 0x14b   :  { %1269 = vmatpush1.bf16.msra.mxu0 %v6890_v37  ;;  %1310 = vmatpush1.bf16.msra.mxu1 %v6895_v1  ;;  %v1060_v47 = vld [vmem:[#allocation4] sm:$0x3]  ;;  %v7004_v1 = vld [vmem:[%s8469_s2] ss:$16 sps:$4 sm:$0xff]   ;;  %v7081_v37 = vld [vmem:[%s8469_s2 + $0x68] ss:$16 sps:$4 sm:$0xff]  }
 0x14c   :  { %v1061_v48 = vpack.c.bf16 %v1060_v47, %v1060_v47  ;;  %1585 = vmatprep.subr.bf16.mxu0 %v6994_v49  ;;  %1626 = vmatprep.subr.bf16.mxu1 %v6999_v50 }
 0x14e   :  { %1287 = vmatmul.mubr.bf16.vlgmr.msra.gmra.mrb[12].mxu0 %v1061_v48  ;;  %1328 = vmatmul.mubr.bf16.vlgmr.msra.gmra.mrb[12].mxu1 %v1061_v48 }
 0x14f   :  { %1617 = vmatprep.mubr.bf16.mxu0 %v8495_v34  ;;  %1658 = vmatprep.mubr.bf16.mxu1 %v8495_v34 }
 0x150   :  { %1586 = vmatpush1.bf16.msra.mxu0 %v7004_v1  ;;  %1627 = vmatpush1.bf16.msra.mxu1 %v7009_v51 }
 0x151   :  { %1587 = vmatprep.subr.bf16.mxu0 %v7018_v52  ;;  %1628 = vmatprep.subr.bf16.mxu1 %v7023_v53 }
 0x154   :  { %1588 = vmatpush1.bf16.msra.mxu0 %v7028_v54  ;;  %1629 = vmatpush1.bf16.msra.mxu1 %v7033_v55 }
 0x155   :  { %1589 = vmatprep.subr.bf16.mxu0 %v7042_v56  ;;  %1630 = vmatprep.subr.bf16.mxu1 %v7047_v58 }
 0x158   :  { %1590 = vmatpush1.bf16.msra.mxu0 %v7052_v59  ;;  %1631 = vmatpush1.bf16.msra.mxu1 %v7057_v60 }
 0x159   :  { %1591 = vmatprep.subr.bf16.mxu0 %v7066_v62  ;;  %1632 = vmatprep.subr.bf16.mxu1 %v7071_v63 }
 0x15c   :  { %1592 = vmatpush1.bf16.msra.mxu0 %v7076_v2  ;;  %1633 = vmatpush1.bf16.msra.mxu1 %v7081_v37 }
 0x15d   :  { %1593 = vmatprep.subr.bf16.mxu0 %v7090_v7  ;;  %1634 = vmatprep.subr.bf16.mxu1 %v7095_v8 }
 0x160   :  { %1594 = vmatpush1.bf16.msra.mxu0 %v7100_v10  ;;  %1635 = vmatpush1.bf16.msra.mxu1 %v7105_v11 }
 0x161   :  { %1595 = vmatprep.subr.bf16.mxu0 %v7114_v12  ;;  %1636 = vmatprep.subr.bf16.mxu1 %v7119_v13 }
 0x164   :  { %1596 = vmatpush1.bf16.msra.mxu0 %v7124_v14  ;;  %1637 = vmatpush1.bf16.msra.mxu1 %v7129_v15 }
 0x165   :  { %1597 = vmatprep.subr.bf16.mxu0 %v7138_v16  ;;  %1638 = vmatprep.subr.bf16.mxu1 %v7143_v17 }
 0x168   :  { %1598 = vmatpush1.bf16.msra.mxu0 %v7148_v18  ;;  %1639 = vmatpush1.bf16.msra.mxu1 %v7153_v19 }
 0x169   :  { %1599 = vmatprep.subr.bf16.mxu0 %v7162_v20  ;;  %1640 = vmatprep.subr.bf16.mxu1 %v7167_v21 }
 0x16c   :  { %1600 = vmatpush1.bf16.msra.mxu0 %v7172_v22  ;;  %1641 = vmatpush1.bf16.msra.mxu1 %v7177_v23 }
 0x16d   :  { %1916 = vmatprep.subr.bf16.mxu0 %v7186_v24  ;;  %1957 = vmatprep.subr.bf16.mxu1 %v7191_v25 }
 0x201   :  { %v957_v26 = vpop.f32.mrb[8].mxu0  ;;  %v998_v27 = vpop.f32.mrb[8].mxu1 }
 0x202   :  { %v959_v28 = vpop.f32.mrb[9].mxu0  ;;  %v1000_v29 = vpop.f32.mrb[9].mxu1 }
 0x203   :  { %v1009_v30 = vcombine.low %v957_v26, %v959_v28  ;;  %v1010_v31 = vcombine.low %v998_v27, %v1000_v29  ;;  %v961_v32 = vpop.f32.mrb[10].mxu0  ;;  %v1002_v33 = vpop.f32.mrb[10].mxu1  ;;  %v1028_v26 = vld [vmem:[#allocation3] sm:$0x3] }
 0x204   :  { %v962_v35 = vpop.f32.mrb[11].mxu0  ;;  %v1003_v36 = vpop.f32.mrb[11].mxu1 }
 0x205   :  { %v1017_v57 = vrot.slane %v1009_v30, %v6939_v9  ;;  %v1024_v61 = vrot.slane %v1010_v31, %v6939_v9 }
 0x207   :  { %v1025_v3 = vcombine.low %v1017_v57, %v1024_v61 }
 0x209   :  { %v1027_v4 = vadd.f32 %v5461_v0, %v1025_v3 }
 0x20b   :  { %v1029_v5 = vmul.f32 0.5, %v1027_v4  ;;  %v1034_v6 = vrot.slane %v1027_v4, 2  ;;  %v1040_v39 = vrot.slane %v1027_v4, 4  ;;  %v1043_v40 = vrot.slane %v1027_v4, 6 }
 0x20d   :  { %6342 = vtanh.f32 %v1029_v5  ;;  %v1036_v38 = vmul.f32 0.5, %v1034_v6  ;;  %v1045_v41 = vmul.f32 0.5, %v1043_v40 }
 0x20f   :  { %6344 = vtanh.f32 %v1036_v38  ;;  %v5495_v38 = vld [vmem:[%s8472_s1 + $0x68] sm:$0xff] }
 0x210   :  { %6346 = vtanh.f32 %v1040_v39 }
 0x211   :  { %6348 = vtanh.f32 %v1045_v41 }
 0x217   :  { %v6343_v42 = vpop.eup %6342 }
 0x218   :  { %v1031_v43 = vmul.f32 0.5, %v6343_v42 }
 0x219   :  { %v6345_v44 = vpop.eup %6344 }
 0x21a   :  { %v1032_v45 = vadd.f32 0.5, %v1031_v43  ;;  %v1038_v46 = vmul.f32 0.5, %v6345_v44  ;;  %v6347_v48 = vpop.eup %6346 }
 0x21b   :  { %v6349_v0 = vpop.eup %6348 }
 0x21c   :  { %v1039_v47 = vadd.f32 0.5, %v1038_v46  ;;  %v1050_v28 = vmul.f32 %v6347_v48, %v1032_v45  ;;  %v1047_v39 = vmul.f32 0.5, %v6349_v0 }
 0x21e   :  { %v1049_v27 = vmul.f32 %v1039_v47, %v1028_v26  ;;  %v1048_v42 = vadd.f32 0.5, %v1047_v39 }
 0x220   :  { %v1051_v29 = vadd.f32 %v1050_v28, %v1049_v27  ;;  %v7211_v27 = vld [vmem:[%s8470_s3] ss:$16 sps:$4 sm:$0xff]  }
 0x221   :  { %v1288_v30 = vpop.f32.mrb[12].mxu0  ;;  %v1329_v31 = vpop.f32.mrb[12].mxu1 }
 0x222   :  { %6350 = vtanh.f32 %v1051_v29  ;;  %1055 = vst [vmem:[#allocation3] sm:$0x3] %v1051_v29  ;;  %v1290_v32 = vpop.f32.mrb[13].mxu0  ;;  %v1331_v33 = vpop.f32.mrb[13].mxu1 }
 0x223   :  { %v1340_v35 = vcombine.low %v1288_v30, %v1290_v32  ;;  %v1341_v36 = vcombine.low %v1329_v31, %v1331_v33  ;;  %v1292_v57 = vpop.f32.mrb[14].mxu0  ;;  %v1333_v61 = vpop.f32.mrb[14].mxu1  ;;  %v7216_v30 = vld [vmem:[%s8470_s3 + $0x8] ss:$16 sps:$4 sm:$0xff]   ;;  %v7221_v33 = vld [vmem:[%s8470_s3 + $0x24] ss:$16 sps:$4 sm:$0xff]  }
 0x224   :  { %v1293_v3 = vpop.f32.mrb[15].mxu0  ;;  %v1334_v4 = vpop.f32.mrb[15].mxu1 }
 0x225   :  { %v1348_v5 = vrot.slane %v1340_v35, %v6939_v9  ;;  %v1355_v6 = vrot.slane %v1341_v36, %v6939_v9  ;;  %v7226_v35 = vld [vmem:[%s8470_s3 + $0x2c] ss:$16 sps:$4 sm:$0xff]   ;;  %v7233_v3 = vld [vmem:[%s8470_s3 + $0x20] ss:$16 sps:$4 sm:$0xff]   ;;  %v7238_v4 = vld [vmem:[%s8470_s3 + $0x28] ss:$16 sps:$4 sm:$0xff]  }
 0x227   :  { %v1356_v40 = vcombine.low %v1348_v5, %v1355_v6  ;;  %v7245_v5 = vld [vmem:[%s8470_s3 + $0x44] ss:$16 sps:$4 sm:$0xff]   ;;  %v7250_v6 = vld [vmem:[%s8470_s3 + $0x4c] ss:$16 sps:$4 sm:$0xff]  }
 0x229   :  { %v1358_v41 = vadd.f32 %v5495_v38, %v1356_v40  ;;  %v1359_v40 = vld [vmem:[#allocation5] sm:$0x3] }
 0x22b   :  { %v1360_v43 = vmul.f32 0.5, %v1358_v41  ;;  %v1365_v44 = vrot.slane %v1358_v41, 2  ;;  %v1371_v48 = vrot.slane %v1358_v41, 4  ;;  %v1374_v26 = vrot.slane %v1358_v41, 6 }
 0x22c   :  { %v6351_v45 = vpop.eup %6350 }
 0x22d   :  { %v1053_v46 = vmul.f32 %v6351_v45, %v1048_v42  ;;  %6352 = vtanh.f32 %v1360_v43  ;;  %v1367_v47 = vmul.f32 0.5, %v1365_v44  ;;  %v1376_v28 = vmul.f32 0.5, %v1374_v26  ;;  %v7259_v43 = vld [vmem:[%s8470_s3 + $0x40] ss:$16 sps:$4 sm:$0xff]   ;;  %v7264_v44 = vld [vmem:[%s8470_s3 + $0x48] ss:$16 sps:$4 sm:$0xff]  }
 0x22e   :  { %v7271_v45 = vld [vmem:[%s8470_s3 + $0x64] ss:$16 sps:$4 sm:$0xff]   ;;  %v7288_v26 = vld [vmem:[%s8470_s3 + $0x68] ss:$16 sps:$4 sm:$0xff]  }
 0x22f   :  { %1054 = vst [vmem:[#allocation2] sm:$0x3] %v1053_v46  ;;  %5494 = vst [vmem:[%s8473_s4 + $0x2] sm:$0x3] %v1053_v46  ;;  %6354 = vtanh.f32 %v1367_v47  ;;  %v7276_v46 = vld [vmem:[%s8470_s3 + $0x6c] ss:$16 sps:$4 sm:$0xff]  }
 0x230   :  { %6356 = vtanh.f32 %v1371_v48  ;;  %v7283_v48 = vld [vmem:[%s8470_s3 + $0x60] ss:$16 sps:$4 sm:$0xff]  }
 0x231   :  { %6358 = vtanh.f32 %v1376_v28  ;;  %v7295_v28 = vld [vmem:[%s8470_s3 + $0x84] ss:$16 sps:$4 sm:$0xff]  }
 0x236   :  { %v1391_v29 = vld [vmem:[#allocation2] sm:$0x3] }
 0x237   :  { %v6353_v31 = vpop.eup %6352  ;;  %v1392_v32 = vpack.c.bf16 %v1391_v29, %v1391_v29  ;;  %v7300_v29 = vld [vmem:[%s8470_s3 + $0x8c] ss:$16 sps:$4 sm:$0xff]  }
 0x238   :  { %v1362_v36 = vmul.f32 0.5, %v6353_v31 }
 0x239   :  { %v6355_v57 = vpop.eup %6354  ;;  %1618 = vmatmul.mubr.bf16.vlgmr.msra.gmra.mrb[16].mxu0 %v1392_v32  ;;  %1659 = vmatmul.mubr.bf16.vlgmr.msra.gmra.mrb[16].mxu1 %v1392_v32  ;;  %v7307_v32 = vld [vmem:[%s8470_s3 + $0x80] ss:$16 sps:$4 sm:$0xff]  }
 0x23a   :  { %v1363_v61 = vadd.f32 0.5, %v1362_v36  ;;  %v1369_v0 = vmul.f32 0.5, %v6355_v57  ;;  %1917 = vmatpush1.bf16.msra.mxu0 %v7211_v27  ;;  %1958 = vmatpush1.bf16.msra.mxu1 %v7216_v30  ;;  %v6357_v39 = vpop.eup %6356  ;;  %v7312_v36 = vld [vmem:[%s8470_s3 + $0x88] ss:$16 sps:$4 sm:$0xff]  }
 0x23b   :  { %1918 = vmatprep.subr.bf16.mxu0 %v7221_v33  ;;  %1959 = vmatprep.subr.bf16.mxu1 %v7226_v35  ;;  %v6359_v31 = vpop.eup %6358 }
 0x23c   :  { %v1370_v38 = vadd.f32 0.5, %v1369_v0  ;;  %1948 = vmatprep.mubr.bf16.mxu0 %v8495_v34  ;;  %1989 = vmatprep.mubr.bf16.mxu1 %v8495_v34  ;;  %v1381_v42 = vmul.f32 %v6357_v39, %v1363_v61  ;;  %v1378_v57 = vmul.f32 0.5, %v6359_v31  ;;  %v7319_v61 = vld [vmem:[%s8470_s3 + $0xa4] ss:$16 sps:$4 sm:$0xff]   ;;  %v7324_v0 = vld [vmem:[%s8470_s3 + $0xac] ss:$16 sps:$4 sm:$0xff]  }
 0x23d   :  { %8499 = vst [vmem:[#allocation6_spill] sm:$0xff] %v7324_v0  ;;  %v7336_v39 = vld [vmem:[%s8470_s3 + $0xa8] ss:$16 sps:$4 sm:$0xff]  }
 0x23e   :  { %v1380_v41 = vmul.f32 %v1370_v38, %v1359_v40  ;;  %1919 = vmatpush1.bf16.msra.mxu0 %v7233_v3  ;;  %1960 = vmatpush1.bf16.msra.mxu1 %v7238_v4  ;;  %v7331_v38 = vld [vmem:[%s8470_s3 + $0xa0] ss:$16 sps:$4 sm:$0xff]   ;;  %v1379_v40 = vadd.f32 0.5, %v1378_v57 }
 0x23f   :  { %1920 = vmatprep.subr.bf16.mxu0 %v7245_v5  ;;  %1961 = vmatprep.subr.bf16.mxu1 %v7250_v6  ;;  %v7355_v57 = vld [vmem:[%s8470_s3 + $0xc0] ss:$16 sps:$4 sm:$0xff]  }
 0x240   :  { %v1382_v47 = vadd.f32 %v1381_v42, %v1380_v41  ;;  %v7343_v41 = vld [vmem:[%s8470_s3 + $0xc4] ss:$16 sps:$4 sm:$0xff]   ;;  %v7348_v42 = vld [vmem:[%s8470_s3 + $0xcc] ss:$16 sps:$4 sm:$0xff]   ;;  %8501 = vst [vmem:[#allocation8_spill] sm:$0xff] %v7355_v57 }
 0x241   :  { %8500 = vst [vmem:[#allocation7_spill] sm:$0xff] %v7348_v42 }
 0x242   :  { %6360 = vtanh.f32 %v1382_v47  ;;  %1386 = vst [vmem:[#allocation5] sm:$0x3] %v1382_v47  ;;  %1921 = vmatpush1.bf16.msra.mxu0 %v7259_v43  ;;  %1962 = vmatpush1.bf16.msra.mxu1 %v7264_v44 }
 0x243   :  { %1922 = vmatprep.subr.bf16.mxu0 %v7271_v45  ;;  %1963 = vmatprep.subr.bf16.mxu1 %v7276_v46 }
 0x246   :  { %1923 = vmatpush1.bf16.msra.mxu0 %v7283_v48  ;;  %1964 = vmatpush1.bf16.msra.mxu1 %v7288_v26 }
 0x247   :  { %1924 = vmatprep.subr.bf16.mxu0 %v7295_v28  ;;  %1965 = vmatprep.subr.bf16.mxu1 %v7300_v29 }
 0x24a   :  { %1925 = vmatpush1.bf16.msra.mxu0 %v7307_v32  ;;  %1966 = vmatpush1.bf16.msra.mxu1 %v7312_v36 }
 0x24b   :  { %1926 = vmatprep.subr.bf16.mxu0 %v7319_v61  ;;  %1967 = vmatprep.subr.bf16.mxu1 %v7324_v0  ;;  %v7360_v0 = vld [vmem:[%s8470_s3 + $0xc8] ss:$16 sps:$4 sm:$0xff]  }
 0x24c   :  { %v6361_v47 = vpop.eup %6360  ;;  %8502 = vst [vmem:[#allocation9_spill] sm:$0xff] %v7360_v0 }
 0x24d   :  { %v1384_v31 = vmul.f32 %v6361_v47, %v1379_v40  ;;  %v7370_v40 = vld [vmem:[%s8470_s3 + $0xe4] ss:$16 sps:$4 sm:$0xff]   ;;  %v7375_v47 = vld [vmem:[%s8470_s3 + $0xec] ss:$16 sps:$4 sm:$0xff]  }
 0x24e   :  { %1927 = vmatpush1.bf16.msra.mxu0 %v7331_v38  ;;  %1968 = vmatpush1.bf16.msra.mxu1 %v7336_v39 }
 0x24f   :  { %1385 = vst [vmem:[#allocation4] sm:$0x3] %v1384_v31  ;;  %5528 = vst [vmem:[%s8474_s5 + $0xc] sm:$0x3] %v1384_v31  ;;  %1928 = vmatprep.subr.bf16.mxu0 %v7343_v41  ;;  %1969 = vmatprep.subr.bf16.mxu1 %v7348_v42  ;;  %v7382_v31 = vld [vmem:[%s8470_s3 + $0xe0] ss:$16 sps:$4 sm:$0xff]  }
 0x250   :  { %v7387_v42 = vld [vmem:[%s8470_s3 + $0xe8] ss:$16 sps:$4 sm:$0xff]  }
 0x252   :  { %1929 = vmatpush1.bf16.msra.mxu0 %v7355_v57  ;;  %1970 = vmatpush1.bf16.msra.mxu1 %v7360_v0 }
 0x253   :  { %1930 = vmatprep.subr.bf16.mxu0 %v7370_v40  ;;  %1971 = vmatprep.subr.bf16.mxu1 %v7375_v47 }
 0x256   :  { %1931 = vmatpush1.bf16.msra.mxu0 %v7382_v31  ;;  %1972 = vmatpush1.bf16.msra.mxu1 %v7387_v42  ;;  %v1722_v57 = vld [vmem:[#allocation4] sm:$0x3] }
 0x257   :  { %v1723_v0 = vpack.c.bf16 %v1722_v57, %v1722_v57  ;;  %2247 = vmatprep.subr.bf16.mxu0 %v6994_v49  ;;  %2288 = vmatprep.subr.bf16.mxu1 %v6999_v50 }
 0x259   :  { %1949 = vmatmul.mubr.bf16.vlgmr.msra.gmra.mrb[20].mxu0 %v1723_v0  ;;  %1990 = vmatmul.mubr.bf16.vlgmr.msra.gmra.mrb[20].mxu1 %v1723_v0 }
 0x25a   :  { %2248 = vmatpush1.bf16.msra.mxu0 %v7004_v1  ;;  %2289 = vmatpush1.bf16.msra.mxu1 %v7009_v51 }
 0x25b   :  { %2249 = vmatprep.subr.bf16.mxu0 %v7018_v52  ;;  %2290 = vmatprep.subr.bf16.mxu1 %v7023_v53 }
 0x25c   :  { %2279 = vmatprep.mubr.bf16.mxu0 %v8495_v34  ;;  %2320 = vmatprep.mubr.bf16.mxu1 %v8495_v34 }
 0x25e   :  { %2250 = vmatpush1.bf16.msra.mxu0 %v7028_v54  ;;  %2291 = vmatpush1.bf16.msra.mxu1 %v7033_v55 }
 0x25f   :  { %2251 = vmatprep.subr.bf16.mxu0 %v7042_v56  ;;  %2292 = vmatprep.subr.bf16.mxu1 %v7047_v58 }
 0x262   :  { %2252 = vmatpush1.bf16.msra.mxu0 %v7052_v59  ;;  %2293 = vmatpush1.bf16.msra.mxu1 %v7057_v60 }
 0x263   :  { %2253 = vmatprep.subr.bf16.mxu0 %v7066_v62  ;;  %2294 = vmatprep.subr.bf16.mxu1 %v7071_v63  ;;  %v5529_v62 = vld [vmem:[%s8471_s0 + $0x20] sm:$0xff] }
 0x266   :  { %2254 = vmatpush1.bf16.msra.mxu0 %v7076_v2  ;;  %2295 = vmatpush1.bf16.msra.mxu1 %v7081_v37 }
 0x267   :  { %2255 = vmatprep.subr.bf16.mxu0 %v7090_v7  ;;  %2296 = vmatprep.subr.bf16.mxu1 %v7095_v8 }
 0x26a   :  { %2256 = vmatpush1.bf16.msra.mxu0 %v7100_v10  ;;  %2297 = vmatpush1.bf16.msra.mxu1 %v7105_v11 }
 0x26b   :  { %2257 = vmatprep.subr.bf16.mxu0 %v7114_v12  ;;  %2298 = vmatprep.subr.bf16.mxu1 %v7119_v13 }
 0x26e   :  { %2258 = vmatpush1.bf16.msra.mxu0 %v7124_v14  ;;  %2299 = vmatpush1.bf16.msra.mxu1 %v7129_v15 }
 0x26f   :  { %2259 = vmatprep.subr.bf16.mxu0 %v7138_v16  ;;  %2300 = vmatprep.subr.bf16.mxu1 %v7143_v17 }
 0x272   :  { %2260 = vmatpush1.bf16.msra.mxu0 %v7148_v18  ;;  %2301 = vmatpush1.bf16.msra.mxu1 %v7153_v19 }
 0x273   :  { %2261 = vmatprep.subr.bf16.mxu0 %v7162_v20  ;;  %2302 = vmatprep.subr.bf16.mxu1 %v7167_v21  ;;  %v1690_v20 = vld [vmem:[#allocation3] sm:$0x3] }
 0x276   :  { %2262 = vmatpush1.bf16.msra.mxu0 %v7172_v22  ;;  %2303 = vmatpush1.bf16.msra.mxu1 %v7177_v23 }
 0x277   :  { %2578 = vmatprep.subr.bf16.mxu0 %v7186_v24  ;;  %2619 = vmatprep.subr.bf16.mxu1 %v7191_v25 }
 0x30c   :  { %v1619_v49 = vpop.f32.mrb[16].mxu0  ;;  %v1660_v50 = vpop.f32.mrb[16].mxu1 }
 0x30d   :  { %v1621_v1 = vpop.f32.mrb[17].mxu0  ;;  %v1662_v51 = vpop.f32.mrb[17].mxu1 }
 0x30e   :  { %v1671_v52 = vcombine.low %v1619_v49, %v1621_v1  ;;  %v1672_v53 = vcombine.low %v1660_v50, %v1662_v51  ;;  %v1623_v54 = vpop.f32.mrb[18].mxu0  ;;  %v1664_v55 = vpop.f32.mrb[18].mxu1 }
 0x30f   :  { %v1624_v56 = vpop.f32.mrb[19].mxu0  ;;  %v1665_v58 = vpop.f32.mrb[19].mxu1 }
 0x310   :  { %v1679_v59 = vrot.slane %v1671_v52, %v6939_v9  ;;  %v1686_v60 = vrot.slane %v1672_v53, %v6939_v9  ;;  %v5563_v58 = vld [vmem:[%s8472_s1 + $0x58] sm:$0xff] }
 0x312   :  { %v1687_v63 = vcombine.low %v1679_v59, %v1686_v60 }
 0x314   :  { %v1689_v2 = vadd.f32 %v5529_v62, %v1687_v63 }
 0x316   :  { %v1691_v37 = vmul.f32 0.5, %v1689_v2  ;;  %v1696_v7 = vrot.slane %v1689_v2, 2  ;;  %v1702_v10 = vrot.slane %v1689_v2, 4  ;;  %v1705_v11 = vrot.slane %v1689_v2, 6 }
 0x318   :  { %6362 = vtanh.f32 %v1691_v37  ;;  %v1698_v8 = vmul.f32 0.5, %v1696_v7  ;;  %v1707_v12 = vmul.f32 0.5, %v1705_v11 }
 0x31a   :  { %6364 = vtanh.f32 %v1698_v8 }
 0x31b   :  { %6366 = vtanh.f32 %v1702_v10 }
 0x31c   :  { %6368 = vtanh.f32 %v1707_v12 }
 0x322   :  { %v6363_v13 = vpop.eup %6362 }
 0x323   :  { %v1693_v14 = vmul.f32 0.5, %v6363_v13 }
 0x324   :  { %v6365_v15 = vpop.eup %6364 }
 0x325   :  { %v1694_v16 = vadd.f32 0.5, %v1693_v14  ;;  %v1700_v17 = vmul.f32 0.5, %v6365_v15  ;;  %v6367_v19 = vpop.eup %6366 }
 0x326   :  { %v6369_v52 = vpop.eup %6368 }
 0x327   :  { %v1701_v18 = vadd.f32 0.5, %v1700_v17  ;;  %v1712_v22 = vmul.f32 %v6367_v19, %v1694_v16  ;;  %v1709_v59 = vmul.f32 0.5, %v6369_v52  ;;  %v7602_v52 = vld [vmem:[%s8469_s2 + $0xa4] ss:$16 sps:$4 sm:$0xff]  }
 0x329   :  { %v1711_v21 = vmul.f32 %v1701_v18, %v1690_v20  ;;  %v1710_v63 = vadd.f32 0.5, %v1709_v59  ;;  %v7636_v59 = vld [vmem:[%s8469_s2 + $0xc0] ss:$16 sps:$4 sm:$0xff]  }
 0x32b   :  { %v1713_v23 = vadd.f32 %v1712_v22, %v1711_v21 }
 0x32c   :  { %v1950_v24 = vpop.f32.mrb[20].mxu0  ;;  %v1991_v25 = vpop.f32.mrb[20].mxu1 }
 0x32d   :  { %6370 = vtanh.f32 %v1713_v23  ;;  %1717 = vst [vmem:[#allocation3] sm:$0x3] %v1713_v23  ;;  %v1952_v0 = vpop.f32.mrb[21].mxu0  ;;  %v1993_v57 = vpop.f32.mrb[21].mxu1  ;;  %v2021_v23 = vld [vmem:[#allocation5] sm:$0x3] }
 0x32e   :  { %v2002_v49 = vcombine.low %v1950_v24, %v1952_v0  ;;  %v2003_v50 = vcombine.low %v1991_v25, %v1993_v57  ;;  %v1954_v1 = vpop.f32.mrb[22].mxu0  ;;  %v1995_v51 = vpop.f32.mrb[22].mxu1  ;;  %v7564_v0 = vld [vmem:[%s8469_s2 + $0x60] ss:$16 sps:$4 sm:$0xff]   ;;  %v7569_v57 = vld [vmem:[%s8469_s2 + $0x68] ss:$16 sps:$4 sm:$0xff]  }
 0x32f   :  { %v1955_v53 = vpop.f32.mrb[23].mxu0  ;;  %v1996_v54 = vpop.f32.mrb[23].mxu1  ;;  %v7588_v1 = vld [vmem:[%s8469_s2 + $0x80] ss:$16 sps:$4 sm:$0xff]   ;;  %v7593_v51 = vld [vmem:[%s8469_s2 + $0x88] ss:$16 sps:$4 sm:$0xff]  }
 0x330   :  { %v2010_v55 = vrot.slane %v2002_v49, %v6939_v9  ;;  %v2017_v56 = vrot.slane %v2003_v50, %v6939_v9  ;;  %v7578_v49 = vld [vmem:[%s8469_s2 + $0x84] ss:$16 sps:$4 sm:$0xff]   ;;  %v7583_v50 = vld [vmem:[%s8469_s2 + $0x8c] ss:$16 sps:$4 sm:$0xff]   ;;  %v7612_v54 = vld [vmem:[%s8469_s2 + $0xa0] ss:$16 sps:$4 sm:$0xff]  }
 0x331   :  { %v7607_v53 = vld [vmem:[%s8469_s2 + $0xac] ss:$16 sps:$4 sm:$0xff]  }
 0x332   :  { %v2018_v60 = vcombine.low %v2010_v55, %v2017_v56  ;;  %v7617_v55 = vld [vmem:[%s8469_s2 + $0xa8] ss:$16 sps:$4 sm:$0xff]   ;;  %v7626_v56 = vld [vmem:[%s8469_s2 + $0xc4] ss:$16 sps:$4 sm:$0xff]  }
 0x334   :  { %v2020_v62 = vadd.f32 %v5563_v58, %v2018_v60  ;;  %v7631_v58 = vld [vmem:[%s8469_s2 + $0xcc] ss:$16 sps:$4 sm:$0xff]   ;;  %v7641_v60 = vld [vmem:[%s8469_s2 + $0xc8] ss:$16 sps:$4 sm:$0xff]  }
 0x336   :  { %v2022_v2 = vmul.f32 0.5, %v2020_v62  ;;  %v2027_v37 = vrot.slane %v2020_v62, 2  ;;  %v2033_v11 = vrot.slane %v2020_v62, 4  ;;  %v2036_v12 = vrot.slane %v2020_v62, 6  ;;  %v7650_v62 = vld [vmem:[%s8469_s2 + $0xe4] ss:$16 sps:$4 sm:$0xff]  }
 0x337   :  { %v6371_v7 = vpop.eup %6370 }
 0x338   :  { %v1715_v8 = vmul.f32 %v6371_v7, %v1710_v63  ;;  %6372 = vtanh.f32 %v2022_v2  ;;  %v2029_v10 = vmul.f32 0.5, %v2027_v37  ;;  %v2038_v13 = vmul.f32 0.5, %v2036_v12  ;;  %v7655_v63 = vld [vmem:[%s8469_s2 + $0xec] ss:$16 sps:$4 sm:$0xff]   ;;  %v7660_v2 = vld [vmem:[%s8469_s2 + $0xe0] ss:$16 sps:$4 sm:$0xff]  }
 0x339   :  { %v7665_v37 = vld [vmem:[%s8469_s2 + $0xe8] ss:$16 sps:$4 sm:$0xff]   ;;  %v7674_v7 = vld [vmem:[%s8470_s3 + $0x4] ss:$16 sps:$4 sm:$0xff]  }
 0x33a   :  { %1716 = vst [vmem:[#allocation2] sm:$0x3] %v1715_v8  ;;  %5562 = vst [vmem:[%s8473_s4 + $0x4] sm:$0x3] %v1715_v8  ;;  %6374 = vtanh.f32 %v2029_v10  ;;  %v7679_v8 = vld [vmem:[%s8470_s3 + $0xc] ss:$16 sps:$4 sm:$0xff]  }
 0x33b   :  { %6376 = vtanh.f32 %v2033_v11 }
 0x33c   :  { %6378 = vtanh.f32 %v2038_v13 }
 0x341   :  { %v2053_v14 = vld [vmem:[#allocation2] sm:$0x3] }
 0x342   :  { %v6373_v15 = vpop.eup %6372  ;;  %v2054_v16 = vpack.c.bf16 %v2053_v14, %v2053_v14 }
 0x343   :  { %v2024_v17 = vmul.f32 0.5, %v6373_v15 }
 0x344   :  { %v6375_v18 = vpop.eup %6374  ;;  %2280 = vmatmul.mubr.bf16.vlgmr.msra.gmra.mrb[24].mxu0 %v2054_v16  ;;  %2321 = vmatmul.mubr.bf16.vlgmr.msra.gmra.mrb[24].mxu1 %v2054_v16 }
 0x345   :  { %v2025_v19 = vadd.f32 0.5, %v2024_v17  ;;  %v2031_v20 = vmul.f32 0.5, %v6375_v18  ;;  %2579 = vmatpush1.bf16.msra.mxu0 %v7211_v27  ;;  %2620 = vmatpush1.bf16.msra.mxu1 %v7216_v30  ;;  %v6377_v22 = vpop.eup %6376 }
 0x346   :  { %2580 = vmatprep.subr.bf16.mxu0 %v7221_v33  ;;  %2621 = vmatprep.subr.bf16.mxu1 %v7226_v35  ;;  %v6379_v30 = vpop.eup %6378 }
 0x347   :  { %v2032_v21 = vadd.f32 0.5, %v2031_v20  ;;  %2610 = vmatprep.mubr.bf16.mxu0 %v8495_v34  ;;  %2651 = vmatprep.mubr.bf16.mxu1 %v8495_v34  ;;  %v2043_v25 = vmul.f32 %v6377_v22, %v2025_v19  ;;  %v2040_v33 = vmul.f32 0.5, %v6379_v30  ;;  %v5597_v22 = vld [vmem:[%s8471_s0 + $0x30] sm:$0xff] }
 0x349   :  { %v2042_v24 = vmul.f32 %v2032_v21, %v2021_v23  ;;  %2581 = vmatpush1.bf16.msra.mxu0 %v7233_v3  ;;  %2622 = vmatpush1.bf16.msra.mxu1 %v7238_v4  ;;  %v2041_v35 = vadd.f32 0.5, %v2040_v33  ;;  %v8503_v3 = vld [vmem:[#allocation6_spill] sm:$0xff] }
 0x34a   :  { %2582 = vmatprep.subr.bf16.mxu0 %v7245_v5  ;;  %2623 = vmatprep.subr.bf16.mxu1 %v7250_v6  ;;  %v8504_v6 = vld [vmem:[#allocation7_spill] sm:$0xff] }
 0x34b   :  { %v2044_v27 = vadd.f32 %v2043_v25, %v2042_v24 }
 0x34d   :  { %6380 = vtanh.f32 %v2044_v27  ;;  %2048 = vst [vmem:[#allocation5] sm:$0x3] %v2044_v27  ;;  %2583 = vmatpush1.bf16.msra.mxu0 %v7259_v43  ;;  %2624 = vmatpush1.bf16.msra.mxu1 %v7264_v44  ;;  %v8505_v43 = vld [vmem:[#allocation8_spill] sm:$0xff]  ;;  %v8506_v44 = vld [vmem:[#allocation9_spill] sm:$0xff] }
 0x34e   :  { %2584 = vmatprep.subr.bf16.mxu0 %v7271_v45  ;;  %2625 = vmatprep.subr.bf16.mxu1 %v7276_v46 }
 0x351   :  { %2585 = vmatpush1.bf16.msra.mxu0 %v7283_v48  ;;  %2626 = vmatpush1.bf16.msra.mxu1 %v7288_v26  ;;  %v7482_v48 = vld [vmem:[%s8469_s2 + $0x4] ss:$16 sps:$4 sm:$0xff]   ;;  %v7487_v26 = vld [vmem:[%s8469_s2 + $0xc] ss:$16 sps:$4 sm:$0xff]  }
 0x352   :  { %2586 = vmatprep.subr.bf16.mxu0 %v7295_v28  ;;  %2627 = vmatprep.subr.bf16.mxu1 %v7300_v29  ;;  %v7492_v28 = vld [vmem:[%s8469_s2] ss:$16 sps:$4 sm:$0xff]   ;;  %v7497_v29 = vld [vmem:[%s8469_s2 + $0x8] ss:$16 sps:$4 sm:$0xff]  }
 0x355   :  { %2587 = vmatpush1.bf16.msra.mxu0 %v7307_v32  ;;  %2628 = vmatpush1.bf16.msra.mxu1 %v7312_v36  ;;  %v7506_v32 = vld [vmem:[%s8469_s2 + $0x24] ss:$16 sps:$4 sm:$0xff]   ;;  %v7511_v36 = vld [vmem:[%s8469_s2 + $0x2c] ss:$16 sps:$4 sm:$0xff]  }
 0x356   :  { %2588 = vmatprep.subr.bf16.mxu0 %v7319_v61  ;;  %2629 = vmatprep.subr.bf16.mxu1 %v8503_v3  ;;  %v7516_v61 = vld [vmem:[%s8469_s2 + $0x20] ss:$16 sps:$4 sm:$0xff]  }
 0x357   :  { %v6381_v4 = vpop.eup %6380 }
 0x358   :  { %v2046_v5 = vmul.f32 %v6381_v4, %v2041_v35 }
 0x359   :  { %2589 = vmatpush1.bf16.msra.mxu0 %v7331_v38  ;;  %2630 = vmatpush1.bf16.msra.mxu1 %v7336_v39  ;;  %v7521_v38 = vld [vmem:[%s8469_s2 + $0x28] ss:$16 sps:$4 sm:$0xff]   ;;  %v7530_v39 = vld [vmem:[%s8469_s2 + $0x44] ss:$16 sps:$4 sm:$0xff]  }
 0x35a   :  { %2047 = vst [vmem:[#allocation4] sm:$0x3] %v2046_v5  ;;  %5596 = vst [vmem:[%s8474_s5 + $0xa] sm:$0x3] %v2046_v5  ;;  %2590 = vmatprep.subr.bf16.mxu0 %v7343_v41  ;;  %2631 = vmatprep.subr.bf16.mxu1 %v8504_v6  ;;  %v7535_v41 = vld [vmem:[%s8469_s2 + $0x4c] ss:$16 sps:$4 sm:$0xff]  }
 0x35d   :  { %2591 = vmatpush1.bf16.msra.mxu0 %v8505_v43  ;;  %2632 = vmatpush1.bf16.msra.mxu1 %v8506_v44 }
 0x35e   :  { %2592 = vmatprep.subr.bf16.mxu0 %v7370_v40  ;;  %2633 = vmatprep.subr.bf16.mxu1 %v7375_v47  ;;  %v7545_v40 = vld [vmem:[%s8469_s2 + $0x48] ss:$16 sps:$4 sm:$0xff]   ;;  %v7554_v47 = vld [vmem:[%s8469_s2 + $0x64] ss:$16 sps:$4 sm:$0xff]  }
 0x361   :  { %2593 = vmatpush1.bf16.msra.mxu0 %v7382_v31  ;;  %2634 = vmatpush1.bf16.msra.mxu1 %v7387_v42  ;;  %v2384_v45 = vld [vmem:[#allocation4] sm:$0x3]  ;;  %v7540_v42 = vld [vmem:[%s8469_s2 + $0x40] ss:$16 sps:$4 sm:$0xff]   ;;  %v7559_v31 = vld [vmem:[%s8469_s2 + $0x6c] ss:$16 sps:$4 sm:$0xff]  }
 0x362   :  { %v2385_v46 = vpack.c.bf16 %v2384_v45, %v2384_v45  ;;  %2909 = vmatprep.subr.bf16.mxu0 %v7482_v48  ;;  %2950 = vmatprep.subr.bf16.mxu1 %v7487_v26 }
 0x364   :  { %2611 = vmatmul.mubr.bf16.vlgmr.msra.gmra.mrb[28].mxu0 %v2385_v46  ;;  %2652 = vmatmul.mubr.bf16.vlgmr.msra.gmra.mrb[28].mxu1 %v2385_v46 }
 0x365   :  { %2941 = vmatprep.mubr.bf16.mxu0 %v8495_v34  ;;  %2982 = vmatprep.mubr.bf16.mxu1 %v8495_v34 }
 0x366   :  { %2910 = vmatpush1.bf16.msra.mxu0 %v7492_v28  ;;  %2951 = vmatpush1.bf16.msra.mxu1 %v7497_v29 }
 0x367   :  { %2911 = vmatprep.subr.bf16.mxu0 %v7506_v32  ;;  %2952 = vmatprep.subr.bf16.mxu1 %v7511_v36 }
 0x36a   :  { %2912 = vmatpush1.bf16.msra.mxu0 %v7516_v61  ;;  %2953 = vmatpush1.bf16.msra.mxu1 %v7521_v38 }
 0x36b   :  { %2913 = vmatprep.subr.bf16.mxu0 %v7530_v39  ;;  %2954 = vmatprep.subr.bf16.mxu1 %v7535_v41 }
 0x36e   :  { %2914 = vmatpush1.bf16.msra.mxu0 %v7540_v42  ;;  %2955 = vmatpush1.bf16.msra.mxu1 %v7545_v40 }
 0x36f   :  { %2915 = vmatprep.subr.bf16.mxu0 %v7554_v47  ;;  %2956 = vmatprep.subr.bf16.mxu1 %v7559_v31 }
 0x372   :  { %2916 = vmatpush1.bf16.msra.mxu0 %v7564_v0  ;;  %2957 = vmatpush1.bf16.msra.mxu1 %v7569_v57 }
 0x373   :  { %2917 = vmatprep.subr.bf16.mxu0 %v7578_v49  ;;  %2958 = vmatprep.subr.bf16.mxu1 %v7583_v50 }
 0x376   :  { %2918 = vmatpush1.bf16.msra.mxu0 %v7588_v1  ;;  %2959 = vmatpush1.bf16.msra.mxu1 %v7593_v51 }
 0x377   :  { %2919 = vmatprep.subr.bf16.mxu0 %v7602_v52  ;;  %2960 = vmatprep.subr.bf16.mxu1 %v7607_v53 }
 0x37a   :  { %2920 = vmatpush1.bf16.msra.mxu0 %v7612_v54  ;;  %2961 = vmatpush1.bf16.msra.mxu1 %v7617_v55 }
 0x37b   :  { %2921 = vmatprep.subr.bf16.mxu0 %v7626_v56  ;;  %2962 = vmatprep.subr.bf16.mxu1 %v7631_v58 }
 0x37e   :  { %2922 = vmatpush1.bf16.msra.mxu0 %v7636_v59  ;;  %2963 = vmatpush1.bf16.msra.mxu1 %v7641_v60 }
 0x37f   :  { %2923 = vmatprep.subr.bf16.mxu0 %v7650_v62  ;;  %2964 = vmatprep.subr.bf16.mxu1 %v7655_v63 }
 0x382   :  { %2924 = vmatpush1.bf16.msra.mxu0 %v7660_v2  ;;  %2965 = vmatpush1.bf16.msra.mxu1 %v7665_v37 }
 0x383   :  { %3240 = vmatprep.subr.bf16.mxu0 %v7674_v7  ;;  %3281 = vmatprep.subr.bf16.mxu1 %v7679_v8 }
 0x417   :  { %v2281_v10 = vpop.f32.mrb[24].mxu0  ;;  %v2322_v11 = vpop.f32.mrb[24].mxu1 }
 0x418   :  { %v2283_v12 = vpop.f32.mrb[25].mxu0  ;;  %v2324_v13 = vpop.f32.mrb[25].mxu1 }
 0x419   :  { %v2333_v14 = vcombine.low %v2281_v10, %v2283_v12  ;;  %v2334_v15 = vcombine.low %v2322_v11, %v2324_v13  ;;  %v2285_v16 = vpop.f32.mrb[26].mxu0  ;;  %v2326_v17 = vpop.f32.mrb[26].mxu1  ;;  %v2352_v10 = vld [vmem:[#allocation3] sm:$0x3] }
 0x41a   :  { %v2286_v18 = vpop.f32.mrb[27].mxu0  ;;  %v2327_v19 = vpop.f32.mrb[27].mxu1 }
 0x41b   :  { %v2341_v20 = vrot.slane %v2333_v14, %v6939_v9  ;;  %v2348_v21 = vrot.slane %v2334_v15, %v6939_v9 }
 0x41d   :  { %v2349_v23 = vcombine.low %v2341_v20, %v2348_v21 }
 0x41f   :  { %v2351_v24 = vadd.f32 %v5597_v22, %v2349_v23 }
 0x421   :  { %v2353_v25 = vmul.f32 0.5, %v2351_v24  ;;  %v2358_v27 = vrot.slane %v2351_v24, 2  ;;  %v2364_v33 = vrot.slane %v2351_v24, 4  ;;  %v2367_v35 = vrot.slane %v2351_v24, 6 }
 0x423   :  { %6382 = vtanh.f32 %v2353_v25  ;;  %v2360_v30 = vmul.f32 0.5, %v2358_v27  ;;  %v2369_v3 = vmul.f32 0.5, %v2367_v35 }
 0x425   :  { %6384 = vtanh.f32 %v2360_v30  ;;  %v5631_v30 = vld [vmem:[%s8472_s1 + $0x48] sm:$0xff] }
 0x426   :  { %6386 = vtanh.f32 %v2364_v33 }
 0x427   :  { %6388 = vtanh.f32 %v2369_v3 }
 0x42d   :  { %v6383_v4 = vpop.eup %6382 }
 0x42e   :  { %v2355_v5 = vmul.f32 0.5, %v6383_v4 }
 0x42f   :  { %v6385_v6 = vpop.eup %6384 }
 0x430   :  { %v2356_v43 = vadd.f32 0.5, %v2355_v5  ;;  %v2362_v44 = vmul.f32 0.5, %v6385_v6  ;;  %v6387_v46 = vpop.eup %6386 }
 0x431   :  { %v6389_v22 = vpop.eup %6388 }
 0x432   :  { %v2363_v45 = vadd.f32 0.5, %v2362_v44  ;;  %v2374_v12 = vmul.f32 %v6387_v46, %v2356_v43  ;;  %v2371_v33 = vmul.f32 0.5, %v6389_v22 }
 0x434   :  { %v2373_v11 = vmul.f32 %v2363_v45, %v2352_v10  ;;  %v2372_v4 = vadd.f32 0.5, %v2371_v33 }
 0x436   :  { %v2375_v13 = vadd.f32 %v2374_v12, %v2373_v11  ;;  %v7699_v11 = vld [vmem:[%s8470_s3] ss:$16 sps:$4 sm:$0xff]  }
 0x437   :  { %v2612_v14 = vpop.f32.mrb[28].mxu0  ;;  %v2653_v15 = vpop.f32.mrb[28].mxu1 }
 0x438   :  { %6390 = vtanh.f32 %v2375_v13  ;;  %2379 = vst [vmem:[#allocation3] sm:$0x3] %v2375_v13  ;;  %v2614_v16 = vpop.f32.mrb[29].mxu0  ;;  %v2655_v17 = vpop.f32.mrb[29].mxu1 }
 0x439   :  { %v2664_v18 = vcombine.low %v2612_v14, %v2614_v16  ;;  %v2665_v19 = vcombine.low %v2653_v15, %v2655_v17  ;;  %v2616_v20 = vpop.f32.mrb[30].mxu0  ;;  %v2657_v21 = vpop.f32.mrb[30].mxu1  ;;  %v7704_v14 = vld [vmem:[%s8470_s3 + $0x8] ss:$16 sps:$4 sm:$0xff]   ;;  %v7709_v17 = vld [vmem:[%s8470_s3 + $0x24] ss:$16 sps:$4 sm:$0xff]  }
 0x43a   :  { %v2617_v23 = vpop.f32.mrb[31].mxu0  ;;  %v2658_v24 = vpop.f32.mrb[31].mxu1 }
 0x43b   :  { %v2672_v25 = vrot.slane %v2664_v18, %v6939_v9  ;;  %v2679_v27 = vrot.slane %v2665_v19, %v6939_v9  ;;  %v7714_v18 = vld [vmem:[%s8470_s3 + $0x2c] ss:$16 sps:$4 sm:$0xff]   ;;  %v7721_v23 = vld [vmem:[%s8470_s3 + $0x20] ss:$16 sps:$4 sm:$0xff]   ;;  %v7726_v24 = vld [vmem:[%s8470_s3 + $0x28] ss:$16 sps:$4 sm:$0xff]  }
 0x43d   :  { %v2680_v35 = vcombine.low %v2672_v25, %v2679_v27  ;;  %v7733_v25 = vld [vmem:[%s8470_s3 + $0x44] ss:$16 sps:$4 sm:$0xff]   ;;  %v7738_v27 = vld [vmem:[%s8470_s3 + $0x4c] ss:$16 sps:$4 sm:$0xff]  }
 0x43f   :  { %v2682_v3 = vadd.f32 %v5631_v30, %v2680_v35  ;;  %v2683_v35 = vld [vmem:[#allocation5] sm:$0x3] }
 0x441   :  { %v2684_v5 = vmul.f32 0.5, %v2682_v3  ;;  %v2689_v6 = vrot.slane %v2682_v3, 2  ;;  %v2695_v46 = vrot.slane %v2682_v3, 4  ;;  %v2698_v10 = vrot.slane %v2682_v3, 6 }
 0x442   :  { %v6391_v43 = vpop.eup %6390 }
 0x443   :  { %v2377_v44 = vmul.f32 %v6391_v43, %v2372_v4  ;;  %6392 = vtanh.f32 %v2684_v5  ;;  %v2691_v45 = vmul.f32 0.5, %v2689_v6  ;;  %v2700_v12 = vmul.f32 0.5, %v2698_v10  ;;  %v7747_v5 = vld [vmem:[%s8470_s3 + $0x40] ss:$16 sps:$4 sm:$0xff]   ;;  %v7752_v6 = vld [vmem:[%s8470_s3 + $0x48] ss:$16 sps:$4 sm:$0xff]  }
 0x444   :  { %v7759_v43 = vld [vmem:[%s8470_s3 + $0x64] ss:$16 sps:$4 sm:$0xff]   ;;  %v7776_v10 = vld [vmem:[%s8470_s3 + $0x68] ss:$16 sps:$4 sm:$0xff]  }
 0x445   :  { %2378 = vst [vmem:[#allocation2] sm:$0x3] %v2377_v44  ;;  %5630 = vst [vmem:[%s8473_s4 + $0x6] sm:$0x3] %v2377_v44  ;;  %6394 = vtanh.f32 %v2691_v45  ;;  %v7764_v44 = vld [vmem:[%s8470_s3 + $0x6c] ss:$16 sps:$4 sm:$0xff]  }
 0x446   :  { %6396 = vtanh.f32 %v2695_v46  ;;  %v7771_v46 = vld [vmem:[%s8470_s3 + $0x60] ss:$16 sps:$4 sm:$0xff]  }
 0x447   :  { %6398 = vtanh.f32 %v2700_v12  ;;  %v7783_v12 = vld [vmem:[%s8470_s3 + $0x84] ss:$16 sps:$4 sm:$0xff]  }
 0x44c   :  { %v2715_v13 = vld [vmem:[#allocation2] sm:$0x3] }
 0x44d   :  { %v6393_v15 = vpop.eup %6392  ;;  %v2716_v16 = vpack.c.bf16 %v2715_v13, %v2715_v13  ;;  %v7788_v13 = vld [vmem:[%s8470_s3 + $0x8c] ss:$16 sps:$4 sm:$0xff]  }
 0x44e   :  { %v2686_v19 = vmul.f32 0.5, %v6393_v15 }
 0x44f   :  { %v6395_v20 = vpop.eup %6394  ;;  %2942 = vmatmul.mubr.bf16.vlgmr.msra.gmra.mrb[32].mxu0 %v2716_v16  ;;  %2983 = vmatmul.mubr.bf16.vlgmr.msra.gmra.mrb[32].mxu1 %v2716_v16  ;;  %v7795_v16 = vld [vmem:[%s8470_s3 + $0x80] ss:$16 sps:$4 sm:$0xff]  }
 0x450   :  { %v2687_v21 = vadd.f32 0.5, %v2686_v19  ;;  %v2693_v22 = vmul.f32 0.5, %v6395_v20  ;;  %3241 = vmatpush1.bf16.msra.mxu0 %v7699_v11  ;;  %3282 = vmatpush1.bf16.msra.mxu1 %v7704_v14  ;;  %v6397_v33 = vpop.eup %6396  ;;  %v7800_v19 = vld [vmem:[%s8470_s3 + $0x88] ss:$16 sps:$4 sm:$0xff]  }
 0x451   :  { %3242 = vmatprep.subr.bf16.mxu0 %v7709_v17  ;;  %3283 = vmatprep.subr.bf16.mxu1 %v7714_v18  ;;  %v6399_v15 = vpop.eup %6398 }
 0x452   :  { %v2694_v30 = vadd.f32 0.5, %v2693_v22  ;;  %3272 = vmatprep.mubr.bf16.mxu0 %v8495_v34  ;;  %3313 = vmatprep.mubr.bf16.mxu1 %v8495_v34  ;;  %v2705_v4 = vmul.f32 %v6397_v33, %v2687_v21  ;;  %v2702_v20 = vmul.f32 0.5, %v6399_v15  ;;  %v7807_v21 = vld [vmem:[%s8470_s3 + $0xa4] ss:$16 sps:$4 sm:$0xff]   ;;  %v7812_v22 = vld [vmem:[%s8470_s3 + $0xac] ss:$16 sps:$4 sm:$0xff]  }
 0x453   :  { %8507 = vst [vmem:[#allocation6_spill] sm:$0xff] %v7812_v22  ;;  %v7824_v33 = vld [vmem:[%s8470_s3 + $0xa8] ss:$16 sps:$4 sm:$0xff]  }
 0x454   :  { %v2704_v3 = vmul.f32 %v2694_v30, %v2683_v35  ;;  %3243 = vmatpush1.bf16.msra.mxu0 %v7721_v23  ;;  %3284 = vmatpush1.bf16.msra.mxu1 %v7726_v24  ;;  %v7819_v30 = vld [vmem:[%s8470_s3 + $0xa0] ss:$16 sps:$4 sm:$0xff]   ;;  %v2703_v35 = vadd.f32 0.5, %v2702_v20 }
 0x455   :  { %3244 = vmatprep.subr.bf16.mxu0 %v7733_v25  ;;  %3285 = vmatprep.subr.bf16.mxu1 %v7738_v27  ;;  %v7843_v20 = vld [vmem:[%s8470_s3 + $0xc0] ss:$16 sps:$4 sm:$0xff]  }
 0x456   :  { %v2706_v45 = vadd.f32 %v2705_v4, %v2704_v3  ;;  %v7831_v3 = vld [vmem:[%s8470_s3 + $0xc4] ss:$16 sps:$4 sm:$0xff]   ;;  %v7836_v4 = vld [vmem:[%s8470_s3 + $0xcc] ss:$16 sps:$4 sm:$0xff]   ;;  %8509 = vst [vmem:[#allocation8_spill] sm:$0xff] %v7843_v20 }
 0x457   :  { %8508 = vst [vmem:[#allocation7_spill] sm:$0xff] %v7836_v4 }
 0x458   :  { %6400 = vtanh.f32 %v2706_v45  ;;  %2710 = vst [vmem:[#allocation5] sm:$0x3] %v2706_v45  ;;  %3245 = vmatpush1.bf16.msra.mxu0 %v7747_v5  ;;  %3286 = vmatpush1.bf16.msra.mxu1 %v7752_v6 }
 0x459   :  { %3246 = vmatprep.subr.bf16.mxu0 %v7759_v43  ;;  %3287 = vmatprep.subr.bf16.mxu1 %v7764_v44 }
 0x45c   :  { %3247 = vmatpush1.bf16.msra.mxu0 %v7771_v46  ;;  %3288 = vmatpush1.bf16.msra.mxu1 %v7776_v10 }
 0x45d   :  { %3248 = vmatprep.subr.bf16.mxu0 %v7783_v12  ;;  %3289 = vmatprep.subr.bf16.mxu1 %v7788_v13 }
 0x460   :  { %3249 = vmatpush1.bf16.msra.mxu0 %v7795_v16  ;;  %3290 = vmatpush1.bf16.msra.mxu1 %v7800_v19 }
 0x461   :  { %3250 = vmatprep.subr.bf16.mxu0 %v7807_v21  ;;  %3291 = vmatprep.subr.bf16.mxu1 %v7812_v22  ;;  %v7848_v22 = vld [vmem:[%s8470_s3 + $0xc8] ss:$16 sps:$4 sm:$0xff]  }
 0x462   :  { %v6401_v45 = vpop.eup %6400  ;;  %8510 = vst [vmem:[#allocation9_spill] sm:$0xff] %v7848_v22 }
 0x463   :  { %v2708_v15 = vmul.f32 %v6401_v45, %v2703_v35  ;;  %v7858_v35 = vld [vmem:[%s8470_s3 + $0xe4] ss:$16 sps:$4 sm:$0xff]   ;;  %v7863_v45 = vld [vmem:[%s8470_s3 + $0xec] ss:$16 sps:$4 sm:$0xff]  }
 0x464   :  { %3251 = vmatpush1.bf16.msra.mxu0 %v7819_v30  ;;  %3292 = vmatpush1.bf16.msra.mxu1 %v7824_v33 }
 0x465   :  { %2709 = vst [vmem:[#allocation4] sm:$0x3] %v2708_v15  ;;  %5664 = vst [vmem:[%s8474_s5 + $0x8] sm:$0x3] %v2708_v15  ;;  %3252 = vmatprep.subr.bf16.mxu0 %v7831_v3  ;;  %3293 = vmatprep.subr.bf16.mxu1 %v7836_v4  ;;  %v7870_v15 = vld [vmem:[%s8470_s3 + $0xe0] ss:$16 sps:$4 sm:$0xff]  }
 0x466   :  { %v7875_v4 = vld [vmem:[%s8470_s3 + $0xe8] ss:$16 sps:$4 sm:$0xff]  }
 0x468   :  { %3253 = vmatpush1.bf16.msra.mxu0 %v7843_v20  ;;  %3294 = vmatpush1.bf16.msra.mxu1 %v7848_v22 }
 0x469   :  { %3254 = vmatprep.subr.bf16.mxu0 %v7858_v35  ;;  %3295 = vmatprep.subr.bf16.mxu1 %v7863_v45 }
 0x46c   :  { %3255 = vmatpush1.bf16.msra.mxu0 %v7870_v15  ;;  %3296 = vmatpush1.bf16.msra.mxu1 %v7875_v4  ;;  %v3046_v20 = vld [vmem:[#allocation4] sm:$0x3] }
 0x46d   :  { %v3047_v22 = vpack.c.bf16 %v3046_v20, %v3046_v20  ;;  %3571 = vmatprep.subr.bf16.mxu0 %v7482_v48  ;;  %3612 = vmatprep.subr.bf16.mxu1 %v7487_v26 }
 0x46f   :  { %3273 = vmatmul.mubr.bf16.vlgmr.msra.gmra.mrb[36].mxu0 %v3047_v22  ;;  %3314 = vmatmul.mubr.bf16.vlgmr.msra.gmra.mrb[36].mxu1 %v3047_v22 }
 0x470   :  { %3572 = vmatpush1.bf16.msra.mxu0 %v7492_v28  ;;  %3613 = vmatpush1.bf16.msra.mxu1 %v7497_v29 }
 0x471   :  { %3573 = vmatprep.subr.bf16.mxu0 %v7506_v32  ;;  %3614 = vmatprep.subr.bf16.mxu1 %v7511_v36 }
 0x472   :  { %3603 = vmatprep.mubr.bf16.mxu0 %v8495_v34  ;;  %3644 = vmatprep.mubr.bf16.mxu1 %v8495_v34 }
 0x474   :  { %3574 = vmatpush1.bf16.msra.mxu0 %v7516_v61  ;;  %3615 = vmatpush1.bf16.msra.mxu1 %v7521_v38 }
 0x475   :  { %3575 = vmatprep.subr.bf16.mxu0 %v7530_v39  ;;  %3616 = vmatprep.subr.bf16.mxu1 %v7535_v41 }
 0x478   :  { %3576 = vmatpush1.bf16.msra.mxu0 %v7540_v42  ;;  %3617 = vmatpush1.bf16.msra.mxu1 %v7545_v40 }
 0x479   :  { %3577 = vmatprep.subr.bf16.mxu0 %v7554_v47  ;;  %3618 = vmatprep.subr.bf16.mxu1 %v7559_v31  ;;  %v5665_v47 = vld [vmem:[%s8471_s0 + $0x40] sm:$0xff] }
 0x47c   :  { %3578 = vmatpush1.bf16.msra.mxu0 %v7564_v0  ;;  %3619 = vmatpush1.bf16.msra.mxu1 %v7569_v57 }
 0x47d   :  { %3579 = vmatprep.subr.bf16.mxu0 %v7578_v49  ;;  %3620 = vmatprep.subr.bf16.mxu1 %v7583_v50 }
 0x480   :  { %3580 = vmatpush1.bf16.msra.mxu0 %v7588_v1  ;;  %3621 = vmatpush1.bf16.msra.mxu1 %v7593_v51 }
 0x481   :  { %3581 = vmatprep.subr.bf16.mxu0 %v7602_v52  ;;  %3622 = vmatprep.subr.bf16.mxu1 %v7607_v53 }
 0x484   :  { %3582 = vmatpush1.bf16.msra.mxu0 %v7612_v54  ;;  %3623 = vmatpush1.bf16.msra.mxu1 %v7617_v55 }
 0x485   :  { %3583 = vmatprep.subr.bf16.mxu0 %v7626_v56  ;;  %3624 = vmatprep.subr.bf16.mxu1 %v7631_v58 }
 0x488   :  { %3584 = vmatpush1.bf16.msra.mxu0 %v7636_v59  ;;  %3625 = vmatpush1.bf16.msra.mxu1 %v7641_v60 }
 0x489   :  { %3585 = vmatprep.subr.bf16.mxu0 %v7650_v62  ;;  %3626 = vmatprep.subr.bf16.mxu1 %v7655_v63  ;;  %v3014_v62 = vld [vmem:[#allocation3] sm:$0x3] }
 0x48c   :  { %3586 = vmatpush1.bf16.msra.mxu0 %v7660_v2  ;;  %3627 = vmatpush1.bf16.msra.mxu1 %v7665_v37 }
 0x48d   :  { %3902 = vmatprep.subr.bf16.mxu0 %v7674_v7  ;;  %3943 = vmatprep.subr.bf16.mxu1 %v7679_v8 }
 0x522   :  { %v2943_v48 = vpop.f32.mrb[32].mxu0  ;;  %v2984_v26 = vpop.f32.mrb[32].mxu1 }
 0x523   :  { %v2945_v28 = vpop.f32.mrb[33].mxu0  ;;  %v2986_v29 = vpop.f32.mrb[33].mxu1 }
 0x524   :  { %v2995_v32 = vcombine.low %v2943_v48, %v2945_v28  ;;  %v2996_v36 = vcombine.low %v2984_v26, %v2986_v29  ;;  %v2947_v61 = vpop.f32.mrb[34].mxu0  ;;  %v2988_v38 = vpop.f32.mrb[34].mxu1 }
 0x525   :  { %v2948_v39 = vpop.f32.mrb[35].mxu0  ;;  %v2989_v41 = vpop.f32.mrb[35].mxu1 }
 0x526   :  { %v3003_v42 = vrot.slane %v2995_v32, %v6939_v9  ;;  %v3010_v40 = vrot.slane %v2996_v36, %v6939_v9  ;;  %v5699_v41 = vld [vmem:[%s8472_s1 + $0x38] sm:$0xff] }
 0x528   :  { %v3011_v31 = vcombine.low %v3003_v42, %v3010_v40 }
 0x52a   :  { %v3013_v0 = vadd.f32 %v5665_v47, %v3011_v31 }
 0x52c   :  { %v3015_v57 = vmul.f32 0.5, %v3013_v0  ;;  %v3020_v49 = vrot.slane %v3013_v0, 2  ;;  %v3026_v1 = vrot.slane %v3013_v0, 4  ;;  %v3029_v51 = vrot.slane %v3013_v0, 6 }
 0x52e   :  { %6402 = vtanh.f32 %v3015_v57  ;;  %v3022_v50 = vmul.f32 0.5, %v3020_v49  ;;  %v3031_v52 = vmul.f32 0.5, %v3029_v51 }
 0x530   :  { %6404 = vtanh.f32 %v3022_v50 }
 0x531   :  { %6406 = vtanh.f32 %v3026_v1 }
 0x532   :  { %6408 = vtanh.f32 %v3031_v52 }
 0x538   :  { %v6403_v53 = vpop.eup %6402 }
 0x539   :  { %v3017_v54 = vmul.f32 0.5, %v6403_v53 }
 0x53a   :  { %v6405_v55 = vpop.eup %6404 }
 0x53b   :  { %v3018_v56 = vadd.f32 0.5, %v3017_v54  ;;  %v3024_v58 = vmul.f32 0.5, %v6405_v55  ;;  %v6407_v60 = vpop.eup %6406 }
 0x53c   :  { %v6409_v32 = vpop.eup %6408 }
 0x53d   :  { %v3025_v59 = vadd.f32 0.5, %v3024_v58  ;;  %v3036_v2 = vmul.f32 %v6407_v60, %v3018_v56  ;;  %v3033_v42 = vmul.f32 0.5, %v6409_v32  ;;  %v8090_v32 = vld [vmem:[%s8469_s2 + $0xa4] ss:$16 sps:$4 sm:$0xff]  }
 0x53f   :  { %v3035_v63 = vmul.f32 %v3025_v59, %v3014_v62  ;;  %v3034_v31 = vadd.f32 0.5, %v3033_v42  ;;  %v8124_v42 = vld [vmem:[%s8469_s2 + $0xc0] ss:$16 sps:$4 sm:$0xff]  }
 0x541   :  { %v3037_v37 = vadd.f32 %v3036_v2, %v3035_v63 }
 0x542   :  { %v3274_v7 = vpop.f32.mrb[36].mxu0  ;;  %v3315_v8 = vpop.f32.mrb[36].mxu1 }
 0x543   :  { %6410 = vtanh.f32 %v3037_v37  ;;  %3041 = vst [vmem:[#allocation3] sm:$0x3] %v3037_v37  ;;  %v3276_v22 = vpop.f32.mrb[37].mxu0  ;;  %v3317_v20 = vpop.f32.mrb[37].mxu1  ;;  %v3345_v37 = vld [vmem:[#allocation5] sm:$0x3] }
 0x544   :  { %v3326_v48 = vcombine.low %v3274_v7, %v3276_v22  ;;  %v3327_v26 = vcombine.low %v3315_v8, %v3317_v20  ;;  %v3278_v28 = vpop.f32.mrb[38].mxu0  ;;  %v3319_v29 = vpop.f32.mrb[38].mxu1  ;;  %v8052_v22 = vld [vmem:[%s8469_s2 + $0x60] ss:$16 sps:$4 sm:$0xff]   ;;  %v8057_v20 = vld [vmem:[%s8469_s2 + $0x68] ss:$16 sps:$4 sm:$0xff]  }
 0x545   :  { %v3279_v36 = vpop.f32.mrb[39].mxu0  ;;  %v3320_v61 = vpop.f32.mrb[39].mxu1  ;;  %v8076_v28 = vld [vmem:[%s8469_s2 + $0x80] ss:$16 sps:$4 sm:$0xff]   ;;  %v8081_v29 = vld [vmem:[%s8469_s2 + $0x88] ss:$16 sps:$4 sm:$0xff]  }
 0x546   :  { %v3334_v38 = vrot.slane %v3326_v48, %v6939_v9  ;;  %v3341_v39 = vrot.slane %v3327_v26, %v6939_v9  ;;  %v8066_v48 = vld [vmem:[%s8469_s2 + $0x84] ss:$16 sps:$4 sm:$0xff]   ;;  %v8071_v26 = vld [vmem:[%s8469_s2 + $0x8c] ss:$16 sps:$4 sm:$0xff]   ;;  %v8100_v61 = vld [vmem:[%s8469_s2 + $0xa0] ss:$16 sps:$4 sm:$0xff]  }
 0x547   :  { %v8095_v36 = vld [vmem:[%s8469_s2 + $0xac] ss:$16 sps:$4 sm:$0xff]  }
 0x548   :  { %v3342_v40 = vcombine.low %v3334_v38, %v3341_v39  ;;  %v8105_v38 = vld [vmem:[%s8469_s2 + $0xa8] ss:$16 sps:$4 sm:$0xff]   ;;  %v8114_v39 = vld [vmem:[%s8469_s2 + $0xc4] ss:$16 sps:$4 sm:$0xff]  }
 0x54a   :  { %v3344_v47 = vadd.f32 %v5699_v41, %v3342_v40  ;;  %v8119_v41 = vld [vmem:[%s8469_s2 + $0xcc] ss:$16 sps:$4 sm:$0xff]   ;;  %v8129_v40 = vld [vmem:[%s8469_s2 + $0xc8] ss:$16 sps:$4 sm:$0xff]  }
 0x54c   :  { %v3346_v0 = vmul.f32 0.5, %v3344_v47  ;;  %v3351_v57 = vrot.slane %v3344_v47, 2  ;;  %v3357_v51 = vrot.slane %v3344_v47, 4  ;;  %v3360_v52 = vrot.slane %v3344_v47, 6  ;;  %v8138_v47 = vld [vmem:[%s8469_s2 + $0xe4] ss:$16 sps:$4 sm:$0xff]  }
 0x54d   :  { %v6411_v49 = vpop.eup %6410 }
 0x54e   :  { %v3039_v50 = vmul.f32 %v6411_v49, %v3034_v31  ;;  %6412 = vtanh.f32 %v3346_v0  ;;  %v3353_v1 = vmul.f32 0.5, %v3351_v57  ;;  %v3362_v53 = vmul.f32 0.5, %v3360_v52  ;;  %v8143_v31 = vld [vmem:[%s8469_s2 + $0xec] ss:$16 sps:$4 sm:$0xff]   ;;  %v8148_v0 = vld [vmem:[%s8469_s2 + $0xe0] ss:$16 sps:$4 sm:$0xff]  }
 0x54f   :  { %v8153_v57 = vld [vmem:[%s8469_s2 + $0xe8] ss:$16 sps:$4 sm:$0xff]   ;;  %v8162_v49 = vld [vmem:[%s8470_s3 + $0x4] ss:$16 sps:$4 sm:$0xff]  }
 0x550   :  { %5698 = vst [vmem:[%s8473_s4 + $0x8] sm:$0x3] %v3039_v50  ;;  %3040 = vst [vmem:[#allocation2] sm:$0x3] %v3039_v50  ;;  %6414 = vtanh.f32 %v3353_v1  ;;  %v8167_v50 = vld [vmem:[%s8470_s3 + $0xc] ss:$16 sps:$4 sm:$0xff]  }
 0x551   :  { %6416 = vtanh.f32 %v3357_v51 }
 0x552   :  { %6418 = vtanh.f32 %v3362_v53 }
 0x557   :  { %v3377_v54 = vld [vmem:[#allocation2] sm:$0x3] }
 0x558   :  { %v6413_v55 = vpop.eup %6412  ;;  %v3378_v56 = vpack.c.bf16 %v3377_v54, %v3377_v54 }
 0x559   :  { %v3348_v58 = vmul.f32 0.5, %v6413_v55 }
 0x55a   :  { %v6415_v59 = vpop.eup %6414  ;;  %3604 = vmatmul.mubr.bf16.vlgmr.msra.gmra.mrb[40].mxu0 %v3378_v56  ;;  %3645 = vmatmul.mubr.bf16.vlgmr.msra.gmra.mrb[40].mxu1 %v3378_v56 }
 0x55b   :  { %v3349_v60 = vadd.f32 0.5, %v3348_v58  ;;  %v3355_v62 = vmul.f32 0.5, %v6415_v59  ;;  %3903 = vmatpush1.bf16.msra.mxu0 %v7699_v11  ;;  %3944 = vmatpush1.bf16.msra.mxu1 %v7704_v14  ;;  %v6417_v2 = vpop.eup %6416 }
 0x55c   :  { %3904 = vmatprep.subr.bf16.mxu0 %v7709_v17  ;;  %3945 = vmatprep.subr.bf16.mxu1 %v7714_v18  ;;  %v6419_v14 = vpop.eup %6418 }
 0x55d   :  { %v3356_v63 = vadd.f32 0.5, %v3355_v62  ;;  %3934 = vmatprep.mubr.bf16.mxu0 %v8495_v34  ;;  %3975 = vmatprep.mubr.bf16.mxu1 %v8495_v34  ;;  %v3367_v8 = vmul.f32 %v6417_v2, %v3349_v60  ;;  %v3364_v17 = vmul.f32 0.5, %v6419_v14  ;;  %v5733_v2 = vld [vmem:[%s8471_s0 + $0x50] sm:$0xff] }
 0x55f   :  { %v3366_v7 = vmul.f32 %v3356_v63, %v3345_v37  ;;  %3905 = vmatpush1.bf16.msra.mxu0 %v7721_v23  ;;  %3946 = vmatpush1.bf16.msra.mxu1 %v7726_v24  ;;  %v3365_v18 = vadd.f32 0.5, %v3364_v17  ;;  %v8511_v23 = vld [vmem:[#allocation6_spill] sm:$0xff] }
 0x560   :  { %3906 = vmatprep.subr.bf16.mxu0 %v7733_v25  ;;  %3947 = vmatprep.subr.bf16.mxu1 %v7738_v27  ;;  %v8512_v27 = vld [vmem:[#allocation7_spill] sm:$0xff] }
 0x561   :  { %v3368_v11 = vadd.f32 %v3367_v8, %v3366_v7 }
 0x563   :  { %6420 = vtanh.f32 %v3368_v11  ;;  %3372 = vst [vmem:[#allocation5] sm:$0x3] %v3368_v11  ;;  %3907 = vmatpush1.bf16.msra.mxu0 %v7747_v5  ;;  %3948 = vmatpush1.bf16.msra.mxu1 %v7752_v6  ;;  %v8513_v5 = vld [vmem:[#allocation8_spill] sm:$0xff]  ;;  %v8514_v6 = vld [vmem:[#allocation9_spill] sm:$0xff] }
 0x564   :  { %3908 = vmatprep.subr.bf16.mxu0 %v7759_v43  ;;  %3949 = vmatprep.subr.bf16.mxu1 %v7764_v44 }
 0x567   :  { %3909 = vmatpush1.bf16.msra.mxu0 %v7771_v46  ;;  %3950 = vmatpush1.bf16.msra.mxu1 %v7776_v10  ;;  %v7970_v46 = vld [vmem:[%s8469_s2 + $0x4] ss:$16 sps:$4 sm:$0xff]   ;;  %v7975_v10 = vld [vmem:[%s8469_s2 + $0xc] ss:$16 sps:$4 sm:$0xff]  }
 0x568   :  { %3910 = vmatprep.subr.bf16.mxu0 %v7783_v12  ;;  %3951 = vmatprep.subr.bf16.mxu1 %v7788_v13  ;;  %v7980_v12 = vld [vmem:[%s8469_s2] ss:$16 sps:$4 sm:$0xff]   ;;  %v7985_v13 = vld [vmem:[%s8469_s2 + $0x8] ss:$16 sps:$4 sm:$0xff]  }
 0x56b   :  { %3911 = vmatpush1.bf16.msra.mxu0 %v7795_v16  ;;  %3952 = vmatpush1.bf16.msra.mxu1 %v7800_v19  ;;  %v7994_v16 = vld [vmem:[%s8469_s2 + $0x24] ss:$16 sps:$4 sm:$0xff]   ;;  %v7999_v19 = vld [vmem:[%s8469_s2 + $0x2c] ss:$16 sps:$4 sm:$0xff]  }
 0x56c   :  { %3912 = vmatprep.subr.bf16.mxu0 %v7807_v21  ;;  %3953 = vmatprep.subr.bf16.mxu1 %v8511_v23  ;;  %v8004_v21 = vld [vmem:[%s8469_s2 + $0x20] ss:$16 sps:$4 sm:$0xff]  }
 0x56d   :  { %v6421_v24 = vpop.eup %6420 }
 0x56e   :  { %v3370_v25 = vmul.f32 %v6421_v24, %v3365_v18 }
 0x56f   :  { %3913 = vmatpush1.bf16.msra.mxu0 %v7819_v30  ;;  %3954 = vmatpush1.bf16.msra.mxu1 %v7824_v33  ;;  %v8009_v30 = vld [vmem:[%s8469_s2 + $0x28] ss:$16 sps:$4 sm:$0xff]   ;;  %v8018_v33 = vld [vmem:[%s8469_s2 + $0x44] ss:$16 sps:$4 sm:$0xff]  }
 0x570   :  { %5732 = vst [vmem:[%s8474_s5 + $0x6] sm:$0x3] %v3370_v25  ;;  %3371 = vst [vmem:[#allocation4] sm:$0x3] %v3370_v25  ;;  %3914 = vmatprep.subr.bf16.mxu0 %v7831_v3  ;;  %3955 = vmatprep.subr.bf16.mxu1 %v8512_v27  ;;  %v8023_v3 = vld [vmem:[%s8469_s2 + $0x4c] ss:$16 sps:$4 sm:$0xff]  }
 0x573   :  { %3915 = vmatpush1.bf16.msra.mxu0 %v8513_v5  ;;  %3956 = vmatpush1.bf16.msra.mxu1 %v8514_v6 }
 0x574   :  { %3916 = vmatprep.subr.bf16.mxu0 %v7858_v35  ;;  %3957 = vmatprep.subr.bf16.mxu1 %v7863_v45  ;;  %v8033_v35 = vld [vmem:[%s8469_s2 + $0x48] ss:$16 sps:$4 sm:$0xff]   ;;  %v8042_v45 = vld [vmem:[%s8469_s2 + $0x64] ss:$16 sps:$4 sm:$0xff]  }
 0x577   :  { %3917 = vmatpush1.bf16.msra.mxu0 %v7870_v15  ;;  %3958 = vmatpush1.bf16.msra.mxu1 %v7875_v4  ;;  %v3708_v43 = vld [vmem:[#allocation4] sm:$0x3]  ;;  %v8028_v4 = vld [vmem:[%s8469_s2 + $0x40] ss:$16 sps:$4 sm:$0xff]   ;;  %v8047_v15 = vld [vmem:[%s8469_s2 + $0x6c] ss:$16 sps:$4 sm:$0xff]  }
 0x578   :  { %v3709_v44 = vpack.c.bf16 %v3708_v43, %v3708_v43  ;;  %4233 = vmatprep.subr.bf16.mxu0 %v7970_v46  ;;  %4274 = vmatprep.subr.bf16.mxu1 %v7975_v10 }
 0x57a   :  { %3935 = vmatmul.mubr.bf16.vlgmr.msra.gmra.mrb[44].mxu0 %v3709_v44  ;;  %3976 = vmatmul.mubr.bf16.vlgmr.msra.gmra.mrb[44].mxu1 %v3709_v44 }
 0x57b   :  { %4265 = vmatprep.mubr.bf16.mxu0 %v8495_v34  ;;  %4306 = vmatprep.mubr.bf16.mxu1 %v8495_v34 }
 0x57c   :  { %4234 = vmatpush1.bf16.msra.mxu0 %v7980_v12  ;;  %4275 = vmatpush1.bf16.msra.mxu1 %v7985_v13 }
 0x57d   :  { %4235 = vmatprep.subr.bf16.mxu0 %v7994_v16  ;;  %4276 = vmatprep.subr.bf16.mxu1 %v7999_v19 }
 0x580   :  { %4236 = vmatpush1.bf16.msra.mxu0 %v8004_v21  ;;  %4277 = vmatpush1.bf16.msra.mxu1 %v8009_v30 }
 0x581   :  { %4237 = vmatprep.subr.bf16.mxu0 %v8018_v33  ;;  %4278 = vmatprep.subr.bf16.mxu1 %v8023_v3 }
 0x584   :  { %4238 = vmatpush1.bf16.msra.mxu0 %v8028_v4  ;;  %4279 = vmatpush1.bf16.msra.mxu1 %v8033_v35 }
 0x585   :  { %4239 = vmatprep.subr.bf16.mxu0 %v8042_v45  ;;  %4280 = vmatprep.subr.bf16.mxu1 %v8047_v15 }
 0x588   :  { %4240 = vmatpush1.bf16.msra.mxu0 %v8052_v22  ;;  %4281 = vmatpush1.bf16.msra.mxu1 %v8057_v20 }
 0x589   :  { %4241 = vmatprep.subr.bf16.mxu0 %v8066_v48  ;;  %4282 = vmatprep.subr.bf16.mxu1 %v8071_v26 }
 0x58c   :  { %4242 = vmatpush1.bf16.msra.mxu0 %v8076_v28  ;;  %4283 = vmatpush1.bf16.msra.mxu1 %v8081_v29 }
 0x58d   :  { %4243 = vmatprep.subr.bf16.mxu0 %v8090_v32  ;;  %4284 = vmatprep.subr.bf16.mxu1 %v8095_v36 }
 0x590   :  { %4244 = vmatpush1.bf16.msra.mxu0 %v8100_v61  ;;  %4285 = vmatpush1.bf16.msra.mxu1 %v8105_v38 }
 0x591   :  { %4245 = vmatprep.subr.bf16.mxu0 %v8114_v39  ;;  %4286 = vmatprep.subr.bf16.mxu1 %v8119_v41 }
 0x594   :  { %4246 = vmatpush1.bf16.msra.mxu0 %v8124_v42  ;;  %4287 = vmatpush1.bf16.msra.mxu1 %v8129_v40 }
 0x595   :  { %4247 = vmatprep.subr.bf16.mxu0 %v8138_v47  ;;  %4288 = vmatprep.subr.bf16.mxu1 %v8143_v31 }
 0x598   :  { %4248 = vmatpush1.bf16.msra.mxu0 %v8148_v0  ;;  %4289 = vmatpush1.bf16.msra.mxu1 %v8153_v57 }
 0x599   :  { %4564 = vmatprep.subr.bf16.mxu0 %v8162_v49  ;;  %4605 = vmatprep.subr.bf16.mxu1 %v8167_v50 }
 0x62d   :  { %v3605_v1 = vpop.f32.mrb[40].mxu0  ;;  %v3646_v51 = vpop.f32.mrb[40].mxu1 }
 0x62e   :  { %v3607_v52 = vpop.f32.mrb[41].mxu0  ;;  %v3648_v53 = vpop.f32.mrb[41].mxu1 }
 0x62f   :  { %v3657_v54 = vcombine.low %v3605_v1, %v3607_v52  ;;  %v3658_v55 = vcombine.low %v3646_v51, %v3648_v53  ;;  %v3609_v56 = vpop.f32.mrb[42].mxu0  ;;  %v3650_v58 = vpop.f32.mrb[42].mxu1  ;;  %v3676_v1 = vld [vmem:[#allocation3] sm:$0x3] }
 0x630   :  { %v3610_v59 = vpop.f32.mrb[43].mxu0  ;;  %v3651_v60 = vpop.f32.mrb[43].mxu1 }
 0x631   :  { %v3665_v62 = vrot.slane %v3657_v54, %v6939_v9  ;;  %v3672_v63 = vrot.slane %v3658_v55, %v6939_v9 }
 0x633   :  { %v3673_v37 = vcombine.low %v3665_v62, %v3672_v63 }
 0x635   :  { %v3675_v7 = vadd.f32 %v5733_v2, %v3673_v37 }
 0x637   :  { %v3677_v8 = vmul.f32 0.5, %v3675_v7  ;;  %v3682_v11 = vrot.slane %v3675_v7, 2  ;;  %v3688_v17 = vrot.slane %v3675_v7, 4  ;;  %v3691_v18 = vrot.slane %v3675_v7, 6 }
 0x639   :  { %6422 = vtanh.f32 %v3677_v8  ;;  %v3684_v14 = vmul.f32 0.5, %v3682_v11  ;;  %v3693_v23 = vmul.f32 0.5, %v3691_v18 }
 0x63b   :  { %6424 = vtanh.f32 %v3684_v14  ;;  %v5767_v14 = vld [vmem:[%s8472_s1 + $0x28] sm:$0xff] }
 0x63c   :  { %6426 = vtanh.f32 %v3688_v17 }
 0x63d   :  { %6428 = vtanh.f32 %v3693_v23 }
 0x643   :  { %v6423_v24 = vpop.eup %6422 }
 0x644   :  { %v3679_v25 = vmul.f32 0.5, %v6423_v24 }
 0x645   :  { %v6425_v27 = vpop.eup %6424 }
 0x646   :  { %v3680_v5 = vadd.f32 0.5, %v3679_v25  ;;  %v3686_v6 = vmul.f32 0.5, %v6425_v27  ;;  %v6427_v44 = vpop.eup %6426 }
 0x647   :  { %v6429_v2 = vpop.eup %6428 }
 0x648   :  { %v3687_v43 = vadd.f32 0.5, %v3686_v6  ;;  %v3698_v52 = vmul.f32 %v6427_v44, %v3680_v5  ;;  %v3695_v17 = vmul.f32 0.5, %v6429_v2 }
 0x64a   :  { %v3697_v51 = vmul.f32 %v3687_v43, %v3676_v1  ;;  %v3696_v24 = vadd.f32 0.5, %v3695_v17 }
 0x64c   :  { %v3699_v53 = vadd.f32 %v3698_v52, %v3697_v51  ;;  %v8187_v51 = vld [vmem:[%s8470_s3] ss:$16 sps:$4 sm:$0xff]  }
 0x64d   :  { %v3936_v54 = vpop.f32.mrb[44].mxu0  ;;  %v3977_v55 = vpop.f32.mrb[44].mxu1 }
 0x64e   :  { %6430 = vtanh.f32 %v3699_v53  ;;  %3703 = vst [vmem:[#allocation3] sm:$0x3] %v3699_v53  ;;  %v3938_v56 = vpop.f32.mrb[45].mxu0  ;;  %v3979_v58 = vpop.f32.mrb[45].mxu1 }
 0x64f   :  { %v3988_v59 = vcombine.low %v3936_v54, %v3938_v56  ;;  %v3989_v60 = vcombine.low %v3977_v55, %v3979_v58  ;;  %v3940_v62 = vpop.f32.mrb[46].mxu0  ;;  %v3981_v63 = vpop.f32.mrb[46].mxu1  ;;  %v8192_v54 = vld [vmem:[%s8470_s3 + $0x8] ss:$16 sps:$4 sm:$0xff]   ;;  %v8197_v58 = vld [vmem:[%s8470_s3 + $0x24] ss:$16 sps:$4 sm:$0xff]  }
 0x650   :  { %v3941_v37 = vpop.f32.mrb[47].mxu0  ;;  %v3982_v7 = vpop.f32.mrb[47].mxu1 }
 0x651   :  { %v3996_v8 = vrot.slane %v3988_v59, %v6939_v9  ;;  %v4003_v11 = vrot.slane %v3989_v60, %v6939_v9  ;;  %v8202_v59 = vld [vmem:[%s8470_s3 + $0x2c] ss:$16 sps:$4 sm:$0xff]   ;;  %v8209_v37 = vld [vmem:[%s8470_s3 + $0x20] ss:$16 sps:$4 sm:$0xff]   ;;  %v8214_v7 = vld [vmem:[%s8470_s3 + $0x28] ss:$16 sps:$4 sm:$0xff]  }
 0x653   :  { %v4004_v18 = vcombine.low %v3996_v8, %v4003_v11  ;;  %v8221_v8 = vld [vmem:[%s8470_s3 + $0x44] ss:$16 sps:$4 sm:$0xff]   ;;  %v8226_v11 = vld [vmem:[%s8470_s3 + $0x4c] ss:$16 sps:$4 sm:$0xff]  }
 0x655   :  { %v4006_v23 = vadd.f32 %v5767_v14, %v4004_v18  ;;  %v4007_v18 = vld [vmem:[#allocation5] sm:$0x3] }
 0x657   :  { %v4008_v25 = vmul.f32 0.5, %v4006_v23  ;;  %v4013_v27 = vrot.slane %v4006_v23, 2  ;;  %v4019_v44 = vrot.slane %v4006_v23, 4  ;;  %v4022_v1 = vrot.slane %v4006_v23, 6 }
 0x658   :  { %v6431_v5 = vpop.eup %6430 }
 0x659   :  { %v3701_v6 = vmul.f32 %v6431_v5, %v3696_v24  ;;  %6432 = vtanh.f32 %v4008_v25  ;;  %v4015_v43 = vmul.f32 0.5, %v4013_v27  ;;  %v4024_v52 = vmul.f32 0.5, %v4022_v1  ;;  %v8235_v25 = vld [vmem:[%s8470_s3 + $0x40] ss:$16 sps:$4 sm:$0xff]   ;;  %v8240_v27 = vld [vmem:[%s8470_s3 + $0x48] ss:$16 sps:$4 sm:$0xff]  }
 0x65a   :  { %v8247_v5 = vld [vmem:[%s8470_s3 + $0x64] ss:$16 sps:$4 sm:$0xff]   ;;  %v8264_v1 = vld [vmem:[%s8470_s3 + $0x68] ss:$16 sps:$4 sm:$0xff]  }
 0x65b   :  { %5766 = vst [vmem:[%s8473_s4 + $0xa] sm:$0x3] %v3701_v6  ;;  %3702 = vst [vmem:[#allocation2] sm:$0x3] %v3701_v6  ;;  %6434 = vtanh.f32 %v4015_v43  ;;  %v8252_v6 = vld [vmem:[%s8470_s3 + $0x6c] ss:$16 sps:$4 sm:$0xff]  }
 0x65c   :  { %6436 = vtanh.f32 %v4019_v44  ;;  %v8259_v44 = vld [vmem:[%s8470_s3 + $0x60] ss:$16 sps:$4 sm:$0xff]  }
 0x65d   :  { %6438 = vtanh.f32 %v4024_v52  ;;  %v8271_v52 = vld [vmem:[%s8470_s3 + $0x84] ss:$16 sps:$4 sm:$0xff]  }
 0x662   :  { %v4039_v53 = vld [vmem:[#allocation2] sm:$0x3] }
 0x663   :  { %v6433_v55 = vpop.eup %6432  ;;  %v4040_v56 = vpack.c.bf16 %v4039_v53, %v4039_v53  ;;  %v8276_v53 = vld [vmem:[%s8470_s3 + $0x8c] ss:$16 sps:$4 sm:$0xff]  }
 0x664   :  { %v4010_v60 = vmul.f32 0.5, %v6433_v55 }
 0x665   :  { %v6435_v62 = vpop.eup %6434  ;;  %4266 = vmatmul.mubr.bf16.vlgmr.msra.gmra.mrb[48].mxu0 %v4040_v56  ;;  %4307 = vmatmul.mubr.bf16.vlgmr.msra.gmra.mrb[48].mxu1 %v4040_v56  ;;  %v8283_v56 = vld [vmem:[%s8470_s3 + $0x80] ss:$16 sps:$4 sm:$0xff]  }
 0x666   :  { %v4011_v63 = vadd.f32 0.5, %v4010_v60  ;;  %v4017_v2 = vmul.f32 0.5, %v6435_v62  ;;  %4565 = vmatpush1.bf16.msra.mxu0 %v8187_v51  ;;  %4606 = vmatpush1.bf16.msra.mxu1 %v8192_v54  ;;  %v6437_v17 = vpop.eup %6436  ;;  %v8288_v60 = vld [vmem:[%s8470_s3 + $0x88] ss:$16 sps:$4 sm:$0xff]  }
 0x667   :  { %4566 = vmatprep.subr.bf16.mxu0 %v8197_v58  ;;  %4607 = vmatprep.subr.bf16.mxu1 %v8202_v59  ;;  %v6439_v55 = vpop.eup %6438 }
 0x668   :  { %v4018_v14 = vadd.f32 0.5, %v4017_v2  ;;  %4596 = vmatprep.mubr.bf16.mxu0 %v8495_v34  ;;  %4637 = vmatprep.mubr.bf16.mxu1 %v8495_v34  ;;  %v4029_v24 = vmul.f32 %v6437_v17, %v4011_v63  ;;  %v4026_v62 = vmul.f32 0.5, %v6439_v55  ;;  %v8295_v63 = vld [vmem:[%s8470_s3 + $0xa4] ss:$16 sps:$4 sm:$0xff]   ;;  %v8300_v2 = vld [vmem:[%s8470_s3 + $0xac] ss:$16 sps:$4 sm:$0xff]  }
 0x669   :  { %8515 = vst [vmem:[#allocation6_spill] sm:$0xff] %v8300_v2  ;;  %v8312_v17 = vld [vmem:[%s8470_s3 + $0xa8] ss:$16 sps:$4 sm:$0xff]  }
 0x66a   :  { %v4028_v23 = vmul.f32 %v4018_v14, %v4007_v18  ;;  %4567 = vmatpush1.bf16.msra.mxu0 %v8209_v37  ;;  %4608 = vmatpush1.bf16.msra.mxu1 %v8214_v7  ;;  %v8307_v14 = vld [vmem:[%s8470_s3 + $0xa0] ss:$16 sps:$4 sm:$0xff]   ;;  %v4027_v18 = vadd.f32 0.5, %v4026_v62 }
 0x66b   :  { %4568 = vmatprep.subr.bf16.mxu0 %v8221_v8  ;;  %4609 = vmatprep.subr.bf16.mxu1 %v8226_v11  ;;  %v8331_v62 = vld [vmem:[%s8470_s3 + $0xc0] ss:$16 sps:$4 sm:$0xff]  }
 0x66c   :  { %v4030_v43 = vadd.f32 %v4029_v24, %v4028_v23  ;;  %v8319_v23 = vld [vmem:[%s8470_s3 + $0xc4] ss:$16 sps:$4 sm:$0xff]   ;;  %v8324_v24 = vld [vmem:[%s8470_s3 + $0xcc] ss:$16 sps:$4 sm:$0xff]   ;;  %8517 = vst [vmem:[#allocation8_spill] sm:$0xff] %v8331_v62 }
 0x66d   :  { %8516 = vst [vmem:[#allocation7_spill] sm:$0xff] %v8324_v24 }
 0x66e   :  { %6440 = vtanh.f32 %v4030_v43  ;;  %4034 = vst [vmem:[#allocation5] sm:$0x3] %v4030_v43  ;;  %4569 = vmatpush1.bf16.msra.mxu0 %v8235_v25  ;;  %4610 = vmatpush1.bf16.msra.mxu1 %v8240_v27 }
 0x66f   :  { %4570 = vmatprep.subr.bf16.mxu0 %v8247_v5  ;;  %4611 = vmatprep.subr.bf16.mxu1 %v8252_v6 }
 0x672   :  { %4571 = vmatpush1.bf16.msra.mxu0 %v8259_v44  ;;  %4612 = vmatpush1.bf16.msra.mxu1 %v8264_v1 }
 0x673   :  { %4572 = vmatprep.subr.bf16.mxu0 %v8271_v52  ;;  %4613 = vmatprep.subr.bf16.mxu1 %v8276_v53 }
 0x676   :  { %4573 = vmatpush1.bf16.msra.mxu0 %v8283_v56  ;;  %4614 = vmatpush1.bf16.msra.mxu1 %v8288_v60 }
 0x677   :  { %4574 = vmatprep.subr.bf16.mxu0 %v8295_v63  ;;  %4615 = vmatprep.subr.bf16.mxu1 %v8300_v2  ;;  %v8336_v2 = vld [vmem:[%s8470_s3 + $0xc8] ss:$16 sps:$4 sm:$0xff]  }
 0x678   :  { %v6441_v43 = vpop.eup %6440  ;;  %8518 = vst [vmem:[#allocation9_spill] sm:$0xff] %v8336_v2 }
 0x679   :  { %v4032_v55 = vmul.f32 %v6441_v43, %v4027_v18  ;;  %v8346_v18 = vld [vmem:[%s8470_s3 + $0xe4] ss:$16 sps:$4 sm:$0xff]   ;;  %v8351_v43 = vld [vmem:[%s8470_s3 + $0xec] ss:$16 sps:$4 sm:$0xff]  }
 0x67a   :  { %4575 = vmatpush1.bf16.msra.mxu0 %v8307_v14  ;;  %4616 = vmatpush1.bf16.msra.mxu1 %v8312_v17 }
 0x67b   :  { %5800 = vst [vmem:[%s8474_s5 + $0x4] sm:$0x3] %v4032_v55  ;;  %4033 = vst [vmem:[#allocation4] sm:$0x3] %v4032_v55  ;;  %4576 = vmatprep.subr.bf16.mxu0 %v8319_v23  ;;  %4617 = vmatprep.subr.bf16.mxu1 %v8324_v24  ;;  %v8358_v55 = vld [vmem:[%s8470_s3 + $0xe0] ss:$16 sps:$4 sm:$0xff]  }
 0x67c   :  { %v8363_v24 = vld [vmem:[%s8470_s3 + $0xe8] ss:$16 sps:$4 sm:$0xff]  }
 0x67e   :  { %4577 = vmatpush1.bf16.msra.mxu0 %v8331_v62  ;;  %4618 = vmatpush1.bf16.msra.mxu1 %v8336_v2 }
 0x67f   :  { %4578 = vmatprep.subr.bf16.mxu0 %v8346_v18  ;;  %4619 = vmatprep.subr.bf16.mxu1 %v8351_v43 }
 0x682   :  { %4579 = vmatpush1.bf16.msra.mxu0 %v8358_v55  ;;  %4620 = vmatpush1.bf16.msra.mxu1 %v8363_v24  ;;  %v4370_v62 = vld [vmem:[#allocation4] sm:$0x3] }
 0x683   :  { %v4371_v2 = vpack.c.bf16 %v4370_v62, %v4370_v62  ;;  %4895 = vmatprep.subr.bf16.mxu0 %v7970_v46  ;;  %4936 = vmatprep.subr.bf16.mxu1 %v7975_v10 }
 0x685   :  { %4597 = vmatmul.mubr.bf16.vlgmr.msra.gmra.mrb[52].mxu0 %v4371_v2  ;;  %4638 = vmatmul.mubr.bf16.vlgmr.msra.gmra.mrb[52].mxu1 %v4371_v2 }
 0x686   :  { %4896 = vmatpush1.bf16.msra.mxu0 %v7980_v12  ;;  %4937 = vmatpush1.bf16.msra.mxu1 %v7985_v13 }
 0x687   :  { %4897 = vmatprep.subr.bf16.mxu0 %v7994_v16  ;;  %4938 = vmatprep.subr.bf16.mxu1 %v7999_v19 }
 0x688   :  { %4927 = vmatprep.mubr.bf16.mxu0 %v8495_v34  ;;  %4968 = vmatprep.mubr.bf16.mxu1 %v8495_v34 }
 0x68a   :  { %4898 = vmatpush1.bf16.msra.mxu0 %v8004_v21  ;;  %4939 = vmatpush1.bf16.msra.mxu1 %v8009_v30 }
 0x68b   :  { %4899 = vmatprep.subr.bf16.mxu0 %v8018_v33  ;;  %4940 = vmatprep.subr.bf16.mxu1 %v8023_v3 }
 0x68e   :  { %4900 = vmatpush1.bf16.msra.mxu0 %v8028_v4  ;;  %4941 = vmatpush1.bf16.msra.mxu1 %v8033_v35 }
 0x68f   :  { %4901 = vmatprep.subr.bf16.mxu0 %v8042_v45  ;;  %4942 = vmatprep.subr.bf16.mxu1 %v8047_v15  ;;  %v5801_v45 = vld [vmem:[%s8471_s0 + $0x60] sm:$0xff] }
 0x692   :  { %4902 = vmatpush1.bf16.msra.mxu0 %v8052_v22  ;;  %4943 = vmatpush1.bf16.msra.mxu1 %v8057_v20 }
 0x693   :  { %4903 = vmatprep.subr.bf16.mxu0 %v8066_v48  ;;  %4944 = vmatprep.subr.bf16.mxu1 %v8071_v26 }
 0x696   :  { %4904 = vmatpush1.bf16.msra.mxu0 %v8076_v28  ;;  %4945 = vmatpush1.bf16.msra.mxu1 %v8081_v29 }
 0x697   :  { %4905 = vmatprep.subr.bf16.mxu0 %v8090_v32  ;;  %4946 = vmatprep.subr.bf16.mxu1 %v8095_v36 }
 0x69a   :  { %4906 = vmatpush1.bf16.msra.mxu0 %v8100_v61  ;;  %4947 = vmatpush1.bf16.msra.mxu1 %v8105_v38 }
 0x69b   :  { %4907 = vmatprep.subr.bf16.mxu0 %v8114_v39  ;;  %4948 = vmatprep.subr.bf16.mxu1 %v8119_v41 }
 0x69e   :  { %4908 = vmatpush1.bf16.msra.mxu0 %v8124_v42  ;;  %4949 = vmatpush1.bf16.msra.mxu1 %v8129_v40 }
 0x69f   :  { %4909 = vmatprep.subr.bf16.mxu0 %v8138_v47  ;;  %4950 = vmatprep.subr.bf16.mxu1 %v8143_v31  ;;  %v4338_v47 = vld [vmem:[#allocation3] sm:$0x3] }
 0x6a2   :  { %4910 = vmatpush1.bf16.msra.mxu0 %v8148_v0  ;;  %4951 = vmatpush1.bf16.msra.mxu1 %v8153_v57 }
 0x6a3   :  { %5225 = vmatprep.subr.bf16.mxu0 %v8162_v49  ;;  %5266 = vmatprep.subr.bf16.mxu1 %v8167_v50 }
 0x738   :  { %v4267_v46 = vpop.f32.mrb[48].mxu0  ;;  %v4308_v10 = vpop.f32.mrb[48].mxu1 }
 0x739   :  { %v4269_v12 = vpop.f32.mrb[49].mxu0  ;;  %v4310_v13 = vpop.f32.mrb[49].mxu1 }
 0x73a   :  { %v4319_v16 = vcombine.low %v4267_v46, %v4269_v12  ;;  %v4320_v19 = vcombine.low %v4308_v10, %v4310_v13  ;;  %v4271_v21 = vpop.f32.mrb[50].mxu0  ;;  %v4312_v30 = vpop.f32.mrb[50].mxu1 }
 0x73b   :  { %v4272_v33 = vpop.f32.mrb[51].mxu0  ;;  %v4313_v3 = vpop.f32.mrb[51].mxu1 }
 0x73c   :  { %v4327_v4 = vrot.slane %v4319_v16, %v6939_v9  ;;  %v4334_v35 = vrot.slane %v4320_v19, %v6939_v9  ;;  %v5835_v3 = vld [vmem:[%s8472_s1 + $0x18] sm:$0xff] }
 0x73e   :  { %v4335_v15 = vcombine.low %v4327_v4, %v4334_v35 }
 0x740   :  { %v4337_v22 = vadd.f32 %v5801_v45, %v4335_v15 }
 0x742   :  { %v4339_v20 = vmul.f32 0.5, %v4337_v22  ;;  %v4344_v48 = vrot.slane %v4337_v22, 2  ;;  %v4350_v28 = vrot.slane %v4337_v22, 4  ;;  %v4353_v29 = vrot.slane %v4337_v22, 6 }
 0x744   :  { %6442 = vtanh.f32 %v4339_v20  ;;  %v4346_v26 = vmul.f32 0.5, %v4344_v48  ;;  %v4355_v32 = vmul.f32 0.5, %v4353_v29 }
 0x746   :  { %6444 = vtanh.f32 %v4346_v26 }
 0x747   :  { %6446 = vtanh.f32 %v4350_v28 }
 0x748   :  { %6448 = vtanh.f32 %v4355_v32 }
 0x74e   :  { %v6443_v36 = vpop.eup %6442 }
 0x74f   :  { %v4341_v61 = vmul.f32 0.5, %v6443_v36 }
 0x750   :  { %v6445_v38 = vpop.eup %6444 }
 0x751   :  { %v4342_v39 = vadd.f32 0.5, %v4341_v61  ;;  %v4348_v41 = vmul.f32 0.5, %v6445_v38  ;;  %v6447_v40 = vpop.eup %6446 }
 0x752   :  { %v6449_v16 = vpop.eup %6448 }
 0x753   :  { %v4349_v42 = vadd.f32 0.5, %v4348_v41  ;;  %v4360_v0 = vmul.f32 %v6447_v40, %v4342_v39  ;;  %v4357_v4 = vmul.f32 0.5, %v6449_v16 }
 0x755   :  { %v4359_v31 = vmul.f32 %v4349_v42, %v4338_v47  ;;  %v4358_v15 = vadd.f32 0.5, %v4357_v4 }
 0x757   :  { %v4361_v57 = vadd.f32 %v4360_v0, %v4359_v31 }
 0x758   :  { %v4598_v49 = vpop.f32.mrb[52].mxu0  ;;  %v4639_v50 = vpop.f32.mrb[52].mxu1 }
 0x759   :  { %6450 = vtanh.f32 %v4361_v57  ;;  %4365 = vst [vmem:[#allocation3] sm:$0x3] %v4361_v57  ;;  %v4600_v2 = vpop.f32.mrb[53].mxu0  ;;  %v4641_v62 = vpop.f32.mrb[53].mxu1  ;;  %v4669_v57 = vld [vmem:[#allocation5] sm:$0x3] }
 0x75a   :  { %v4650_v46 = vcombine.low %v4598_v49, %v4600_v2  ;;  %v4651_v10 = vcombine.low %v4639_v50, %v4641_v62  ;;  %v4602_v12 = vpop.f32.mrb[54].mxu0  ;;  %v4643_v13 = vpop.f32.mrb[54].mxu1 }
 0x75b   :  { %v4603_v19 = vpop.f32.mrb[55].mxu0  ;;  %v4644_v21 = vpop.f32.mrb[55].mxu1 }
 0x75c   :  { %v4658_v30 = vrot.slane %v4650_v46, %v6939_v9  ;;  %v4665_v33 = vrot.slane %v4651_v10, %v6939_v9 }
 0x75e   :  { %v4666_v35 = vcombine.low %v4658_v30, %v4665_v33 }
 0x760   :  { %v4668_v45 = vadd.f32 %v5835_v3, %v4666_v35  ;;  %v5000_v35 = vld [vmem:[#allocation3] sm:$0x3] }
 0x762   :  { %v4670_v22 = vmul.f32 0.5, %v4668_v45  ;;  %v4675_v20 = vrot.slane %v4668_v45, 2  ;;  %v4681_v29 = vrot.slane %v4668_v45, 4  ;;  %v4684_v32 = vrot.slane %v4668_v45, 6 }
 0x763   :  { %v6451_v48 = vpop.eup %6450 }
 0x764   :  { %v4363_v26 = vmul.f32 %v6451_v48, %v4358_v15  ;;  %6452 = vtanh.f32 %v4670_v22  ;;  %v4677_v28 = vmul.f32 0.5, %v4675_v20  ;;  %v4686_v36 = vmul.f32 0.5, %v4684_v32 }
 0x766   :  { %5834 = vst [vmem:[%s8473_s4 + $0xc] sm:$0x3] %v4363_v26  ;;  %4364 = vst [vmem:[#allocation2] sm:$0x3] %v4363_v26  ;;  %6454 = vtanh.f32 %v4677_v28 }
 0x767   :  { %6456 = vtanh.f32 %v4681_v29 }
 0x768   :  { %6458 = vtanh.f32 %v4686_v36 }
 0x76d   :  { %v4701_v61 = vld [vmem:[#allocation2] sm:$0x3] }
 0x76e   :  { %v6453_v38 = vpop.eup %6452  ;;  %v4702_v39 = vpack.c.bf16 %v4701_v61, %v4701_v61 }
 0x76f   :  { %v4672_v41 = vmul.f32 0.5, %v6453_v38 }
 0x770   :  { %v6455_v42 = vpop.eup %6454  ;;  %4928 = vmatmul.mubr.bf16.vlgmr.msra.gmra.mrb[56].mxu0 %v4702_v39  ;;  %4969 = vmatmul.mubr.bf16.vlgmr.msra.gmra.mrb[56].mxu1 %v4702_v39 }
 0x771   :  { %v4673_v40 = vadd.f32 0.5, %v4672_v41  ;;  %v4679_v47 = vmul.f32 0.5, %v6455_v42  ;;  %5226 = vmatpush1.bf16.msra.mxu0 %v8187_v51  ;;  %5267 = vmatpush1.bf16.msra.mxu1 %v8192_v54  ;;  %v6457_v0 = vpop.eup %6456 }
 0x772   :  { %5227 = vmatprep.subr.bf16.mxu0 %v8197_v58  ;;  %5268 = vmatprep.subr.bf16.mxu1 %v8202_v59  ;;  %v8519_v59 = vld [vmem:[#allocation6_spill] sm:$0xff] }
 0x773   :  { %v4680_v31 = vadd.f32 0.5, %v4679_v47  ;;  %5257 = vmatprep.mubr.bf16.mxu0 %v8495_v34  ;;  %5298 = vmatprep.mubr.bf16.mxu1 %v8495_v34  ;;  %v4691_v50 = vmul.f32 %v6457_v0, %v4673_v40  ;;  %v6459_v34 = vpop.eup %6458  ;;  %v5030_v47 = vld [vmem:[%s8472_s1 + $0x8] sm:$0xff] }
 0x774   :  { %v4688_v54 = vmul.f32 0.5, %v6459_v34 }
 0x775   :  { %v4690_v49 = vmul.f32 %v4680_v31, %v4669_v57  ;;  %5228 = vmatpush1.bf16.msra.mxu0 %v8209_v37  ;;  %5269 = vmatpush1.bf16.msra.mxu1 %v8214_v7 }
 0x776   :  { %5229 = vmatprep.subr.bf16.mxu0 %v8221_v8  ;;  %5270 = vmatprep.subr.bf16.mxu1 %v8226_v11  ;;  %v4689_v58 = vadd.f32 0.5, %v4688_v54  ;;  %v8520_v8 = vld [vmem:[#allocation7_spill] sm:$0xff]  ;;  %v8521_v11 = vld [vmem:[#allocation8_spill] sm:$0xff] }
 0x777   :  { %v4692_v51 = vadd.f32 %v4691_v50, %v4690_v49 }
 0x779   :  { %6460 = vtanh.f32 %v4692_v51  ;;  %4696 = vst [vmem:[#allocation5] sm:$0x3] %v4692_v51  ;;  %5230 = vmatpush1.bf16.msra.mxu0 %v8235_v25  ;;  %5271 = vmatpush1.bf16.msra.mxu1 %v8240_v27  ;;  %v8522_v25 = vld [vmem:[#allocation9_spill] sm:$0xff] }
 0x77a   :  { %5231 = vmatprep.subr.bf16.mxu0 %v8247_v5  ;;  %5272 = vmatprep.subr.bf16.mxu1 %v8252_v6 }
 0x77d   :  { %5232 = vmatpush1.bf16.msra.mxu0 %v8259_v44  ;;  %5273 = vmatpush1.bf16.msra.mxu1 %v8264_v1 }
 0x77e   :  { %5233 = vmatprep.subr.bf16.mxu0 %v8271_v52  ;;  %5274 = vmatprep.subr.bf16.mxu1 %v8276_v53 }
 0x781   :  { %5234 = vmatpush1.bf16.msra.mxu0 %v8283_v56  ;;  %5275 = vmatpush1.bf16.msra.mxu1 %v8288_v60 }
 0x782   :  { %5235 = vmatprep.subr.bf16.mxu0 %v8295_v63  ;;  %5276 = vmatprep.subr.bf16.mxu1 %v8519_v59 }
 0x783   :  { %v6461_v37 = vpop.eup %6460 }
 0x784   :  { %v4694_v7 = vmul.f32 %v6461_v37, %v4689_v58 }
 0x785   :  { %5236 = vmatpush1.bf16.msra.mxu0 %v8307_v14  ;;  %5277 = vmatpush1.bf16.msra.mxu1 %v8312_v17 }
 0x786   :  { %5868 = vst [vmem:[%s8474_s5 + $0x2] sm:$0x3] %v4694_v7  ;;  %4695 = vst [vmem:[#allocation4] sm:$0x3] %v4694_v7  ;;  %5237 = vmatprep.subr.bf16.mxu0 %v8319_v23  ;;  %5278 = vmatprep.subr.bf16.mxu1 %v8520_v8 }
 0x789   :  { %5238 = vmatpush1.bf16.msra.mxu0 %v8521_v11  ;;  %5279 = vmatpush1.bf16.msra.mxu1 %v8522_v25 }
 0x78a   :  { %5239 = vmatprep.subr.bf16.mxu0 %v8346_v18  ;;  %5280 = vmatprep.subr.bf16.mxu1 %v8351_v43 }
 0x78d   :  { %5240 = vmatpush1.bf16.msra.mxu0 %v8358_v55  ;;  %5281 = vmatpush1.bf16.msra.mxu1 %v8363_v24  ;;  %v5031_v27 = vld [vmem:[#allocation4] sm:$0x3]  ;;  %v5869_v24 = vld [vmem:[%s8471_s0 + $0x70] sm:$0xff] }
 0x78e   :  { %v5032_v5 = vpack.c.bf16 %v5031_v27, %v5031_v27 }
 0x790   :  { %5258 = vmatmul.mubr.bf16.vlgmr.msra.gmra.mrb[60].mxu0 %v5032_v5  ;;  %5299 = vmatmul.mubr.bf16.vlgmr.msra.gmra.mrb[60].mxu1 %v5032_v5 }
 0x843   :  { %v4929_v6 = vpop.f32.mrb[56].mxu0  ;;  %v4970_v44 = vpop.f32.mrb[56].mxu1 }
 0x844   :  { %v4931_v1 = vpop.f32.mrb[57].mxu0  ;;  %v4972_v52 = vpop.f32.mrb[57].mxu1 }
 0x845   :  { %v4981_v53 = vcombine.low %v4929_v6, %v4931_v1  ;;  %v4982_v56 = vcombine.low %v4970_v44, %v4972_v52  ;;  %v4933_v60 = vpop.f32.mrb[58].mxu0  ;;  %v4974_v63 = vpop.f32.mrb[58].mxu1  ;;  %v5330_v44 = vld [vmem:[#allocation5] sm:$0x3] }
 0x846   :  { %v4934_v14 = vpop.f32.mrb[59].mxu0  ;;  %v4975_v17 = vpop.f32.mrb[59].mxu1 }
 0x847   :  { %v4989_v23 = vrot.slane %v4981_v53, %v6939_v9  ;;  %v4996_v18 = vrot.slane %v4982_v56, %v6939_v9 }
 0x849   :  { %v4997_v43 = vcombine.low %v4989_v23, %v4996_v18 }
 0x84b   :  { %v4999_v55 = vadd.f32 %v5869_v24, %v4997_v43 }
 0x84d   :  { %v5001_v2 = vmul.f32 0.5, %v4999_v55  ;;  %v5006_v62 = vrot.slane %v4999_v55, 2  ;;  %v5012_v10 = vrot.slane %v4999_v55, 4  ;;  %v5015_v12 = vrot.slane %v4999_v55, 6 }
 0x84f   :  { %6462 = vtanh.f32 %v5001_v2  ;;  %v5008_v46 = vmul.f32 0.5, %v5006_v62  ;;  %v5017_v13 = vmul.f32 0.5, %v5015_v12 }
 0x851   :  { %6464 = vtanh.f32 %v5008_v46 }
 0x852   :  { %6466 = vtanh.f32 %v5012_v10 }
 0x853   :  { %6468 = vtanh.f32 %v5017_v13 }
 0x859   :  { %v6463_v16 = vpop.eup %6462 }
 0x85a   :  { %v5003_v19 = vmul.f32 0.5, %v6463_v16 }
 0x85b   :  { %v6465_v21 = vpop.eup %6464 }
 0x85c   :  { %v5004_v30 = vadd.f32 0.5, %v5003_v19  ;;  %v5010_v33 = vmul.f32 0.5, %v6465_v21  ;;  %v6467_v4 = vpop.eup %6466 }
 0x85d   :  { %v6469_v38 = vpop.eup %6468 }
 0x85e   :  { %v5011_v3 = vadd.f32 0.5, %v5010_v33  ;;  %v5022_v15 = vmul.f32 %v6467_v4, %v5004_v30  ;;  %v5019_v31 = vmul.f32 0.5, %v6469_v38 }
 0x860   :  { %v5021_v45 = vmul.f32 %v5011_v3, %v5000_v35  ;;  %v5020_v49 = vadd.f32 0.5, %v5019_v31 }
 0x862   :  { %v5023_v22 = vadd.f32 %v5022_v15, %v5021_v45 }
 0x863   :  { %v5259_v20 = vpop.f32.mrb[60].mxu0  ;;  %v5300_v48 = vpop.f32.mrb[60].mxu1 }
 0x864   :  { %6470 = vtanh.f32 %v5023_v22  ;;  %5027 = vst [vmem:[#allocation3] sm:$0x3] %v5023_v22  ;;  %v5261_v26 = vpop.f32.mrb[61].mxu0  ;;  %v5302_v28 = vpop.f32.mrb[61].mxu1 }
 0x865   :  { %v5311_v29 = vcombine.low %v5259_v20, %v5261_v26  ;;  %v5312_v32 = vcombine.low %v5300_v48, %v5302_v28  ;;  %v5263_v36 = vpop.f32.mrb[62].mxu0  ;;  %v5304_v61 = vpop.f32.mrb[62].mxu1 }
 0x866   :  { %v5264_v39 = vpop.f32.mrb[63].mxu0  ;;  %v5305_v41 = vpop.f32.mrb[63].mxu1 }
 0x867   :  { %v5319_v42 = vrot.slane %v5311_v29, %v6939_v9  ;;  %v5326_v40 = vrot.slane %v5312_v32, %v6939_v9 }
 0x869   :  { %v5327_v0 = vcombine.low %v5319_v42, %v5326_v40 }
 0x86b   :  { %v5329_v57 = vadd.f32 %v5327_v0, %v5030_v47 }
 0x86d   :  { %v5331_v50 = vmul.f32 0.5, %v5329_v57  ;;  %v5336_v51 = vrot.slane %v5329_v57, 2  ;;  %v5342_v9 = vrot.slane %v5329_v57, 4  ;;  %v5345_v59 = vrot.slane %v5329_v57, 6 }
 0x86e   :  { %v6471_v34 = vpop.eup %6470 }
 0x86f   :  { %v5025_v54 = vmul.f32 %v6471_v34, %v5020_v49  ;;  %6472 = vtanh.f32 %v5331_v50  ;;  %v5338_v58 = vmul.f32 0.5, %v5336_v51  ;;  %v5347_v37 = vmul.f32 0.5, %v5345_v59 }
 0x871   :  { %5026 = vst [vmem:[#allocation2] sm:$0x3] %v5025_v54  ;;  %5902 = vst [vmem:[%s8473_s4 + $0xe] sm:$0x3] %v5025_v54  ;;  %6474 = vtanh.f32 %v5338_v58 }
 0x872   :  { %6476 = vtanh.f32 %v5342_v9 }
 0x873   :  { %6478 = vtanh.f32 %v5347_v37 }
 0x879   :  { %v6473_v7 = vpop.eup %6472 }
 0x87a   :  { %v5333_v8 = vmul.f32 0.5, %v6473_v7 }
 0x87b   :  { %v6475_v11 = vpop.eup %6474 }
 0x87c   :  { %v5334_v25 = vadd.f32 0.5, %v5333_v8  ;;  %v5340_v27 = vmul.f32 0.5, %v6475_v11  ;;  %v6477_v6 = vpop.eup %6476 }
 0x87d   :  { %v6479_v56 = vpop.eup %6478 }
 0x87e   :  { %v5341_v5 = vadd.f32 0.5, %v5340_v27  ;;  %v5352_v52 = vmul.f32 %v6477_v6, %v5334_v25  ;;  %v5349_v60 = vmul.f32 0.5, %v6479_v56 }
 0x880   :  { %v5351_v1 = vmul.f32 %v5341_v5, %v5330_v44  ;;  %v5350_v63 = vadd.f32 0.5, %v5349_v60 }
 0x882   :  { %v5353_v53 = vadd.f32 %v5352_v52, %v5351_v1 }
 0x884   :  { %6480 = vtanh.f32 %v5353_v53  ;;  %5357 = vst [vmem:[#allocation5] sm:$0x3] %v5353_v53 }
 0x88e   :  { %v6481_v14 = vpop.eup %6480 }
 0x88f   :  { %v5355_v17 = vmul.f32 %v6481_v14, %v5350_v63 }
 0x891   :  { %5356 = vst [vmem:[#allocation4] sm:$0x3] %v5355_v17  ;;  %5358 = vst [vmem:[%s8474_s5] sm:$0x3] %v5355_v17 }

</bundles_post_ra>
